<compile_context>
chip_gen: v5e
topology: v5e:2x2
jax: 0.10.0
libtpu: 0.0.40
codegen_flags: <defaults>
</compile_context>

<pallas_src>
from functools import partial

import jax
import jax.numpy as jnp
from jax.experimental import pallas as pl
from jax.experimental.pallas import tpu as pltpu

FEATURE_DIM = 1280    # timm tf_efficientnetv2_b0 -> backbone.num_features == 1280
HIDDEN = 128          # 128 * config['scale'], scale = 1
DROPOUT_P = 0.1       # config['dropout']
NEG_SLOPE = 0.01      # nn.LeakyReLU default negative_slope
MAX_TP = 1024         # cap on the spatial tile: the (TP, F) f32 intermediate
                      # (1280*TP*4 B) is the real VMEM consumer, not the x tile


def _fused_kernel(x_ref, wst_ref, bs_ref, w1_ref, b1_ref, drop_ref, w2_ref, b2_ref,
                  o_ref, acc_ref, *, inv_pool):
    """grid = (batch, spatial_tiles); spatial axis is the (arbitrary) reduction axis."""
    s = pl.program_id(1)

    @pl.when(s == 0)
    def _zero_acc():
        acc_ref[...] = jnp.zeros_like(acc_ref)

    # ---- backbone stand-in: pointwise conv + SiLU, pooled-sum accumulation ----
    # x tile is (TP, Cin): spatial on sublanes, channels contracted (K = Cin is
    # tiny, so the MXU is nowhere near binding; the EUP sigmoid / VPU mul are,
    # which is why everything downstream is kept lane-dense in F).
    x = x_ref[0]                                                         # (TP, Cin)
    h = jnp.dot(x, wst_ref[...], preferred_element_type=jnp.float32)     # (TP, F) lane-dense
    h = h + bs_ref[...]                                                  # (1, F) sublane-broadcast
    h = h * jax.nn.sigmoid(h)                                            # SiLU (EUP + VPU)

    # Partial spatial pool: fold TP rows onto 8 sublanes with pure VPU adds;
    # the single 8 -> 1 sublane (XLU) reduce is deferred to the head.
    tp, f = h.shape
    if tp % 8 == 0:
        acc_ref[...] += jnp.sum(h.reshape(tp // 8, 8, f), axis=0)        # (8, F)
    else:  # odd spatial extents: accumulate into sublane row 0 only
        acc_ref[0:1, :] = acc_ref[0:1, :] + jnp.sum(h, axis=0, keepdims=True)

    # ---- finalize at the last spatial tile: global mean pool + fused MLP head ----
    @pl.when(s == pl.num_programs(1) - 1)
    def _head():
        feats = jnp.sum(acc_ref[...], axis=0, keepdims=True) * inv_pool  # (1, F) mean over H*W
        h1 = jnp.dot(feats, w1_ref[...],
                     preferred_element_type=jnp.float32) + b1_ref[...]   # (1, HIDDEN)
        h1 = jnp.where(h1 >= 0.0, h1, NEG_SLOPE * h1)                    # LeakyReLU
        h1 = h1 * drop_ref[0]                                            # inverted dropout
        o_ref[0] = jnp.dot(h1, w2_ref[...],
                           preferred_element_type=jnp.float32) + b2_ref[...]  # (1, CPAD)


def _stem_compute_dtype():
    """bf16 x / stem weights on bf16-native generations (v6e / v7x), else f32."""
    try:
        kind = jax.devices()[0].device_kind.lower()
    except Exception:
        return jnp.float32
    if any(tag in kind for tag in ("v6", "v7", "trillium")):
        return jnp.bfloat16
    return jnp.float32


def init_params(key, n_channels, num_classes):
    ks = jax.random.split(key, 6)
    stem_scale = 1.0 / float(n_channels) ** 0.5
    lim1 = 1.0 / float(FEATURE_DIM) ** 0.5
    lim2 = 1.0 / float(HIDDEN) ** 0.5
    return {
        # backbone stand-in: pointwise conv weight (F, Cin) like PyTorch, bias (F,)
        "stem_w": jax.random.normal(ks[0], (FEATURE_DIM, n_channels), jnp.float32) * stem_scale,
        "stem_b": jnp.zeros((FEATURE_DIM,), jnp.float32),
        # head Linear layers in PyTorch (out, in) layout
        "w1": jax.random.uniform(ks[1], (HIDDEN, FEATURE_DIM), jnp.float32, -lim1, lim1),
        "b1": jax.random.uniform(ks[2], (HIDDEN,), jnp.float32, -lim1, lim1),
        "w2": jax.random.uniform(ks[3], (num_classes, HIDDEN), jnp.float32, -lim2, lim2),
        "b2": jax.random.uniform(ks[4], (num_classes,), jnp.float32, -lim2, lim2),
    }


def model_forward(x_nchw, params, *, training=True, seed=0):
    B, C, H, W = x_nchw.shape
    P = H * W
    cdtype = _stem_compute_dtype()

    # NCHW -> (B, H*W, Cin): spatial on sublanes, channels on lanes, so the stem
    # matmul output (TP, F) is lane-dense in the 1280 features (one-time XLA op).
    x3 = x_nchw.reshape(B, C, P).transpose(0, 2, 1).astype(cdtype)

    # Spatial tile: largest tile (<= MAX_TP) that divides P (all candidates are
    # multiples of 8); for small inputs TP = P -> a single reduction step.
    if P <= MAX_TP:
        TP = P
    else:
        TP = next((t for t in (1024, 512, 256, 128, 64, 32, 16, 8) if P % t == 0), P)
    n_s = P // TP if P % TP == 0 else 1

    F = FEATURE_DIM
    HID = params["w1"].shape[0]
    nc = params["w2"].shape[0]
    CPAD = max(128, ((nc + 127) // 128) * 128)          # lane-friendly padded class dim

    # Transpose resident params into lane-dense layouts (one-time, wrapper side).
    wst = params["stem_w"].T.astype(cdtype)                              # (Cin, F)
    bs = params["stem_b"].reshape(1, F).astype(jnp.float32)              # (1, F)
    w1 = params["w1"].T.astype(jnp.float32)                              # (F, HID)
    b1 = params["b1"].reshape(1, HID).astype(jnp.float32)                # (1, HID)
    w2p = jnp.zeros((HID, CPAD), jnp.float32).at[:, :nc].set(params["w2"].T)  # (HID, CPAD)
    b2p = jnp.zeros((1, CPAD), jnp.float32).at[0, :nc].set(params["b2"])      # (1, CPAD)

    # Inverted-dropout multiplier precomputed with jax.random in the wrapper
    # (no in-kernel TPU PRNG needed); caller must vary `seed` per training step.
    if training:
        keep = jax.random.bernoulli(jax.random.PRNGKey(seed), 1.0 - DROPOUT_P, (B, 1, HID))
        drop = keep.astype(jnp.float32) * (1.0 / (1.0 - DROPOUT_P))
    else:
        drop = jnp.ones((B, 1, HID), jnp.float32)

    kernel = partial(_fused_kernel, inv_pool=1.0 / float(P))

    out = pl.pallas_call(
        kernel,
        out_shape=jax.ShapeDtypeStruct((B, 1, CPAD), jnp.float32),
        grid=(B, n_s),
        in_specs=[
            # streamed activation tiles
            pl.BlockSpec((1, TP, C), lambda b, s: (b, s, 0)),
            # resident weights / biases (constant index maps -> fetched once)
            pl.BlockSpec((C, F), lambda b, s: (0, 0)),
            pl.BlockSpec((1, F), lambda b, s: (0, 0)),
            pl.BlockSpec((F, HID), lambda b, s: (0, 0)),
            pl.BlockSpec((1, HID), lambda b, s: (0, 0)),
            pl.BlockSpec((1, 1, HID), lambda b, s: (b, 0, 0)),
            pl.BlockSpec((HID, CPAD), lambda b, s: (0, 0)),
            pl.BlockSpec((1, CPAD), lambda b, s: (0, 0)),
        ],
        out_specs=pl.BlockSpec((1, 1, CPAD), lambda b, s: (b, 0, 0)),
        scratch_shapes=[pltpu.VMEM((8, F), jnp.float32)],
        compiler_params=pltpu.CompilerParams(
            # TODO(synk): if B can be 1 on v7x, split the spatial reduction into
            # two parallel halves so the second TensorCore is not idle.
            dimension_semantics=("parallel", "arbitrary"),
            vmem_limit_bytes=48 * 1024 * 1024,
        ),
    )(x3, wst, bs, w1, b1, drop, w2p, b2p)

    return out[:, 0, :nc]                                   # (B, num_classes)


if __name__ == "__main__":
    key = jax.random.PRNGKey(0)
    k_x, k_p = jax.random.split(key)

    batch, n_channels, spatial = 2, 3, 16      # module default n_channels = 3
    num_classes = 10

    x = jax.random.normal(k_x, (batch, n_channels, spatial, spatial), jnp.float32)
    params = init_params(k_p, n_channels, num_classes)

    out = model_forward(x, params, training=True, seed=0)
    out = jax.block_until_ready(out)

    assert out.shape == (batch, num_classes), out.shape
    assert bool(jnp.all(jnp.isfinite(out)))
    print("KERNEL_OK")
</pallas_src>

<mosaic_0001>
module attributes {stable_mosaic.version = 11 : i64} {
  func.func @_fused_kernel(%arg0: i32, %arg1: i32, %arg2: memref<1x256x3xf32, #tpu.memory_space<vmem>>, %arg3: memref<3x1280xf32, #tpu.memory_space<vmem>>, %arg4: memref<1x1280xf32, #tpu.memory_space<vmem>>, %arg5: memref<1280x128xf32, #tpu.memory_space<vmem>>, %arg6: memref<1x128xf32, #tpu.memory_space<vmem>>, %arg7: memref<1x1x128xf32, #tpu.memory_space<vmem>>, %arg8: memref<128x128xf32, #tpu.memory_space<vmem>>, %arg9: memref<1x128xf32, #tpu.memory_space<vmem>>, %arg10: memref<1x1x128xf32, #tpu.memory_space<vmem>>, %arg11: memref<8x1280xf32, #tpu.memory_space<vmem>>) attributes {dimension_semantics = [#tpu.dimension_semantics<parallel>, #tpu.dimension_semantics<arbitrary>], iteration_bounds = array<i64: 2, 1>, scalar_prefetch = 0 : i64, scratch_operands = 1 : i64, tpu.core_type = #tpu.core_type<tc>, window_params = [{transform_indices = @transform_0, window_bounds = array<i64: 1, 256, 3>}, {pipeline_mode = #tpu.pipeline_mode<synchronous>, transform_indices = @transform_1, window_bounds = array<i64: 3, 1280>}, {pipeline_mode = #tpu.pipeline_mode<synchronous>, transform_indices = @transform_2, window_bounds = array<i64: 1, 1280>}, {pipeline_mode = #tpu.pipeline_mode<synchronous>, transform_indices = @transform_3, window_bounds = array<i64: 1280, 128>}, {pipeline_mode = #tpu.pipeline_mode<synchronous>, transform_indices = @transform_4, window_bounds = array<i64: 1, 128>}, {transform_indices = @transform_5, window_bounds = array<i64: 1, 1, 128>}, {pipeline_mode = #tpu.pipeline_mode<synchronous>, transform_indices = @transform_6, window_bounds = array<i64: 128, 128>}, {pipeline_mode = #tpu.pipeline_mode<synchronous>, transform_indices = @transform_7, window_bounds = array<i64: 1, 128>}, {transform_indices = @transform_8, window_bounds = array<i64: 1, 1, 128>}]} {
    %c0_i32 = arith.constant 0 : i32
    %0 = arith.cmpi eq, %arg1, %c0_i32 : i32
    %1 = arith.extui %0 : i1 to i32
    %c0_i32_0 = arith.constant 0 : i32
    %2 = arith.cmpi ne, %1, %c0_i32_0 : i32
    scf.if %2 {
      %cst_15 = arith.constant 0.000000e+00 : f32
      %24 = vector.broadcast %cst_15 : f32 to vector<8x1280xf32>
      %c0_16 = arith.constant 0 : index
      %c0_17 = arith.constant 0 : index
      %25 = vector.load %arg11[%c0_16, %c0_17] : memref<8x1280xf32, #tpu.memory_space<vmem>>, vector<8x1280xf32>
      tpu.vector_store %arg11[%c0_16, %c0_17], %24 {strides = array<i32>} : memref<8x1280xf32, #tpu.memory_space<vmem>>, vector<8x1280xf32>,
    } else {
    }
    %c0 = arith.constant 0 : index
    %c0_1 = arith.constant 0 : index
    %c0_2 = arith.constant 0 : index
    %3 = vector.load %arg2[%c0, %c0_1, %c0_2] : memref<1x256x3xf32, #tpu.memory_space<vmem>>, vector<1x256x3xf32>
    %4 = vector.shape_cast %3 : vector<1x256x3xf32> to vector<256x3xf32>
    %c0_3 = arith.constant 0 : index
    %c0_4 = arith.constant 0 : index
    %5 = vector.load %arg3[%c0_3, %c0_4] : memref<3x1280xf32, #tpu.memory_space<vmem>>, vector<3x1280xf32>
    %cst = arith.constant dense<0.000000e+00> : vector<256x1280xf32>
    %6 = tpu.matmul %4, %5, %cst {dimension_numbers = #tpu.dot_dimension_numbers<[1], [0], [0], [1], [0, 0, 1, 1], [], []>} : vector<256x3xf32>, vector<3x1280xf32>, vector<256x1280xf32> -> vector<256x1280xf32>
    %c0_5 = arith.constant 0 : index
    %c0_6 = arith.constant 0 : index
    %7 = vector.load %arg4[%c0_5, %c0_6] : memref<1x1280xf32, #tpu.memory_space<vmem>>, vector<1x1280xf32>
    %8 = vector.broadcast %7 : vector<1x1280xf32> to vector<256x1280xf32>
    %9 = arith.addf %6, %8 : vector<256x1280xf32>
    %10 = arith.negf %9 : vector<256x1280xf32>
    %11 = math.exp %10 : vector<256x1280xf32>
    %cst_7 = arith.constant 1.000000e+00 : f32
    %12 = vector.broadcast %cst_7 : f32 to vector<256x1280xf32>
    %13 = arith.addf %12, %11 : vector<256x1280xf32>
    %14 = arith.divf %12, %13 : vector<256x1280xf32>
    %15 = arith.mulf %9, %14 : vector<256x1280xf32>
    %c0_8 = arith.constant 0 : index
    %c0_9 = arith.constant 0 : index
    %16 = vector.load %arg11[%c0_8, %c0_9] : memref<8x1280xf32, #tpu.memory_space<vmem>>, vector<8x1280xf32>
    %17 = vector.shape_cast %15 : vector<256x1280xf32> to vector<32x8x1280xf32>
    %cst_10 = arith.constant dense<0.000000e+00> : vector<8x1280xf32>
    %18 = vector.multi_reduction <add>, %17, %cst_10 [0] : vector<32x8x1280xf32> to vector<8x1280xf32>
    %19 = arith.addf %16, %18 : vector<8x1280xf32>
    %c0_11 = arith.constant 0 : index
    %c0_12 = arith.constant 0 : index
    %20 = vector.load %arg11[%c0_11, %c0_12] : memref<8x1280xf32, #tpu.memory_space<vmem>>, vector<8x1280xf32>
    tpu.vector_store %arg11[%c0_11, %c0_12], %19 {strides = array<i32>} : memref<8x1280xf32, #tpu.memory_space<vmem>>, vector<8x1280xf32>,
    %c0_i32_13 = arith.constant 0 : i32
    %21 = arith.cmpi eq, %arg1, %c0_i32_13 : i32
    %22 = arith.extui %21 : i1 to i32
    %c0_i32_14 = arith.constant 0 : i32
    %23 = arith.cmpi ne, %22, %c0_i32_14 : i32
    scf.if %23 {
      %c0_15 = arith.constant 0 : index
      %c0_16 = arith.constant 0 : index
      %24 = vector.load %arg11[%c0_15, %c0_16] : memref<8x1280xf32, #tpu.memory_space<vmem>>, vector<8x1280xf32>
      %cst_17 = arith.constant dense<0.000000e+00> : vector<1280xf32>
      %25 = vector.multi_reduction <add>, %24, %cst_17 [0] : vector<8x1280xf32> to vector<1280xf32>
      %26 = vector.shape_cast %25 : vector<1280xf32> to vector<1x1280xf32>
      %cst_18 = arith.constant 3.906250e-03 : f32
      %27 = vector.broadcast %cst_18 : f32 to vector<1x1280xf32>
      %28 = arith.mulf %26, %27 : vector<1x1280xf32>
      %c0_19 = arith.constant 0 : index
      %c0_20 = arith.constant 0 : index
      %29 = vector.load %arg5[%c0_19, %c0_20] : memref<1280x128xf32, #tpu.memory_space<vmem>>, vector<1280x128xf32>
      %cst_21 = arith.constant dense<0.000000e+00> : vector<1x128xf32>
      %30 = tpu.matmul %28, %29, %cst_21 {dimension_numbers = #tpu.dot_dimension_numbers<[1], [0], [0], [1], [0, 0, 1, 1], [], []>} : vector<1x1280xf32>, vector<1280x128xf32>, vector<1x128xf32> -> vector<1x128xf32>
      %c0_22 = arith.constant 0 : index
      %c0_23 = arith.constant 0 : index
      %31 = vector.load %arg6[%c0_22, %c0_23] : memref<1x128xf32, #tpu.memory_space<vmem>>, vector<1x128xf32>
      %32 = arith.addf %30, %31 : vector<1x128xf32>
      %cst_24 = arith.constant 0.000000e+00 : f32
      %33 = vector.broadcast %cst_24 : f32 to vector<1x128xf32>
      %34 = arith.cmpf oge, %32, %33 : vector<1x128xf32>
      %cst_25 = arith.constant 0.00999999977 : f32
      %35 = vector.broadcast %cst_25 : f32 to vector<1x128xf32>
      %36 = arith.mulf %35, %32 : vector<1x128xf32>
      %37 = arith.select %34, %32, %36 : vector<1x128xi1>, vector<1x128xf32>
      %c0_26 = arith.constant 0 : index
      %c0_27 = arith.constant 0 : index
      %c0_28 = arith.constant 0 : index
      %38 = vector.load %arg7[%c0_26, %c0_27, %c0_28] : memref<1x1x128xf32, #tpu.memory_space<vmem>>, vector<1x1x128xf32>
      %39 = vector.shape_cast %38 : vector<1x1x128xf32> to vector<1x128xf32>
      %40 = arith.mulf %37, %39 : vector<1x128xf32>
      %c0_29 = arith.constant 0 : index
      %c0_30 = arith.constant 0 : index
      %41 = vector.load %arg8[%c0_29, %c0_30] : memref<128x128xf32, #tpu.memory_space<vmem>>, vector<128x128xf32>
      %cst_31 = arith.constant dense<0.000000e+00> : vector<1x128xf32>
      %42 = tpu.matmul %40, %41, %cst_31 {dimension_numbers = #tpu.dot_dimension_numbers<[1], [0], [0], [1], [0, 0, 1, 1], [], []>} : vector<1x128xf32>, vector<128x128xf32>, vector<1x128xf32> -> vector<1x128xf32>
      %c0_32 = arith.constant 0 : index
      %c0_33 = arith.constant 0 : index
      %43 = vector.load %arg9[%c0_32, %c0_33] : memref<1x128xf32, #tpu.memory_space<vmem>>, vector<1x128xf32>
      %44 = arith.addf %42, %43 : vector<1x128xf32>
      %c0_34 = arith.constant 0 : index
      %c0_35 = arith.constant 0 : index
      %c0_36 = arith.constant 0 : index
      %45 = vector.load %arg10[%c0_34, %c0_35, %c0_36] : memref<1x1x128xf32, #tpu.memory_space<vmem>>, vector<1x1x128xf32>
      %46 = vector.shape_cast %45 : vector<1x1x128xf32> to vector<1x128xf32>
      %47 = vector.shape_cast %44 : vector<1x128xf32> to vector<1x1x128xf32>
      tpu.vector_store %arg10[%c0_34, %c0_35, %c0_36], %47 {strides = array<i32>} : memref<1x1x128xf32, #tpu.memory_space<vmem>>, vector<1x1x128xf32>,
    } else {
    }
    return
  }
  func.func @transform_0(%arg0: i32, %arg1: i32) -> (i32, i32, i32) {
    %c0_i32 = arith.constant 0 : i32
    %c0_i32_0 = arith.constant 0 : i32
    return %arg0, %arg1, %c0_i32 : i32, i32, i32
  }
  func.func @transform_1(%arg0: i32, %arg1: i32) -> (i32, i32) {
    %c0_i32 = arith.constant 0 : i32
    %c0_i32_0 = arith.constant 0 : i32
    %c0_i32_1 = arith.constant 0 : i32
    return %c0_i32, %c0_i32_0 : i32, i32
  }
  func.func @transform_2(%arg0: i32, %arg1: i32) -> (i32, i32) {
    %c0_i32 = arith.constant 0 : i32
    %c0_i32_0 = arith.constant 0 : i32
    %c0_i32_1 = arith.constant 0 : i32
    return %c0_i32, %c0_i32_0 : i32, i32
  }
  func.func @transform_3(%arg0: i32, %arg1: i32) -> (i32, i32) {
    %c0_i32 = arith.constant 0 : i32
    %c0_i32_0 = arith.constant 0 : i32
    %c0_i32_1 = arith.constant 0 : i32
    return %c0_i32, %c0_i32_0 : i32, i32
  }
  func.func @transform_4(%arg0: i32, %arg1: i32) -> (i32, i32) {
    %c0_i32 = arith.constant 0 : i32
    %c0_i32_0 = arith.constant 0 : i32
    %c0_i32_1 = arith.constant 0 : i32
    return %c0_i32, %c0_i32_0 : i32, i32
  }
  func.func @transform_5(%arg0: i32, %arg1: i32) -> (i32, i32, i32) {
    %c0_i32 = arith.constant 0 : i32
    %c0_i32_0 = arith.constant 0 : i32
    %c0_i32_1 = arith.constant 0 : i32
    return %arg0, %c0_i32, %c0_i32_0 : i32, i32, i32
  }
  func.func @transform_6(%arg0: i32, %arg1: i32) -> (i32, i32) {
    %c0_i32 = arith.constant 0 : i32
    %c0_i32_0 = arith.constant 0 : i32
    %c0_i32_1 = arith.constant 0 : i32
    return %c0_i32, %c0_i32_0 : i32, i32
  }
  func.func @transform_7(%arg0: i32, %arg1: i32) -> (i32, i32) {
    %c0_i32 = arith.constant 0 : i32
    %c0_i32_0 = arith.constant 0 : i32
    %c0_i32_1 = arith.constant 0 : i32
    return %c0_i32, %c0_i32_0 : i32, i32
  }
  func.func @transform_8(%arg0: i32, %arg1: i32) -> (i32, i32, i32) {
    %c0_i32 = arith.constant 0 : i32
    %c0_i32_0 = arith.constant 0 : i32
    %c0_i32_1 = arith.constant 0 : i32
    return %arg0, %c0_i32, %c0_i32_0 : i32, i32, i32
  }
}

</mosaic_0001>

<bundles_post_ra>
// kernel: tpu_custom_call.1
= control target key start
LH: loop header
LB: loop body
LE: loop exit
PB: predicated region body
PF: predicated region fallthrough
CT: control target
= control target key end

     0   :  { %13 = vsyncpa [#allocation4], 0  ;;  %s21937_s0 = inlined_call_operand.vmem [shape: f32[2,256,3], index: 0, kind: input, shape index: {}]   ;;  %s21938_s1 = inlined_call_operand.vmem [shape: f32[3,1280], index: 1, kind: input, shape index: {}]   ;;  %s21939_s2 = inlined_call_operand.vmem [shape: f32[1,1280], index: 2, kind: input, shape index: {}]   ;;  %s21940_s3 = inlined_call_operand.hbm [shape: f32[1280,128], index: 3, kind: input, shape index: {}]   ;;  %s21941_s4 = inlined_call_operand.vmem [shape: f32[1,128], index: 4, kind: input, shape index: {}]   ;;  %s21942_s5 = inlined_call_operand.vmem [shape: f32[2,1,128], index: 5, kind: input, shape index: {}]   ;;  %s21943_s6 = inlined_call_operand.vmem [shape: f32[128,128], index: 6, kind: input, shape index: {}]   ;;  %s21944_s7 = inlined_call_operand.vmem [shape: f32[1,128], index: 7, kind: input, shape index: {}]   ;;  %s21945_s8 = inlined_call_operand.hbm [shape: f32[2,1,128], index: 8, kind: output, shape index: {}]  }
   0x1   :  { %14 = vsyncpa [#allocation5], 0 }
   0x2   :  { %16 = vsyncpa [#allocation5 + $0x1], 0  ;;  %s11318_s27 = smov 0   ;;  %s11320_s28 = smov 0  }
   0x3   :  { %s11322_s29 = smov 0   ;;  %s11324_s30 = smov 0  }
   0x4   :  { %s11326_s9 = smov 0   ;;  %s11328_s10 = smov 0  }
   0x5 LB: > { %s9038_s11 = sadd.s32 4294967295, %s11268_s10   ;;  %s9039_s12 = sadd.s32 4294967294, %s11268_s10   ;;  %s11268_s10 = sphi %s11328_s10, %s22_s10   ;;  %s11264_s9 = sphi %s11326_s9, %s22928_s9   ;;  %s11260_s30 = sphi %s11324_s30, %s22927_s30   ;;  %s11256_s29 = sphi %s11322_s29, %s22926_s29   ;;  %s11252_s28 = sphi %s11320_s28, %s22925_s28   ;;  %s11248_s27 = sphi %s11318_s27, %s22924_s27  }
   0x6   : > { %s34_s13 = sadd.s32 1, %s11264_s9  ;;  %s221_s14 = sadd.s32 1, %s11256_s29 }
   0x7   : > { %p36_p0 = scmp.ge.s32.totalorder %s34_s13, 2  ;;  %p231_p1 = scmp.ne.s32.totalorder %s11256_s29, %s11252_s28 }
   0x8   : > { %p232_p2 = scmp.eq.s32.totalorder %s9038_s11, 1  ;;  %p237_p3 = scmp.ne.s32.totalorder %s11252_s28, %s11248_s27 }
   0x9   : > { %s22930_s13 = smov (%p36_p0, %s34_s13), 0  ;;  %p238_p5 = scmp.eq.s32.totalorder %s9039_s12, 1 }
   0xa   : > { %p11358_p4 = por %p232_p2, %p231_p1  ;;  %s218_s16 = ssub.s32 %s11264_s9, %s22930_s13 }
   0xb   : > { %p9040_p6 = scmp.ge.s32.totalorder %s11268_s10, 1  ;;  %p219_p7 = scmp.eq.s32.totalorder %s218_s16, 0 }
   0xc   : > { %p11365_p8 = por %p238_p5, %p237_p3  ;;  %p245_p9 = scmp.lt.s32.totalorder %s11268_s10, 3 }
   0xd   : > { %s11371_s18 = scalar_select %p219_p7, %s11256_s29, %s221_s14  }
   0xe   : > { %p246_p10 = pnand %p9040_p6, %p245_p9  ;;  %p9717_p11 = scmp.eq.s32.totalorder %s9038_s11, 0 }
   0xf   : > { %s262_s21 = sshll.u32 %s21940_s3, 4  ;;  %s11270_s22 = smov [#allocation3]   ;;  %s263_s21 = int_to_ptr.hbm [resolvable:$true] %s262_s21 }
  0x10   : > { %p9709_p12 = pneg %p246_p10  ;;  %s264_s23 = sshll.u32 %s11270_s22, 4  ;;  %s265_s23 = int_to_ptr.vmem [resolvable:$true] %s264_s23 }
  0x11   : > { %s11271_s24 = smov 128   ;;  %s11272_s25 = smov 8  }
  0x12   : > { %p9710_p13 = pnand %p9717_p11, %p9709_p12  ;;  %308 = sbr.rel (%p246_p10) target bundleno = 2022 (0x7e6), region = 52 }
  0x14   : > { %9712 = dma.hbm_to_vmem [thread:$0]  (!%p9710_p13), %s263_s21, 20480, %s265_s23, [#allocation4], %s11271_s24, %s11271_s24, %s11272_s25  }
  0x17   : > { %11239 = dma.done.wait (%p9717_p11), [#allocation4], 20480  }
  0x18   : > { %11241 = vsyncadd (%p9717_p11), [#allocation4], 4294946816  ;;  %p350_p0 = scmp.lt.s32.totalorder %s11260_s30, 1  ;;  %v408_v0 = vld [vmem:[%s21938_s1] sm:$0x77]  ;;  %vm21946_vm0 = vcmask 1042432   ;;  %s8944_s25 = scalar_lea.hbm %s21945_s8, %s11260_s30 }
  0x19   : > { %442 = vst [vmem:[#allocation1] ss:$2 sm:$0xff] %v408_v0  ;;  %v410_v1 = vld [vmem:[%s21938_s1 + $0x10] sm:$0x77]  ;;  %v412_v2 = vld [vmem:[%s21938_s1 + $0x20] sm:$0x77] }
  0x1a   : > { %s11378_s26 = scalar_select %p350_p0, %s11260_s30, 1  ;;  %446 = vst [vmem:[#allocation1 + $0x20] ss:$2 sm:$0xff] %v410_v1  ;;  %vm460_vm1 = vcmask 23552   ;;  %v409_v9 = vld [vmem:[%s21938_s1 + $0x8] sm:$0x77] }
  0x1b   : > { %444 = vst [vmem:[#allocation1 + $0x10] ss:$2 sm:$0xff] %v409_v9  ;;  %v11513_v32 = vld [vmem:[%s21939_s2] sm:$0xff]  ;;  %s347_s21 = sand.u32 1, %s11252_s28   ;;  %s11206_s24 = scalar_lea.hbm %s21945_s8, 2 }
  0x1c   : > { %s9699_s14 = sshll.u32 %s11378_s26, 8  ;;  %v11519_v33 = vperm.slane %v11513_v32, 0  ;;  %v11525_v36 = vperm.slane %v11513_v32, 1  ;;  %s361_s20 = scalar_lea.vmem %s21942_s5, %s11378_s26 }
  0x1d   : > { %s11390_s22 = scalar_lea.vmem %s21937_s0, %s9699_s14  ;;  %s348_s14 = scalar_lea.vmem [#allocation6], %s347_s21 }
  0x1e   : > { %v376_v3 = vld [vmem:[%s11390_s22] sm:$0xff]  ;;  %v402_v4 = vld [vmem:[%s11390_s22 + $0xd0] sm:$0xff]  ;;  %v377_v10 = vld [vmem:[%s11390_s22 + $0x8] sm:$0xff]  ;;  %s8946_s26 = sshll.u32 %s348_s14, 4  ;;  %s8936_s16 = scalar_lea.sflag [#allocation5], %s347_s21  ;;  %s8947_s26 = int_to_ptr.vmem [resolvable:$true] %s8946_s26 }
  0x1f   : > { %v403_v11 = vld [vmem:[%s11390_s22 + $0xd8] sm:$0xff]  ;;  %v378_v13 = vld [vmem:[%s11390_s22 + $0x10] sm:$0xff]  ;;  %v404_v14 = vld [vmem:[%s11390_s22 + $0xe0] sm:$0xff] }
  0x20   : > { %v449_v5 = vld.sshfl [vmem:[#allocation1] sm:$0xff pattern:$0x75316420]  ;;  %v450_v6 = vld.sshfl [vmem:[#allocation1 + $0x8] sm:$0xff pattern:$0x75316420] }
  0x21   : > { %9047 = vmatpush.msk.msra.mxu0 %vm21946_vm0, %v449_v5  ;;  %9700 = vmatpush.msk.msra.mxu3 %vm21946_vm0, %v449_v5  ;;  %457 = vst [vmem:[#allocation1] ss:$2 sm:$0xff] %v412_v2  ;;  %v453_v7 = vld.sshfl [vmem:[#allocation1 + $0x20] sm:$0xff pattern:$0x75316420]  ;;  %v379_v16 = vld [vmem:[%s11390_s22 + $0x18] sm:$0xff] }
  0x22   : > { %9080 = vmatpush.msk.msra.mxu1 %vm21946_vm0, %v450_v6  ;;  %9701 = vmatpush.msk.msra.mxu2 %vm21946_vm0, %v450_v6  ;;  %v454_v8 = vld.sshfl [vmem:[#allocation1 + $0x28] sm:$0xff pattern:$0x75316420]  ;;  %v451_v12 = vld.sshfl [vmem:[#allocation1 + $0x10] sm:$0xff pattern:$0x75316420] }
  0x23   : > { %9048 = vmatmul.msk.f32.vlgmr.msra.gmra.mxu0 %vm460_vm1, %v376_v3  ;;  %9074 = vmatmul.msk.f32.vlgmr.msra.gmra.mxu3 %vm460_vm1, %v402_v4  ;;  %v452_v15 = vld.sshfl [vmem:[#allocation1 + $0x18] sm:$0xff pattern:$0x75316420]  ;;  %v405_v17 = vld [vmem:[%s11390_s22 + $0xe8] sm:$0xff]  ;;  %v380_v18 = vld [vmem:[%s11390_s22 + $0x20] sm:$0xff] }
  0x24   : > { %9081 = vmatmul.msk.f32.vlgmr.msra.gmra.mxu1 %vm460_vm1, %v376_v3  ;;  %9107 = vmatmul.msk.f32.vlgmr.msra.gmra.mxu2 %vm460_vm1, %v402_v4  ;;  %v406_v19 = vld [vmem:[%s11390_s22 + $0xf0] sm:$0xff]  ;;  %v381_v20 = vld [vmem:[%s11390_s22 + $0x28] sm:$0xff]  ;;  %v407_v21 = vld [vmem:[%s11390_s22 + $0xf8] sm:$0xff] }
  0x25   : > { %9179 = vmatpush.msk.msrb.mxu0 %vm21946_vm0, %v453_v7  ;;  %9212 = vmatpush.msk.msrb.mxu1 %vm21946_vm0, %v454_v8  ;;  %v382_v22 = vld [vmem:[%s11390_s22 + $0x30] sm:$0xff]  ;;  %v383_v23 = vld [vmem:[%s11390_s22 + $0x38] sm:$0xff]  ;;  %v384_v24 = vld [vmem:[%s11390_s22 + $0x40] sm:$0xff] }
  0x26   : > { %9702 = vmatpush.msk.msrb.mxu3 %vm21946_vm0, %v450_v6  ;;  %9113 = vmatpush.msk.msrb.mxu2 %vm21946_vm0, %v451_v12  ;;  %v385_v25 = vld [vmem:[%s11390_s22 + $0x48] sm:$0xff]  ;;  %v386_v26 = vld [vmem:[%s11390_s22 + $0x50] sm:$0xff]  ;;  %v11469_v27 = vld [vmem:[%s11390_s22 + $0x58] sm:$0xff] }
  0x27   : > { %v11478_v28 = vld [vmem:[%s11390_s22 + $0x60] sm:$0xff]  ;;  %v11487_v29 = vld [vmem:[%s11390_s22 + $0x68] sm:$0xff]  ;;  %v11496_v30 = vld [vmem:[%s11390_s22 + $0x70] sm:$0xff] }
  0x28   : > { %9146 = vmatpush.msk.msra.mxu3 %vm21946_vm0, %v452_v15  ;;  %v11505_v31 = vld [vmem:[%s11390_s22 + $0x78] sm:$0xff]  ;;  %v11522_v35 = vld [vmem:[%s11390_s22 + $0x80] sm:$0xff]  ;;  %v11545_v44 = vld [vmem:[%s11390_s22 + $0x88] sm:$0xff] }
  0x29   : > { %v11568_v55 = vld [vmem:[%s11390_s22 + $0x90] sm:$0xff]  ;;  %v11594_v5 = vld [vmem:[%s11390_s22 + $0x98] sm:$0xff] }
  0x2b   : > { %9049 = vmatmul.msk.f32.gmra.mxu0 %vm460_vm1, %v377_v10  ;;  %9075 = vmatmul.msk.f32.gmra.mxu3 %vm460_vm1, %v403_v11 }
  0x2c   : > { %9082 = vmatmul.msk.f32.gmra.mxu1 %vm460_vm1, %v377_v10  ;;  %9108 = vmatmul.msk.f32.gmra.mxu2 %vm460_vm1, %v403_v11 }
  0x33   : > { %9050 = vmatmul.msk.f32.gmra.mxu0 %vm460_vm1, %v378_v13  ;;  %9076 = vmatmul.msk.f32.gmra.mxu3 %vm460_vm1, %v404_v14 }
  0x34   : > { %9083 = vmatmul.msk.f32.gmra.mxu1 %vm460_vm1, %v378_v13  ;;  %9109 = vmatmul.msk.f32.gmra.mxu2 %vm460_vm1, %v404_v14 }
  0x3b   : > { %9051 = vmatmul.msk.f32.gmra.mxu0 %vm460_vm1, %v379_v16  ;;  %9077 = vmatmul.msk.f32.gmra.mxu3 %vm460_vm1, %v405_v17 }
  0x3c   : > { %9084 = vmatmul.msk.f32.gmra.mxu1 %vm460_vm1, %v379_v16  ;;  %9110 = vmatmul.msk.f32.gmra.mxu2 %vm460_vm1, %v405_v17 }
  0x43   : > { %9052 = vmatmul.msk.f32.gmra.mxu0 %vm460_vm1, %v380_v18  ;;  %9078 = vmatmul.msk.f32.gmra.mxu3 %vm460_vm1, %v406_v19 }
  0x44   : > { %9085 = vmatmul.msk.f32.gmra.mxu1 %vm460_vm1, %v380_v18  ;;  %9111 = vmatmul.msk.f32.gmra.mxu2 %vm460_vm1, %v406_v19 }
  0x4b   : > { %9053 = vmatmul.msk.f32.gmra.mxu0 %vm460_vm1, %v381_v20  ;;  %9079 = vmatmul.msk.f32.gmra.mxu3 %vm460_vm1, %v407_v21 }
  0x4c   : > { %9086 = vmatmul.msk.f32.gmra.mxu1 %vm460_vm1, %v381_v20  ;;  %9114 = vmatmul.msk.f32.vlgmr.msrb.gmra.mxu2 %vm460_vm1, %v376_v3 }
  0x53   : > { %9054 = vmatmul.msk.f32.gmra.mxu0 %vm460_vm1, %v382_v22  ;;  %9112 = vmatmul.msk.f32.vlgmr.msrb.gmra.mxu3 %vm460_vm1, %v407_v21 }
  0x54   : > { %9087 = vmatmul.msk.f32.gmra.mxu1 %vm460_vm1, %v382_v22  ;;  %9115 = vmatmul.msk.f32.gmra.mxu2 %vm460_vm1, %v377_v10 }
  0x5b   : > { %9055 = vmatmul.msk.f32.gmra.mxu0 %vm460_vm1, %v383_v23  ;;  %9147 = vmatmul.msk.f32.vlgmr.msra.gmra.mxu3 %vm460_vm1, %v376_v3 }
  0x5c   : > { %9088 = vmatmul.msk.f32.gmra.mxu1 %vm460_vm1, %v383_v23  ;;  %9116 = vmatmul.msk.f32.gmra.mxu2 %vm460_vm1, %v378_v13 }
  0x63   : > { %9056 = vmatmul.msk.f32.gmra.mxu0 %vm460_vm1, %v384_v24  ;;  %9148 = vmatmul.msk.f32.gmra.mxu3 %vm460_vm1, %v377_v10 }
  0x64   : > { %9089 = vmatmul.msk.f32.gmra.mxu1 %vm460_vm1, %v384_v24  ;;  %9117 = vmatmul.msk.f32.gmra.mxu2 %vm460_vm1, %v379_v16 }
  0x6b   : > { %9057 = vmatmul.msk.f32.gmra.mxu0 %vm460_vm1, %v385_v25  ;;  %9149 = vmatmul.msk.f32.gmra.mxu3 %vm460_vm1, %v378_v13 }
  0x6c   : > { %9090 = vmatmul.msk.f32.gmra.mxu1 %vm460_vm1, %v385_v25  ;;  %9118 = vmatmul.msk.f32.gmra.mxu2 %vm460_vm1, %v380_v18 }
  0x73   : > { %9058 = vmatmul.msk.f32.gmra.mxu0 %vm460_vm1, %v386_v26  ;;  %9150 = vmatmul.msk.f32.gmra.mxu3 %vm460_vm1, %v379_v16 }
  0x74   : > { %9091 = vmatmul.msk.f32.gmra.mxu1 %vm460_vm1, %v386_v26  ;;  %9119 = vmatmul.msk.f32.gmra.mxu2 %vm460_vm1, %v381_v20 }
  0x7b   : > { %9059 = vmatmul.msk.f32.gmra.mxu0 %vm460_vm1, %v11469_v27  ;;  %9151 = vmatmul.msk.f32.gmra.mxu3 %vm460_vm1, %v380_v18 }
  0x7c   : > { %9092 = vmatmul.msk.f32.gmra.mxu1 %vm460_vm1, %v11469_v27  ;;  %9120 = vmatmul.msk.f32.gmra.mxu2 %vm460_vm1, %v382_v22 }
  0x83   : > { %9060 = vmatmul.msk.f32.gmra.mxu0 %vm460_vm1, %v11478_v28  ;;  %9152 = vmatmul.msk.f32.gmra.mxu3 %vm460_vm1, %v381_v20 }
  0x84   : > { %9093 = vmatmul.msk.f32.gmra.mxu1 %vm460_vm1, %v11478_v28  ;;  %9121 = vmatmul.msk.f32.gmra.mxu2 %vm460_vm1, %v383_v23 }
  0x8b   : > { %9061 = vmatmul.msk.f32.gmra.mxu0 %vm460_vm1, %v11487_v29  ;;  %9153 = vmatmul.msk.f32.gmra.mxu3 %vm460_vm1, %v382_v22 }
  0x8c   : > { %9094 = vmatmul.msk.f32.gmra.mxu1 %vm460_vm1, %v11487_v29  ;;  %9122 = vmatmul.msk.f32.gmra.mxu2 %vm460_vm1, %v384_v24 }
  0x93   : > { %9062 = vmatmul.msk.f32.gmra.mxu0 %vm460_vm1, %v11496_v30  ;;  %9154 = vmatmul.msk.f32.gmra.mxu3 %vm460_vm1, %v383_v23 }
  0x94   : > { %9095 = vmatmul.msk.f32.gmra.mxu1 %vm460_vm1, %v11496_v30  ;;  %9123 = vmatmul.msk.f32.gmra.mxu2 %vm460_vm1, %v385_v25 }
  0x9b   : > { %9063 = vmatmul.msk.f32.gmra.mxu0 %vm460_vm1, %v11505_v31  ;;  %9155 = vmatmul.msk.f32.gmra.mxu3 %vm460_vm1, %v384_v24 }
  0x9c   : > { %9096 = vmatmul.msk.f32.gmra.mxu1 %vm460_vm1, %v11505_v31  ;;  %9124 = vmatmul.msk.f32.gmra.mxu2 %vm460_vm1, %v386_v26 }
  0xa0   : > { %v595_v34 = vpop.f32.mrf.mxu0 }
  0xa1   : > { %v708_v37 = vpop.f32.mrf.mxu1  ;;  %v11528_v38 = vadd.f32 %v595_v34, %v11519_v33 }
  0xa2   : > { %v11538_v39 = vadd.f32 %v708_v37, %v11525_v36 }
  0xa3   : > { %9064 = vmatmul.msk.f32.gmra.mxu0 %vm460_vm1, %v11522_v35  ;;  %9156 = vmatmul.msk.f32.gmra.mxu3 %vm460_vm1, %v385_v25  ;;  %v9377_v40 = vmul.f32 -1.442695, %v11528_v38 }
  0xa4   : > { %9097 = vmatmul.msk.f32.gmra.mxu1 %vm460_vm1, %v11522_v35  ;;  %9125 = vmatmul.msk.f32.gmra.mxu2 %vm460_vm1, %v11469_v27  ;;  %v9378_v45 = vmul.f32 -1.442695, %v11538_v39 }
  0xa5   : > { %9771 = vpow2.f32 %v9377_v40 }
  0xa6   : > { %v673_v41 = vpop.f32.mrf.mxu3  ;;  %9773 = vpow2.f32 %v9378_v45 }
  0xa7   : > { %v11542_v42 = vadd.f32 %v673_v41, %v11519_v33  ;;  %v786_v47 = vpop.f32.mrf.mxu2 }
  0xa8   : > { %v598_v43 = vpop.f32.mrf.mxu0  ;;  %v11552_v49 = vadd.f32 %v786_v47, %v11525_v36 }
  0xa9   : > { %v11549_v46 = vadd.f32 %v598_v43, %v11519_v33  ;;  %v711_v48 = vpop.f32.mrf.mxu1  ;;  %v9637_v50 = vmul.f32 -1.442695, %v11542_v42 }
  0xaa   : > { %v11564_v52 = vadd.f32 %v711_v48, %v11525_v36  ;;  %v9638_v53 = vmul.f32 -1.442695, %v11552_v49 }
  0xab   : > { %9065 = vmatmul.msk.f32.gmra.mxu0 %vm460_vm1, %v11545_v44  ;;  %9157 = vmatmul.msk.f32.gmra.mxu3 %vm460_vm1, %v386_v26  ;;  %v9387_v51 = vmul.f32 -1.442695, %v11549_v46  ;;  %v9772_v54 = vpop.eup %9771  ;;  %9775 = vpow2.f32 %v9637_v50 }
  0xac   : > { %9098 = vmatmul.msk.f32.gmra.mxu1 %vm460_vm1, %v11545_v44  ;;  %9126 = vmatmul.msk.f32.gmra.mxu2 %vm460_vm1, %v11478_v28  ;;  %v9388_v56 = vmul.f32 -1.442695, %v11564_v52  ;;  %v9774_v58 = vpop.eup %9773  ;;  %v11571_v59 = vadd.f32 1.0, %v9772_v54 }
  0xad   : > { %9777 = vpow2.f32 %v9387_v51  ;;  %v11584_v62 = vadd.f32 1.0, %v9774_v58 }
  0xae   : > { %v676_v57 = vpop.f32.mrf.mxu3  ;;  %9779 = vpow2.f32 %v9638_v53  ;;  %v2999_v16 = vand.u32 2147483648, %v11571_v59  ;;  %v2997_v25 = vand.u32 2147483647, %v11571_v59  ;;  %vm2993_vm2 = vweird.f32 %v11571_v59 }
  0xaf   : > { %v11574_v60 = vadd.f32 %v676_v57, %v11519_v33  ;;  %9781 = vpow2.f32 %v9388_v56  ;;  %v789_v10 = vpop.f32.mrf.mxu2  ;;  %v3014_v17 = vand.u32 2147483648, %v11584_v62  ;;  %vm3008_vm4 = vweird.f32 %v11584_v62 }
  0xb0   : > { %9783 = vrcp.f32 %v11571_v59  ;;  %v601_v7 = vpop.f32.mrf.mxu0  ;;  %v11637_v24 = vadd.f32 %v789_v10, %v11525_v36  ;;  %vm11682_vm6 = vcmp.eq.f32.partialorder %v2997_v25, 8.507059e+37 }
  0xb1   : > { %v9776_v61 = vpop.eup %9775  ;;  %v9647_v0 = vmul.f32 -1.442695, %v11574_v60  ;;  %9785 = vrcp.f32 %v11584_v62  ;;  %v714_v13 = vpop.f32.mrf.mxu1  ;;  %v11618_v15 = vadd.f32 %v601_v7, %v11519_v33  ;;  %v11648_v34 = vor.u32 1.1754944e-38, %v3014_v17 }
  0xb2   : > { %v11588_v2 = vadd.f32 1.0, %v9776_v61  ;;  %v11626_v19 = vadd.f32 %v714_v13, %v11525_v36  ;;  %v9648_v54 = vmul.f32 -1.442695, %v11637_v24 }
  0xb3   : > { %9066 = vmatmul.msk.f32.gmra.mxu0 %vm460_vm1, %v11568_v55  ;;  %9158 = vmatmul.msk.f32.gmra.mxu3 %vm460_vm1, %v11469_v27  ;;  %v9778_v63 = vpop.eup %9777  ;;  %9787 = vpow2.f32 %v9647_v0  ;;  %v9397_v26 = vmul.f32 -1.442695, %v11618_v15 }
  0xb4   : > { %9099 = vmatmul.msk.f32.gmra.mxu1 %vm460_vm1, %v11568_v55  ;;  %9127 = vmatmul.msk.f32.gmra.mxu2 %vm460_vm1, %v11487_v29  ;;  %v9780_v1 = vpop.eup %9779  ;;  %v11591_v3 = vadd.f32 1.0, %v9778_v63  ;;  %9789 = vrcp.f32 %v11588_v2  ;;  %v6897_v37 = vand.u32 2147483647, %v11588_v2  ;;  %v9398_v47 = vmul.f32 -1.442695, %v11626_v19 }
  0xb5   : > { %v9782_v4 = vpop.eup %9781  ;;  %v11598_v6 = vadd.f32 1.0, %v9780_v1  ;;  %vm6893_vm3 = vweird.f32 %v11588_v2  ;;  %v6899_v63 = vand.u32 2147483648, %v11588_v2 }
  0xb6   : > { %v11604_v8 = vpop.eup %9783  ;;  %9791 = vrcp.f32 %v11591_v3  ;;  %v11610_v9 = vadd.f32 1.0, %v9782_v4  ;;  %v679_v40 = vpop.f32.mrf.mxu3  ;;  %v11679_v4 = vld [vmem:[%s11390_s22 + $0xa0] sm:$0xff]  ;;  %vm11715_vm10 = vcmp.eq.f32.partialorder %v6897_v37, 8.507059e+37  ;;  %vm3143_vm11 = vweird.f32 %v11591_v3 }
  0xb7   : > { %v11612_v11 = vpop.eup %9785  ;;  %v2989_v12 = vmul.f32 %v11604_v8, %v11571_v59  ;;  %9793 = vrcp.f32 %v11598_v6  ;;  %v11658_v48 = vadd.f32 %v679_v40, %v11519_v33  ;;  %v792_v58 = vpop.f32.mrf.mxu2  ;;  %v6914_v0 = vand.u32 2147483648, %v11598_v6 }
  0xb8   : > { %9795 = vrcp.f32 %v11610_v9  ;;  %v3004_v22 = vmul.f32 %v11612_v11, %v11584_v62  ;;  %v604_v41 = vpop.f32.mrf.mxu0  ;;  %v11676_v1 = vadd.f32 %v792_v58, %v11525_v36  ;;  %vm2994_vm5 = vweird.f32 %v11604_v8 }
  0xb9   : > { %v9788_v14 = vpop.eup %9787  ;;  %v2990_v21 = vsub.f32 1.0, %v2989_v12  ;;  %v9657_v57 = vmul.f32 -1.442695, %v11658_v48  ;;  %v11670_v61 = vadd.f32 %v604_v41, %v11519_v33  ;;  %vm3009_vm7 = vweird.f32 %v11612_v11  ;;  %vm11725_vm12 = vmor %vm2993_vm2, %vm2994_vm5 }
  0xba   : > { %v11623_v18 = vpop.eup %9789  ;;  %v11634_v23 = vadd.f32 1.0, %v9788_v14  ;;  %v3005_v53 = vsub.f32 1.0, %v3004_v22  ;;  %vm6908_vm8 = vweird.f32 %v11598_v6  ;;  %v6912_v22 = vand.u32 2147483647, %v11598_v6  ;;  %vm11750_vm5 = vmor %vm3008_vm4, %vm3009_vm7 }
  0xbb   : > { %9159 = vmatmul.msk.f32.gmra.mxu3 %vm460_vm1, %v11478_v28  ;;  %9067 = vmatmul.msk.f32.gmra.mxu0 %vm460_vm1, %v11594_v5  ;;  %v11645_v28 = vor.u32 1.1754944e-38, %v2999_v16  ;;  %v6889_v43 = vmul.f32 %v11623_v18, %v11588_v2  ;;  %v2991_v51 = vmul.f32 %v11604_v8, %v2990_v21  ;;  %v9407_v16 = vmul.f32 -1.442695, %v11670_v61 }
  0xbc   : > { %9100 = vmatmul.msk.f32.gmra.mxu1 %vm460_vm1, %v11594_v5  ;;  %9128 = vmatmul.msk.f32.gmra.mxu2 %vm460_vm1, %v11496_v30  ;;  %v11630_v20 = vpop.eup %9791  ;;  %9797 = vrcp.f32 %v11634_v23  ;;  %v3006_v14 = vmul.f32 %v11612_v11, %v3005_v53  ;;  %v11706_v40 = vor.u32 1.1754944e-38, %v6914_v0  ;;  %v3147_v41 = vand.u32 2147483647, %v11591_v3 }
  0xbd   : > { %v11643_v27 = vpop.eup %9793  ;;  %v3139_v45 = vmul.f32 %v11630_v20, %v11591_v3  ;;  %9799 = vpow2.f32 %v9397_v26  ;;  %v6890_v10 = vsub.f32 1.0, %v6889_v43  ;;  %v2992_v17 = vadd.f32 %v11604_v8, %v2991_v51 }
  0xbe   : > { %v11660_v50 = vpop.eup %9795  ;;  %v6904_v56 = vmul.f32 %v11643_v27, %v11598_v6  ;;  %9801 = vpow2.f32 %v9398_v47  ;;  %v11704_v26 = vor.u32 1.1754944e-38, %v6899_v63  ;;  %vm6894_vm13 = vweird.f32 %v11623_v18 }
  0xbf   : > { %v3140_v12 = vsub.f32 1.0, %v3139_v45  ;;  %v3154_v13 = vmul.f32 %v11660_v50, %v11610_v9  ;;  %9803 = vpow2.f32 %v9648_v54  ;;  %v6891_v47 = vmul.f32 %v11623_v18, %v6890_v10  ;;  %vm11773_vm4 = vmor %vm6893_vm3, %vm6894_vm13 }
  0xc0   : > { %v6905_v21 = vsub.f32 1.0, %v6904_v56  ;;  %9805 = vpow2.f32 %v9657_v57  ;;  %v3007_v57 = vadd.f32 %v11612_v11, %v3006_v14  ;;  %v3149_v37 = vand.u32 2147483648, %v11591_v3 }
  0xc1   : > { %v3141_v53 = vmul.f32 %v11630_v20, %v3140_v12  ;;  %v3155_v54 = vsub.f32 1.0, %v3154_v13  ;;  %9807 = vpow2.f32 %v9407_v16  ;;  %v2996_v58 = vsel %vm11725_vm12, %v11604_v8, %v2992_v17 }
  0xc2   : > { %v11702_v25 = vpop.eup %9797  ;;  %v6906_v63 = vmul.f32 %v11643_v27, %v6905_v21  ;;  %vm6909_vm14 = vweird.f32 %v11643_v27  ;;  %vm3144_vm15 = vweird.f32 %v11630_v20  ;;  %vm11740_vm2 = vcmp.eq.f32.partialorder %v3147_v41, 8.507059e+37 }
  0xc3   : > { %9160 = vmatmul.msk.f32.gmra.mxu3 %vm460_vm1, %v11487_v29  ;;  %v3012_v29 = vand.u32 2147483647, %v11584_v62  ;;  %9068 = vmatmul.msk.f32.gmra.mxu0 %vm460_vm1, %v11679_v4  ;;  %v9800_v43 = vpop.eup %9799  ;;  %v7039_v59 = vmul.f32 %v11702_v25, %v11634_v23  ;;  %v6892_v14 = vadd.f32 %v11623_v18, %v6891_v47  ;;  %vm11755_vm12 = vcmp.eq.f32.partialorder %v6912_v22, 8.507059e+37  ;;  %vm11790_vm3 = vmor %vm3143_vm11, %vm3144_vm15 }
  0xc4   : > { %9129 = vmatmul.msk.f32.gmra.mxu2 %vm460_vm1, %v11505_v31  ;;  %9101 = vmatmul.msk.f32.gmra.mxu1 %vm460_vm1, %v11679_v4  ;;  %v9802_v56 = vpop.eup %9801  ;;  %v11744_v12 = vadd.f32 1.0, %v9800_v43  ;;  %v3142_v17 = vadd.f32 %v11630_v20, %v3141_v53  ;;  %v3156_v21 = vmul.f32 %v11660_v50, %v3155_v54  ;;  %v3001_v62 = vsel %vm11682_vm6, %v11645_v28, %v2996_v58  ;;  %vm11817_vm11 = vmor %vm6908_vm8, %vm6909_vm14 }
  0xc5   : > { %vm11710_vm9 = vcmp.eq.f32.partialorder %v3012_v29, 8.507059e+37  ;;  %v9804_v0 = vpop.eup %9803  ;;  %v11761_v41 = vadd.f32 1.0, %v9802_v56  ;;  %v3011_v43 = vsel %vm11750_vm5, %v11612_v11, %v3007_v57  ;;  %v3150_v47 = vor.u32 1.1754944e-38, %v3149_v37 }
  0xc6   : > { %v9806_v13 = vpop.eup %9805  ;;  %vm3158_vm7 = vweird.f32 %v11610_v9  ;;  %v6907_v28 = vadd.f32 %v11643_v27, %v6906_v63  ;;  %v3162_v7 = vand.u32 2147483647, %v11610_v9  ;;  %v7040_v53 = vsub.f32 1.0, %v7039_v59 }
  0xc7   : > { %v11782_v11 = vadd.f32 1.0, %v9804_v0  ;;  %v9808_v2 = vpop.eup %9807  ;;  %vm3159_vm6 = vweird.f32 %v11660_v50  ;;  %v6896_v29 = vsel %vm11773_vm4, %v11623_v18, %v6892_v14  ;;  %v3146_v3 = vsel %vm11790_vm3, %v11630_v20, %v3142_v17 }
  0xc8   : > { %v3157_v57 = vadd.f32 %v11660_v50, %v3156_v21  ;;  %v7788_v58 = vmul.f32 %v3001_v62, %v11528_v38  ;;  %v3016_v63 = vsel %vm11710_vm9, %v11648_v34, %v3011_v43  ;;  %v3164_v20 = vand.u32 2147483648, %v11610_v9  ;;  %vm11837_vm8 = vmor %vm3158_vm7, %vm3159_vm6  ;;  %v607_v9 = vpop.f32.mrf.mxu0 }
  0xc9   : > { %vm7043_vm13 = vweird.f32 %v11634_v23  ;;  %v7041_v59 = vmul.f32 %v11702_v25, %v7040_v53  ;;  %v7047_v38 = vand.u32 2147483647, %v11634_v23  ;;  %v11826_v45 = vadd.f32 1.0, %v9808_v2 }
  0xca   : > { %v6901_v6 = vsel %vm11715_vm10, %v11704_v26, %v6896_v29  ;;  %v3151_v34 = vsel %vm11740_vm2, %v3150_v47, %v3146_v3  ;;  %v6911_v51 = vsel %vm11817_vm11, %v11643_v27, %v6907_v28  ;;  %v3161_v26 = vsel %vm11837_vm8, %v11660_v50, %v3157_v57 }
  0xcb   : > { %9161 = vmatmul.msk.f32.gmra.mxu3 %vm460_vm1, %v11496_v30  ;;  %v9658_v30 = vmul.f32 -1.442695, %v11676_v1  ;;  %vm7044_vm9 = vweird.f32 %v11702_v25  ;;  %v11855_v14 = vmul.f32 %v3016_v63, %v11538_v39  ;;  %vm3163_vm10 = vcmp.eq.f32.partialorder %v3162_v7, 8.507059e+37 }
  0xcc   : > { %9130 = vmatmul.msk.f32.gmra.mxu2 %vm460_vm1, %v11522_v35  ;;  %v3165_v17 = vor.u32 1.1754944e-38, %v3164_v20  ;;  %v7049_v21 = vand.u32 2147483648, %v11634_v23  ;;  %v11863_v50 = vmul.f32 %v6901_v6, %v11542_v42  ;;  %v7042_v62 = vadd.f32 %v11702_v25, %v7041_v59  ;;  %vm11877_vm14 = vmor %vm7043_vm13, %vm7044_vm9  ;;  %v682_v42 = vpop.f32.mrf.mxu3 }
  0xcd   : > { %9809 = vpow2.f32 %v9658_v30  ;;  %v717_v30 = vpop.f32.mrf.mxu1  ;;  %v6916_v39 = vsel %vm11755_vm12, %v11706_v40, %v6911_v51  ;;  %vm11886_vm15 = vcmp.eq.f32.partialorder %v7047_v38, 8.507059e+37  ;;  %v11894_v23 = vadd.f32 %v682_v42, %v11519_v33 }
  0xce   : > { %9811 = vrcp.f32 %v11744_v12  ;;  %v11799_v56 = vadd.f32 %v717_v30, %v11525_v36  ;;  %21984 = vst [vmem:[#allocation9_spill] sm:$0xff] %v11863_v50  ;;  %v7798_v30 = vmul.f32 %v3151_v34, %v11549_v46  ;;  %v3166_v43 = vsel %vm3163_vm10, %v3165_v17, %v3161_v26  ;;  %v11935_v26 = vld [vmem:[%s11390_s22 + $0xa8] sm:$0xff] }
  0xcf   : > { %9813 = vrcp.f32 %v11761_v41  ;;  %v11882_v46 = vadd.f32 %v607_v9, %v11519_v33  ;;  %v7050_v7 = vor.u32 1.1754944e-38, %v7049_v21  ;;  %v7064_v53 = vand.u32 2147483648, %v11782_v11  ;;  %9069 = vmatmul.msk.f32.gmra.mxu0 %vm460_vm1, %v11935_v26  ;;  %9102 = vmatmul.msk.f32.gmra.mxu1 %vm460_vm1, %v11935_v26 }
  0xd0   : > { %9815 = vrcp.f32 %v11782_v11  ;;  %v3299_v2 = vand.u32 2147483648, %v11744_v12  ;;  %v11903_v29 = vmul.f32 %v6916_v39, %v11552_v49  ;;  %v11905_v3 = vadd.f32 %v7798_v30, %v7788_v58 }
  0xd1   : > { %v11908_v57 = vmul.f32 %v3166_v43, %v11564_v52  ;;  %v3297_v18 = vand.u32 2147483647, %v11744_v12  ;;  %v9417_v20 = vmul.f32 -1.442695, %v11882_v46  ;;  %v7062_v52 = vand.u32 2147483647, %v11782_v11 }
  0xd2   : > { %21989 = vst [vmem:[#allocation10_spill] sm:$0xff] %v11903_v29  ;;  %v11930_v0 = vor.u32 1.1754944e-38, %v7064_v53  ;;  %vm7058_vm2 = vweird.f32 %v11782_v11  ;;  %vm3293_vm5 = vweird.f32 %v11744_v12  ;;  %v3312_v17 = vand.u32 2147483647, %v11761_v41 }
  0xd3   : > { %9162 = vmatmul.msk.f32.gmra.mxu3 %vm460_vm1, %v11505_v31  ;;  %v11796_v31 = vadd.f32 1.0, %v9806_v13  ;;  %v9810_v37 = vpop.eup %9809  ;;  %v9408_v13 = vmul.f32 -1.442695, %v11799_v56  ;;  %v3314_v21 = vand.u32 2147483648, %v11761_v41  ;;  %vm3308_vm12 = vweird.f32 %v11761_v41 }
  0xd4   : > { %9131 = vmatmul.msk.f32.gmra.mxu2 %vm460_vm1, %v11545_v44  ;;  %v11850_v10 = vadd.f32 1.0, %v9810_v37  ;;  %v11852_v8 = vpop.eup %9811  ;;  %v7046_v37 = vsel %vm11877_vm14, %v11702_v25, %v7042_v62  ;;  %v9667_v25 = vmul.f32 -1.442695, %v11894_v23  ;;  %v795_v62 = vpop.f32.mrf.mxu2  ;;  %vm11976_vm11 = vcmp.eq.f32.partialorder %v3297_v18, 8.507059e+37 }
  0xd5   : > { %9817 = vrcp.f32 %v11796_v31  ;;  %v11860_v27 = vpop.eup %9813  ;;  %v3289_v40 = vmul.f32 %v11852_v8, %v11744_v12  ;;  %v720_v16 = vpop.f32.mrf.mxu1  ;;  %v11928_v34 = vsel %vm11886_vm15, %v7050_v7, %v7046_v37  ;;  %v7197_v39 = vand.u32 2147483647, %v11796_v31 }
  0xd6   : > { %9819 = vrcp.f32 %v11826_v45  ;;  %v11884_v22 = vpop.eup %9815  ;;  %v3304_v54 = vmul.f32 %v11860_v27, %v11761_v41  ;;  %v11918_v49 = vadd.f32 %v720_v16, %v11525_v36  ;;  %vm3294_vm4 = vweird.f32 %v11852_v8 }
  0xd7   : > { %9821 = vpow2.f32 %v9408_v13  ;;  %v7054_v63 = vmul.f32 %v11884_v22, %v11782_v11  ;;  %v3290_v59 = vsub.f32 1.0, %v3289_v40  ;;  %v11932_v13 = vor.u32 1.1754944e-38, %v3299_v2  ;;  %v610_v2 = vpop.f32.mrf.mxu0  ;;  %vm12021_vm10 = vmor %vm3293_vm5, %vm3294_vm4 }
  0xd8   : > { %9823 = vrcp.f32 %v11850_v10  ;;  %v3305_v51 = vsub.f32 1.0, %v3304_v54  ;;  %vm7193_vm7 = vweird.f32 %v11796_v31  ;;  %v7199_v40 = vand.u32 2147483648, %v11796_v31 }
  0xd9   : > { %9825 = vpow2.f32 %v9667_v25  ;;  %v3291_v42 = vmul.f32 %v11852_v8, %v3290_v59  ;;  %vm7059_vm3 = vweird.f32 %v11884_v22  ;;  %v11970_v54 = vor.u32 1.1754944e-38, %v3314_v21 }
  0xda   : > { %v3306_v16 = vmul.f32 %v11860_v27, %v3305_v51  ;;  %v9418_v37 = vmul.f32 -1.442695, %v11918_v49  ;;  %vm3309_vm6 = vweird.f32 %v11860_v27  ;;  %vm11980_vm13 = vcmp.eq.f32.partialorder %v3312_v17, 8.507059e+37  ;;  %vm12049_vm0 = vmor %vm7058_vm2, %vm7059_vm3 }
  0xdb   : > { %9163 = vmatmul.msk.f32.gmra.mxu3 %vm460_vm1, %v11522_v35  ;;  %v11896_v28 = vpop.eup %9817  ;;  %v11956_v35 = vadd.f32 %v795_v62, %v11525_v36  ;;  %v11988_v62 = vadd.f32 %v610_v2, %v11519_v33  ;;  %vm11990_vm8 = vcmp.eq.f32.partialorder %v7062_v52, 8.507059e+37  ;;  %vm12003_vm9 = vcmp.eq.f32.partialorder %v7197_v39, 8.507059e+37  ;;  %vm12039_vm5 = vmor %vm3308_vm12, %vm3309_vm6 }
  0xdc   : > { %9132 = vmatmul.msk.f32.gmra.mxu2 %vm460_vm1, %v11568_v55  ;;  %v11920_v58 = vpop.eup %9819  ;;  %v7189_v38 = vmul.f32 %v11896_v28, %v11796_v31  ;;  %v3307_v18 = vadd.f32 %v11860_v27, %v3306_v16  ;;  %v12007_v52 = vor.u32 1.1754944e-38, %v7199_v40  ;;  %vm7194_vm14 = vweird.f32 %v11896_v28 }
  0xdd   : > { %v9822_v6 = vpop.eup %9821  ;;  %v3439_v43 = vmul.f32 %v11920_v58, %v11826_v45  ;;  %v9668_v53 = vmul.f32 -1.442695, %v11956_v35  ;;  %v9427_v16 = vmul.f32 -1.442695, %v11988_v62  ;;  %vm7208_vm15 = vweird.f32 %v11850_v10  ;;  %vm12069_vm2 = vmor %vm7193_vm7, %vm7194_vm14 }
  0xde   : > { %v11939_v9 = vpop.eup %9823  ;;  %v11945_v30 = vadd.f32 1.0, %v9822_v6  ;;  %v7190_v47 = vsub.f32 1.0, %v7189_v38  ;;  %v685_v38 = vpop.f32.mrf.mxu3  ;;  %v3292_v6 = vadd.f32 %v11852_v8, %v3291_v42  ;;  %v7212_v39 = vand.u32 2147483647, %v11850_v10 }
  0xdf   : > { %v7204_v7 = vmul.f32 %v11939_v9, %v11850_v10  ;;  %v3440_v59 = vsub.f32 1.0, %v3439_v43  ;;  %v9826_v25 = vpop.eup %9825  ;;  %vm7209_vm4 = vweird.f32 %v11939_v9  ;;  %v3311_v41 = vsel %vm12039_vm5, %v11860_v27, %v3307_v18 }
  0xe0   : > { %9827 = vrcp.f32 %v11945_v30  ;;  %v7191_v43 = vmul.f32 %v11896_v28, %v7190_v47  ;;  %v11996_v17 = vadd.f32 1.0, %v9826_v25  ;;  %v3296_v12 = vsel %vm12021_vm10, %v11852_v8, %v3292_v6 }
  0xe1   : > { %9829 = vpow2.f32 %v9417_v20  ;;  %v11985_v20 = vadd.f32 %v685_v38, %v11519_v33  ;;  %v7205_v42 = vsub.f32 1.0, %v7204_v7  ;;  %v3441_v40 = vmul.f32 %v11920_v58, %v3440_v59 }
  0xe2   : > { %9831 = vpow2.f32 %v9668_v53  ;;  %v11999_v53 = vld [vmem:[%s11390_s22 + $0xb0] sm:$0xff]  ;;  %v7192_v8 = vadd.f32 %v11896_v28, %v7191_v43  ;;  %v7214_v18 = vand.u32 2147483648, %v11850_v10  ;;  %vm3444_vm12 = vweird.f32 %v11920_v58 }
  0xe3   : > { %9164 = vmatmul.msk.f32.gmra.mxu3 %vm460_vm1, %v11545_v44  ;;  %v7055_v44 = vsub.f32 1.0, %v7054_v63  ;;  %9833 = vpow2.f32 %v9418_v37  ;;  %21994 = vst [vmem:[#allocation11_spill] sm:$0xff] %v11985_v20  ;;  %v9677_v2 = vmul.f32 -1.442695, %v11985_v20  ;;  %9070 = vmatmul.msk.f32.gmra.mxu0 %vm460_vm1, %v11999_v53  ;;  %v7206_v6 = vmul.f32 %v11939_v9, %v7205_v42 }
  0xe4   : > { %9133 = vmatmul.msk.f32.gmra.mxu2 %vm460_vm1, %v11594_v5  ;;  %9103 = vmatmul.msk.f32.gmra.mxu1 %vm460_vm1, %v11999_v53  ;;  %9835 = vrcp.f32 %v11996_v17  ;;  %v3442_v43 = vadd.f32 %v11920_v58, %v3441_v40  ;;  %v3447_v42 = vand.u32 2147483647, %v11826_v45  ;;  %vm3443_vm3 = vweird.f32 %v11826_v45 }
  0xe5   : > { %v7056_v63 = vmul.f32 %v11884_v22, %v7055_v44  ;;  %9837 = vpow2.f32 %v9677_v2  ;;  %v3449_v31 = vand.u32 2147483648, %v11826_v45  ;;  %v3301_v40 = vsel %vm11976_vm11, %v11932_v13, %v3296_v12  ;;  %vm12112_vm7 = vmor %vm3443_vm3, %vm3444_vm12 }
  0xe6   : > { %v12015_v47 = vpop.eup %9827  ;;  %9839 = vpow2.f32 %v9427_v16  ;;  %v3316_v25 = vsel %vm11980_vm13, %v11970_v54, %v3311_v41  ;;  %v7196_v54 = vsel %vm12069_vm2, %v11896_v28, %v7192_v8  ;;  %vm12118_vm6 = vcmp.eq.f32.partialorder %v7212_v39, 8.507059e+37 }
  0xe7   : > { %v9830_v7 = vpop.eup %9829  ;;  %v7057_v38 = vadd.f32 %v11884_v22, %v7056_v63  ;;  %v3454_v50 = vmul.f32 %v12015_v47, %v11945_v30  ;;  %v3446_v28 = vsel %vm12112_vm7, %v11920_v58, %v3442_v43  ;;  %vm3448_vm11 = vcmp.eq.f32.partialorder %v3447_v42, 8.507059e+37 }
  0xe8   : > { %v9832_v59 = vpop.eup %9831  ;;  %v12060_v20 = vadd.f32 1.0, %v9830_v7  ;;  %v12084_v7 = vpop.f32.mrf.mxu1  ;;  %v3450_v39 = vor.u32 1.1754944e-38, %v3449_v31  ;;  %v7809_v63 = vmul.f32 %v3316_v25, %v11626_v19  ;;  %v7201_v58 = vsel %vm12003_vm9, %v12007_v52, %v7196_v54 }
  0xe9   : > { %v9834_v29 = vpop.eup %9833  ;;  %v7061_v2 = vsel %vm12049_vm0, %v11884_v22, %v7057_v38  ;;  %v12082_v16 = vadd.f32 1.0, %v9832_v59  ;;  %vm12097_vm0 = vmor %vm7208_vm15, %vm7209_vm4  ;;  %v3455_v10 = vsub.f32 1.0, %v3454_v50  ;;  %v7215_v38 = vor.u32 1.1754944e-38, %v7214_v18 }
  0xea   : > { %v12101_v22 = vadd.f32 1.0, %v9834_v29  ;;  %v12105_v13 = vpop.eup %9835  ;;  %9841 = vrcp.f32 %v12060_v20  ;;  %v7066_v50 = vsel %vm11990_vm8, %v11930_v0, %v7061_v2  ;;  %v7808_v59 = vmul.f32 %v3301_v40, %v11618_v15 }
  0xeb   : > { %9165 = vmatmul.msk.f32.gmra.mxu3 %vm460_vm1, %v11568_v55  ;;  %v798_v55 = vpop.f32.mrf.mxu2  ;;  %v9838_v21 = vpop.eup %9837  ;;  %9843 = vrcp.f32 %v12082_v16  ;;  %v3451_v8 = vsel %vm3448_vm11, %v3450_v39, %v3446_v28  ;;  %v3456_v0 = vmul.f32 %v12015_v47, %v3455_v10  ;;  %v8149_v15 = vadd.f32 %v11908_v57, %v11855_v14 }
  0xec   : > { %9134 = vmatmul.msk.f32.gmra.mxu2 %vm460_vm1, %v11679_v4  ;;  %v12063_v11 = vadd.f32 %v798_v55, %v11525_v36  ;;  %v7207_v55 = vadd.f32 %v11939_v9, %v7206_v6  ;;  %v9840_v12 = vpop.eup %9839  ;;  %9845 = vrcp.f32 %v12101_v22  ;;  %v12141_v44 = vadd.f32 1.0, %v9838_v21 }
  0xed   : > { %v3462_v19 = vand.u32 2147483647, %v11945_v30  ;;  %v7339_v37 = vmul.f32 %v12105_v13, %v11996_v17  ;;  %v12148_v52 = vadd.f32 1.0, %v9840_v12  ;;  %v12157_v27 = vmul.f32 %v7066_v50, %v11637_v24 }
  0xee   : > { %22005 = vst [vmem:[#allocation12_spill] sm:$0xff] %v12063_v11  ;;  %v9678_v29 = vmul.f32 -1.442695, %v12063_v11  ;;  %v7211_v41 = vsel %vm12097_vm0, %v11939_v9, %v7207_v55  ;;  %v12154_v9 = vmul.f32 %v11928_v34, %v11574_v60  ;;  %v8119_v18 = vadd.f32 %v11905_v3, %v7808_v59 }
  0xef   : > { %22015 = vst [vmem:[#allocation14_spill] sm:$0xff] %v12157_v27  ;;  %v12161_v14 = vmul.f32 %v7201_v58, %v11658_v48  ;;  %v12163_v57 = vadd.f32 %v8149_v15, %v7809_v63  ;;  %v7216_v43 = vsel %vm12118_vm6, %v7215_v38, %v7211_v41  ;;  %v7818_v42 = vmul.f32 %v3451_v8, %v11670_v61  ;;  %v613_v48 = vpop.f32.mrf.mxu0 }
  0xf0   : > { %9847 = vpow2.f32 %v9678_v29  ;;  %v12150_v6 = vpop.eup %9841  ;;  %22014 = vst [vmem:[#allocation13_spill] sm:$0xff] %v12154_v9  ;;  %v3464_v2 = vand.u32 2147483648, %v11945_v30  ;;  %v3457_v24 = vadd.f32 %v12015_v47, %v3456_v0  ;;  %vm3458_vm13 = vweird.f32 %v11945_v30  ;;  %v726_v3 = vpop.f32.mrf.mxu1 }
  0xf1   : > { %22016 = vst [vmem:[#allocation15_spill] sm:$0xff] %v12161_v14  ;;  %v12171_v60 = vpop.eup %9843  ;;  %vm3459_vm8 = vweird.f32 %v12015_v47  ;;  %9849 = vrcp.f32 %v12141_v44  ;;  %vm12179_vm9 = vcmp.eq.f32.partialorder %v3462_v19, 8.507059e+37  ;;  %v7340_v31 = vsub.f32 1.0, %v7339_v37  ;;  %v11060_v14 = vld [vmem:[%s11390_s22 + $0x20] sm:$0xff] }
  0xf2   : > { %v12177_v34 = vpop.eup %9845  ;;  %9851 = vrcp.f32 %v12148_v52  ;;  %v12189_v25 = vmul.f32 %v7216_v43, %v11676_v1  ;;  %v7347_v55 = vand.u32 2147483647, %v11996_v17  ;;  %v7349_v45 = vand.u32 2147483648, %v11996_v17  ;;  %vm12203_vm10 = vmor %vm3458_vm13, %vm3459_vm8 }
  0xf3   : > { %9166 = vmatmul.msk.f32.gmra.mxu3 %vm460_vm1, %v11594_v5  ;;  %v12195_v54 = vadd.f32 %v12084_v7, %v11525_v36  ;;  %v12197_v51 = vadd.f32 %v8119_v18, %v7818_v42  ;;  %v3465_v1 = vor.u32 1.1754944e-38, %v3464_v2  ;;  %v12208_v29 = vadd.f32 %v613_v48, %v11519_v33  ;;  %v12250_v2 = vld [vmem:[%s11390_s22 + $0xb8] sm:$0xff]  ;;  %v821_v61 = vpop.f32.mrf.mxu2 }
  0xf4   : > { %9135 = vmatmul.msk.f32.gmra.mxu2 %vm460_vm1, %v11935_v26  ;;  %22019 = vst [vmem:[#allocation16_spill] sm:$0xff] %v12189_v25  ;;  %v12211_v21 = vadd.f32 %v726_v3, %v11525_v36  ;;  %v3461_v7 = vsel %vm12203_vm10, %v12015_v47, %v3457_v24  ;;  %vm7343_vm14 = vweird.f32 %v11996_v17  ;;  %v7354_v30 = vmul.f32 %v12171_v60, %v12082_v16 }
  0xf5   : > { %v7364_v5 = vand.u32 2147483648, %v12082_v16  ;;  %v7341_v38 = vmul.f32 %v12105_v13, %v7340_v31  ;;  %v3604_v12 = vmul.f32 %v12177_v34, %v12101_v22  ;;  %vm12227_vm15 = vcmp.eq.f32.partialorder %v7347_v55, 8.507059e+37  ;;  %9071 = vmatmul.msk.f32.gmra.mxu0 %vm460_vm1, %v12250_v2  ;;  %9104 = vmatmul.msk.f32.gmra.mxu1 %vm460_vm1, %v12250_v2 }
  0xf6   : > { %v9848_v40 = vpop.eup %9847  ;;  %v7350_v47 = vor.u32 1.1754944e-38, %v7349_v45  ;;  %v3599_v63 = vand.u32 2147483648, %v12060_v20  ;;  %v9428_v58 = vmul.f32 -1.442695, %v12195_v54  ;;  %vm7344_vm5 = vweird.f32 %v12105_v13 }
  0xf7   : > { %v12223_v50 = vadd.f32 1.0, %v9848_v40  ;;  %v12225_v59 = vpop.eup %9849  ;;  %vm7358_vm4 = vweird.f32 %v12082_v16  ;;  %vm3593_vm2 = vweird.f32 %v12060_v20  ;;  %v3597_v8 = vand.u32 2147483647, %v12060_v20  ;;  %vm12254_vm12 = vmor %vm7343_vm14, %vm7344_vm5  ;;  %v12273_v40 = vpop.f32.mrf.mxu3 }
  0xf8   : > { %v12233_v41 = vpop.eup %9851  ;;  %v3466_v0 = vsel %vm12179_vm9, %v3465_v1, %v3461_v7  ;;  %v7355_v15 = vsub.f32 1.0, %v7354_v30  ;;  %v7362_v19 = vand.u32 2147483647, %v12082_v16  ;;  %v12244_v37 = vor.u32 1.1754944e-38, %v7364_v5  ;;  %v400_v7 = vld [vmem:[%s11390_s22 + $0xc0] sm:$0xff] }
  0xf9   : > { %22022 = vst [vmem:[#allocation17_spill] sm:$0xff] %v12223_v50  ;;  %v7342_v18 = vadd.f32 %v12105_v13, %v7341_v38  ;;  %v3605_v42 = vsub.f32 1.0, %v3604_v12  ;;  %9853 = vrcp.f32 %v12223_v50  ;;  %v12258_v24 = vor.u32 1.1754944e-38, %v3599_v63 }
  0xfa   : > { %v7489_v48 = vmul.f32 %v12225_v59, %v12141_v44  ;;  %v3739_v3 = vmul.f32 %v12233_v41, %v12148_v52  ;;  %9855 = vpow2.f32 %v9428_v58  ;;  %v7819_v17 = vmul.f32 %v3466_v0, %v11799_v56 }
  0xfb   : > { %9167 = vmatmul.msk.f32.gmra.mxu3 %vm460_vm1, %v11679_v4  ;;  %v3589_v4 = vmul.f32 %v12150_v6, %v12060_v20  ;;  %vm3594_vm3 = vweird.f32 %v12150_v6  ;;  %vm3608_vm0 = vweird.f32 %v12101_v22  ;;  %v3612_v31 = vand.u32 2147483647, %v12101_v22 }
  0xfc   : > { %9136 = vmatmul.msk.f32.gmra.mxu2 %vm460_vm1, %v11999_v53  ;;  %v7356_v55 = vmul.f32 %v12171_v60, %v7355_v15  ;;  %vm7359_vm7 = vweird.f32 %v12171_v60  ;;  %vm12279_vm6 = vcmp.eq.f32.partialorder %v3597_v8, 8.507059e+37  ;;  %v12284_v56 = vperm.slane %v11513_v32, 2  ;;  %vm12314_vm13 = vmor %vm3593_vm2, %vm3594_vm3 }
  0xfd   : > { %v3590_v28 = vsub.f32 1.0, %v3589_v4  ;;  %v3614_v4 = vand.u32 2147483648, %v12101_v22  ;;  %v9437_v10 = vmul.f32 -1.442695, %v12208_v29  ;;  %v7346_v1 = vsel %vm12254_vm12, %v12105_v13, %v7342_v18  ;;  %vm12330_vm10 = vmor %vm7358_vm4, %vm7359_vm7  ;;  %9072 = vmatmul.msk.f32.gmra.mxu0 %vm460_vm1, %v400_v7  ;;  %9105 = vmatmul.msk.f32.gmra.mxu1 %vm460_vm1, %v400_v7 }
  0xfe   : > { %vm12290_vm11 = vcmp.eq.f32.partialorder %v7362_v19, 8.507059e+37  ;;  %v3606_v5 = vmul.f32 %v12177_v34, %v3605_v42  ;;  %v9438_v38 = vmul.f32 -1.442695, %v12211_v21  ;;  %v3740_v12 = vsub.f32 1.0, %v3739_v3 }
  0xff   : > { %v3591_v43 = vmul.f32 %v12150_v6, %v3590_v28  ;;  %v7490_v28 = vsub.f32 1.0, %v7489_v48  ;;  %v12298_v32 = vadd.f32 %v821_v61, %v12284_v56  ;;  %9857 = vpow2.f32 %v9437_v10  ;;  %v12300_v63 = vpop.eup %9853  ;;  %v801_v22 = vpop.f32.mrf.mxu3 }
 0x100   : > { %22031 = vst [vmem:[#allocation18_spill] sm:$0xff] %v12300_v63  ;;  %v12303_v13 = vadd.f32 %v12163_v57, %v7819_v17  ;;  %v7497_v58 = vand.u32 2147483647, %v12141_v44  ;;  %v7499_v8 = vand.u32 2147483648, %v12141_v44  ;;  %9859 = vpow2.f32 %v9438_v38  ;;  %v9856_v0 = vpop.eup %9855 }
 0x101   : > { %v3592_v30 = vadd.f32 %v12150_v6, %v3591_v43  ;;  %v7357_v15 = vadd.f32 %v12171_v60, %v7356_v55  ;;  %vm12318_vm8 = vcmp.eq.f32.partialorder %v3612_v31, 8.507059e+37  ;;  %v3615_v18 = vor.u32 1.1754944e-38, %v3614_v4  ;;  %v824_v55 = vpop.f32.mrf.mxu2 }
 0x102   : > { %vm7493_vm9 = vweird.f32 %v12141_v44  ;;  %v7351_v43 = vsel %vm12227_vm15, %v7350_v47, %v7346_v1  ;;  %v3607_v42 = vadd.f32 %v12177_v34, %v3606_v5  ;;  %vm3609_vm14 = vweird.f32 %v12177_v34 }
 0x103   : > { %9168 = vmatmul.msk.f32.gmra.mxu3 %vm460_vm1, %v11935_v26  ;;  %v12336_v26 = vadd.f32 1.0, %v9856_v0  ;;  %v3596_v48 = vsel %vm12314_vm13, %v12150_v6, %v3592_v30  ;;  %v7491_v39 = vmul.f32 %v12225_v59, %v7490_v28  ;;  %v3741_v47 = vmul.f32 %v12233_v41, %v3740_v12  ;;  %vm12358_vm5 = vmor %vm3608_vm0, %vm3609_vm14 }
 0x104   : > { %9137 = vmatmul.msk.f32.gmra.mxu2 %vm460_vm1, %v12250_v2  ;;  %vm12343_vm15 = vcmp.eq.f32.partialorder %v7497_v58, 8.507059e+37  ;;  %v7500_v3 = vor.u32 1.1754944e-38, %v7499_v8  ;;  %v7504_v61 = vmul.f32 %v12300_v63, %v12223_v50  ;;  %v12351_v31 = vmul.f32 %v7351_v43, %v11894_v23 }
 0x105   : > { %v9858_v17 = vpop.eup %9857  ;;  %v7361_v6 = vsel %vm12330_vm10, %v12171_v60, %v7357_v15  ;;  %vm7494_vm4 = vweird.f32 %v12225_v59  ;;  %vm3743_vm2 = vweird.f32 %v12148_v52  ;;  %v3601_v23 = vsel %vm12279_vm6, %v12258_v24, %v3596_v48 }
 0x106   : > { %22040 = vst [vmem:[#allocation19_spill] sm:$0xff] %v12351_v31  ;;  %v9860_v10 = vpop.eup %9859  ;;  %v3611_v60 = vsel %vm12358_vm5, %v12177_v34, %v3607_v42  ;;  %v12370_v1 = vadd.f32 1.0, %v9858_v17  ;;  %v12373_v30 = vadd.f32 %v824_v55, %v12284_v56  ;;  %v7492_v5 = vadd.f32 %v12225_v59, %v7491_v39  ;;  %vm12382_vm3 = vmor %vm7493_vm9, %vm7494_vm4  ;;  %v616_v42 = vpop.f32.mrf.mxu0 }
 0x107   : > { %v3742_v38 = vadd.f32 %v12233_v41, %v3741_v47  ;;  %vm3744_vm12 = vweird.f32 %v12233_v41  ;;  %v12378_v28 = vadd.f32 1.0, %v9860_v10  ;;  %v7505_v34 = vsub.f32 1.0, %v7504_v61  ;;  %v729_v55 = vpop.f32.mrf.mxu1 }
 0x108   : > { %v3747_v45 = vand.u32 2147483647, %v12148_v52  ;;  %v3749_v12 = vand.u32 2147483648, %v12148_v52  ;;  %v7366_v44 = vsel %vm12290_vm11, %v12244_v37, %v7361_v6  ;;  %v7828_v8 = vmul.f32 %v3601_v23, %v11882_v46  ;;  %vm12406_vm7 = vmor %vm3743_vm2, %vm3744_vm12 }
 0x109   : > { %vm7508_vm0 = vweird.f32 %v12223_v50  ;;  %v3616_v15 = vsel %vm12318_vm8, %v3615_v18, %v3611_v60  ;;  %v12412_v46 = vadd.f32 %v12273_v40, %v11519_v33  ;;  %v9389_v37 = vmul.f32 -1.442695, %v12373_v30  ;;  %v12459_v60 = vpop.f32.mrf.mxu3 }
 0x10a   : > { %v7496_v57 = vsel %vm12382_vm3, %v12225_v59, %v7492_v5  ;;  %v3746_v18 = vsel %vm12406_vm7, %v12233_v41, %v3742_v38  ;;  %v12429_v40 = vmul.f32 %v7366_v44, %v11956_v35  ;;  %v7506_v43 = vmul.f32 %v12300_v63, %v7505_v34 }
 0x10b   : > { %9169 = vmatmul.msk.f32.gmra.mxu3 %vm460_vm1, %v11999_v53  ;;  %v9379_v53 = vmul.f32 -1.442695, %v12298_v32  ;;  %22047 = vst [vmem:[#allocation20_spill] sm:$0xff] %v12412_v46  ;;  %v7514_v59 = vand.u32 2147483648, %v12223_v50  ;;  %v3750_v20 = vor.u32 1.1754944e-38, %v3749_v12  ;;  %v7829_v41 = vmul.f32 %v3616_v15, %v11918_v49 }
 0x10c   : > { %22048 = vst [vmem:[#allocation21_spill] sm:$0xff] %v12429_v40  ;;  %9138 = vmatmul.msk.f32.gmra.mxu2 %vm460_vm1, %v400_v7  ;;  %vm3748_vm6 = vcmp.eq.f32.partialorder %v3747_v45, 8.507059e+37  ;;  %v7501_v35 = vsel %vm12343_vm15, %v7500_v3, %v7496_v57  ;;  %vm7509_vm11 = vweird.f32 %v12300_v63  ;;  %v9687_v17 = vmul.f32 -1.442695, %v12412_v46  ;;  %v22055_v45 = vld [vmem:[#allocation11_spill] sm:$0xff] }
 0x10d   : > { %9861 = vpow2.f32 %v9379_v53  ;;  %v3751_v47 = vsel %vm3748_vm6, %v3750_v20, %v3746_v18  ;;  %v12447_v6 = vadd.f32 %v801_v22, %v11525_v36  ;;  %v12450_v4 = vadd.f32 %v616_v42, %v11519_v33  ;;  %vm12466_vm13 = vmor %vm7508_vm0, %vm7509_vm11 }
 0x10e   : > { %9863 = vrcp.f32 %v12336_v26  ;;  %v8121_v16 = vadd.f32 %v12197_v51, %v7828_v8  ;;  %v12454_v3 = vadd.f32 %v12300_v63, %v7506_v43  ;;  %v22051_v22 = vmov 0 }
 0x10f   : > { %9865 = vrcp.f32 %v12370_v1  ;;  %22049 = vst [vmem:[#allocation22_spill] sm:$0xff] %v12447_v6  ;;  %v22052_v22 = vsel %vm12466_vm13, 4294967295, %v22051_v22  ;;  %v12470_v51 = vor.u32 1.1754944e-38, %v7514_v59  ;;  %v7838_v5 = vmul.f32 %v3751_v47, %v11988_v62 }
 0x110   : > { %9867 = vrcp.f32 %v12378_v28  ;;  %22050 = vst [vmem:[#allocation23_spill] sm:$0xff] %v12454_v3  ;;  %v3762_v38 = vand.u32 2147483647, %v12336_v26  ;;  %v3764_v24 = vand.u32 2147483648, %v12336_v26  ;;  %v12476_v34 = vadd.f32 %v12303_v13, %v7829_v41  ;;  %v12767_v13 = vld [vmem:[%s11390_s22 + $0x10] sm:$0xff] }
 0x111   : > { %22053 = vst [vmem:[#allocation24_spill] sm:$0xff] %v22052_v22  ;;  %v12479_v12 = vmul.f32 %v7501_v35, %v22055_v45  ;;  %v12482_v44 = vadd.f32 %v729_v55, %v11525_v36  ;;  %v12487_v62 = vmul.f32 -1.442695, %v12447_v6  ;;  %v12498_v18 = vadd.f32 %v8121_v16, %v7838_v5 }
 0x112   : > { %22054 = vst [vmem:[#allocation25_spill] sm:$0xff] %v12470_v51  ;;  %vm3758_vm9 = vweird.f32 %v12336_v26  ;;  %vm12501_vm10 = vcmp.eq.f32.partialorder %v3762_v38, 8.507059e+37  ;;  %v3765_v43 = vor.u32 1.1754944e-38, %v3764_v24  ;;  %v3897_v35 = vand.u32 2147483647, %v12370_v1 }
 0x113   : > { %9170 = vmatmul.msk.f32.gmra.mxu3 %vm460_vm1, %v12250_v2  ;;  %v9862_v58 = vpop.eup %9861  ;;  %22056 = vst [vmem:[#allocation11_spill] sm:$0xff] %v12479_v12  ;;  %v9447_v2 = vmul.f32 -1.442695, %v12450_v4  ;;  %v9448_v41 = vmul.f32 -1.442695, %v12482_v44  ;;  %vm3893_vm15 = vweird.f32 %v12370_v1  ;;  %v3914_v38 = vand.u32 2147483648, %v12378_v28 }
 0x114   : > { %v12397_v0 = vpop.eup %9863  ;;  %v12424_v53 = vadd.f32 1.0, %v9862_v58  ;;  %v3912_v16 = vand.u32 2147483647, %v12378_v28  ;;  %vm3908_vm12 = vweird.f32 %v12378_v28  ;;  %vm12543_vm7 = vcmp.eq.f32.partialorder %v3897_v35, 8.507059e+37 }
 0x115   : > { %v3754_v52 = vmul.f32 %v12397_v0, %v12336_v26  ;;  %v12436_v39 = vpop.eup %9865  ;;  %vm3759_vm8 = vweird.f32 %v12397_v0  ;;  %v3899_v26 = vand.u32 2147483648, %v12370_v1 }
 0x116   : > { %9869 = vrcp.f32 %v12424_v53  ;;  %v12441_v61 = vpop.eup %9867  ;;  %v3889_v49 = vmul.f32 %v12436_v39, %v12370_v1  ;;  %vm12509_vm14 = vmor %vm3758_vm9, %vm3759_vm8  ;;  %v3029_v5 = vand.u32 2147483648, %v12424_v53  ;;  %vm3894_vm5 = vweird.f32 %v12436_v39  ;;  %v12535_v1 = vpop.f32.mrf.mxu3 }
 0x117   : > { %v3755_v48 = vsub.f32 1.0, %v3754_v52  ;;  %9871 = vpow2.f32 %v9389_v37  ;;  %v3904_v23 = vmul.f32 %v12441_v61, %v12378_v28  ;;  %vm3023_vm4 = vweird.f32 %v12424_v53  ;;  %vm12539_vm0 = vmor %vm3893_vm15, %vm3894_vm5  ;;  %v827_v52 = vpop.f32.mrf.mxu2 }
 0x118   : > { %v3890_v58 = vsub.f32 1.0, %v3889_v49  ;;  %9873 = vpow2.f32 %v9687_v17  ;;  %v619_v17 = vpop.f32.mrf.mxu0  ;;  %vm3909_vm3 = vweird.f32 %v12441_v61  ;;  %vm12547_vm6 = vcmp.eq.f32.partialorder %v3912_v16, 8.507059e+37 }
 0x119   : > { %v3756_v10 = vmul.f32 %v12397_v0, %v3755_v48  ;;  %v3905_v15 = vsub.f32 1.0, %v3904_v23  ;;  %9875 = vpow2.f32 %v9447_v2  ;;  %v3027_v23 = vand.u32 2147483647, %v12424_v53  ;;  %vm12578_vm9 = vmor %vm3908_vm12, %vm3909_vm3 }
 0x11a   : > { %v3891_v20 = vmul.f32 %v12436_v39, %v3890_v58  ;;  %v401_v58 = vld [vmem:[%s11390_s22 + $0xc8] sm:$0xff]  ;;  %v3030_v48 = vor.u32 1.1754944e-38, %v3029_v5  ;;  %v12566_v35 = vadd.f32 %v827_v52, %v12284_v56 }
 0x11b   : > { %9171 = vmatmul.msk.f32.gmra.mxu3 %vm460_vm1, %v400_v7  ;;  %v3757_v7 = vadd.f32 %v12397_v0, %v3756_v10  ;;  %v3906_v47 = vmul.f32 %v12441_v61, %v3905_v15  ;;  %9073 = vmatmul.msk.f32.gmra.mxu0 %vm460_vm1, %v401_v58  ;;  %vm12561_vm8 = vcmp.eq.f32.partialorder %v3027_v23, 8.507059e+37 }
 0x11c   : > { %v12484_v8 = vpop.eup %9869  ;;  %9106 = vmatmul.msk.f32.gmra.mxu1 %vm460_vm1, %v401_v58  ;;  %9139 = vmatmul.msk.f32.gmra.mxu2 %vm460_vm1, %v401_v58 }
 0x11d   : > { %v9872_v37 = vpop.eup %9871  ;;  %v3019_v57 = vmul.f32 %v12484_v8, %v12424_v53  ;;  %v3761_v49 = vsel %vm12509_vm14, %v12397_v0, %v3757_v7  ;;  %vm3024_vm2 = vweird.f32 %v12484_v8  ;;  %v3892_v0 = vadd.f32 %v12436_v39, %v3891_v20 }
 0x11e   : > { %v12506_v42 = vadd.f32 1.0, %v9872_v37  ;;  %v9874_v10 = vpop.eup %9873  ;;  %v3766_v24 = vsel %vm12501_vm10, %v3765_v43, %v3761_v49  ;;  %v3907_v45 = vadd.f32 %v12441_v61, %v3906_v47  ;;  %v3900_v7 = vor.u32 1.1754944e-38, %v3899_v26  ;;  %vm12557_vm11 = vmor %vm3023_vm4, %vm3024_vm2 }
 0x11f   : > { %v3020_v59 = vsub.f32 1.0, %v3019_v57  ;;  %v9876_v43 = vpop.eup %9875  ;;  %v7839_v53 = vmul.f32 %v3766_v24, %v12195_v54  ;;  %v3896_v47 = vsel %vm12539_vm0, %v12436_v39, %v3892_v0  ;;  %v3915_v49 = vor.u32 1.1754944e-38, %v3914_v38  ;;  %v732_v0 = vpop.f32.mrf.mxu1 }
 0x120   : > { %9877 = vrcp.f32 %v12506_v42  ;;  %v3911_v16 = vsel %vm12578_vm9, %v12441_v61, %v3907_v45  ;;  %vm3173_vm10 = vweird.f32 %v12506_v42  ;;  %v9399_v39 = vmul.f32 -1.442695, %v12566_v35  ;;  %v11051_v61 = vld [vmem:[%s21939_s2] sm:$0xff]  ;;  %v622_v45 = vpop.f32.mrf.mxu0 }
 0x121   : > { %v3021_v55 = vmul.f32 %v12484_v8, %v3020_v59  ;;  %9879 = vpow2.f32 %v9448_v41  ;;  %v3177_v23 = vand.u32 2147483647, %v12506_v42  ;;  %v3179_v5 = vand.u32 2147483648, %v12506_v42 }
 0x122   : > { %v12599_v24 = vperm.slane %v11051_v61, 3  ;;  %v12616_v37 = vadd.f32 %v732_v0, %v11525_v36  ;;  %v12619_v57 = vadd.f32 1.0, %v9874_v10  ;;  %v830_v61 = vpop.f32.mrf.mxu2 }
 0x123   : > { %v3022_v15 = vadd.f32 %v12484_v8, %v3021_v55  ;;  %9172 = vmatmul.msk.f32.gmra.mxu3 %vm460_vm1, %v401_v58  ;;  %v12582_v55 = vadd.f32 1.0, %v9876_v43  ;;  %v3916_v58 = vsel %vm12547_vm6, %v3915_v49, %v3911_v16  ;;  %vm12637_vm5 = vcmp.eq.f32.partialorder %v3177_v23, 8.507059e+37 }
 0x124   : > { %v12613_v59 = vadd.f32 %v12459_v60, %v12599_v24  ;;  %vm22081_vm6 = vcmask 1042432  }
 0x125   : > { %v3026_v28 = vsel %vm12557_vm11, %v12484_v8, %v3022_v15  ;;  %9881 = vrcp.f32 %v12582_v55  ;;  %v3901_v8 = vsel %vm12543_vm7, %v3900_v7, %v3896_v47  ;;  %v12607_v15 = vadd.f32 %v619_v17, %v11519_v33  ;;  %v11053_v47 = vld [vmem:[%s11390_s22 + $0xd0] sm:$0xff] }
 0x126   : > { %v9878_v26 = vpop.eup %9877  ;;  %9883 = vpow2.f32 %v9399_v39  ;;  %v3031_v52 = vsel %vm12561_vm8, %v3030_v48, %v3026_v28  ;;  %v8153_v7 = vadd.f32 %v12476_v34, %v7839_v53  ;;  %v3180_v17 = vor.u32 1.1754944e-38, %v3179_v5  ;;  %v12631_v48 = vld [vmem:[%s11390_s22] sm:$0xff]  ;;  %v12643_v53 = vpop.f32.mrf.mxu3  ;;  %9140 = vmatmul.msk.f32.gmra.mxu2 %vm460_vm1, %v11053_v47 }
 0x127   : > { %v3169_v54 = vmul.f32 %v9878_v26, %v12506_v42  ;;  %vm3174_vm14 = vweird.f32 %v9878_v26  ;;  %9885 = vpow2.f32 %v12487_v62  ;;  %v9880_v2 = vpop.eup %9879  ;;  %9180 = vmatmul.msk.f32.vlgmr.msrb.gmra.mxu0 %vm460_vm1, %v12631_v48  ;;  %9213 = vmatmul.msk.f32.vlgmr.msrb.gmra.mxu1 %vm460_vm1, %v12631_v48  ;;  %v9380_v42 = vmul.f32 -1.442695, %v12613_v59  ;;  %v735_v62 = vpop.f32.mrf.mxu1 }
 0x128   : > { %vm12624_vm15 = vmor %vm3173_vm10, %vm3174_vm14  ;;  %v12628_v20 = vadd.f32 1.0, %v9880_v2  ;;  %v9457_v10 = vmul.f32 -1.442695, %v12607_v15  ;;  %v7790_v49 = vmul.f32 %v3031_v52, %v12298_v32  ;;  %v7848_v16 = vmul.f32 %v3901_v8, %v12208_v29  ;;  %v625_v34 = vpop.f32.mrf.mxu0 }
 0x129   : > { %v3170_v38 = vsub.f32 1.0, %v3169_v54  ;;  %v7849_v54 = vmul.f32 %v3916_v58, %v12211_v21  ;;  %v9458_v5 = vmul.f32 -1.442695, %v12616_v37  ;;  %v4047_v29 = vand.u32 2147483647, %v12582_v55 }
 0x12a   : > { %9887 = vrcp.f32 %v12628_v20  ;;  %v4049_v21 = vand.u32 2147483648, %v12582_v55  ;;  %v12672_v2 = vadd.f32 %v830_v61, %v12284_v56  ;;  %v12675_v52 = vadd.f32 %v12498_v18, %v7848_v16 }
 0x12b   : > { %v3171_v43 = vmul.f32 %v9878_v26, %v3170_v38  ;;  %9173 = vmatmul.msk.f32.gmra.mxu3 %vm460_vm1, %v11053_v47  ;;  %v12648_v41 = vpop.eup %9881  ;;  %9889 = vpow2.f32 %v9380_v42  ;;  %v12688_v18 = vadd.f32 %v8153_v7, %v7849_v54  ;;  %vm4043_vm2 = vweird.f32 %v12582_v55  ;;  %v12697_v47 = vld [vmem:[%s11390_s22 + $0x8] sm:$0xff] }
 0x12c   : > { %v9884_v39 = vpop.eup %9883  ;;  %v4039_v23 = vmul.f32 %v12648_v41, %v12582_v55  ;;  %9891 = vpow2.f32 %v9457_v10  ;;  %vm4044_vm4 = vweird.f32 %v12648_v41  ;;  %vm12691_vm12 = vcmp.eq.f32.partialorder %v4047_v29, 8.507059e+37 }
 0x12d   : > { %v3172_v60 = vadd.f32 %v9878_v26, %v3171_v43  ;;  %v12659_v0 = vpop.eup %9885  ;;  %v12665_v38 = vadd.f32 1.0, %v9884_v39  ;;  %v12680_v43 = vadd.f32 %v622_v45, %v11519_v33  ;;  %v4064_v45 = vand.u32 2147483648, %v12628_v20  ;;  %v11055_v39 = vld [vmem:[%s11390_s22 + $0xd8] sm:$0xff]  ;;  %vm12713_vm3 = vmor %vm4043_vm2, %vm4044_vm4 }
 0x12e   : > { %v4040_v58 = vsub.f32 1.0, %v4039_v23  ;;  %v4050_v16 = vor.u32 1.1754944e-38, %v4049_v21  ;;  %v12707_v54 = vadd.f32 %v735_v62, %v11525_v36  ;;  %9141 = vmatmul.msk.f32.gmra.mxu2 %vm460_vm1, %v11055_v39  ;;  %vm4058_vm0 = vweird.f32 %v12628_v20 }
 0x12f   : > { %v3176_v28 = vsel %vm12624_vm15, %v9878_v26, %v3172_v60  ;;  %v411_v26 = vld [vmem:[%s21938_s1 + $0x18] sm:$0x77]  ;;  %9893 = vrcp.f32 %v12665_v38  ;;  %v9409_v60 = vmul.f32 -1.442695, %v12672_v2  ;;  %9181 = vmatmul.msk.f32.gmra.mxu0 %vm460_vm1, %v12697_v47  ;;  %9214 = vmatmul.msk.f32.gmra.mxu1 %vm460_vm1, %v12697_v47  ;;  %v4062_v23 = vand.u32 2147483647, %v12628_v20  ;;  %vm22088_vm15 = vmmov %vm22081_vm6 }
 0x130   : > { %v3181_v32 = vsel %vm12637_vm5, %v3180_v17, %v3176_v28  ;;  %448 = vst [vmem:[#allocation1 + $0x30] ss:$2 sm:$0xff] %v411_v26  ;;  %9895 = vpow2.f32 %v9458_v5  ;;  %v12686_v42 = vpop.eup %9887  ;;  %v9467_v61 = vmul.f32 -1.442695, %v12680_v43  ;;  %vm3323_vm7 = vweird.f32 %v12665_v38 }
 0x131   : > { %v7800_v8 = vmul.f32 %v3181_v32, %v12373_v30  ;;  %v4041_v30 = vmul.f32 %v12648_v41, %v4040_v58  ;;  %v4054_v55 = vmul.f32 %v12686_v42, %v12628_v20  ;;  %v12722_v32 = vadd.f32 %v625_v34, %v11519_v33 }
 0x132   : > { %9897 = vpow2.f32 %v9409_v60  ;;  %v12730_v58 = vor.u32 1.1754944e-38, %v4064_v45  ;;  %v3327_v62 = vand.u32 2147483647, %v12665_v38  ;;  %v12743_v45 = vadd.f32 %v12535_v1, %v12599_v24 }
 0x133   : > { %v12682_v17 = vadd.f32 %v7800_v8, %v7790_v49  ;;  %v9890_v49 = vpop.eup %9889  ;;  %v4042_v7 = vadd.f32 %v12648_v41, %v4041_v30  ;;  %v4055_v26 = vsub.f32 1.0, %v4054_v55  ;;  %vm12745_vm11 = vcmp.eq.f32.partialorder %v4062_v23, 8.507059e+37 }
 0x134   : > { %v12719_v5 = vadd.f32 1.0, %v9890_v49  ;;  %v9892_v29 = vpop.eup %9891  ;;  %v3329_v55 = vand.u32 2147483648, %v12665_v38  ;;  %v9468_v28 = vmul.f32 -1.442695, %v12707_v54  ;;  %vm4059_vm8 = vweird.f32 %v12686_v42 }
 0x135   : > { %v4046_v21 = vsel %vm12713_vm3, %v12648_v41, %v4042_v7  ;;  %v12728_v8 = vpop.eup %9893  ;;  %v4056_v41 = vmul.f32 %v12686_v42, %v4055_v26  ;;  %v12750_v10 = vadd.f32 1.0, %v9892_v29  ;;  %v12757_v26 = vpop.f32.mrf.mxu3  ;;  %9174 = vmatmul.msk.f32.gmra.mxu3 %vm460_vm1, %v11055_v39  ;;  %vm12792_vm14 = vcmp.eq.f32.partialorder %v3327_v62, 8.507059e+37  ;;  %vm12804_vm5 = vmor %vm4058_vm0, %vm4059_vm8 }
 0x136   : > { %9899 = vrcp.f32 %v12719_v5  ;;  %v9896_v34 = vpop.eup %9895  ;;  %v4051_v49 = vsel %vm12691_vm12, %v4050_v16, %v4046_v21  ;;  %v3319_v60 = vmul.f32 %v12728_v8, %v12665_v38  ;;  %v12755_v21 = vpop.f32.mrf.mxu2  ;;  %vm3324_vm9 = vweird.f32 %v12728_v8 }
 0x137   : > { %v455_v30 = vld.sshfl [vmem:[#allocation1 + $0x30] sm:$0xff pattern:$0x75316420]  ;;  %v12752_v16 = vadd.f32 1.0, %v9896_v34  ;;  %9901 = vpow2.f32 %v9467_v61  ;;  %v7858_v23 = vmul.f32 %v4051_v49, %v12450_v4  ;;  %v4057_v29 = vadd.f32 %v12686_v42, %v4056_v41  ;;  %v738_v34 = vpop.f32.mrf.mxu1  ;;  %9182 = vmatmul.msk.f32.gmra.mxu0 %vm460_vm1, %v12767_v13  ;;  %9215 = vmatmul.msk.f32.gmra.mxu1 %vm460_vm1, %v12767_v13  ;;  %vm12788_vm10 = vmor %vm3323_vm7, %vm3324_vm9 }
 0x138   : > { %9245 = vmatpush.msk.msra.mxu2 %vm22081_vm6, %v455_v30  ;;  %v3320_v1 = vsub.f32 1.0, %v3319_v60  ;;  %v3042_v30 = vand.u32 2147483647, %v12719_v5  ;;  %9903 = vrcp.f32 %v12750_v10  ;;  %v9898_v39 = vpop.eup %9897  ;;  %v3044_v4 = vand.u32 2147483648, %v12719_v5  ;;  %v12778_v60 = vld [vmem:[%s11390_s22 + $0xe0] sm:$0xff] }
 0x139   : > { %9905 = vrcp.f32 %v12752_v16  ;;  %v9390_v49 = vmul.f32 -1.442695, %v12743_v45  ;;  %v456_v41 = vld.sshfl [vmem:[#allocation1 + $0x38] sm:$0xff pattern:$0x75316420]  ;;  %9142 = vmatmul.msk.f32.gmra.mxu2 %vm460_vm1, %v12778_v60  ;;  %v3330_v40 = vor.u32 1.1754944e-38, %v3329_v55  ;;  %vm3038_vm4 = vweird.f32 %v12719_v5 }
 0x13a   : > { %v3321_v61 = vmul.f32 %v12728_v8, %v3320_v1  ;;  %9278 = vmatpush.msk.msrb.mxu3 %vm22088_vm15, %v456_v41  ;;  %9907 = vpow2.f32 %v9468_v28  ;;  %v12798_v12 = vmul.f32 -1.442695, %v12722_v32  ;;  %v12813_v55 = vadd.f32 %v738_v34, %v11525_v36 }
 0x13b   : > { %v12816_v28 = vadd.f32 %v12675_v52, %v7858_v23  ;;  %v4061_v20 = vsel %vm12804_vm5, %v12686_v42, %v4057_v29  ;;  %vm12821_vm2 = vcmp.eq.f32.partialorder %v3042_v30, 8.507059e+37  ;;  %v12826_v11 = vadd.f32 1.0, %v9898_v39 }
 0x13c   : > { %v12782_v19 = vpop.eup %9899  ;;  %v3322_v62 = vadd.f32 %v12728_v8, %v3321_v61  ;;  %v4197_v61 = vand.u32 2147483647, %v12750_v10  ;;  %v3045_v52 = vor.u32 1.1754944e-38, %v3044_v4  ;;  %9909 = vpow2.f32 %v9390_v49 }
 0x13d   : > { %v3034_v46 = vmul.f32 %v12782_v19, %v12719_v5  ;;  %v9902_v25 = vpop.eup %9901  ;;  %vm3039_vm12 = vweird.f32 %v12782_v19  ;;  %v4199_v29 = vand.u32 2147483648, %v12750_v10  ;;  %9911 = vrcp.f32 %v12826_v11 }
 0x13e   : > { %v3326_v34 = vsel %vm12788_vm10, %v12728_v8, %v3322_v62  ;;  %v12831_v23 = vpop.eup %9903  ;;  %vm4193_vm3 = vweird.f32 %v12750_v10  ;;  %vm12848_vm0 = vcmp.eq.f32.partialorder %v4197_v61, 8.507059e+37  ;;  %v12855_v7 = vpop.f32.mrf.mxu2  ;;  %vm12868_vm7 = vmor %vm3038_vm4, %vm3039_vm12  ;;  %v12875_v61 = vld [vmem:[%s11390_s22 + $0xe8] sm:$0xff]  ;;  %vm4208_vm6 = vweird.f32 %v12752_v16 }
 0x13f   : > { %v3035_v31 = vsub.f32 1.0, %v3034_v46  ;;  %v3331_v42 = vsel %vm12792_vm14, %v3330_v40, %v3326_v34  ;;  %v12838_v30 = vpop.eup %9905  ;;  %v4066_v46 = vsel %vm12745_vm11, %v12730_v58, %v4061_v20  ;;  %v4189_v40 = vmul.f32 %v12831_v23, %v12750_v10 }
 0x140   : > { %v7810_v8 = vmul.f32 %v3331_v42, %v12566_v35  ;;  %v9908_v6 = vpop.eup %9907  ;;  %v4204_v49 = vmul.f32 %v12838_v30, %v12752_v16  ;;  %v4212_v58 = vand.u32 2147483647, %v12752_v16  ;;  %v11058_v35 = vld [vmem:[%s11390_s22 + $0x18] sm:$0xff]  ;;  %v12872_v20 = vadd.f32 1.0, %v9902_v25 }
 0x141   : > { %v3036_v39 = vmul.f32 %v12782_v19, %v3035_v31  ;;  %9183 = vmatmul.msk.f32.gmra.mxu0 %vm460_vm1, %v11058_v35  ;;  %9216 = vmatmul.msk.f32.gmra.mxu1 %vm460_vm1, %v11058_v35  ;;  %v4190_v62 = vsub.f32 1.0, %v4189_v40  ;;  %v4200_v34 = vor.u32 1.1754944e-38, %v4199_v29  ;;  %vm4194_vm11 = vweird.f32 %v12831_v23 }
 0x142   : > { %v12861_v31 = vadd.f32 %v12682_v17, %v7810_v8  ;;  %9143 = vmatmul.msk.f32.gmra.mxu2 %vm460_vm1, %v12875_v61  ;;  %v7859_v17 = vmul.f32 %v4066_v46, %v12482_v44  ;;  %v4205_v42 = vsub.f32 1.0, %v4204_v49  ;;  %v9910_v8 = vpop.eup %9909  ;;  %9913 = vrcp.f32 %v12872_v20  ;;  %vm12902_vm10 = vmor %vm4193_vm3, %vm4194_vm11 }
 0x143   : > { %v3037_v1 = vadd.f32 %v12782_v19, %v3036_v39  ;;  %v4191_v5 = vmul.f32 %v12831_v23, %v4190_v62  ;;  %v4214_v39 = vand.u32 2147483648, %v12752_v16  ;;  %v9912_v25 = vpop.eup %9911  ;;  %vm12889_vm8 = vcmp.eq.f32.partialorder %v4212_v58, 8.507059e+37 }
 0x144   : > { %v4206_v44 = vmul.f32 %v12838_v30, %v4205_v42  ;;  %v3477_v46 = vand.u32 2147483647, %v12826_v11  ;;  %v12894_v49 = vadd.f32 1.0, %v9910_v8  ;;  %v3469_v62 = vmul.f32 %v9912_v25, %v12826_v11 }
 0x145   : > { %v3041_v40 = vsel %vm12868_vm7, %v12782_v19, %v3037_v1  ;;  %v4192_v35 = vadd.f32 %v12831_v23, %v4191_v5  ;;  %vm3473_vm9 = vweird.f32 %v12826_v11  ;;  %v3479_v38 = vand.u32 2147483648, %v12826_v11 }
 0x146   : > { %v4207_v58 = vadd.f32 %v12838_v30, %v4206_v44  ;;  %vm4209_vm14 = vweird.f32 %v12838_v30  ;;  %9915 = vrcp.f32 %v12894_v49  ;;  %v12909_v1 = vadd.f32 1.0, %v9908_v6 }
 0x147   : > { %v3046_v42 = vsel %vm12821_vm2, %v3045_v52, %v3041_v40  ;;  %v4196_v8 = vsel %vm12902_vm10, %v12831_v23, %v4192_v35  ;;  %v3470_v10 = vsub.f32 1.0, %v3469_v62  ;;  %vm3474_vm15 = vweird.f32 %v9912_v25  ;;  %vm12935_vm4 = vmor %vm4208_vm6, %vm4209_vm14 }
 0x148   : > { %v12917_v5 = vadd.f32 %v12688_v18, %v7859_v17  ;;  %v4215_v27 = vor.u32 1.1754944e-38, %v4214_v39  ;;  %vm12919_vm5 = vcmp.eq.f32.partialorder %v3477_v46, 8.507059e+37  ;;  %v3192_v6 = vand.u32 2147483647, %v12894_v49  ;;  %v12927_v41 = vpop.eup %9913  ;;  %vm12949_vm2 = vmor %vm3473_vm9, %vm3474_vm15  ;;  %v12961_v46 = vld [vmem:[%s11390_s22 + $0xf0] sm:$0xff] }
 0x149   : > { %9184 = vmatmul.msk.f32.gmra.mxu0 %vm460_vm1, %v11060_v14  ;;  %9217 = vmatmul.msk.f32.gmra.mxu1 %vm460_vm1, %v11060_v14  ;;  %v4201_v52 = vsel %vm12848_vm0, %v4200_v34, %v4196_v8  ;;  %v3471_v23 = vmul.f32 %v9912_v25, %v3470_v10  ;;  %v3480_v17 = vor.u32 1.1754944e-38, %v3479_v38  ;;  %v4347_v39 = vand.u32 2147483647, %v12872_v20  ;;  %v12956_v34 = vpop.f32.mrf.mxu2  ;;  %v741_v38 = vpop.f32.mrf.mxu1 }
 0x14a   : > { %v12941_v40 = vmul.f32 %v3046_v42, %v12613_v59  ;;  %v4211_v14 = vsel %vm12935_vm4, %v12838_v30, %v4207_v58  ;;  %v4339_v4 = vmul.f32 %v12927_v41, %v12872_v20  ;;  %vm4343_vm12 = vweird.f32 %v12872_v20  ;;  %v12958_v59 = vpop.f32.mrf.mxu3  ;;  %9144 = vmatmul.msk.f32.gmra.mxu2 %vm460_vm1, %v12961_v46  ;;  %9175 = vmatmul.msk.f32.gmra.mxu3 %vm460_vm1, %v12778_v60 }
 0x14b   : > { %v3472_v11 = vadd.f32 %v9912_v25, %v3471_v23  ;;  %vm3188_vm3 = vweird.f32 %v12894_v49  ;;  %v3194_v30 = vand.u32 2147483648, %v12894_v49  ;;  %9917 = vrcp.f32 %v12909_v1 }
 0x14c   : > { %v9916_v35 = vpop.eup %9915  ;;  %v7868_v62 = vmul.f32 %v4201_v52, %v12607_v15  ;;  %vm12971_vm0 = vcmp.eq.f32.partialorder %v3192_v6, 8.507059e+37  ;;  %v4340_v19 = vsub.f32 1.0, %v4339_v4  ;;  %v4349_v58 = vand.u32 2147483648, %v12872_v20  ;;  %v628_v6 = vpop.f32.mrf.mxu0  ;;  %v458_v4 = vld.sshfl [vmem:[#allocation1] sm:$0xff pattern:$0x75316420] }
 0x14d   : > { %v4216_v60 = vsel %vm12889_vm8, %v4215_v27, %v4211_v14  ;;  %v3476_v42 = vsel %vm12949_vm2, %v9912_v25, %v3472_v11  ;;  %v3184_v8 = vmul.f32 %v9916_v35, %v12894_v49  ;;  %vm12981_vm7 = vcmp.eq.f32.partialorder %v4347_v39, 8.507059e+37  ;;  %v11062_v39 = vld [vmem:[%s11390_s22 + $0x28] sm:$0xff] }
 0x14e   : > { %v12987_v15 = vadd.f32 %v12755_v21, %v12284_v56  ;;  %v3481_v52 = vsel %vm12919_vm5, %v3480_v17, %v3476_v42  ;;  %vm3189_vm6 = vweird.f32 %v9916_v35  ;;  %v4341_v27 = vmul.f32 %v12927_v41, %v4340_v19  ;;  %v459_v42 = vld.sshfl [vmem:[#allocation1 + $0x8] sm:$0xff pattern:$0x75316420] }
 0x14f   : > { %vm4344_vm11 = vweird.f32 %v12927_v41  ;;  %v7820_v25 = vmul.f32 %v3481_v52, %v12672_v2  ;;  %v3185_v29 = vsub.f32 1.0, %v3184_v8  ;;  %v12997_v23 = vadd.f32 %v12643_v53, %v12599_v24  ;;  %vm13024_vm9 = vmor %vm3188_vm3, %vm3189_vm6 }
 0x150   : > { %v9419_v18 = vmul.f32 -1.442695, %v12987_v15  ;;  %v4342_v21 = vadd.f32 %v12927_v41, %v4341_v27  ;;  %9919 = vpow2.f32 %v12798_v12  ;;  %v9478_v44 = vmul.f32 -1.442695, %v12813_v55  ;;  %vm13015_vm8 = vmor %vm4343_vm12, %vm4344_vm11 }
 0x151   : > { %v13003_v17 = vadd.f32 %v628_v6, %v11519_v33  ;;  %9185 = vmatmul.msk.f32.gmra.mxu0 %vm460_vm1, %v11062_v39  ;;  %9218 = vmatmul.msk.f32.gmra.mxu1 %vm460_vm1, %v11062_v39  ;;  %v9918_v2 = vpop.eup %9917  ;;  %v13009_v14 = vadd.f32 %v12861_v31, %v7820_v25  ;;  %v3186_v53 = vmul.f32 %v9916_v35, %v3185_v29  ;;  %v9400_v16 = vmul.f32 -1.442695, %v12997_v23 }
 0x152   : > { %9921 = vpow2.f32 %v9419_v18  ;;  %v7869_v11 = vmul.f32 %v4216_v60, %v12616_v37  ;;  %v3195_v19 = vor.u32 1.1754944e-38, %v3194_v30  ;;  %v4354_v20 = vmul.f32 %v9918_v2, %v12909_v1 }
 0x153   : > { %9923 = vpow2.f32 %v9478_v44  ;;  %vm22115_vm10 = vcmask 1042432   ;;  %v3187_v8 = vadd.f32 %v9916_v35, %v3186_v53  ;;  %v4346_v6 = vsel %vm13015_vm8, %v12927_v41, %v4342_v21 }
 0x154   : > { %9311 = vmatpush.msk.msra.mxu0 %vm22115_vm10, %v458_v4  ;;  %9925 = vpow2.f32 %v9400_v16  ;;  %vm22116_vm14 = vmmov %vm22115_vm10  ;;  %v13036_v37 = vadd.f32 %v12855_v7, %v12284_v56  ;;  %v4350_v49 = vor.u32 1.1754944e-38, %v4349_v58  ;;  %v4355_v30 = vsub.f32 1.0, %v4354_v20  ;;  %v11063_v16 = vld [vmem:[%s11390_s22 + $0x30] sm:$0xff] }
 0x155   : > { %9344 = vmatpush.msk.msra.mxu1 %vm22116_vm14, %v459_v42  ;;  %v4364_v60 = vand.u32 2147483648, %v12909_v1  ;;  %v9487_v52 = vmul.f32 -1.442695, %v13003_v17  ;;  %v8125_v27 = vadd.f32 %v12816_v28, %v7868_v62  ;;  %v3191_v25 = vsel %vm13024_vm9, %v9916_v35, %v3187_v8 }
 0x156   : > { %v4362_v41 = vand.u32 2147483647, %v12909_v1  ;;  %v9429_v29 = vmul.f32 -1.442695, %v13036_v37  ;;  %v9920_v18 = vpop.eup %9919  ;;  %v3196_v7 = vsel %vm12971_vm0, %v3195_v19, %v3191_v25  ;;  %v4351_v58 = vsel %vm12981_vm7, %v4350_v49, %v4346_v6 }
 0x157   : > { %v4356_v21 = vmul.f32 %v9918_v2, %v4355_v30  ;;  %vm4359_vm15 = vweird.f32 %v9918_v2  ;;  %v7801_v28 = vmul.f32 %v3196_v7, %v12743_v45  ;;  %vm4358_vm5 = vweird.f32 %v12909_v1  ;;  %v13088_v30 = vld [vmem:[%s11390_s22 + $0xf8] sm:$0xff] }
 0x158   : > { %v9922_v44 = vpop.eup %9921  ;;  %v13051_v35 = vadd.f32 1.0, %v9920_v18  ;;  %9927 = vpow2.f32 %v9429_v29  ;;  %v4365_v53 = vor.u32 1.1754944e-38, %v4364_v60  ;;  %v7878_v4 = vmul.f32 %v4351_v58, %v12680_v43  ;;  %vm4360_vm4 = vmor %vm4358_vm5, %vm4359_vm15 }
 0x159   : > { %v9924_v62 = vpop.eup %9923  ;;  %v4357_v39 = vadd.f32 %v9918_v2, %v4356_v21  ;;  %v13053_v12 = vadd.f32 1.0, %v9922_v44  ;;  %9929 = vpow2.f32 %v9487_v52  ;;  %9186 = vmatmul.msk.f32.gmra.mxu0 %vm460_vm1, %v11063_v16  ;;  %9219 = vmatmul.msk.f32.gmra.mxu1 %vm460_vm1, %v11063_v16  ;;  %v13059_v45 = vadd.f32 %v7801_v28, %v12941_v40  ;;  %v631_v40 = vpop.f32.mrf.mxu0 }
 0x15a   : > { %v9926_v10 = vpop.eup %9925  ;;  %9931 = vrcp.f32 %v13051_v35  ;;  %v13068_v31 = vadd.f32 %v12757_v26, %v12599_v24  ;;  %v8156_v19 = vadd.f32 %v12917_v5, %v7869_v11  ;;  %vm4363_vm2 = vcmp.eq.f32.partialorder %v4362_v41, 8.507059e+37  ;;  %v13085_v11 = vpop.f32.mrf.mxu3  ;;  %9176 = vmatmul.msk.f32.gmra.mxu3 %vm460_vm1, %v12875_v61 }
 0x15b   : > { %v4361_v20 = vsel %vm4360_vm4, %v9918_v2, %v4357_v39  ;;  %9933 = vrcp.f32 %v13053_v12  ;;  %v3627_v43 = vand.u32 2147483647, %v13053_v12  ;;  %v13073_v8 = vadd.f32 1.0, %v9926_v10  ;;  %v13083_v2 = vpop.f32.mrf.mxu2  ;;  %9145 = vmatmul.msk.f32.gmra.mxu2 %vm460_vm1, %v13088_v30 }
 0x15c   : > { %v4366_v42 = vsel %vm4363_vm2, %v4365_v53, %v4361_v20  ;;  %v13076_v1 = vadd.f32 %v741_v38, %v11525_v36  ;;  %v3629_v26 = vand.u32 2147483648, %v13053_v12  ;;  %v4497_v49 = vand.u32 2147483647, %v13051_v35  ;;  %v11065_v38 = vld [vmem:[%s11390_s22 + $0x38] sm:$0xff] }
 0x15d   : > { %v7879_v6 = vmul.f32 %v4366_v42, %v12707_v54  ;;  %v13081_v5 = vadd.f32 1.0, %v9924_v62  ;;  %v13094_v54 = vadd.f32 %v8125_v27, %v7878_v4  ;;  %9935 = vrcp.f32 %v13073_v8 }
 0x15e   : > { %v9928_v60 = vpop.eup %9927  ;;  %v9410_v52 = vmul.f32 -1.442695, %v13068_v31  ;;  %v13099_v25 = vadd.f32 %v631_v40, %v11519_v33  ;;  %v3342_v18 = vand.u32 2147483647, %v13073_v8  ;;  %v4499_v7 = vand.u32 2147483648, %v13051_v35 }
 0x15f   : > { %v9930_v41 = vpop.eup %9929  ;;  %v13101_v29 = vadd.f32 %v8156_v19, %v7879_v6  ;;  %9937 = vrcp.f32 %v13081_v5  ;;  %vm3623_vm12 = vweird.f32 %v13053_v12  ;;  %vm13107_vm3 = vcmp.eq.f32.partialorder %v3627_v43, 8.507059e+37 }
 0x160   : > { %v9932_v61 = vpop.eup %9931  ;;  %vm4493_vm0 = vweird.f32 %v13051_v35  ;;  %v9488_v58 = vmul.f32 -1.442695, %v13076_v1  ;;  %v3630_v44 = vor.u32 1.1754944e-38, %v3629_v26  ;;  %v3344_v28 = vand.u32 2147483648, %v13073_v8 }
 0x161   : > { %v9934_v21 = vpop.eup %9933  ;;  %v4489_v62 = vmul.f32 %v9932_v61, %v13051_v35  ;;  %vm13115_vm7 = vcmp.eq.f32.partialorder %v4497_v49, 8.507059e+37  ;;  %v13119_v53 = vadd.f32 1.0, %v9928_v60  ;;  %9187 = vmatmul.msk.f32.gmra.mxu0 %vm460_vm1, %v11065_v38  ;;  %9220 = vmatmul.msk.f32.gmra.mxu1 %vm460_vm1, %v11065_v38  ;;  %vm3338_vm6 = vweird.f32 %v13073_v8 }
 0x162   : > { %v3619_v16 = vmul.f32 %v9934_v21, %v13053_v12  ;;  %v4512_v10 = vand.u32 2147483647, %v13081_v5  ;;  %v4514_v4 = vand.u32 2147483648, %v13081_v5  ;;  %vm13128_vm11 = vcmp.eq.f32.partialorder %v3342_v18, 8.507059e+37 }
 0x163   : > { %v4490_v20 = vsub.f32 1.0, %v4489_v62  ;;  %v4500_v40 = vor.u32 1.1754944e-38, %v4499_v7  ;;  %9939 = vrcp.f32 %v13119_v53  ;;  %v9936_v42 = vpop.eup %9935  ;;  %vm3624_vm8 = vweird.f32 %v9934_v21  ;;  %v13216_v7 = vpop.f32.mrf.mxu2  ;;  %9246 = vmatmul.msk.f32.vlgmr.msra.gmra.mxu2 %vm460_vm1, %v12631_v48 }
 0x164   : > { %v3620_v43 = vsub.f32 1.0, %v3619_v16  ;;  %vm4508_vm9 = vweird.f32 %v13081_v5  ;;  %9941 = vpow2.f32 %v9410_v52  ;;  %v13134_v6 = vadd.f32 1.0, %v9930_v41  ;;  %vm13145_vm5 = vmor %vm3623_vm12, %vm3624_vm8 }
 0x165   : > { %v9938_v26 = vpop.eup %9937  ;;  %v3334_v49 = vmul.f32 %v9936_v42, %v13073_v8  ;;  %v3345_v60 = vor.u32 1.1754944e-38, %v3344_v28  ;;  %v4491_v18 = vmul.f32 %v9932_v61, %v4490_v20  ;;  %vm4494_vm10 = vweird.f32 %v9932_v61 }
 0x166   : > { %v3621_v38 = vmul.f32 %v9934_v21, %v3620_v43  ;;  %v4504_v62 = vmul.f32 %v9938_v26, %v13081_v5  ;;  %vm13138_vm14 = vcmp.eq.f32.partialorder %v4512_v10, 8.507059e+37  ;;  %v4515_v16 = vor.u32 1.1754944e-38, %v4514_v4  ;;  %vm13152_vm2 = vmor %vm4493_vm0, %vm4494_vm10 }
 0x167   : > { %vm3773_vm15 = vweird.f32 %v13119_v53  ;;  %v3335_v41 = vsub.f32 1.0, %v3334_v49  ;;  %vm3339_vm4 = vweird.f32 %v9936_v42  ;;  %v4492_v28 = vadd.f32 %v9932_v61, %v4491_v18  ;;  %v11066_v18 = vld [vmem:[%s11390_s22 + $0x40] sm:$0xff] }
 0x168   : > { %v3777_v20 = vand.u32 2147483647, %v13119_v53  ;;  %v3622_v43 = vadd.f32 %v9934_v21, %v3621_v38  ;;  %v4505_v4 = vsub.f32 1.0, %v4504_v62  ;;  %v3779_v12 = vand.u32 2147483648, %v13119_v53  ;;  %vm13168_vm0 = vmor %vm3338_vm6, %vm3339_vm4  ;;  %v634_v62 = vpop.f32.mrf.mxu0 }
 0x169   : > { %9943 = vrcp.f32 %v13134_v6  ;;  %v9940_v51 = vpop.eup %9939  ;;  %v3336_v3 = vmul.f32 %v9936_v42, %v3335_v41  ;;  %v4496_v49 = vsel %vm13152_vm2, %v9932_v61, %v4492_v28  ;;  %vm4509_vm12 = vweird.f32 %v9938_v26  ;;  %9188 = vmatmul.msk.f32.gmra.mxu0 %vm460_vm1, %v11066_v18  ;;  %9221 = vmatmul.msk.f32.gmra.mxu1 %vm460_vm1, %v11066_v18 }
 0x16a   : > { %9945 = vpow2.f32 %v9488_v58  ;;  %v9942_v35 = vpop.eup %9941  ;;  %v3626_v38 = vsel %vm13145_vm5, %v9934_v21, %v3622_v43  ;;  %v4501_v61 = vsel %vm13115_vm7, %v4500_v40, %v4496_v49  ;;  %v4506_v58 = vmul.f32 %v9938_v26, %v4505_v4 }
 0x16b   : > { %v3769_v41 = vmul.f32 %v9940_v51, %v13119_v53  ;;  %v3631_v28 = vsel %vm13107_vm3, %v3630_v44, %v3626_v38  ;;  %v3337_v10 = vadd.f32 %v9936_v42, %v3336_v3  ;;  %v7888_v52 = vmul.f32 %v4501_v61, %v12722_v32  ;;  %vm4510_vm3 = vmor %vm4508_vm9, %vm4509_vm12  ;;  %v13218_v53 = vpop.f32.mrf.mxu3  ;;  %9177 = vmatmul.msk.f32.gmra.mxu3 %vm460_vm1, %v12961_v46  ;;  %v744_v38 = vpop.f32.mrf.mxu1 }
 0x16c   : > { %vm3774_vm8 = vweird.f32 %v9940_v51  ;;  %v7830_v21 = vmul.f32 %v3631_v28, %v12987_v15  ;;  %v4507_v8 = vadd.f32 %v9938_v26, %v4506_v58  ;;  %v13179_v18 = vadd.f32 1.0, %v9942_v35  ;;  %v11067_v35 = vld [vmem:[%s11390_s22 + $0x48] sm:$0xff] }
 0x16d   : > { %v3770_v43 = vsub.f32 1.0, %v3769_v41  ;;  %v3341_v39 = vsel %vm13168_vm0, %v9936_v42, %v3337_v10  ;;  %v13184_v40 = vadd.f32 %v13094_v54, %v7888_v52  ;;  %vm13189_vm7 = vcmp.eq.f32.partialorder %v3777_v20, 8.507059e+37  ;;  %vm13205_vm6 = vmor %vm3773_vm15, %vm3774_vm8  ;;  %v11068_v20 = vld [vmem:[%s11390_s22 + $0x50] sm:$0xff] }
 0x16e   : > { %v4647_v32 = vand.u32 2147483647, %v13134_v6  ;;  %v8183_v27 = vadd.f32 %v13009_v14, %v7830_v21  ;;  %v3346_v44 = vsel %vm13128_vm11, %v3345_v60, %v3341_v39  ;;  %v4511_v42 = vsel %vm4510_vm3, %v9938_v26, %v4507_v8 }
 0x16f   : > { %v13194_v15 = vpop.eup %9943  ;;  %v3771_v54 = vmul.f32 %v9940_v51, %v3770_v43  ;;  %v7811_v49 = vmul.f32 %v3346_v44, %v12997_v23  ;;  %v4516_v5 = vsel %vm13138_vm14, %v4515_v16, %v4511_v42  ;;  %v3780_v14 = vor.u32 1.1754944e-38, %v3779_v12 }
 0x170   : > { %v9946_v4 = vpop.eup %9945  ;;  %9947 = vrcp.f32 %v13179_v18  ;;  %v7889_v19 = vmul.f32 %v4516_v5, %v12813_v55  ;;  %v4649_v60 = vand.u32 2147483648, %v13134_v6  ;;  %v13214_v23 = vadd.f32 %v12956_v34, %v12284_v56 }
 0x171   : > { %v3772_v26 = vadd.f32 %v9940_v51, %v3771_v54  ;;  %v13225_v16 = vadd.f32 %v13059_v45, %v7811_v49  ;;  %v4639_v55 = vmul.f32 %v13194_v15, %v13134_v6  ;;  %v13229_v12 = vadd.f32 1.0, %v9946_v4  ;;  %9189 = vmatmul.msk.f32.gmra.mxu0 %vm460_vm1, %v11067_v35  ;;  %9222 = vmatmul.msk.f32.gmra.mxu1 %vm460_vm1, %v11067_v35 }
 0x172   : > { %v9497_v34 = vmul.f32 -1.442695, %v13099_v25  ;;  %v13236_v46 = vadd.f32 %v13101_v29, %v7889_v19  ;;  %vm4643_vm11 = vweird.f32 %v13134_v6  ;;  %vm13241_vm9 = vcmp.eq.f32.partialorder %v4647_v32, 8.507059e+37 }
 0x173   : > { %v3776_v48 = vsel %vm13205_vm6, %v9940_v51, %v3772_v26  ;;  %v3492_v58 = vand.u32 2147483647, %v13179_v18  ;;  %v4640_v41 = vsub.f32 1.0, %v4639_v55  ;;  %9949 = vrcp.f32 %v13229_v12 }
 0x174   : > { %v3781_v61 = vsel %vm13189_vm7, %v3780_v14, %v3776_v48  ;;  %vm4644_vm10 = vweird.f32 %v13194_v15  ;;  %v4650_v51 = vor.u32 1.1754944e-38, %v4649_v60  ;;  %v9439_v28 = vmul.f32 -1.442695, %v13214_v23 }
 0x175   : > { %v7840_v29 = vmul.f32 %v3781_v61, %v13036_v37  ;;  %v4641_v52 = vmul.f32 %v13194_v15, %v4640_v41  ;;  %v13255_v21 = vadd.f32 %v12958_v59, %v12599_v24  ;;  %9951 = vpow2.f32 %v9497_v34  ;;  %vm4645_vm4 = vmor %vm4643_vm11, %vm4644_vm10 }
 0x176   : > { %v9948_v10 = vpop.eup %9947  ;;  %v13258_v8 = vadd.f32 %v744_v38, %v11525_v36  ;;  %vm3488_vm14 = vweird.f32 %v13179_v18  ;;  %v3494_v39 = vand.u32 2147483648, %v13179_v18  ;;  %vm13265_vm15 = vcmp.eq.f32.partialorder %v3492_v58, 8.507059e+37  ;;  %v747_v38 = vpop.f32.mrf.mxu1 }
 0x177   : > { %v13260_v43 = vadd.f32 %v8183_v27, %v7840_v29  ;;  %v3484_v37 = vmul.f32 %v9948_v10, %v13179_v18  ;;  %v4642_v59 = vadd.f32 %v13194_v15, %v4641_v52  ;;  %9953 = vpow2.f32 %v9439_v28  ;;  %v637_v18 = vpop.f32.mrf.mxu0 }
 0x178   : > { %v9420_v32 = vmul.f32 -1.442695, %v13255_v21  ;;  %vm3489_vm5 = vweird.f32 %v9948_v10  ;;  %v9498_v27 = vmul.f32 -1.442695, %v13258_v8  ;;  %v13278_v42 = vadd.f32 %v13083_v2, %v12284_v56 }
 0x179   : > { %v3485_v44 = vsub.f32 1.0, %v3484_v37  ;;  %v9950_v54 = vpop.eup %9949  ;;  %v4646_v4 = vsel %vm4645_vm4, %v13194_v15, %v4642_v59  ;;  %v4662_v49 = vand.u32 2147483647, %v13229_v12  ;;  %v4664_v5 = vand.u32 2147483648, %v13229_v12  ;;  %9190 = vmatmul.msk.f32.gmra.mxu0 %vm460_vm1, %v11068_v20  ;;  %9223 = vmatmul.msk.f32.gmra.mxu1 %vm460_vm1, %v11068_v20  ;;  %vm13292_vm2 = vmor %vm3488_vm14, %vm3489_vm5 }
 0x17a   : > { %9955 = vpow2.f32 %v9420_v32  ;;  %v3495_v14 = vor.u32 1.1754944e-38, %v3494_v39  ;;  %v4651_v19 = vsel %vm13241_vm9, %v4650_v51, %v4646_v4  ;;  %v4654_v2 = vmul.f32 %v9950_v54, %v13229_v12 }
 0x17b   : > { %v3486_v6 = vmul.f32 %v9948_v10, %v3485_v44  ;;  %v9952_v26 = vpop.eup %9951  ;;  %v7898_v60 = vmul.f32 %v4651_v19, %v13003_v17  ;;  %vm4658_vm12 = vweird.f32 %v13229_v12  ;;  %9957 = vpow2.f32 %v9498_v27 }
 0x17c   : > { %v9449_v55 = vmul.f32 -1.442695, %v13278_v42  ;;  %v4655_v35 = vsub.f32 1.0, %v4654_v2  ;;  %v13299_v48 = vadd.f32 1.0, %v9952_v26  ;;  %v13302_v45 = vadd.f32 %v634_v62, %v11519_v33 }
 0x17d   : > { %v3487_v34 = vadd.f32 %v9948_v10, %v3486_v6  ;;  %v9954_v61 = vpop.eup %9953  ;;  %v13305_v58 = vadd.f32 %v13184_v40, %v7898_v60  ;;  %vm4659_vm0 = vweird.f32 %v9950_v54  ;;  %vm13307_vm8 = vcmp.eq.f32.partialorder %v4662_v49, 8.507059e+37  ;;  %v11069_v49 = vld [vmem:[%s11390_s22 + $0x58] sm:$0xff] }
 0x17e   : > { %v4665_v41 = vor.u32 1.1754944e-38, %v4664_v5  ;;  %v4656_v51 = vmul.f32 %v9950_v54, %v4655_v35  ;;  %v13313_v28 = vadd.f32 1.0, %v9954_v61  ;;  %9959 = vrcp.f32 %v13299_v48  ;;  %vm4660_vm3 = vmor %vm4658_vm12, %vm4659_vm0  ;;  %v13373_v61 = vpop.f32.mrf.mxu1 }
 0x17f   : > { %v3491_v29 = vsel %vm13292_vm2, %v9948_v10, %v3487_v34  ;;  %9961 = vpow2.f32 %v9449_v55  ;;  %v13319_v52 = vadd.f32 %v747_v38, %v11525_v36  ;;  %v13322_v37 = vadd.f32 %v637_v18, %v11519_v33  ;;  %v13432_v60 = vpop.f32.mrf.mxu0 }
 0x180   : > { %v9956_v62 = vpop.eup %9955  ;;  %v3496_v40 = vsel %vm13265_vm15, %v3495_v14, %v3491_v29  ;;  %v4657_v10 = vadd.f32 %v9950_v54, %v4656_v51  ;;  %9963 = vrcp.f32 %v13313_v28  ;;  %v9507_v59 = vmul.f32 -1.442695, %v13302_v45 }
 0x181   : > { %v7821_v39 = vmul.f32 %v3496_v40, %v13068_v31  ;;  %v9958_v32 = vpop.eup %9957  ;;  %v3927_v3 = vand.u32 2147483647, %v13313_v28  ;;  %v13331_v44 = vadd.f32 1.0, %v9956_v62  ;;  %v4797_v27 = vand.u32 2147483647, %v13299_v48  ;;  %9191 = vmatmul.msk.f32.gmra.mxu0 %vm460_vm1, %v11069_v49  ;;  %9224 = vmatmul.msk.f32.gmra.mxu1 %vm460_vm1, %v11069_v49 }
 0x182   : > { %v4799_v4 = vand.u32 2147483648, %v13299_v48  ;;  %v4661_v5 = vsel %vm4660_vm3, %v9950_v54, %v4657_v10  ;;  %v3929_v12 = vand.u32 2147483648, %v13313_v28  ;;  %v13342_v20 = vadd.f32 1.0, %v9958_v32  ;;  %v13383_v10 = vpop.f32.mrf.mxu3  ;;  %9178 = vmatmul.msk.f32.gmra.mxu3 %vm460_vm1, %v13088_v30  ;;  %v11070_v32 = vld [vmem:[%s11390_s22 + $0x60] sm:$0xff] }
 0x183   : > { %v13339_v31 = vadd.f32 %v13225_v16, %v7821_v39  ;;  %v4666_v6 = vsel %vm13307_vm8, %v4665_v41, %v4661_v5  ;;  %9965 = vrcp.f32 %v13331_v44  ;;  %v13349_v14 = vadd.f32 %v13085_v11, %v12599_v24 }
 0x184   : > { %v9508_v19 = vmul.f32 -1.442695, %v13319_v52  ;;  %v9960_v2 = vpop.eup %9959  ;;  %v7899_v16 = vmul.f32 %v4666_v6, %v13076_v1  ;;  %vm3923_vm7 = vweird.f32 %v13313_v28  ;;  %vm4793_vm6 = vweird.f32 %v13299_v48 }
 0x185   : > { %v13356_v54 = vmul.f32 -1.442695, %v13322_v37  ;;  %v9962_v26 = vpop.eup %9961  ;;  %vm13358_vm11 = vcmp.eq.f32.partialorder %v3927_v3, 8.507059e+37  ;;  %v4789_v11 = vmul.f32 %v9960_v2, %v13299_v48  ;;  %vm13363_vm9 = vcmp.eq.f32.partialorder %v4797_v27, 8.507059e+37 }
 0x186   : > { %v4800_v55 = vor.u32 1.1754944e-38, %v4799_v4  ;;  %9967 = vrcp.f32 %v13342_v20  ;;  %v9964_v1 = vpop.eup %9963  ;;  %v13369_v34 = vadd.f32 %v13236_v46, %v7899_v16  ;;  %v3930_v35 = vor.u32 1.1754944e-38, %v3929_v12  ;;  %v13397_v4 = vpop.f32.mrf.mxu2  ;;  %9247 = vmatmul.msk.f32.gmra.mxu2 %vm460_vm1, %v12697_v47 }
 0x187   : > { %v3642_v38 = vand.u32 2147483647, %v13331_v44  ;;  %v3644_v18 = vand.u32 2147483648, %v13331_v44  ;;  %v3919_v17 = vmul.f32 %v9964_v1, %v13313_v28  ;;  %vm3638_vm10 = vweird.f32 %v13331_v44 }
 0x188   : > { %v4790_v41 = vsub.f32 1.0, %v4789_v11  ;;  %v4814_v29 = vand.u32 2147483648, %v13342_v20  ;;  %vm4794_vm14 = vweird.f32 %v9960_v2  ;;  %v13378_v51 = vadd.f32 1.0, %v9962_v26 }
 0x189   : > { %v9430_v46 = vmul.f32 -1.442695, %v13349_v14  ;;  %9969 = vpow2.f32 %v9507_v59  ;;  %v13381_v62 = vpop.eup %9965  ;;  %v3920_v40 = vsub.f32 1.0, %v3919_v17  ;;  %vm3924_vm15 = vweird.f32 %v9964_v1  ;;  %9192 = vmatmul.msk.f32.gmra.mxu0 %vm460_vm1, %v11070_v32  ;;  %9225 = vmatmul.msk.f32.gmra.mxu1 %vm460_vm1, %v11070_v32  ;;  %vm4795_vm2 = vmor %vm4793_vm6, %vm4794_vm14 }
 0x18a   : > { %v4791_v39 = vmul.f32 %v9960_v2, %v4790_v41  ;;  %9971 = vpow2.f32 %v9508_v19  ;;  %v3634_v3 = vmul.f32 %v13381_v62, %v13331_v44  ;;  %vm13391_vm5 = vcmp.eq.f32.partialorder %v3642_v38, 8.507059e+37  ;;  %vm13409_vm12 = vmor %vm3923_vm7, %vm3924_vm15  ;;  %v13438_v44 = vpop.f32.mrf.mxu1 }
 0x18b   : > { %v3645_v59 = vor.u32 1.1754944e-38, %v3644_v18  ;;  %vm4808_vm4 = vweird.f32 %v13342_v20  ;;  %9973 = vrcp.f32 %v13378_v51  ;;  %v3921_v49 = vmul.f32 %v9964_v1, %v3920_v40 }
 0x18c   : > { %v9968_v30 = vpop.eup %9967  ;;  %v4792_v5 = vadd.f32 %v9960_v2, %v4791_v39  ;;  %v4812_v12 = vand.u32 2147483647, %v13342_v20  ;;  %v4815_v6 = vor.u32 1.1754944e-38, %v4814_v29  ;;  %v3635_v16 = vsub.f32 1.0, %v3634_v3 }
 0x18d   : > { %vm3639_vm0 = vweird.f32 %v13381_v62  ;;  %v4804_v47 = vmul.f32 %v9968_v30, %v13342_v20  ;;  %9975 = vpow2.f32 %v9430_v46  ;;  %v3922_v26 = vadd.f32 %v9964_v1, %v3921_v49 }
 0x18e   : > { %v4796_v11 = vsel %vm4795_vm2, %v9960_v2, %v4792_v5  ;;  %vm4073_vm8 = vweird.f32 %v13378_v51  ;;  %v4077_v48 = vand.u32 2147483647, %v13378_v51  ;;  %v3636_v18 = vmul.f32 %v13381_v62, %v3635_v16  ;;  %vm13425_vm3 = vmor %vm3638_vm10, %vm3639_vm0  ;;  %v11071_v16 = vld [vmem:[%s11390_s22 + $0x68] sm:$0xff]  ;;  %v13502_v2 = vpop.f32.mrf.mxu0 }
 0x18f   : > { %v9970_v38 = vpop.eup %9969  ;;  %v4801_v28 = vsel %vm13363_vm9, %v4800_v55, %v4796_v11  ;;  %v4805_v17 = vsub.f32 1.0, %v4804_v47  ;;  %v4079_v41 = vand.u32 2147483648, %v13378_v51  ;;  %v3926_v40 = vsel %vm13409_vm12, %v9964_v1, %v3922_v26 }
 0x190   : > { %v9972_v29 = vpop.eup %9971  ;;  %v7908_v46 = vmul.f32 %v4801_v28, %v13099_v25  ;;  %vm4809_vm7 = vweird.f32 %v9968_v30  ;;  %v13430_v39 = vadd.f32 1.0, %v9970_v38  ;;  %v3931_v32 = vsel %vm13358_vm11, %v3930_v35, %v3926_v40 }
 0x191   : > { %v9974_v55 = vpop.eup %9973  ;;  %v3637_v1 = vadd.f32 %v13381_v62, %v3636_v18  ;;  %v4806_v3 = vmul.f32 %v9968_v30, %v4805_v17  ;;  %9977 = vpow2.f32 %v13356_v54  ;;  %v7850_v49 = vmul.f32 %v3931_v32, %v13214_v23  ;;  %9193 = vmatmul.msk.f32.gmra.mxu0 %vm460_vm1, %v11071_v16  ;;  %9226 = vmatmul.msk.f32.gmra.mxu1 %vm460_vm1, %v11071_v16  ;;  %vm4810_vm11 = vmor %vm4808_vm4, %vm4809_vm7 }
 0x192   : > { %v13442_v25 = vadd.f32 %v13305_v58, %v7908_v46  ;;  %v4069_v5 = vmul.f32 %v9974_v55, %v13378_v51  ;;  %v13445_v19 = vadd.f32 1.0, %v9972_v29  ;;  %vm4074_vm6 = vweird.f32 %v9974_v55  ;;  %v11073_v46 = vld [vmem:[%s11390_s22 + $0x70] sm:$0xff] }
 0x193   : > { %v9976_v15 = vpop.eup %9975  ;;  %v3641_v35 = vsel %vm13425_vm3, %v13381_v62, %v3637_v1  ;;  %v4807_v54 = vadd.f32 %v9968_v30, %v4806_v3  ;;  %9979 = vrcp.f32 %v13430_v39  ;;  %v8185_v23 = vadd.f32 %v13260_v43, %v7850_v49  ;;  %vm13472_vm10 = vmor %vm4073_vm8, %vm4074_vm6  ;;  %v13517_v49 = vpop.f32.mrf.mxu1 }
 0x194   : > { %v3646_v58 = vsel %vm13391_vm5, %v3645_v59, %v3641_v35  ;;  %v4070_v47 = vsub.f32 1.0, %v4069_v5  ;;  %v13460_v26 = vadd.f32 1.0, %v9976_v15  ;;  %9981 = vrcp.f32 %v12619_v57 }
 0x195   : > { %v7831_v62 = vmul.f32 %v3646_v58, %v13255_v21  ;;  %v4811_v11 = vsel %vm4810_vm11, %v9968_v30, %v4807_v54  ;;  %vm4813_vm9 = vcmp.eq.f32.partialorder %v4812_v12, 8.507059e+37  ;;  %v4080_v43 = vor.u32 1.1754944e-38, %v4079_v41  ;;  %v13481_v12 = vpop.f32.mrf.mxu2  ;;  %9248 = vmatmul.msk.f32.gmra.mxu2 %vm460_vm1, %v12767_v13 }
 0x196   : > { %v4816_v38 = vsel %vm4813_vm9, %v4815_v6, %v4811_v11  ;;  %v4071_v18 = vmul.f32 %v9974_v55, %v4070_v47  ;;  %9983 = vrcp.f32 %v13460_v26  ;;  %v4947_v21 = vand.u32 2147483647, %v13430_v39  ;;  %v13483_v6 = vpop.f32.mrf.mxu3 }
 0x197   : > { %v9978_v27 = vpop.eup %9977  ;;  %v13466_v59 = vadd.f32 %v13339_v31, %v7831_v62  ;;  %v7909_v20 = vmul.f32 %v4816_v38, %v13258_v8  ;;  %v13479_v30 = vadd.f32 %v13216_v7, %v12284_v56  ;;  %v11072_v8 = vld [vmem:[%s11390_s22] sm:$0xff]  ;;  %vm4078_vm14 = vcmp.eq.f32.partialorder %v4077_v48, 8.507059e+37 }
 0x198   : > { %9279 = vmatmul.msk.f32.vlgmr.msrb.gmra.mxu3 %vm460_vm1, %v11072_v8  ;;  %v4072_v51 = vadd.f32 %v9974_v55, %v4071_v18  ;;  %9985 = vrcp.f32 %v13445_v19  ;;  %vm3788_vm15 = vweird.f32 %v13460_v26  ;;  %vm4943_vm5 = vweird.f32 %v13430_v39 }
 0x199   : > { %v9980_v17 = vpop.eup %9979  ;;  %v13492_v7 = vadd.f32 %v13369_v34, %v7909_v20  ;;  %v4949_v13 = vand.u32 2147483648, %v13430_v39  ;;  %v3792_v29 = vand.u32 2147483647, %v13460_v26  ;;  %v3794_v40 = vand.u32 2147483648, %v13460_v26  ;;  %9194 = vmatmul.msk.f32.gmra.mxu0 %vm460_vm1, %v11073_v46  ;;  %9227 = vmatmul.msk.f32.gmra.mxu1 %vm460_vm1, %v11073_v46 }
 0x19a   : > { %v4076_v41 = vsel %vm13472_vm10, %v9974_v55, %v4072_v51  ;;  %v4939_v48 = vmul.f32 %v9980_v17, %v13430_v39  ;;  %v13506_v34 = vpop.eup %9981  ;;  %vm13508_vm4 = vcmp.eq.f32.partialorder %v4947_v21, 8.507059e+37  ;;  %v9459_v55 = vmul.f32 -1.442695, %v13479_v30  ;;  %v11076_v51 = vld [vmem:[%s11390_s22 + $0x78] sm:$0xff] }
 0x19b   : > { %v4081_v32 = vsel %vm4078_vm14, %v4080_v43, %v4076_v41  ;;  %v13515_v3 = vadd.f32 %v13218_v53, %v12599_v24  ;;  %vm4944_vm2 = vweird.f32 %v9980_v17  ;;  %v13521_v35 = vadd.f32 1.0, %v9978_v27  ;;  %v11075_v27 = vld [vmem:[%s11390_s22 + $0x8] sm:$0xff] }
 0x19c   : > { %v9984_v5 = vpop.eup %9983  ;;  %v7860_v16 = vmul.f32 %v4081_v32, %v13278_v42  ;;  %v4940_v15 = vsub.f32 1.0, %v4939_v48  ;;  %v4962_v58 = vand.u32 2147483647, %v13445_v19  ;;  %v4964_v47 = vand.u32 2147483648, %v13445_v19  ;;  %vm4945_vm8 = vmor %vm4943_vm5, %vm4944_vm2 }
 0x19d   : > { %v3784_v54 = vmul.f32 %v9984_v5, %v13460_v26  ;;  %9987 = vpow2.f32 %v9459_v55  ;;  %v9440_v38 = vmul.f32 -1.442695, %v13515_v3  ;;  %vm3789_vm12 = vweird.f32 %v9984_v5 }
 0x19e   : > { %v9986_v53 = vpop.eup %9985  ;;  %v13526_v62 = vadd.f32 %v8185_v23, %v7860_v16  ;;  %v4941_v11 = vmul.f32 %v9980_v17, %v4940_v15  ;;  %9989 = vrcp.f32 %v13521_v35  ;;  %v4950_v18 = vor.u32 1.1754944e-38, %v4949_v13  ;;  %vm13545_vm7 = vmor %vm3788_vm15, %vm3789_vm12 }
 0x19f   : > { %v3785_v42 = vsub.f32 1.0, %v3784_v54  ;;  %v4954_v43 = vmul.f32 %v9986_v53, %v13445_v19  ;;  %vm13531_vm0 = vcmp.eq.f32.partialorder %v3792_v29, 8.507059e+37  ;;  %v3795_v20 = vor.u32 1.1754944e-38, %v3794_v40 }
 0x1a0   : > { %v4942_v28 = vadd.f32 %v9980_v17, %v4941_v11  ;;  %9991 = vpow2.f32 %v9440_v38  ;;  %vm4958_vm3 = vweird.f32 %v13445_v19  ;;  %v13541_v8 = vadd.f32 %v13373_v61, %v11525_v36  ;;  %v13592_v19 = vld [vmem:[%s11390_s22 + $0x18] sm:$0xff] }
 0x1a1   : > { %v3786_v21 = vmul.f32 %v9984_v5, %v3785_v42  ;;  %v4955_v23 = vsub.f32 1.0, %v4954_v43  ;;  %vm4959_vm6 = vweird.f32 %v9986_v53  ;;  %vm13549_vm11 = vcmp.eq.f32.partialorder %v4962_v58, 8.507059e+37  ;;  %v13589_v43 = vpop.f32.mrf.mxu3  ;;  %9280 = vmatmul.msk.f32.gmra.mxu3 %vm460_vm1, %v11075_v27 }
 0x1a2   : > { %v4946_v13 = vsel %vm4945_vm8, %v9980_v17, %v4942_v28  ;;  %v4965_v39 = vor.u32 1.1754944e-38, %v4964_v47  ;;  %v13557_v26 = vadd.f32 %v13432_v60, %v11519_v33  ;;  %v5097_v55 = vand.u32 2147483647, %v13521_v35  ;;  %vm4960_vm9 = vmor %vm4958_vm3, %vm4959_vm6 }
 0x1a3   : > { %v9988_v29 = vpop.eup %9987  ;;  %v3787_v40 = vadd.f32 %v9984_v5, %v3786_v21  ;;  %v4951_v48 = vsel %vm13508_vm4, %v4950_v18, %v4946_v13  ;;  %v4956_v61 = vmul.f32 %v9986_v53, %v4955_v23  ;;  %v9518_v16 = vmul.f32 -1.442695, %v13541_v8  ;;  %v13608_v23 = vpop.f32.mrf.mxu0  ;;  %9195 = vmatmul.msk.f32.gmra.mxu0 %vm460_vm1, %v11076_v51 }
 0x1a4   : > { %v13559_v46 = vpop.eup %9989  ;;  %v7918_v17 = vmul.f32 %v4951_v48, %v13302_v45  ;;  %v13562_v32 = vadd.f32 1.0, %v9988_v29  ;;  %v5099_v60 = vand.u32 2147483648, %v13521_v35  ;;  %v9527_v18 = vmul.f32 -1.442695, %v13557_v26 }
 0x1a5   : > { %v3791_v15 = vsel %vm13545_vm7, %v9984_v5, %v3787_v40  ;;  %v4957_v1 = vadd.f32 %v9986_v53, %v4956_v61  ;;  %v5089_v54 = vmul.f32 %v13559_v46, %v13521_v35  ;;  %v13582_v5 = vadd.f32 %v13438_v44, %v11525_v36 }
 0x1a6   : > { %v9992_v58 = vpop.eup %9991  ;;  %v3796_v45 = vsel %vm13531_vm0, %v3795_v20, %v3791_v15  ;;  %v13574_v47 = vadd.f32 %v13442_v25, %v7918_v17  ;;  %9993 = vrcp.f32 %v13562_v32  ;;  %v4227_v42 = vand.u32 2147483647, %v13562_v32  ;;  %v13587_v25 = vpop.f32.mrf.mxu2  ;;  %9249 = vmatmul.msk.f32.gmra.mxu2 %vm460_vm1, %v13592_v19 }
 0x1a7   : > { %v7841_v11 = vmul.f32 %v3796_v45, %v13349_v14  ;;  %v4961_v38 = vsel %vm4960_vm9, %v9986_v53, %v4957_v1  ;;  %v13600_v44 = vadd.f32 1.0, %v9992_v58  ;;  %v5090_v53 = vsub.f32 1.0, %v5089_v54 }
 0x1a8   : > { %v4966_v14 = vsel %vm13549_vm11, %v4965_v39, %v4961_v38  ;;  %9995 = vpow2.f32 %v9518_v16  ;;  %v4229_v21 = vand.u32 2147483648, %v13562_v32  ;;  %vm5093_vm10 = vweird.f32 %v13521_v35 }
 0x1a9   : > { %v13603_v20 = vadd.f32 %v13466_v59, %v7841_v11  ;;  %v7919_v28 = vmul.f32 %v4966_v14, %v13319_v52  ;;  %9997 = vrcp.f32 %v13600_v44  ;;  %vm5094_vm14 = vweird.f32 %v13559_v46 }
 0x1aa   : > { %vm13614_vm15 = vcmp.eq.f32.partialorder %v5097_v55, 8.507059e+37  ;;  %v5100_v59 = vor.u32 1.1754944e-38, %v5099_v60  ;;  %v5091_v41 = vmul.f32 %v13559_v46, %v5090_v53  ;;  %v13624_v39 = vadd.f32 %v13397_v4, %v12284_v56  ;;  %vm5095_vm0 = vmor %vm5093_vm10, %vm5094_vm14 }
 0x1ab   : > { %v13619_v52 = vadd.f32 %v13492_v7, %v7919_v28  ;;  %v13628_v29 = vadd.f32 %v13383_v10, %v12599_v24  ;;  %vm4223_vm5 = vweird.f32 %v13562_v32  ;;  %vm13631_vm4 = vcmp.eq.f32.partialorder %v4227_v42, 8.507059e+37 }
 0x1ac   : > { %v9994_v40 = vpop.eup %9993  ;;  %9999 = vpow2.f32 %v9527_v18  ;;  %v9528_v7 = vmul.f32 -1.442695, %v13582_v5  ;;  %v4230_v17 = vor.u32 1.1754944e-38, %v4229_v21  ;;  %v5092_v4 = vadd.f32 %v13559_v46, %v5091_v41 }
 0x1ad   : > { %v4219_v61 = vmul.f32 %v9994_v40, %v13562_v32  ;;  %v9469_v55 = vmul.f32 -1.442695, %v13624_v39  ;;  %vm4224_vm2 = vweird.f32 %v9994_v40  ;;  %vm3938_vm12 = vweird.f32 %v13600_v44 }
 0x1ae   : > { %v9996_v16 = vpop.eup %9995  ;;  %v9450_v10 = vmul.f32 -1.442695, %v13628_v29  ;;  %v13647_v15 = vadd.f32 %v13502_v2, %v11519_v33  ;;  %v5096_v54 = vsel %vm5095_vm0, %v13559_v46, %v5092_v4  ;;  %v3942_v45 = vand.u32 2147483647, %v13600_v44  ;;  %vm13661_vm8 = vmor %vm4223_vm5, %vm4224_vm2 }
 0x1af   : > { %v4220_v1 = vsub.f32 1.0, %v4219_v61  ;;  %v13650_v60 = vadd.f32 1.0, %v9996_v16  ;;  %10001 = vpow2.f32 %v9469_v55  ;;  %v9998_v58 = vpop.eup %9997  ;;  %v3944_v11 = vand.u32 2147483648, %v13600_v44 }
 0x1b0   : > { %v5101_v35 = vsel %vm13614_vm15, %v5100_v59, %v5096_v54  ;;  %10003 = vpow2.f32 %v9450_v10  ;;  %v3934_v42 = vmul.f32 %v9998_v58, %v13600_v44  ;;  %vm3939_vm3 = vweird.f32 %v9998_v58  ;;  %v13757_v10 = vpop.f32.mrf.mxu2 }
 0x1b1   : > { %v4221_v38 = vmul.f32 %v9994_v40, %v4220_v1  ;;  %v7928_v2 = vmul.f32 %v5101_v35, %v13322_v37  ;;  %10005 = vpow2.f32 %v9528_v7  ;;  %v9537_v27 = vmul.f32 -1.442695, %v13647_v15  ;;  %vm13697_vm6 = vmor %vm3938_vm12, %vm3939_vm3 }
 0x1b2   : > { %v10000_v18 = vpop.eup %9999  ;;  %10007 = vrcp.f32 %v13650_v60  ;;  %v13669_v14 = vadd.f32 %v13517_v49, %v11525_v36  ;;  %v3935_v37 = vsub.f32 1.0, %v3934_v42  ;;  %v13678_v32 = vmul.f32 %v13506_v34, %v12619_v57  ;;  %v13685_v49 = vpop.f32.mrf.mxu1  ;;  %9228 = vmatmul.msk.f32.gmra.mxu1 %vm460_vm1, %v11076_v51 }
 0x1b3   : > { %v4222_v53 = vadd.f32 %v9994_v40, %v4221_v38  ;;  %v13672_v28 = vadd.f32 %v13574_v47, %v7928_v2  ;;  %v13674_v21 = vadd.f32 1.0, %v10000_v18  ;;  %vm13680_vm7 = vcmp.eq.f32.partialorder %v3942_v45, 8.507059e+37 }
 0x1b4   : > { %v3945_v59 = vor.u32 1.1754944e-38, %v3944_v11  ;;  %v5114_v41 = vand.u32 2147483648, %v13650_v60  ;;  %v3936_v61 = vmul.f32 %v9998_v58, %v3935_v37  ;;  %v5112_v4 = vand.u32 2147483647, %v13650_v60 }
 0x1b5   : > { %v10002_v7 = vpop.eup %10001  ;;  %v4226_v47 = vsel %vm13661_vm8, %v9994_v40, %v4222_v53  ;;  %10009 = vrcp.f32 %v13674_v21  ;;  %v13704_v40 = vmul.f32 -1.442695, %v13669_v14  ;;  %v13708_v1 = vadd.f32 %v13608_v23, %v11519_v33 }
 0x1b6   : > { %v10004_v55 = vpop.eup %10003  ;;  %v4231_v16 = vsel %vm13631_vm4, %v4230_v17, %v4226_v47  ;;  %v13701_v51 = vadd.f32 1.0, %v10002_v7  ;;  %v3937_v17 = vadd.f32 %v9998_v58, %v3936_v61  ;;  %vm5108_vm11 = vweird.f32 %v13650_v60 }
 0x1b7   : > { %v10006_v54 = vpop.eup %10005  ;;  %v7870_v48 = vmul.f32 %v4231_v16, %v13479_v30  ;;  %v13712_v44 = vadd.f32 1.0, %v10004_v55  ;;  %10011 = vpow2.f32 %v9537_v27  ;;  %v5115_v11 = vor.u32 1.1754944e-38, %v5114_v41 }
 0x1b8   : > { %v10008_v45 = vpop.eup %10007  ;;  %10013 = vrcp.f32 %v13701_v51  ;;  %v4377_v35 = vand.u32 2147483647, %v13701_v51  ;;  %v13718_v38 = vadd.f32 %v13481_v12, %v12284_v56  ;;  %v3941_v30 = vsel %vm13697_vm6, %v9998_v58, %v3937_v17 }
 0x1b9   : > { %v13721_v23 = vadd.f32 %v13526_v62, %v7870_v48  ;;  %v5104_v42 = vmul.f32 %v10008_v45, %v13650_v60  ;;  %vm13726_vm9 = vcmp.eq.f32.partialorder %v5112_v4, 8.507059e+37  ;;  %v4379_v18 = vand.u32 2147483648, %v13701_v51  ;;  %v11078_v48 = vld [vmem:[%s11390_s22 + $0x10] sm:$0xff] }
 0x1ba   : > { %v3946_v46 = vsel %vm13680_vm7, %v3945_v59, %v3941_v30  ;;  %10015 = vrcp.f32 %v13712_v44  ;;  %vm5243_vm10 = vweird.f32 %v13674_v21  ;;  %v13735_v12 = vadd.f32 1.0, %v10006_v54  ;;  %v13762_v54 = vld [vmem:[%s11390_s22 + $0x20] sm:$0xff] }
 0x1bb   : > { %v13737_v62 = vpop.eup %10009  ;;  %v7851_v58 = vmul.f32 %v3946_v46, %v13515_v3  ;;  %v5105_v27 = vsub.f32 1.0, %v5104_v42  ;;  %v4092_v53 = vand.u32 2147483647, %v13712_v44  ;;  %v5247_v37 = vand.u32 2147483647, %v13674_v21  ;;  %9250 = vmatmul.msk.f32.gmra.mxu2 %vm460_vm1, %v13762_v54 }
 0x1bc   : > { %vm5109_vm14 = vweird.f32 %v10008_v45  ;;  %vm4373_vm15 = vweird.f32 %v13701_v51  ;;  %v5239_v13 = vmul.f32 %v13737_v62, %v13674_v21  ;;  %v5249_v59 = vand.u32 2147483648, %v13674_v21 }
 0x1bd   : > { %v10012_v41 = vpop.eup %10011  ;;  %v13747_v7 = vadd.f32 %v13603_v20, %v7851_v58  ;;  %v5106_v3 = vmul.f32 %v10008_v45, %v5105_v27  ;;  %vm13749_vm5 = vcmp.eq.f32.partialorder %v4377_v35, 8.507059e+37  ;;  %v4380_v61 = vor.u32 1.1754944e-38, %v4379_v18  ;;  %v13759_v20 = vpop.f32.mrf.mxu3  ;;  %9281 = vmatmul.msk.f32.gmra.mxu3 %vm460_vm1, %v11078_v48  ;;  %vm5110_vm8 = vmor %vm5108_vm11, %vm5109_vm14 }
 0x1be   : > { %vm4088_vm4 = vweird.f32 %v13712_v44  ;;  %v10014_v4 = vpop.eup %10013  ;;  %v4094_v55 = vand.u32 2147483648, %v13712_v44  ;;  %v5240_v16 = vsub.f32 1.0, %v5239_v13  ;;  %vm5244_vm2 = vweird.f32 %v13737_v62  ;;  %v13786_v13 = vpop.f32.mrf.mxu0 }
 0x1bf   : > { %10017 = vrcp.f32 %v13735_v12  ;;  %v5107_v17 = vadd.f32 %v10008_v45, %v5106_v3  ;;  %v4369_v35 = vmul.f32 %v10014_v4, %v13701_v51  ;;  %vm13769_vm12 = vcmp.eq.f32.partialorder %v4092_v53, 8.507059e+37  ;;  %vm5245_vm6 = vmor %vm5243_vm10, %vm5244_vm2 }
 0x1c0   : > { %vm13773_vm0 = vcmp.eq.f32.partialorder %v5247_v37, 8.507059e+37  ;;  %v10016_v18 = vpop.eup %10015  ;;  %v5241_v46 = vmul.f32 %v13737_v62, %v5240_v16  ;;  %v5250_v58 = vor.u32 1.1754944e-38, %v5249_v59  ;;  %v9479_v27 = vmul.f32 -1.442695, %v13718_v38  ;;  %v11079_v37 = vld [vmem:[%s11390_s22 + $0x80] sm:$0xff] }
 0x1c1   : > { %v13784_v53 = vadd.f32 %v13483_v6, %v12599_v24  ;;  %9196 = vmatmul.msk.f32.gmra.mxu0 %vm460_vm1, %v11079_v37  ;;  %v5111_v3 = vsel %vm5110_vm8, %v10008_v45, %v5107_v17  ;;  %v4370_v48 = vsub.f32 1.0, %v4369_v35  ;;  %vm4374_vm3 = vweird.f32 %v10014_v4 }
 0x1c2   : > { %v4084_v60 = vmul.f32 %v10016_v18, %v13712_v44  ;;  %v5116_v16 = vsel %vm13726_vm9, %v5115_v11, %v5111_v3  ;;  %vm4089_vm7 = vweird.f32 %v10016_v18  ;;  %v5242_v59 = vadd.f32 %v13737_v62, %v5241_v46  ;;  %vm13802_vm11 = vmor %vm4373_vm15, %vm4374_vm3 }
 0x1c3   : > { %v5264_v31 = vand.u32 2147483648, %v13735_v12  ;;  %v7929_v6 = vmul.f32 %v5116_v16, %v13541_v8  ;;  %v4371_v63 = vmul.f32 %v10014_v4, %v4370_v48  ;;  %10019 = vpow2.f32 %v9479_v27  ;;  %vm13819_vm9 = vmor %vm4088_vm4, %vm4089_vm7  ;;  %v13838_v48 = vpop.f32.mrf.mxu1  ;;  %9229 = vmatmul.msk.f32.gmra.mxu1 %vm460_vm1, %v11079_v37 }
 0x1c4   : > { %v4085_v22 = vsub.f32 1.0, %v4084_v60  ;;  %v5246_v2 = vsel %vm5245_vm6, %v13737_v62, %v5242_v59  ;;  %v9460_v17 = vmul.f32 -1.442695, %v13784_v53  ;;  %v13808_v8 = vadd.f32 1.0, %v10012_v41 }
 0x1c5   : > { %v10018_v45 = vpop.eup %10017  ;;  %10021 = vpow2.f32 %v13704_v40  ;;  %v13812_v35 = vadd.f32 %v13619_v52, %v7929_v6  ;;  %v4372_v21 = vadd.f32 %v10014_v4, %v4371_v63  ;;  %v5251_v51 = vsel %vm13773_vm0, %v5250_v58, %v5246_v2 }
 0x1c6   : > { %v4086_v46 = vmul.f32 %v10016_v18, %v4085_v22  ;;  %v4095_v62 = vor.u32 1.1754944e-38, %v4094_v55  ;;  %v7938_v41 = vmul.f32 %v5251_v51, %v13557_v26  ;;  %v5254_v40 = vmul.f32 %v10018_v45, %v13735_v12 }
 0x1c7   : > { %10023 = vpow2.f32 %v9460_v17  ;;  %v4376_v63 = vsel %vm13802_vm11, %v10014_v4, %v4372_v21  ;;  %vm5258_vm10 = vweird.f32 %v13735_v12  ;;  %v5262_v26 = vand.u32 2147483647, %v13735_v12 }
 0x1c8   : > { %v4087_v22 = vadd.f32 %v10016_v18, %v4086_v46  ;;  %10025 = vrcp.f32 %v13808_v8  ;;  %v4381_v52 = vsel %vm13749_vm5, %v4380_v61, %v4376_v63  ;;  %v13832_v44 = vadd.f32 %v13672_v28, %v7938_v41  ;;  %v13887_v63 = vpop.f32.mrf.mxu2 }
 0x1c9   : > { %v5255_v55 = vsub.f32 1.0, %v5254_v40  ;;  %v10020_v42 = vpop.eup %10019  ;;  %v7880_v58 = vmul.f32 %v4381_v52, %v13624_v39  ;;  %vm5259_vm14 = vweird.f32 %v10018_v45  ;;  %v5265_v3 = vor.u32 1.1754944e-38, %v5264_v31 }
 0x1ca   : > { %v4091_v4 = vsel %vm13819_vm9, %v10016_v18, %v4087_v22  ;;  %v13843_v60 = vadd.f32 1.0, %v10020_v42  ;;  %v5397_v16 = vand.u32 2147483647, %v13808_v8  ;;  %v5399_v31 = vand.u32 2147483648, %v13808_v8  ;;  %vm5260_vm15 = vmor %vm5258_vm10, %vm5259_vm14  ;;  %v13889_v22 = vpop.f32.mrf.mxu3  ;;  %9282 = vmatmul.msk.f32.gmra.mxu3 %vm460_vm1, %v13592_v19 }
 0x1cb   : > { %v10022_v47 = vpop.eup %10021  ;;  %v4096_v28 = vsel %vm13769_vm12, %v4095_v62, %v4091_v4  ;;  %v5256_v61 = vmul.f32 %v10018_v45, %v5255_v55  ;;  %v13847_v39 = vadd.f32 %v13721_v23, %v7880_v58  ;;  %v13857_v11 = vadd.f32 %v13587_v25, %v12284_v56  ;;  %v13908_v19 = vpop.f32.mrf.mxu1 }
 0x1cc   : > { %v7861_v18 = vmul.f32 %v4096_v28, %v13628_v29  ;;  %v13851_v59 = vadd.f32 1.0, %v10022_v47  ;;  %10027 = vrcp.f32 %v13843_v60  ;;  %v4527_v30 = vand.u32 2147483647, %v13843_v60  ;;  %v13906_v28 = vpop.f32.mrf.mxu0 }
 0x1cd   : > { %v10024_v6 = vpop.eup %10023  ;;  %v5257_v37 = vadd.f32 %v10018_v45, %v5256_v61  ;;  %v4529_v29 = vand.u32 2147483648, %v13843_v60  ;;  %vm5263_vm5 = vcmp.eq.f32.partialorder %v5262_v26, 8.507059e+37  ;;  %vm5393_vm4 = vweird.f32 %v13808_v8  ;;  %v11081_v61 = vld [vmem:[%s11390_s22 + $0x88] sm:$0xff] }
 0x1ce   : > { %v10026_v2 = vpop.eup %10025  ;;  %v13860_v23 = vadd.f32 %v13747_v7, %v7861_v18  ;;  %v13866_v17 = vadd.f32 1.0, %v10024_v6  ;;  %10029 = vrcp.f32 %v13851_v59  ;;  %vm13872_vm2 = vcmp.eq.f32.partialorder %v5397_v16, 8.507059e+37  ;;  %9197 = vmatmul.msk.f32.gmra.mxu0 %vm460_vm1, %v11081_v61  ;;  %9230 = vmatmul.msk.f32.gmra.mxu1 %vm460_vm1, %v11081_v61 }
 0x1cf   : > { %v5261_v21 = vsel %vm5260_vm15, %v10018_v45, %v5257_v37  ;;  %v5389_v46 = vmul.f32 %v10026_v2, %v13808_v8  ;;  %v5400_v12 = vor.u32 1.1754944e-38, %v5399_v31  ;;  %vm4523_vm12 = vweird.f32 %v13843_v60 }
 0x1d0   : > { %v5266_v25 = vsel %vm5263_vm5, %v5265_v3, %v5261_v21  ;;  %10031 = vrcp.f32 %v13866_v17  ;;  %v4242_v45 = vand.u32 2147483647, %v13866_v17  ;;  %vm13879_vm0 = vcmp.eq.f32.partialorder %v4527_v30, 8.507059e+37 }
 0x1d1   : > { %v7939_v51 = vmul.f32 %v5266_v25, %v13582_v5  ;;  %v5390_v27 = vsub.f32 1.0, %v5389_v46  ;;  %v13883_v41 = vor.u32 1.1754944e-38, %v4529_v29  ;;  %vm4238_vm8 = vweird.f32 %v13866_v17  ;;  %v13892_v5 = vld [vmem:[%s11390_s22 + $0x28] sm:$0xff] }
 0x1d2   : > { %vm5394_vm3 = vweird.f32 %v10026_v2  ;;  %v9489_v40 = vmul.f32 -1.442695, %v13857_v11  ;;  %9251 = vmatmul.msk.f32.gmra.mxu2 %vm460_vm1, %v13892_v5  ;;  %v10028_v52 = vpop.eup %10027  ;;  %v4244_v26 = vand.u32 2147483648, %v13866_v17  ;;  %vm5408_vm7 = vweird.f32 %v13851_v59 }
 0x1d3   : > { %v13899_v55 = vadd.f32 %v13812_v35, %v7939_v51  ;;  %v5391_v42 = vmul.f32 %v10026_v2, %v5390_v27  ;;  %v4519_v4 = vmul.f32 %v10028_v52, %v13843_v60  ;;  %vm4524_vm6 = vweird.f32 %v10028_v52  ;;  %vm5395_vm10 = vmor %vm5393_vm4, %vm5394_vm3 }
 0x1d4   : > { %v10030_v58 = vpop.eup %10029  ;;  %v5412_v3 = vand.u32 2147483647, %v13851_v59  ;;  %v5414_v47 = vand.u32 2147483648, %v13851_v59  ;;  %vm13913_vm11 = vcmp.eq.f32.partialorder %v4242_v45, 8.507059e+37  ;;  %10033 = vpow2.f32 %v9489_v40  ;;  %vm13937_vm15 = vmor %vm4523_vm12, %vm4524_vm6 }
 0x1d5   : > { %v5392_v16 = vadd.f32 %v10026_v2, %v5391_v42  ;;  %v5404_v18 = vmul.f32 %v10030_v58, %v13851_v59  ;;  %vm5409_vm9 = vweird.f32 %v10030_v58  ;;  %v4520_v6 = vsub.f32 1.0, %v4519_v4 }
 0x1d6   : > { %v10032_v31 = vpop.eup %10031  ;;  %v13923_v37 = vadd.f32 %v13589_v43, %v12599_v24  ;;  %v9547_v30 = vmul.f32 -1.442695, %v13708_v1  ;;  %v13928_v29 = vadd.f32 %v13685_v49, %v11525_v36  ;;  %v4245_v4 = vor.u32 1.1754944e-38, %v4244_v26  ;;  %vm5410_vm5 = vmor %vm5408_vm7, %vm5409_vm9 }
 0x1d7   : > { %v4234_v21 = vmul.f32 %v10032_v31, %v13866_v17  ;;  %vm4239_vm14 = vweird.f32 %v10032_v31  ;;  %v5396_v46 = vsel %vm5395_vm10, %v10026_v2, %v5392_v16  ;;  %v5405_v25 = vsub.f32 1.0, %v5404_v18 }
 0x1d8   : > { %v4521_v51 = vmul.f32 %v10028_v52, %v4520_v6  ;;  %v5401_v8 = vsel %vm13872_vm2, %v5400_v12, %v5396_v46  ;;  %v9470_v45 = vmul.f32 -1.442695, %v13923_v37  ;;  %10035 = vpow2.f32 %v9547_v30  ;;  %vm13958_vm4 = vmor %vm4238_vm8, %vm4239_vm14 }
 0x1d9   : > { %v4235_v49 = vsub.f32 1.0, %v4234_v21  ;;  %v7948_v27 = vmul.f32 %v5401_v8, %v13647_v15  ;;  %v5406_v40 = vmul.f32 %v10030_v58, %v5405_v25  ;;  %v9548_v2 = vmul.f32 -1.442695, %v13928_v29 }
 0x1da   : > { %v4522_v42 = vadd.f32 %v10028_v52, %v4521_v51  ;;  %10037 = vpow2.f32 %v9470_v45  ;;  %v13945_v7 = vadd.f32 %v13757_v10, %v12284_v56  ;;  %v10034_v12 = vpop.eup %10033  ;;  %v5415_v26 = vor.u32 1.1754944e-38, %v5414_v47 }
 0x1db   : > { %v4236_v61 = vmul.f32 %v10032_v31, %v4235_v49  ;;  %v13948_v60 = vadd.f32 %v13832_v44, %v7948_v27  ;;  %v5407_v16 = vadd.f32 %v10030_v58, %v5406_v40  ;;  %10039 = vpow2.f32 %v9548_v2 }
 0x1dc   : > { %v4526_v15 = vsel %vm13937_vm15, %v10028_v52, %v4522_v42  ;;  %v13962_v18 = vadd.f32 1.0, %v10034_v12  ;;  %v9499_v44 = vmul.f32 -1.442695, %v13945_v7  ;;  %vm5413_vm2 = vcmp.eq.f32.partialorder %v5412_v3, 8.507059e+37 }
 0x1dd   : > { %v4531_v59 = vsel %vm13879_vm0, %v13883_v41, %v4526_v15  ;;  %v4237_v6 = vadd.f32 %v10032_v31, %v4236_v61  ;;  %v5411_v30 = vsel %vm5410_vm5, %v10030_v58, %v5407_v16  ;;  %v22195_v47 = vand.u32 2147483648, %v12619_v57 }
 0x1de   : > { %v10036_v52 = vpop.eup %10035  ;;  %v7890_v17 = vmul.f32 %v4531_v59, %v13718_v38  ;;  %v5416_v46 = vsel %vm5413_vm2, %v5415_v26, %v5411_v30  ;;  %10041 = vrcp.f32 %v13962_v18  ;;  %v13980_v41 = vadd.f32 %v13786_v13, %v11519_v33  ;;  %v14031_v26 = vpop.f32.mrf.mxu3  ;;  %9283 = vmatmul.msk.f32.gmra.mxu3 %vm460_vm1, %v13762_v54 }
 0x1df   : > { %v13973_v25 = vor.u32 1.1754944e-38, %v22195_v47  ;;  %v4241_v51 = vsel %vm13958_vm4, %v10032_v31, %v4237_v6  ;;  %v7949_v62 = vmul.f32 %v5416_v46, %v13669_v14  ;;  %v13987_v8 = vadd.f32 1.0, %v10036_v52  ;;  %v14045_v46 = vpop.f32.mrf.mxu0  ;;  %v11083_v47 = vld [vmem:[%s11390_s22 + $0x90] sm:$0xff] }
 0x1e0   : > { %v10038_v58 = vpop.eup %10037  ;;  %v13983_v3 = vadd.f32 %v13847_v39, %v7890_v17  ;;  %v4246_v38 = vsel %vm13913_vm11, %v4245_v4, %v4241_v51  ;;  %10043 = vpow2.f32 %v9499_v44  ;;  %v7640_v43 = vsub.f32 1.0, %v13678_v32  ;;  %v14034_v44 = vld [vmem:[%s11390_s22 + $0x30] sm:$0xff]  ;;  %9198 = vmatmul.msk.f32.gmra.mxu0 %vm460_vm1, %v11083_v47 }
 0x1e1   : > { %22196 = vst [vmem:[#allocation26_spill] sm:$0xff] %v13973_v25  ;;  %v10040_v45 = vpop.eup %10039  ;;  %v13991_v31 = vadd.f32 1.0, %v12659_v0  ;;  %v7871_v14 = vmul.f32 %v4246_v38, %v13784_v53  ;;  %v13995_v13 = vadd.f32 %v13899_v55, %v7949_v62  ;;  %v4677_v39 = vand.u32 2147483647, %v13962_v18 }
 0x1e2   : > { %v4679_v49 = vand.u32 2147483648, %v13962_v18  ;;  %v13999_v35 = vadd.f32 1.0, %v10038_v58  ;;  %10045 = vrcp.f32 %v13987_v8  ;;  %v14006_v0 = vadd.f32 1.0, %v10040_v45 }
 0x1e3   : > { %22197 = vst [vmem:[#allocation27_spill] sm:$0xff] %v13991_v31  ;;  %v14004_v40 = vadd.f32 %v13860_v23, %v7871_v14  ;;  %v9557_v53 = vmul.f32 -1.442695, %v13980_v41  ;;  %v5549_v55 = vand.u32 2147483648, %v13987_v8  ;;  %v14013_v42 = vadd.f32 %v13759_v20, %v12599_v24 }
 0x1e4   : > { %v10042_v2 = vpop.eup %10041  ;;  %10047 = vrcp.f32 %v13999_v35  ;;  %v14017_v4 = vadd.f32 %v13838_v48, %v11525_v36  ;;  %vm4673_vm12 = vweird.f32 %v13962_v18  ;;  %v4392_v12 = vand.u32 2147483647, %v13999_v35  ;;  %v14029_v48 = vpop.f32.mrf.mxu2  ;;  %9252 = vmatmul.msk.f32.gmra.mxu2 %vm460_vm1, %v14034_v44 }
 0x1e5   : > { %v4669_v23 = vmul.f32 %v10042_v2, %v13962_v18  ;;  %v5547_v61 = vand.u32 2147483647, %v13987_v8  ;;  %vm14023_vm0 = vcmp.eq.f32.partialorder %v4677_v39, 8.507059e+37  ;;  %v4680_v10 = vor.u32 1.1754944e-38, %v4679_v49 }
 0x1e6   : > { %v10044_v16 = vpop.eup %10043  ;;  %v4394_v20 = vand.u32 2147483648, %v13999_v35  ;;  %10049 = vrcp.f32 %v14006_v0  ;;  %vm4674_vm8 = vweird.f32 %v10042_v2  ;;  %vm5543_vm3 = vweird.f32 %v13987_v8 }
 0x1e7   : > { %v4670_v59 = vsub.f32 1.0, %v4669_v23  ;;  %v14041_v6 = vadd.f32 1.0, %v10044_v16  ;;  %vm4388_vm7 = vweird.f32 %v13999_v35  ;;  %v5550_v52 = vor.u32 1.1754944e-38, %v5549_v55  ;;  %vm14062_vm9 = vmor %vm4673_vm12, %vm4674_vm8 }
 0x1e8   : > { %v10046_v30 = vpop.eup %10045  ;;  %v9480_v17 = vmul.f32 -1.442695, %v14013_v42  ;;  %10051 = vpow2.f32 %v9557_v53  ;;  %vm14049_vm6 = vcmp.eq.f32.partialorder %v4392_v12, 8.507059e+37  ;;  %vm14054_vm11 = vcmp.eq.f32.partialorder %v5547_v61, 8.507059e+37 }
 0x1e9   : > { %v4671_v51 = vmul.f32 %v10042_v2, %v4670_v59  ;;  %v5539_v62 = vmul.f32 %v10046_v30, %v13987_v8  ;;  %v5562_v38 = vand.u32 2147483647, %v14006_v0  ;;  %v4395_v39 = vor.u32 1.1754944e-38, %v4394_v20 }
 0x1ea   : > { %v10048_v45 = vpop.eup %10047  ;;  %v5564_v49 = vand.u32 2147483648, %v14006_v0  ;;  %10053 = vrcp.f32 %v14041_v6  ;;  %v9558_v53 = vmul.f32 -1.442695, %v14017_v4  ;;  %vm5558_vm10 = vweird.f32 %v14006_v0 }
 0x1eb   : > { %v4672_v55 = vadd.f32 %v10042_v2, %v4671_v51  ;;  %v4384_v23 = vmul.f32 %v10048_v45, %v13999_v35  ;;  %v5540_v12 = vsub.f32 1.0, %v5539_v62  ;;  %vm4389_vm14 = vweird.f32 %v10048_v45 }
 0x1ec   : > { %v10050_v61 = vpop.eup %10049  ;;  %vm5544_vm15 = vweird.f32 %v10046_v30  ;;  %10055 = vpow2.f32 %v9480_v17  ;;  %v14073_v18 = vadd.f32 %v13906_v28, %v11519_v33  ;;  %vm14078_vm5 = vcmp.eq.f32.partialorder %v5562_v38, 8.507059e+37  ;;  %v14085_v28 = vpop.f32.mrf.mxu1  ;;  %9231 = vmatmul.msk.f32.gmra.mxu1 %vm460_vm1, %v11083_v47  ;;  %vm14097_vm12 = vmor %vm4388_vm7, %vm4389_vm14 }
 0x1ed   : > { %v4676_v16 = vsel %vm14062_vm9, %v10042_v2, %v4672_v55  ;;  %v4385_v20 = vsub.f32 1.0, %v4384_v23  ;;  %v5541_v59 = vmul.f32 %v10046_v30, %v5540_v12  ;;  %v5554_v51 = vmul.f32 %v10050_v61, %v14006_v0  ;;  %vm5545_vm2 = vmor %vm5543_vm3, %vm5544_vm15 }
 0x1ee   : > { %v10052_v62 = vpop.eup %10051  ;;  %v4681_v27 = vsel %vm14023_vm0, %v4680_v10, %v4676_v16  ;;  %v5565_v17 = vor.u32 1.1754944e-38, %v5564_v49  ;;  %vm4823_vm4 = vweird.f32 %v14041_v6  ;;  %10057 = vpow2.f32 %v9558_v53 }
 0x1ef   : > { %v7900_v2 = vmul.f32 %v4681_v27, %v13857_v11  ;;  %v4386_v14 = vmul.f32 %v10048_v45, %v4385_v20  ;;  %v5542_v55 = vadd.f32 %v10046_v30, %v5541_v59  ;;  %v5555_v38 = vsub.f32 1.0, %v5554_v51 }
 0x1f0   : > { %v14092_v23 = vpop.eup %10053  ;;  %vm5559_vm0 = vweird.f32 %v10050_v61  ;;  %v4827_v10 = vand.u32 2147483647, %v14041_v6  ;;  %v14102_v11 = vadd.f32 1.0, %v10052_v62  ;;  %v9567_v27 = vmul.f32 -1.442695, %v14073_v18 }
 0x1f1   : > { %v14106_v8 = vadd.f32 %v13983_v3, %v7900_v2  ;;  %v4387_v47 = vadd.f32 %v10048_v45, %v4386_v14  ;;  %v5546_v49 = vsel %vm5545_vm2, %v10046_v30, %v5542_v55  ;;  %v5556_v53 = vmul.f32 %v10050_v61, %v5555_v38  ;;  %vm5560_vm8 = vmor %vm5558_vm10, %vm5559_vm0 }
 0x1f2   : > { %v10056_v12 = vpop.eup %10055  ;;  %v5551_v35 = vsel %vm14054_vm11, %v5550_v52, %v5546_v49  ;;  %v4819_v16 = vmul.f32 %v14092_v23, %v14041_v6  ;;  %v4829_v20 = vand.u32 2147483648, %v14041_v6  ;;  %10059 = vrcp.f32 %v14102_v11  ;;  %v14160_v6 = vpop.f32.mrf.mxu2 }
 0x1f3   : > { %v4391_v59 = vsel %vm14097_vm12, %v10048_v45, %v4387_v47  ;;  %v7958_v3 = vmul.f32 %v5551_v35, %v13708_v1  ;;  %v5557_v51 = vadd.f32 %v10050_v61, %v5556_v53  ;;  %v14117_v62 = vadd.f32 1.0, %v10056_v12 }
 0x1f4   : > { %v10058_v30 = vpop.eup %10057  ;;  %v4396_v58 = vsel %vm14049_vm6, %v4395_v39, %v4391_v59  ;;  %v4820_v52 = vsub.f32 1.0, %v4819_v16  ;;  %vm4824_vm3 = vweird.f32 %v14092_v23  ;;  %10061 = vpow2.f32 %v9567_v27  ;;  %v14165_v27 = vld [vmem:[%s11390_s22 + $0x38] sm:$0xff] }
 0x1f5   : > { %v7881_v2 = vmul.f32 %v4396_v58, %v13923_v37  ;;  %v14127_v45 = vadd.f32 %v13948_v60, %v7958_v3  ;;  %v5561_v1 = vsel %vm5560_vm8, %v10050_v61, %v5557_v51  ;;  %10063 = vrcp.f32 %v14117_v62  ;;  %vm14144_vm6 = vmor %vm4823_vm4, %vm4824_vm3  ;;  %9253 = vmatmul.msk.f32.gmra.mxu2 %vm460_vm1, %v14165_v27 }
 0x1f6   : > { %v5566_v54 = vsel %vm14078_vm5, %v5565_v17, %v5561_v1  ;;  %v4821_v39 = vmul.f32 %v14092_v23, %v4820_v52  ;;  %vm14133_vm7 = vcmp.eq.f32.partialorder %v4827_v10, 8.507059e+37  ;;  %v5697_v14 = vand.u32 2147483647, %v14102_v11  ;;  %v14162_v10 = vpop.f32.mrf.mxu3  ;;  %9284 = vmatmul.msk.f32.gmra.mxu3 %vm460_vm1, %v13892_v5  ;;  %v14186_v5 = vpop.f32.mrf.mxu0 }
 0x1f7   : > { %v14139_v37 = vadd.f32 %v14004_v40, %v7881_v2  ;;  %v7959_v60 = vmul.f32 %v5566_v54, %v13928_v29  ;;  %v4830_v21 = vor.u32 1.1754944e-38, %v4829_v20  ;;  %v4542_v17 = vand.u32 2147483647, %v14117_v62 }
 0x1f8   : > { %v10060_v55 = vpop.eup %10059  ;;  %v4822_v38 = vadd.f32 %v14092_v23, %v4821_v39  ;;  %v14150_v15 = vadd.f32 1.0, %v10058_v30  ;;  %v14154_v40 = vadd.f32 %v13887_v63, %v12284_v56  ;;  %v14158_v29 = vadd.f32 %v13908_v19, %v11525_v36 }
 0x1f9   : > { %v14172_v63 = vadd.f32 %v13995_v13, %v7959_v60  ;;  %vm4538_vm11 = vweird.f32 %v14117_v62  ;;  %v5689_v19 = vmul.f32 %v10060_v55, %v14102_v11  ;;  %vm5693_vm9 = vweird.f32 %v14102_v11  ;;  %v11085_v13 = vld [vmem:[%s11390_s22 + $0x98] sm:$0xff] }
 0x1fa   : > { %v10062_v47 = vpop.eup %10061  ;;  %v4826_v49 = vsel %vm14144_vm6, %v14092_v23, %v4822_v38  ;;  %v4544_v53 = vand.u32 2147483648, %v14117_v62  ;;  %vm14181_vm10 = vcmp.eq.f32.partialorder %v5697_v14, 8.507059e+37  ;;  %10065 = vrcp.f32 %v14150_v15  ;;  %9199 = vmatmul.msk.f32.gmra.mxu0 %vm460_vm1, %v11085_v13 }
 0x1fb   : > { %v10064_v35 = vpop.eup %10063  ;;  %v4831_v16 = vsel %vm14133_vm7, %v4830_v21, %v4826_v49  ;;  %vm14192_vm14 = vcmp.eq.f32.partialorder %v4542_v17, 8.507059e+37  ;;  %v5690_v23 = vsub.f32 1.0, %v5689_v19  ;;  %v5699_v59 = vand.u32 2147483648, %v14102_v11 }
 0x1fc   : > { %v7910_v3 = vmul.f32 %v4831_v16, %v13945_v7  ;;  %v4534_v51 = vmul.f32 %v10064_v35, %v14117_v62  ;;  %vm5694_vm15 = vweird.f32 %v10060_v55  ;;  %v9509_v30 = vmul.f32 -1.442695, %v14154_v40 }
 0x1fd   : > { %vm4539_vm5 = vweird.f32 %v10064_v35  ;;  %v5691_v58 = vmul.f32 %v10060_v55, %v5690_v23  ;;  %v5712_v52 = vand.u32 2147483647, %v14150_v15  ;;  %v14203_v2 = vadd.f32 %v13889_v22, %v12599_v24  ;;  %vm5695_vm4 = vmor %vm5693_vm9, %vm5694_vm15 }
 0x1fe   : > { %v14206_v1 = vadd.f32 %v14106_v8, %v7910_v3  ;;  %v4535_v54 = vsub.f32 1.0, %v4534_v51  ;;  %10067 = vpow2.f32 %v9509_v30  ;;  %v14208_v39 = vadd.f32 1.0, %v10062_v47  ;;  %vm14223_vm2 = vmor %vm4538_vm11, %vm4539_vm5  ;;  %v14245_v3 = vpop.f32.mrf.mxu1  ;;  %9232 = vmatmul.msk.f32.gmra.mxu1 %vm460_vm1, %v11085_v13 }
 0x1ff   : > { %v4545_v7 = vor.u32 1.1754944e-38, %v4544_v53  ;;  %v5692_v0 = vadd.f32 %v10060_v55, %v5691_v58  ;;  %v9490_v14 = vmul.f32 -1.442695, %v14203_v2  ;;  %v9568_v60 = vmul.f32 -1.442695, %v14158_v29 }
 0x200   : > { %v10066_v61 = vpop.eup %10065  ;;  %v4536_v21 = vmul.f32 %v10064_v35, %v4535_v54  ;;  %v5700_v22 = vor.u32 1.1754944e-38, %v5699_v59  ;;  %10069 = vrcp.f32 %v14208_v39  ;;  %v14218_v8 = vadd.f32 %v14045_v46, %v11519_v33  ;;  %v14296_v46 = vld [vmem:[%s11390_s22 + $0x40] sm:$0xff] }
 0x201   : > { %v5696_v38 = vsel %vm5695_vm4, %v10060_v55, %v5692_v0  ;;  %v5704_v19 = vmul.f32 %v10066_v61, %v14150_v15  ;;  %vm5708_vm12 = vweird.f32 %v14150_v15  ;;  %10071 = vpow2.f32 %v9490_v14 }
 0x202   : > { %v4537_v11 = vadd.f32 %v10064_v35, %v4536_v21  ;;  %v5701_v47 = vsel %vm14181_vm10, %v5700_v22, %v5696_v38  ;;  %vm14231_vm0 = vcmp.eq.f32.partialorder %v5712_v52, 8.507059e+37  ;;  %v5714_v62 = vand.u32 2147483648, %v14150_v15 }
 0x203   : > { %v7968_v49 = vmul.f32 %v5701_v47, %v13980_v41  ;;  %v5705_v53 = vsub.f32 1.0, %v5704_v19  ;;  %10073 = vpow2.f32 %v9568_v60  ;;  %v14239_v55 = vadd.f32 %v14029_v48, %v12284_v56  ;;  %v14293_v47 = vpop.f32.mrf.mxu3  ;;  %9285 = vmatmul.msk.f32.gmra.mxu3 %vm460_vm1, %v14034_v44 }
 0x204   : > { %v10068_v16 = vpop.eup %10067  ;;  %v4541_v23 = vsel %vm14223_vm2, %v10064_v35, %v4537_v11  ;;  %vm5709_vm8 = vweird.f32 %v10066_v61  ;;  %v5847_v12 = vand.u32 2147483647, %v14208_v39  ;;  %v9577_v59 = vmul.f32 -1.442695, %v14218_v8  ;;  %v14291_v11 = vpop.f32.mrf.mxu2  ;;  %9254 = vmatmul.msk.f32.gmra.mxu2 %vm460_vm1, %v14296_v46 }
 0x205   : > { %v4546_v41 = vsel %vm14192_vm14, %v4545_v7, %v4541_v23  ;;  %v14251_v51 = vadd.f32 %v14127_v45, %v7968_v49  ;;  %v5706_v48 = vmul.f32 %v10066_v61, %v5705_v53  ;;  %v14253_v30 = vadd.f32 1.0, %v10068_v16  ;;  %vm5710_vm3 = vmor %vm5708_vm12, %vm5709_vm8 }
 0x206   : > { %v14255_v58 = vpop.eup %10069  ;;  %v7891_v35 = vmul.f32 %v4546_v41, %v14013_v42  ;;  %v5849_v52 = vand.u32 2147483648, %v14208_v39  ;;  %v9519_v54 = vmul.f32 -1.442695, %v14239_v55  ;;  %10075 = vpow2.f32 %v9577_v59  ;;  %v14315_v59 = vpop.f32.mrf.mxu0  ;;  %v11087_v41 = vld [vmem:[%s11390_s22 + $0xa0] sm:$0xff] }
 0x207   : > { %v10072_v0 = vpop.eup %10071  ;;  %v5707_v13 = vadd.f32 %v10066_v61, %v5706_v48  ;;  %v5715_v14 = vor.u32 1.1754944e-38, %v5714_v62  ;;  %10077 = vrcp.f32 %v14253_v30  ;;  %v14263_v45 = vadd.f32 %v14031_v26, %v12599_v24  ;;  %9200 = vmatmul.msk.f32.gmra.mxu0 %vm460_vm1, %v11087_v41 }
 0x208   : > { %v14266_v20 = vadd.f32 %v14139_v37, %v7891_v35  ;;  %v4977_v42 = vand.u32 2147483647, %v14253_v30  ;;  %v14272_v7 = vadd.f32 1.0, %v10072_v0  ;;  %v5839_v60 = vmul.f32 %v14255_v58, %v14208_v39 }
 0x209   : > { %v10074_v21 = vpop.eup %10073  ;;  %v5711_v22 = vsel %vm5710_vm3, %v10066_v61, %v5707_v13  ;;  %v4979_v26 = vand.u32 2147483648, %v14253_v30  ;;  %vm5843_vm7 = vweird.f32 %v14208_v39  ;;  %10079 = vpow2.f32 %v9519_v54 }
 0x20a   : > { %v5716_v37 = vsel %vm14231_vm0, %v5715_v14, %v5711_v22  ;;  %10081 = vrcp.f32 %v14272_v7  ;;  %vm14281_vm6 = vcmp.eq.f32.partialorder %v5847_v12, 8.507059e+37  ;;  %v5850_v17 = vor.u32 1.1754944e-38, %v5849_v52 }
 0x20b   : > { %v7969_v38 = vmul.f32 %v5716_v37, %v14017_v4  ;;  %vm4973_vm11 = vweird.f32 %v14253_v30  ;;  %v5840_v61 = vsub.f32 1.0, %v5839_v60  ;;  %v14289_v19 = vadd.f32 %v14085_v28, %v11525_v36 }
 0x20c   : > { %v10076_v4 = vpop.eup %10075  ;;  %vm14302_vm9 = vcmp.eq.f32.partialorder %v4977_v42, 8.507059e+37  ;;  %vm5844_vm10 = vweird.f32 %v14255_v58  ;;  %v14307_v28 = vadd.f32 1.0, %v10074_v21  ;;  %v9500_v49 = vmul.f32 -1.442695, %v14263_v45 }
 0x20d   : > { %v10078_v53 = vpop.eup %10077  ;;  %v14311_v16 = vadd.f32 %v14172_v63, %v7969_v38  ;;  %v4980_v23 = vor.u32 1.1754944e-38, %v4979_v26  ;;  %v4692_v12 = vand.u32 2147483647, %v14272_v7  ;;  %v5841_v44 = vmul.f32 %v14255_v58, %v5840_v61  ;;  %vm5845_vm5 = vmor %vm5843_vm7, %vm5844_vm10 }
 0x20e   : > { %v4969_v48 = vmul.f32 %v10078_v53, %v14253_v30  ;;  %vm4688_vm14 = vweird.f32 %v14272_v7  ;;  %v4694_v35 = vand.u32 2147483648, %v14272_v7  ;;  %10083 = vrcp.f32 %v14307_v28 }
 0x20f   : > { %v10080_v63 = vpop.eup %10079  ;;  %v5842_v52 = vadd.f32 %v14255_v58, %v5841_v44  ;;  %10085 = vpow2.f32 %v9500_v49  ;;  %v9578_v54 = vmul.f32 -1.442695, %v14289_v19  ;;  %v14327_v0 = vadd.f32 %v14186_v5, %v11519_v33 }
 0x210   : > { %v10082_v13 = vpop.eup %10081  ;;  %v4970_v14 = vsub.f32 1.0, %v4969_v48  ;;  %vm4974_vm15 = vweird.f32 %v10078_v53  ;;  %v14333_v42 = vadd.f32 1.0, %v10080_v63  ;;  %v14335_v60 = vadd.f32 1.0, %v10076_v4 }
 0x211   : > { %v4684_v21 = vmul.f32 %v10082_v13, %v14272_v7  ;;  %vm14338_vm4 = vcmp.eq.f32.partialorder %v4692_v12, 8.507059e+37  ;;  %v5846_v5 = vsel %vm5845_vm5, %v14255_v58, %v5842_v52  ;;  %v5862_v26 = vand.u32 2147483647, %v14307_v28  ;;  %vm14350_vm2 = vmor %vm4973_vm11, %vm4974_vm15 }
 0x212   : > { %v4971_v37 = vmul.f32 %v10078_v53, %v4970_v14  ;;  %v5851_v38 = vsel %vm14281_vm6, %v5850_v17, %v5846_v5  ;;  %v5864_v39 = vand.u32 2147483648, %v14307_v28  ;;  %10087 = vrcp.f32 %v14333_v42 }
 0x213   : > { %v4685_v4 = vsub.f32 1.0, %v4684_v21  ;;  %vm4689_vm12 = vweird.f32 %v10082_v13  ;;  %v7978_v58 = vmul.f32 %v5851_v38, %v14073_v18  ;;  %10089 = vpow2.f32 %v9578_v54 }
 0x214   : > { %v10084_v49 = vpop.eup %10083  ;;  %v4972_v12 = vadd.f32 %v10078_v53, %v4971_v37  ;;  %v4695_v44 = vor.u32 1.1754944e-38, %v4694_v35  ;;  %vm5858_vm0 = vweird.f32 %v14307_v28  ;;  %10091 = vrcp.f32 %v14335_v60  ;;  %vm14369_vm3 = vmor %vm4688_vm14, %vm4689_vm12  ;;  %v14382_v37 = vpop.f32.mrf.mxu1  ;;  %9233 = vmatmul.msk.f32.gmra.mxu1 %vm460_vm1, %v11087_v41 }
 0x215   : > { %v10086_v15 = vpop.eup %10085  ;;  %v4686_v17 = vmul.f32 %v10082_v13, %v4685_v4  ;;  %v14358_v30 = vadd.f32 %v14251_v51, %v7978_v58  ;;  %v5854_v48 = vmul.f32 %v10084_v49, %v14307_v28  ;;  %vm14361_vm8 = vcmp.eq.f32.partialorder %v5862_v26, 8.507059e+37 }
 0x216   : > { %v4976_v18 = vsel %vm14350_vm2, %v10078_v53, %v4972_v12  ;;  %v5865_v52 = vor.u32 1.1754944e-38, %v5864_v39  ;;  %vm5123_vm7 = vweird.f32 %v14333_v42  ;;  %v14374_v51 = vadd.f32 1.0, %v10086_v15 }
 0x217   : > { %v4981_v54 = vsel %vm14302_vm9, %v4980_v23, %v4976_v18  ;;  %v4687_v14 = vadd.f32 %v10082_v13, %v4686_v17  ;;  %v5855_v21 = vsub.f32 1.0, %v5854_v48  ;;  %v5127_v5 = vand.u32 2147483647, %v14333_v42 }
 0x218   : > { %v10088_v26 = vpop.eup %10087  ;;  %v7920_v53 = vmul.f32 %v4981_v54, %v14154_v40  ;;  %vm5859_vm6 = vweird.f32 %v10084_v49  ;;  %v5129_v7 = vand.u32 2147483648, %v14333_v42  ;;  %10093 = vrcp.f32 %v14374_v51 }
 0x219   : > { %v10090_v38 = vpop.eup %10089  ;;  %v4691_v62 = vsel %vm14369_vm3, %v10082_v13, %v4687_v14  ;;  %v5856_v23 = vmul.f32 %v10084_v49, %v5855_v21  ;;  %v5119_v39 = vmul.f32 %v10088_v26, %v14333_v42  ;;  %v4842_v61 = vand.u32 2147483647, %v14374_v51  ;;  %vm5860_vm10 = vmor %vm5858_vm0, %vm5859_vm6 }
 0x21a   : > { %v14389_v4 = vpop.eup %10091  ;;  %v8192_v40 = vadd.f32 %v14206_v1, %v7920_v53  ;;  %v4696_v58 = vsel %vm14338_vm4, %v4695_v44, %v4691_v62  ;;  %vm5124_vm11 = vweird.f32 %v10088_v26  ;;  %v4844_v12 = vand.u32 2147483648, %v14374_v51 }
 0x21b   : > { %vm5993_vm9 = vweird.f32 %v14335_v60  ;;  %v7901_v41 = vmul.f32 %v4696_v58, %v14203_v2  ;;  %v5857_v13 = vadd.f32 %v10084_v49, %v5856_v23  ;;  %v5120_v15 = vsub.f32 1.0, %v5119_v39  ;;  %vm14420_vm4 = vmor %vm5123_vm7, %vm5124_vm11 }
 0x21c   : > { %v5989_v17 = vmul.f32 %v14389_v4, %v14335_v60  ;;  %vm14402_vm14 = vcmp.eq.f32.partialorder %v5127_v5, 8.507059e+37  ;;  %v5130_v22 = vor.u32 1.1754944e-38, %v5129_v7  ;;  %vm4838_vm15 = vweird.f32 %v14374_v51 }
 0x21d   : > { %v5997_v44 = vand.u32 2147483647, %v14335_v60  ;;  %v14409_v2 = vadd.f32 %v14266_v20, %v7901_v41  ;;  %v5861_v48 = vsel %vm5860_vm10, %v10084_v49, %v5857_v13  ;;  %v5121_v18 = vmul.f32 %v10088_v26, %v5120_v15  ;;  %v14460_v15 = vpop.f32.mrf.mxu0 }
 0x21e   : > { %vm14411_vm5 = vcmp.eq.f32.partialorder %v4842_v61, 8.507059e+37  ;;  %v5990_v28 = vsub.f32 1.0, %v5989_v17  ;;  %v10094_v54 = vpop.eup %10093  ;;  %v5866_v14 = vsel %vm14361_vm8, %v5865_v52, %v5861_v48  ;;  %v5999_v20 = vand.u32 2147483648, %v14335_v60  ;;  %v11089_v17 = vld [vmem:[%s11390_s22 + $0xa8] sm:$0xff] }
 0x21f   : > { %v14425_v49 = vadd.f32 1.0, %v10090_v38  ;;  %v14429_v5 = vadd.f32 %v14160_v6, %v12284_v56  ;;  %v7979_v53 = vmul.f32 %v5866_v14, %v14158_v29  ;;  %v5122_v63 = vadd.f32 %v10088_v26, %v5121_v18  ;;  %v14440_v38 = vpop.f32.mrf.mxu2  ;;  %v14442_v6 = vpop.f32.mrf.mxu3  ;;  %v14445_v29 = vld [vmem:[%s11390_s22 + $0x48] sm:$0xff]  ;;  %9286 = vmatmul.msk.f32.gmra.mxu3 %vm460_vm1, %v14165_v27  ;;  %9201 = vmatmul.msk.f32.gmra.mxu0 %vm460_vm1, %v11089_v17 }
 0x220   : > { %v4834_v52 = vmul.f32 %v10094_v54, %v14374_v51  ;;  %v4845_v7 = vor.u32 1.1754944e-38, %v4844_v12  ;;  %v5991_v42 = vmul.f32 %v14389_v4, %v5990_v28  ;;  %vm5994_vm2 = vweird.f32 %v14389_v4  ;;  %9255 = vmatmul.msk.f32.gmra.mxu2 %vm460_vm1, %v14445_v29 }
 0x221   : > { %vm14435_vm12 = vcmp.eq.f32.partialorder %v5997_v44, 8.507059e+37  ;;  %10095 = vrcp.f32 %v14425_v49  ;;  %v14452_v23 = vadd.f32 %v14311_v16, %v7979_v53  ;;  %v5126_v39 = vsel %vm14420_vm4, %v10088_v26, %v5122_v63  ;;  %vm5995_vm8 = vmor %vm5993_vm9, %vm5994_vm2 }
 0x222   : > { %v4835_v61 = vsub.f32 1.0, %v4834_v52  ;;  %vm4839_vm0 = vweird.f32 %v10094_v54  ;;  %v5131_v58 = vsel %vm14402_vm14, %v5130_v22, %v5126_v39  ;;  %v5992_v12 = vadd.f32 %v14389_v4, %v5991_v42 }
 0x223   : > { %v6000_v41 = vor.u32 1.1754944e-38, %v5999_v20  ;;  %v9529_v13 = vmul.f32 -1.442695, %v14429_v5  ;;  %v7930_v27 = vmul.f32 %v5131_v58, %v14239_v55  ;;  %v6012_v26 = vand.u32 2147483647, %v14425_v49  ;;  %vm14476_vm3 = vmor %vm4838_vm15, %vm4839_vm0 }
 0x224   : > { %v4836_v16 = vmul.f32 %v10094_v54, %v4835_v61  ;;  %v14472_v1 = vadd.f32 %v14162_v10, %v12599_v24  ;;  %v5996_v55 = vsel %vm5995_vm8, %v14389_v4, %v5992_v12  ;;  %v9587_v44 = vmul.f32 -1.442695, %v14327_v0 }
 0x225   : > { %10097 = vpow2.f32 %v9529_v13  ;;  %v14484_v60 = vadd.f32 %v14245_v3, %v11525_v36  ;;  %v14486_v48 = vadd.f32 %v8192_v40, %v7930_v27  ;;  %v6001_v10 = vsel %vm14435_vm12, %v6000_v41, %v5996_v55 }
 0x226   : > { %v4837_v18 = vadd.f32 %v10094_v54, %v4836_v16  ;;  %v9510_v51 = vmul.f32 -1.442695, %v14472_v1  ;;  %v7988_v14 = vmul.f32 %v6001_v10, %v14218_v8  ;;  %10099 = vpow2.f32 %v9587_v44 }
 0x227   : > { %v10096_v28 = vpop.eup %10095  ;;  %v9588_v4 = vmul.f32 -1.442695, %v14484_v60  ;;  %v14495_v21 = vadd.f32 %v14291_v11, %v12284_v56  ;;  %v6014_v20 = vand.u32 2147483648, %v14425_v49  ;;  %v14514_v42 = vadd.f32 %v14315_v59, %v11519_v33 }
 0x228   : > { %v4841_v3 = vsel %vm14476_vm3, %v10094_v54, %v4837_v18  ;;  %v6004_v40 = vmul.f32 %v10096_v28, %v14425_v49  ;;  %10101 = vpow2.f32 %v9510_v51  ;;  %v14504_v8 = vadd.f32 %v14358_v30, %v7988_v14 }
 0x229   : > { %v4846_v53 = vsel %vm14411_vm5, %v4845_v7, %v4841_v3  ;;  %10103 = vpow2.f32 %v9588_v4  ;;  %v9539_v63 = vmul.f32 -1.442695, %v14495_v21  ;;  %v14510_v54 = vadd.f32 %v14293_v47, %v12599_v24 }
 0x22a   : > { %v7911_v11 = vmul.f32 %v4846_v53, %v14263_v45  ;;  %v6005_v52 = vsub.f32 1.0, %v6004_v40  ;;  %v7641_v30 = vmul.f32 %v13506_v34, %v7640_v43  ;;  %10105 = vrcp.f32 %v13991_v31  ;;  %v777_v45 = vpop.f32.mrf.mxu1  ;;  %9234 = vmatmul.msk.f32.gmra.mxu1 %vm460_vm1, %v11089_v17  ;;  %v14570_v53 = vld [vmem:[%s11390_s22 + $0x50] sm:$0xff] }
 0x22b   : > { %v10098_v62 = vpop.eup %10097  ;;  %vm6009_vm7 = vweird.f32 %v10096_v28  ;;  %v9520_v59 = vmul.f32 -1.442695, %v14510_v54  ;;  %v22244_v32 = vand.u32 2147483648, %v13991_v31  ;;  %vm6008_vm6 = vweird.f32 %v14425_v49 }
 0x22c   : > { %v14523_v47 = vadd.f32 %v14409_v2, %v7911_v11  ;;  %v6006_v7 = vmul.f32 %v10096_v28, %v6005_v52  ;;  %v14525_v39 = vadd.f32 1.0, %v10098_v62  ;;  %v10100_v61 = vpop.eup %10099  ;;  %10107 = vpow2.f32 %v9539_v63  ;;  %vm6010_vm9 = vmor %vm6008_vm6, %vm6009_vm7 }
 0x22d   : > { %v14530_v43 = vor.u32 1.1754944e-38, %v22244_v32  ;;  %v9597_v58 = vmul.f32 -1.442695, %v14514_v42  ;;  %vm6013_vm11 = vcmp.eq.f32.partialorder %v6012_v26, 8.507059e+37  ;;  %v6015_v2 = vor.u32 1.1754944e-38, %v6014_v20  ;;  %v14565_v20 = vpop.f32.mrf.mxu2  ;;  %9256 = vmatmul.msk.f32.gmra.mxu2 %vm460_vm1, %v14570_v53 }
 0x22e   : > { %v10102_v12 = vpop.eup %10101  ;;  %v6007_v41 = vadd.f32 %v10096_v28, %v6006_v7  ;;  %10109 = vrcp.f32 %v14525_v39  ;;  %v14538_v27 = vadd.f32 1.0, %v10100_v61  ;;  %v14542_v49 = vadd.f32 %v14382_v37, %v11525_v36 }
 0x22f   : > { %22245 = vst [vmem:[#allocation28_spill] sm:$0xff] %v14530_v43  ;;  %v10104_v13 = vpop.eup %10103  ;;  %v14536_v17 = vadd.f32 1.0, %v10102_v12  ;;  %10111 = vpow2.f32 %v9520_v59  ;;  %v5277_v22 = vand.u32 2147483647, %v14525_v39  ;;  %v14550_v44 = vadd.f32 %v13506_v34, %v7641_v30  ;;  %v14590_v59 = vpop.f32.mrf.mxu0 }
 0x230   : > { %v6011_v16 = vsel %vm6010_vm9, %v10096_v28, %v6007_v41  ;;  %v14545_v55 = vadd.f32 1.0, %v10104_v13  ;;  %10113 = vpow2.f32 %v9597_v58  ;;  %v14547_v26 = vpop.eup %10105  ;;  %v5279_v10 = vand.u32 2147483648, %v14525_v39 }
 0x231   : > { %v6016_v18 = vsel %vm6013_vm11, %v6015_v2, %v6011_v16  ;;  %10115 = vrcp.f32 %v14536_v17  ;;  %v4992_v51 = vand.u32 2147483647, %v14536_v17  ;;  %v4994_v28 = vand.u32 2147483648, %v14536_v17 }
 0x232   : > { %v7989_v37 = vmul.f32 %v6016_v18, %v14289_v19  ;;  %10117 = vrcp.f32 %v14538_v27  ;;  %v10108_v14 = vpop.eup %10107  ;;  %v6149_v4 = vand.u32 2147483648, %v14538_v27  ;;  %v9598_v3 = vmul.f32 -1.442695, %v14542_v49  ;;  %v14567_v19 = vpop.f32.mrf.mxu3  ;;  %9287 = vmatmul.msk.f32.gmra.mxu3 %vm460_vm1, %v14296_v46 }
 0x233   : > { %10119 = vrcp.f32 %v14545_v55  ;;  %v14563_v40 = vadd.f32 %v14460_v15, %v11519_v33  ;;  %vm5273_vm10 = vweird.f32 %v14525_v39  ;;  %vm14580_vm14 = vcmp.eq.f32.partialorder %v5277_v22, 8.507059e+37 }
 0x234   : > { %v10110_v63 = vpop.eup %10109  ;;  %v14577_v11 = vadd.f32 %v14452_v23, %v7989_v37  ;;  %v14585_v52 = vadd.f32 %v777_v45, %v11525_v36  ;;  %v5280_v7 = vor.u32 1.1754944e-38, %v5279_v10  ;;  %vm4988_vm15 = vweird.f32 %v14536_v17  ;;  %v11091_v23 = vld [vmem:[%s11390_s22 + $0xb0] sm:$0xff] }
 0x235   : > { %v10112_v62 = vpop.eup %10111  ;;  %v5269_v30 = vmul.f32 %v10110_v63, %v14525_v39  ;;  %v6147_v46 = vand.u32 2147483647, %v14538_v27  ;;  %9202 = vmatmul.msk.f32.gmra.mxu0 %vm460_vm1, %v11091_v23  ;;  %vm14594_vm5 = vcmp.eq.f32.partialorder %v4992_v51, 8.507059e+37  ;;  %v4995_v45 = vor.u32 1.1754944e-38, %v4994_v28 }
 0x236   : > { %v10114_v61 = vpop.eup %10113  ;;  %v6162_v58 = vand.u32 2147483647, %v14545_v55  ;;  %v14599_v12 = vadd.f32 1.0, %v10108_v14  ;;  %vm5274_vm4 = vweird.f32 %v10110_v63  ;;  %vm6143_vm2 = vweird.f32 %v14538_v27 }
 0x237   : > { %v10116_v41 = vpop.eup %10115  ;;  %v5270_v2 = vsub.f32 1.0, %v5269_v30  ;;  %v6150_v13 = vor.u32 1.1754944e-38, %v6149_v4  ;;  %v6164_v16 = vand.u32 2147483648, %v14545_v55  ;;  %vm6158_vm12 = vweird.f32 %v14545_v55  ;;  %vm14622_vm8 = vmor %vm5273_vm10, %vm5274_vm4 }
 0x238   : > { %v10118_v22 = vpop.eup %10117  ;;  %v4984_v18 = vmul.f32 %v10116_v41, %v14536_v17  ;;  %v14605_v10 = vadd.f32 1.0, %v10112_v62  ;;  %v14607_v37 = vadd.f32 1.0, %v10114_v61  ;;  %10121 = vpow2.f32 %v9598_v3 }
 0x239   : > { %v10120_v51 = vpop.eup %10119  ;;  %v5271_v28 = vmul.f32 %v10110_v63, %v5270_v2  ;;  %v6139_v14 = vmul.f32 %v10118_v22, %v14538_v27  ;;  %vm14610_vm0 = vcmp.eq.f32.partialorder %v6147_v46, 8.507059e+37  ;;  %10123 = vrcp.f32 %v14599_v12 }
 0x23a   : > { %v14617_v4 = vadd.f32 %v14442_v6, %v12599_v24  ;;  %v4985_v3 = vsub.f32 1.0, %v4984_v18  ;;  %vm4989_vm3 = vweird.f32 %v10116_v41  ;;  %v6154_v46 = vmul.f32 %v10120_v51, %v14545_v55 }
 0x23b   : > { %vm14627_vm7 = vcmp.eq.f32.partialorder %v6162_v58, 8.507059e+37  ;;  %v5272_v2 = vadd.f32 %v10110_v63, %v5271_v28  ;;  %v6140_v35 = vsub.f32 1.0, %v6139_v14  ;;  %vm6144_vm6 = vweird.f32 %v10118_v22  ;;  %vm14636_vm9 = vmor %vm4988_vm15, %vm4989_vm3 }
 0x23c   : > { %v6165_v6 = vor.u32 1.1754944e-38, %v6164_v16  ;;  %v4986_v43 = vmul.f32 %v10116_v41, %v4985_v3  ;;  %v6155_v25 = vsub.f32 1.0, %v6154_v46  ;;  %vm6159_vm11 = vweird.f32 %v10120_v51 }
 0x23d   : > { %10125 = vrcp.f32 %v14605_v10  ;;  %v5276_v39 = vsel %vm14622_vm8, %v10110_v63, %v5272_v2  ;;  %v6141_v58 = vmul.f32 %v10118_v22, %v6140_v35  ;;  %vm5423_vm10 = vweird.f32 %v14599_v12  ;;  %v14645_v63 = vpop.f32.mrf.mxu1  ;;  %9235 = vmatmul.msk.f32.gmra.mxu1 %vm460_vm1, %v11091_v23  ;;  %vm6160_vm4 = vmor %vm6158_vm12, %vm6159_vm11 }
 0x23e   : > { %v5427_v28 = vand.u32 2147483647, %v14599_v12  ;;  %v10122_v16 = vpop.eup %10121  ;;  %v5281_v14 = vsel %vm14580_vm14, %v5280_v7, %v5276_v39  ;;  %v4987_v3 = vadd.f32 %v10116_v41, %v4986_v43  ;;  %v6156_v46 = vmul.f32 %v10120_v51, %v6155_v25  ;;  %vm6145_vm14 = vmor %vm6143_vm2, %vm6144_vm6 }
 0x23f   : > { %v5429_v62 = vand.u32 2147483648, %v14599_v12  ;;  %v10124_v17 = vpop.eup %10123  ;;  %v7940_v2 = vmul.f32 %v5281_v14, %v14429_v5  ;;  %v6142_v35 = vadd.f32 %v10118_v22, %v6141_v58  ;;  %vm5138_vm15 = vweird.f32 %v14605_v10 }
 0x240   : > { %10127 = vrcp.f32 %v14607_v37  ;;  %v4991_v15 = vsel %vm14636_vm9, %v10116_v41, %v4987_v3  ;;  %v6157_v25 = vadd.f32 %v10120_v51, %v6156_v46  ;;  %v5419_v43 = vmul.f32 %v10124_v17, %v14599_v12 }
 0x241   : > { %v5142_v7 = vand.u32 2147483647, %v14605_v10  ;;  %v8194_v23 = vadd.f32 %v14486_v48, %v7940_v2  ;;  %v4996_v5 = vsel %vm14594_vm5, %v4995_v45, %v4991_v15  ;;  %v6146_v39 = vsel %vm6145_vm14, %v10118_v22, %v6142_v35 }
 0x242   : > { %vm5424_vm8 = vweird.f32 %v10124_v17  ;;  %v7921_v27 = vmul.f32 %v4996_v5, %v14472_v1  ;;  %v6151_v18 = vsel %vm14610_vm0, %v6150_v13, %v6146_v39  ;;  %v6161_v58 = vsel %vm6160_vm4, %v10120_v51, %v6157_v25 }
 0x243   : > { %v10126_v41 = vpop.eup %10125  ;;  %v5420_v14 = vsub.f32 1.0, %v5419_v43  ;;  %v7998_v3 = vmul.f32 %v6151_v18, %v14327_v0  ;;  %v6166_v48 = vsel %vm14627_vm7, %v6165_v6, %v6161_v58  ;;  %v5144_v45 = vand.u32 2147483648, %v14605_v10  ;;  %vm14684_vm2 = vmor %vm5423_vm10, %vm5424_vm8  ;;  %v14723_v18 = vld [vmem:[%s11390_s22 + $0x58] sm:$0xff] }
 0x244   : > { %v5134_v32 = vmul.f32 %v10126_v41, %v14605_v10  ;;  %v8223_v55 = vadd.f32 %v14523_v47, %v7921_v27  ;;  %v7999_v22 = vmul.f32 %v6166_v48, %v14484_v60  ;;  %vm14674_vm5 = vcmp.eq.f32.partialorder %v5427_v28, 8.507059e+37  ;;  %v14718_v27 = vpop.f32.mrf.mxu2  ;;  %9257 = vmatmul.msk.f32.gmra.mxu2 %vm460_vm1, %v14723_v18 }
 0x245   : > { %v5421_v46 = vmul.f32 %v10124_v17, %v5420_v14  ;;  %v14679_v51 = vadd.f32 %v14504_v8, %v7998_v3  ;;  %v5430_v30 = vor.u32 1.1754944e-38, %v5429_v62  ;;  %vm5139_vm12 = vweird.f32 %v10126_v41 }
 0x246   : > { %v10128_v13 = vpop.eup %10127  ;;  %v5135_v47 = vsub.f32 1.0, %v5134_v32  ;;  %v14689_v60 = vadd.f32 %v14577_v11, %v7999_v22  ;;  %vm14691_vm0 = vcmp.eq.f32.partialorder %v5142_v7, 8.507059e+37  ;;  %v5145_v2 = vor.u32 1.1754944e-38, %v5144_v45  ;;  %vm14703_vm3 = vmor %vm5138_vm15, %vm5139_vm12  ;;  %v670_v45 = vpop.f32.mrf.mxu0 }
 0x247   : > { %v5422_v61 = vadd.f32 %v10124_v17, %v5421_v46  ;;  %v6289_v8 = vmul.f32 %v10128_v13, %v14607_v37  ;;  %v6297_v12 = vand.u32 2147483647, %v14607_v37  ;;  %v14697_v35 = vadd.f32 1.0, %v10122_v16 }
 0x248   : > { %v5136_v28 = vmul.f32 %v10126_v41, %v5135_v47  ;;  %v14709_v25 = vadd.f32 %v14440_v38, %v12284_v56  ;;  %v9530_v43 = vmul.f32 -1.442695, %v14617_v4  ;;  %v6299_v5 = vand.u32 2147483648, %v14607_v37  ;;  %v14720_v38 = vpop.f32.mrf.mxu3  ;;  %9288 = vmatmul.msk.f32.gmra.mxu3 %vm460_vm1, %v14445_v29  ;;  %v11093_v29 = vld [vmem:[%s11390_s22 + $0xb8] sm:$0xff] }
 0x249   : > { %v5426_v62 = vsel %vm14684_vm2, %v10124_v17, %v5422_v61  ;;  %v6290_v15 = vsub.f32 1.0, %v6289_v8  ;;  %10129 = vrcp.f32 %v14697_v35  ;;  %vm6294_vm7 = vweird.f32 %v10128_v13  ;;  %9203 = vmatmul.msk.f32.gmra.mxu0 %vm460_vm1, %v11093_v29 }
 0x24a   : > { %v5431_v16 = vsel %vm14674_vm5, %v5430_v30, %v5426_v62  ;;  %v5137_v7 = vadd.f32 %v10126_v41, %v5136_v28  ;;  %v9607_v39 = vmul.f32 -1.442695, %v14563_v40  ;;  %vm6293_vm6 = vweird.f32 %v14607_v37 }
 0x24b   : > { %v7950_v10 = vmul.f32 %v5431_v16, %v14495_v21  ;;  %v6291_v17 = vmul.f32 %v10128_v13, %v6290_v15  ;;  %v9549_v58 = vmul.f32 -1.442695, %v14709_v25  ;;  %10131 = vpow2.f32 %v9530_v43  ;;  %vm6295_vm9 = vmor %vm6293_vm6, %vm6294_vm7 }
 0x24c   : > { %v5141_v21 = vsel %vm14703_vm3, %v10126_v41, %v5137_v7  ;;  %vm14737_vm11 = vcmp.eq.f32.partialorder %v6297_v12, 8.507059e+37  ;;  %v6300_v37 = vor.u32 1.1754944e-38, %v6299_v5  ;;  %v14748_v46 = vadd.f32 %v14565_v20, %v12284_v56 }
 0x24d   : > { %v14733_v14 = vadd.f32 %v8194_v23, %v7950_v10  ;;  %v5146_v3 = vsel %vm14691_vm0, %v5145_v2, %v5141_v21  ;;  %v6292_v48 = vadd.f32 %v10128_v13, %v6291_v17  ;;  %10133 = vpow2.f32 %v9549_v58 }
 0x24e   : > { %v7931_v41 = vmul.f32 %v5146_v3, %v14510_v54  ;;  %v9608_v23 = vmul.f32 -1.442695, %v14585_v52  ;;  %10135 = vpow2.f32 %v9607_v39  ;;  %v14752_v1 = vadd.f32 %v14567_v19, %v12599_v24 }
 0x24f   : > { %v6296_v22 = vsel %vm6295_vm9, %v10128_v13, %v6292_v48  ;;  %v10130_v0 = vpop.eup %10129  ;;  %v14756_v54 = vmul.f32 %v14547_v26, %v13991_v31  ;;  %v9559_v61 = vmul.f32 -1.442695, %v14748_v46  ;;  %v14767_v19 = vadd.f32 %v14590_v59, %v11519_v33 }
 0x250   : > { %v14758_v30 = vadd.f32 %v8223_v55, %v7931_v41  ;;  %v6301_v47 = vsel %vm14737_vm11, %v6300_v37, %v6296_v22  ;;  %10137 = vpow2.f32 %v9608_v23  ;;  %v6304_v20 = vmul.f32 %v10130_v0, %v14697_v35  ;;  %v14824_v23 = vpop.f32.mrf.mxu3  ;;  %v14827_v22 = vld [vmem:[%s11390_s22 + $0x60] sm:$0xff]  ;;  %9289 = vmatmul.msk.f32.gmra.mxu3 %vm460_vm1, %v14570_v53 }
 0x251   : > { %v8008_v13 = vmul.f32 %v6301_v47, %v14514_v42  ;;  %22268 = vst [vmem:[#allocation29_spill] sm:$0xff] %v14767_v19  ;;  %v10132_v6 = vpop.eup %10131  ;;  %v6312_v8 = vand.u32 2147483647, %v14697_v35  ;;  %v6314_v55 = vand.u32 2147483648, %v14697_v35  ;;  %v9540_v28 = vmul.f32 -1.442695, %v14752_v1  ;;  %v14776_v42 = vpop.f32.mrf.mxu1  ;;  %9236 = vmatmul.msk.f32.gmra.mxu1 %vm460_vm1, %v11093_v29 }
 0x252   : > { %v14774_v2 = vadd.f32 %v14645_v63, %v11525_v36  ;;  %v6305_v59 = vsub.f32 1.0, %v6304_v20  ;;  %v14782_v62 = vadd.f32 1.0, %v10132_v6  ;;  %10139 = vpow2.f32 %v9559_v61  ;;  %22274 = vst [vmem:[#allocation31_spill] sm:$0xff] %v14827_v22 }
 0x253   : > { %v14780_v12 = vadd.f32 %v14679_v51, %v8008_v13  ;;  %v10134_v11 = vpop.eup %10133  ;;  %vm6308_vm10 = vweird.f32 %v14697_v35  ;;  %vm6309_vm15 = vweird.f32 %v10130_v0  ;;  %10141 = vpow2.f32 %v9540_v28  ;;  %v14850_v28 = vld [vmem:[%s11390_s22 + $0xc0] sm:$0xff] }
 0x254   : > { %22269 = vst [vmem:[#allocation30_spill] sm:$0xff] %v14774_v2  ;;  %v10136_v63 = vpop.eup %10135  ;;  %v6306_v43 = vmul.f32 %v10130_v0, %v6305_v59  ;;  %v14786_v16 = vadd.f32 1.0, %v10134_v11  ;;  %10143 = vrcp.f32 %v14782_v62  ;;  %v9617_v51 = vmul.f32 -1.442695, %v14767_v19  ;;  %vm14807_vm4 = vmor %vm6308_vm10, %vm6309_vm15 }
 0x255   : > { %vm14790_vm14 = vcmp.eq.f32.partialorder %v6312_v8, 8.507059e+37  ;;  %v6315_v10 = vor.u32 1.1754944e-38, %v6314_v55  ;;  %v5292_v17 = vand.u32 2147483647, %v14782_v62  ;;  %v14795_v39 = vadd.f32 1.0, %v10136_v63  ;;  %v14847_v55 = vpop.f32.mrf.mxu0  ;;  %9204 = vmatmul.msk.f32.gmra.mxu0 %vm460_vm1, %v14850_v28 }
 0x256   : > { %v10138_v7 = vpop.eup %10137  ;;  %v6307_v21 = vadd.f32 %v10130_v0, %v6306_v43  ;;  %10145 = vrcp.f32 %v14786_v16  ;;  %v14799_v58 = vmul.f32 -1.442695, %v14774_v2  ;;  %v14802_v3 = vadd.f32 %v670_v45, %v11519_v33  ;;  %v14822_v45 = vpop.f32.mrf.mxu2  ;;  %9258 = vmatmul.msk.f32.gmra.mxu2 %vm460_vm1, %v14827_v22 }
 0x257   : > { %v5577_v32 = vand.u32 2147483647, %v14786_v16  ;;  %v5294_v29 = vand.u32 2147483648, %v14782_v62  ;;  %10147 = vrcp.f32 %v14795_v39  ;;  %v14816_v41 = vadd.f32 %v14720_v38, %v12599_v24 }
 0x258   : > { %v10140_v37 = vpop.eup %10139  ;;  %v6311_v33 = vsel %vm14807_vm4, %v10130_v0, %v6307_v21  ;;  %v5579_v35 = vand.u32 2147483648, %v14786_v16  ;;  %vm5288_vm8 = vweird.f32 %v14782_v62  ;;  %10149 = vpow2.f32 %v9617_v51 }
 0x259   : > { %v10142_v38 = vpop.eup %10141  ;;  %v6316_v0 = vsel %vm14790_vm14, %v6315_v10, %v6311_v33  ;;  %vm5573_vm5 = vweird.f32 %v14786_v16  ;;  %vm14836_vm2 = vcmp.eq.f32.partialorder %v5292_v17, 8.507059e+37  ;;  %v14840_v13 = vadd.f32 1.0, %v10138_v7 }
 0x25a   : > { %v10144_v20 = vpop.eup %10143  ;;  %v8009_v61 = vmul.f32 %v6316_v0, %v14542_v49  ;;  %v6447_v6 = vand.u32 2147483647, %v14795_v39  ;;  %v6449_v8 = vand.u32 2147483648, %v14795_v39  ;;  %v14845_v53 = vadd.f32 1.0, %v10140_v37 }
 0x25b   : > { %vm14854_vm12 = vcmp.eq.f32.partialorder %v5577_v32, 8.507059e+37  ;;  %v5284_v11 = vmul.f32 %v10144_v20, %v14782_v62  ;;  %v5295_v49 = vor.u32 1.1754944e-38, %v5294_v29  ;;  %10151 = vrcp.f32 %v14840_v13 }
 0x25c   : > { %v10146_v63 = vpop.eup %10145  ;;  %v14861_v43 = vadd.f32 %v14689_v60, %v8009_v61  ;;  %v5580_v51 = vor.u32 1.1754944e-38, %v5579_v35  ;;  %vm6443_vm0 = vweird.f32 %v14795_v39  ;;  %v6464_v7 = vand.u32 2147483648, %v14840_v13 }
 0x25d   : > { %v14865_v5 = vadd.f32 1.0, %v10142_v38  ;;  %v10148_v10 = vpop.eup %10147  ;;  %v5569_v17 = vmul.f32 %v10146_v63, %v14786_v16  ;;  %v5285_v21 = vsub.f32 1.0, %v5284_v11  ;;  %vm5289_vm3 = vweird.f32 %v10144_v20 }
 0x25e   : > { %10153 = vrcp.f32 %v14845_v53  ;;  %v10150_v48 = vpop.eup %10149  ;;  %vm5574_vm7 = vweird.f32 %v10146_v63  ;;  %v6439_v32 = vmul.f32 %v10148_v10, %v14795_v39  ;;  %vm14870_vm6 = vcmp.eq.f32.partialorder %v6447_v6, 8.507059e+37  ;;  %vm14882_vm14 = vmor %vm5288_vm8, %vm5289_vm3 }
 0x25f   : > { %v6450_v29 = vor.u32 1.1754944e-38, %v6449_v8  ;;  %v6462_v37 = vand.u32 2147483647, %v14840_v13  ;;  %v5570_v33 = vsub.f32 1.0, %v5569_v17  ;;  %v5286_v35 = vmul.f32 %v10144_v20, %v5285_v21  ;;  %vm14893_vm8 = vmor %vm5573_vm5, %vm5574_vm7 }
 0x260   : > { %vm6444_vm11 = vweird.f32 %v10148_v10  ;;  %vm6458_vm9 = vweird.f32 %v14840_v13  ;;  %v5727_v38 = vand.u32 2147483647, %v14845_v53  ;;  %v6440_v61 = vsub.f32 1.0, %v6439_v32 }
 0x261   : > { %v6465_v6 = vor.u32 1.1754944e-38, %v6464_v7  ;;  %v5729_v8 = vand.u32 2147483648, %v14845_v53  ;;  %10155 = vrcp.f32 %v14865_v5  ;;  %v10152_v11 = vpop.eup %10151  ;;  %v5571_v17 = vmul.f32 %v10146_v63, %v5570_v33  ;;  %vm6445_vm7 = vmor %vm6443_vm0, %vm6444_vm11 }
 0x262   : > { %v5287_v21 = vadd.f32 %v10144_v20, %v5286_v35  ;;  %vm5723_vm4 = vweird.f32 %v14845_v53  ;;  %v6441_v32 = vmul.f32 %v10148_v10, %v6440_v61  ;;  %v6454_v7 = vmul.f32 %v10152_v11, %v14840_v13 }
 0x263   : > { %vm14898_vm3 = vcmp.eq.f32.partialorder %v6462_v37, 8.507059e+37  ;;  %vm14902_vm15 = vcmp.eq.f32.partialorder %v5727_v38, 8.507059e+37  ;;  %v5442_v35 = vand.u32 2147483647, %v14865_v5  ;;  %v5572_v50 = vadd.f32 %v10146_v63, %v5571_v17 }
 0x264   : > { %v10154_v9 = vpop.eup %10153  ;;  %v5291_v16 = vsel %vm14882_vm14, %v10144_v20, %v5287_v21  ;;  %vm6459_vm5 = vweird.f32 %v10152_v11  ;;  %v5730_v22 = vor.u32 1.1754944e-38, %v5729_v8  ;;  %v6442_v37 = vadd.f32 %v10148_v10, %v6441_v32 }
 0x265   : > { %v5296_v61 = vsel %vm14836_vm2, %v5295_v49, %v5291_v16  ;;  %v6455_v2 = vsub.f32 1.0, %v6454_v7  ;;  %v5719_v31 = vmul.f32 %v10154_v9, %v14845_v53  ;;  %v5576_v38 = vsel %vm14893_vm8, %v10146_v63, %v5572_v50  ;;  %vm14930_vm2 = vmor %vm6458_vm9, %vm6459_vm5  ;;  %v14954_v53 = vpop.f32.mrf.mxu1  ;;  %9237 = vmatmul.msk.f32.gmra.mxu1 %vm460_vm1, %v14850_v28 }
 0x266   : > { %v7941_v19 = vmul.f32 %v5296_v61, %v14617_v4  ;;  %vm5724_vm10 = vweird.f32 %v10154_v9  ;;  %v5444_v20 = vand.u32 2147483648, %v14865_v5  ;;  %v5581_v47 = vsel %vm14854_vm12, %v5580_v51, %v5576_v38 }
 0x267   : > { %v10156_v0 = vpop.eup %10155  ;;  %v6446_v49 = vsel %vm6445_vm7, %v10148_v10, %v6442_v37  ;;  %v6456_v8 = vmul.f32 %v10152_v11, %v6455_v2  ;;  %v5720_v17 = vsub.f32 1.0, %v5719_v31  ;;  %v7960_v21 = vmul.f32 %v5581_v47, %v14709_v25  ;;  %vm14938_vm0 = vmor %vm5723_vm4, %vm5724_vm10 }
 0x268   : > { %v8225_v50 = vadd.f32 %v14758_v30, %v7941_v19  ;;  %v6451_v4 = vsel %vm14870_vm6, %v6450_v29, %v6446_v49  ;;  %v5434_v39 = vmul.f32 %v10156_v0, %v14865_v5  ;;  %vm5439_vm12 = vweird.f32 %v10156_v0  ;;  %v15052_v30 = vpop.f32.mrf.mxu0 }
 0x269   : > { %v8018_v63 = vmul.f32 %v6451_v4, %v14563_v40  ;;  %v6457_v62 = vadd.f32 %v10152_v11, %v6456_v8  ;;  %v5721_v31 = vmul.f32 %v10154_v9, %v5720_v17  ;;  %v8196_v25 = vadd.f32 %v14733_v14, %v7960_v21  ;;  %v884_v17 = vpop.f32.mrf.mxu2  ;;  %v991_v21 = vpop.f32.mrf.mxu3  ;;  %v15029_v4 = vld [vmem:[%s11390_s22 + $0x68] sm:$0xff]  ;;  %9290 = vmatmul.msk.f32.gmra.mxu3 %vm460_vm1, %v14723_v18 }
 0x26a   : > { %v5435_v40 = vsub.f32 1.0, %v5434_v39  ;;  %v14942_v19 = vadd.f32 1.0, %v10150_v48  ;;  %10157 = vpow2.f32 %v14799_v58  ;;  %v14952_v14 = vadd.f32 %v14718_v27, %v12284_v56  ;;  %9259 = vmatmul.msk.f32.gmra.mxu2 %vm460_vm1, %v15029_v4 }
 0x26b   : > { %v14946_v2 = vadd.f32 %v14780_v12, %v8018_v63  ;;  %v6461_v13 = vsel %vm14930_vm2, %v10152_v11, %v6457_v62  ;;  %v5722_v51 = vadd.f32 %v10154_v9, %v5721_v31  ;;  %vm22293_vm6 = vweird.f32 %v13506_v34  ;;  %v11097_v63 = vld [vmem:[%s21939_s2] sm:$0xff] }
 0x26c   : > { %vm22294_vm11 = vweird.f32 %v12619_v57  ;;  %v6466_v58 = vsel %vm14898_vm3, %v6465_v6, %v6461_v13  ;;  %v5436_v10 = vmul.f32 %v10156_v0, %v5435_v40  ;;  %10159 = vrcp.f32 %v14942_v19 }
 0x26d   : > { %vm14962_vm9 = vmor %vm22294_vm11, %vm22293_vm6  ;;  %v9627_v27 = vmul.f32 -1.442695, %v14802_v3  ;;  %v8019_v48 = vmul.f32 %v6466_v58, %v14585_v52  ;;  %v5726_v28 = vsel %vm14938_vm0, %v10154_v9, %v5722_v51  ;;  %vm22297_vm10 = vweird.f32 %v14865_v5  ;;  %v15064_v60 = vpop.f32.mrf.mxu1 }
 0x26e   : > { %vm14976_vm14 = vmor %vm22297_vm10, %vm5439_vm12  ;;  %vm14980_vm4 = vcmp.eq.f32.partialorder %v5442_v35, 8.507059e+37  ;;  %v5445_v29 = vor.u32 1.1754944e-38, %v5444_v20  ;;  %v5731_v6 = vsel %vm14902_vm15, %v5730_v22, %v5726_v28  ;;  %v5437_v11 = vadd.f32 %v10156_v0, %v5436_v10 }
 0x26f   : > { %v9569_v52 = vmul.f32 -1.442695, %v14952_v14  ;;  %v9550_v9 = vmul.f32 -1.442695, %v14816_v41  ;;  %v22302_v32 = vsub.f32 1.0, %v14756_v54  ;;  %v14996_v35 = vadd.f32 %v14861_v43, %v8019_v48 }
 0x270   : > { %v7970_v33 = vmul.f32 %v5731_v6, %v14748_v46  ;;  %v10158_v22 = vpop.eup %10157  ;;  %v5441_v16 = vsel %vm14976_vm14, %v10156_v0, %v5437_v11  ;;  %v15003_v61 = vadd.f32 %v14776_v42, %v11525_v36  ;;  %v15007_v37 = vadd.f32 %v14822_v45, %v12284_v56 }
 0x271   : > { %v7656_v7 = vmul.f32 %v14547_v26, %v22302_v32  ;;  %10161 = vpow2.f32 %v9569_v52  ;;  %v5446_v43 = vsel %vm14980_vm4, %v5445_v29, %v5441_v16  ;;  %v15013_v38 = vadd.f32 1.0, %v10158_v22  ;;  %v15148_v32 = vld [vmem:[%s11390_s22 + $0x70] sm:$0xff] }
 0x272   : > { %v15009_v54 = vadd.f32 %v8196_v25, %v7970_v33  ;;  %10163 = vpow2.f32 %v9550_v9  ;;  %v10160_v46 = vpop.eup %10159  ;;  %v7951_v20 = vmul.f32 %v5446_v43, %v14752_v1  ;;  %v6597_v0 = vand.u32 2147483647, %v14942_v19 }
 0x273   : > { %10165 = vpow2.f32 %v9627_v27  ;;  %v9628_v36 = vmul.f32 -1.442695, %v15003_v61  ;;  %v15019_v42 = vadd.f32 %v14547_v26, %v7656_v7  ;;  %v6589_v45 = vmul.f32 %v10160_v46, %v14942_v19 }
 0x274   : > { %10167 = vrcp.f32 %v15013_v38  ;;  %v9579_v47 = vmul.f32 -1.442695, %v15007_v37  ;;  %v15024_v49 = vadd.f32 %v8225_v50, %v7951_v20  ;;  %v6599_v8 = vand.u32 2147483648, %v14942_v19 }
 0x275   : > { %v6614_v1 = vand.u32 2147483648, %v15013_v38  ;;  %10169 = vpow2.f32 %v9628_v36  ;;  %v6590_v39 = vsub.f32 1.0, %v6589_v45  ;;  %vm6593_vm15 = vweird.f32 %v14942_v19 }
 0x276   : > { %v15038_v50 = vadd.f32 %v14824_v23, %v12599_v24  ;;  %v15043_v62 = vperm.slane %v11097_v63, 4  ;;  %vm6594_vm8 = vweird.f32 %v10160_v46  ;;  %vm15045_vm3 = vcmp.eq.f32.partialorder %v6597_v0, 8.507059e+37  ;;  %v11098_v23 = vld [vmem:[%s11390_s22 + $0xc8] sm:$0xff] }
 0x277   : > { %v10162_v59 = vpop.eup %10161  ;;  %v6612_v18 = vand.u32 2147483647, %v15013_v38  ;;  %v15050_v25 = vperm.slane %v11097_v63, 5  ;;  %9205 = vmatmul.msk.f32.gmra.mxu0 %vm460_vm1, %v11098_v23  ;;  %v6591_v13 = vmul.f32 %v10160_v46, %v6590_v39  ;;  %10171 = vpow2.f32 %v9579_v47  ;;  %9238 = vmatmul.msk.f32.gmra.mxu1 %vm460_vm1, %v11098_v23  ;;  %vm6595_vm7 = vmor %vm6593_vm15, %vm6594_vm8 }
 0x278   : > { %v10164_v40 = vpop.eup %10163  ;;  %v15056_v51 = vadd.f32 1.0, %v10162_v59  ;;  %v15059_v58 = vadd.f32 %v884_v17, %v12284_v56  ;;  %v6600_v27 = vor.u32 1.1754944e-38, %v6599_v8  ;;  %vm6608_vm5 = vweird.f32 %v15013_v38 }
 0x279   : > { %v10166_v10 = vpop.eup %10165  ;;  %v6615_v48 = vor.u32 1.1754944e-38, %v6614_v1  ;;  %v15062_v28 = vadd.f32 1.0, %v10164_v40  ;;  %v6592_v29 = vadd.f32 %v10160_v46, %v6591_v13  ;;  %v9560_v6 = vmul.f32 -1.442695, %v15038_v50 }
 0x27a   : > { %v10168_v15 = vpop.eup %10167  ;;  %10173 = vrcp.f32 %v15056_v51  ;;  %v15071_v11 = vadd.f32 %v14847_v55, %v15043_v62  ;;  %vm15077_vm2 = vcmp.eq.f32.partialorder %v6612_v18, 8.507059e+37  ;;  %v5877_v7 = vand.u32 2147483647, %v15056_v51 }
 0x27b   : > { %v10170_v52 = vpop.eup %10169  ;;  %v6604_v9 = vmul.f32 %v10168_v15, %v15013_v38  ;;  %10175 = vrcp.f32 %v15062_v28  ;;  %v15085_v33 = vadd.f32 %v14954_v53, %v15050_v25  ;;  %v6596_v55 = vsel %vm6595_vm7, %v10160_v46, %v6592_v29  ;;  %v22307_v53 = vld [vmem:[#allocation29_spill] sm:$0xff] }
 0x27c   : > { %v5879_v22 = vand.u32 2147483648, %v15056_v51  ;;  %v15089_v19 = vmul.f32 -1.442695, %v15059_v58  ;;  %v15092_v16 = vadd.f32 %v991_v21, %v12599_v24  ;;  %v6601_v43 = vsel %vm15045_vm3, %v6600_v27, %v6596_v55 }
 0x27d   : > { %v6605_v20 = vsub.f32 1.0, %v6604_v9  ;;  %vm5873_vm12 = vweird.f32 %v15056_v51  ;;  %v5592_v0 = vand.u32 2147483647, %v15062_v28  ;;  %v10172_v36 = vpop.eup %10171  ;;  %v8028_v45 = vmul.f32 %v6601_v43, %v22307_v53 }
 0x27e   : > { %v5594_v46 = vand.u32 2147483648, %v15062_v28  ;;  %v15100_v47 = vadd.f32 1.0, %v10166_v10  ;;  %v15102_v8 = vadd.f32 1.0, %v10170_v52  ;;  %vm6609_vm0 = vweird.f32 %v10168_v15  ;;  %v22312_v52 = vld [vmem:[#allocation27_spill] sm:$0xff] }
 0x27f   : > { %v6606_v1 = vmul.f32 %v10168_v15, %v6605_v20  ;;  %vm15104_vm6 = vcmp.eq.f32.partialorder %v5877_v7, 8.507059e+37  ;;  %10177 = vpow2.f32 %v9560_v6  ;;  %v15111_v39 = vadd.f32 %v14946_v2, %v8028_v45  ;;  %vm6610_vm14 = vmor %vm6608_vm5, %vm6609_vm0 }
 0x280   : > { %v15108_v21 = vpop.eup %10173  ;;  %v5880_v63 = vor.u32 1.1754944e-38, %v5879_v22  ;;  %vm5588_vm11 = vweird.f32 %v15062_v28  ;;  %10179 = vrcp.f32 %v15100_v47  ;;  %vm15119_vm10 = vcmp.eq.f32.partialorder %v5592_v0, 8.507059e+37  ;;  %v15143_v0 = vpop.f32.mrf.mxu2  ;;  %9260 = vmatmul.msk.f32.gmra.mxu2 %vm460_vm1, %v15148_v32 }
 0x281   : > { %v15115_v59 = vpop.eup %10175  ;;  %v6607_v31 = vadd.f32 %v10168_v15, %v6606_v1  ;;  %v5869_v18 = vmul.f32 %v15108_v21, %v15056_v51  ;;  %v15123_v40 = vadd.f32 1.0, %v10172_v36  ;;  %v5595_v13 = vor.u32 1.1754944e-38, %v5594_v46  ;;  %v15145_v36 = vpop.f32.mrf.mxu3 }
 0x282   : > { %v5584_v2 = vmul.f32 %v15115_v59, %v15062_v28  ;;  %v6749_v10 = vand.u32 2147483648, %v15100_v47  ;;  %10181 = vrcp.f32 %v15102_v8  ;;  %vm5874_vm4 = vweird.f32 %v15108_v21 }
 0x283   : > { %v6611_v27 = vsel %vm6610_vm14, %v10168_v15, %v6607_v31  ;;  %v5870_v29 = vsub.f32 1.0, %v5869_v18  ;;  %v6747_v6 = vand.u32 2147483647, %v15100_v47  ;;  %vm7658_vm15 = vweird.f32 %v22312_v52  ;;  %v22313_v15 = vld [vmem:[#allocation30_spill] sm:$0xff]  ;;  %vm15158_vm5 = vmor %vm5873_vm12, %vm5874_vm4 }
 0x284   : > { %vm7659_vm8 = vweird.f32 %v14547_v26  ;;  %v6616_v38 = vsel %vm15077_vm2, %v6615_v48, %v6611_v27  ;;  %v5585_v9 = vsub.f32 1.0, %v5584_v2  ;;  %vm5589_vm3 = vweird.f32 %v15115_v59  ;;  %v22314_v48 = vld [vmem:[#allocation31_spill] sm:$0xff] }
 0x285   : > { %v6764_v7 = vand.u32 2147483648, %v15102_v8  ;;  %v10178_v55 = vpop.eup %10177  ;;  %v8029_v22 = vmul.f32 %v6616_v38, %v22313_v15  ;;  %v5871_v43 = vmul.f32 %v15108_v21, %v5870_v29  ;;  %v6762_v20 = vand.u32 2147483647, %v15102_v8  ;;  %9291 = vmatmul.msk.f32.gmra.mxu3 %vm460_vm1, %v22314_v48  ;;  %vm15173_vm2 = vmor %vm5588_vm11, %vm5589_vm3  ;;  %v15196_v48 = vpop.f32.mrf.mxu0 }
 0x286   : > { %10183 = vrcp.f32 %v15123_v40  ;;  %v10180_v53 = vpop.eup %10179  ;;  %v5586_v46 = vmul.f32 %v15115_v59, %v5585_v9  ;;  %vm6743_vm7 = vweird.f32 %v15100_v47  ;;  %v6750_v1 = vor.u32 1.1754944e-38, %v6749_v10  ;;  %vm15249_vm14 = vmor %vm7658_vm15, %vm7659_vm8 }
 0x287   : > { %v6027_v31 = vand.u32 2147483647, %v15123_v40  ;;  %v15166_v18 = vadd.f32 %v14996_v35, %v8029_v22  ;;  %v5872_v2 = vadd.f32 %v15108_v21, %v5871_v43  ;;  %v6739_v27 = vmul.f32 %v10180_v53, %v15100_v47 }
 0x288   : > { %vm15178_vm12 = vcmp.eq.f32.partialorder %v6747_v6, 8.507059e+37  ;;  %v10182_v35 = vpop.eup %10181  ;;  %v5587_v29 = vadd.f32 %v15115_v59, %v5586_v46  ;;  %v6765_v38 = vor.u32 1.1754944e-38, %v6764_v7  ;;  %v6029_v28 = vand.u32 2147483648, %v15123_v40  ;;  %v11100_v46 = vld [vmem:[%s11390_s22 + $0xd0] sm:$0xff] }
 0x289   : > { %v15186_v9 = vadd.f32 1.0, %v10178_v55  ;;  %v5876_v15 = vsel %vm15158_vm5, %v15108_v21, %v5872_v2  ;;  %v6740_v6 = vsub.f32 1.0, %v6739_v27  ;;  %vm6744_vm11 = vweird.f32 %v10180_v53  ;;  %9206 = vmatmul.msk.f32.gmra.mxu0 %vm460_vm1, %v11100_v46 }
 0x28a   : > { %v6754_v22 = vmul.f32 %v10182_v35, %v15102_v8  ;;  %vm15192_vm4 = vcmp.eq.f32.partialorder %v6762_v20, 8.507059e+37  ;;  %v5881_v7 = vsel %vm15104_vm6, %v5880_v63, %v5876_v15  ;;  %v5591_v21 = vsel %vm15173_vm2, %v15115_v59, %v5587_v29  ;;  %vm6745_vm0 = vmor %vm6743_vm7, %vm6744_vm11  ;;  %v22360_v29 = vld [vmem:[#allocation14_spill] sm:$0xff] }
 0x28b   : > { %vm15205_vm3 = vcmp.eq.f32.partialorder %v6027_v31, 8.507059e+37  ;;  %10185 = vrcp.f32 %v15186_v9  ;;  %v7980_v45 = vmul.f32 %v5881_v7, %v14952_v14  ;;  %v5596_v2 = vsel %vm15119_vm10, %v5595_v13, %v5591_v21  ;;  %v22325_v31 = vld [vmem:[#allocation17_spill] sm:$0xff] }
 0x28c   : > { %v10184_v20 = vpop.eup %10183  ;;  %v6741_v27 = vmul.f32 %v10180_v53, %v6740_v6  ;;  %v6755_v5 = vsub.f32 1.0, %v6754_v22  ;;  %v7961_v17 = vmul.f32 %v5596_v2, %v14816_v41  ;;  %v6030_v59 = vor.u32 1.1754944e-38, %v6029_v28  ;;  %v15234_v22 = vpop.f32.mrf.mxu1  ;;  %9239 = vmatmul.msk.f32.gmra.mxu1 %vm460_vm1, %v11100_v46 }
 0x28d   : > { %v6019_v63 = vmul.f32 %v10184_v20, %v15123_v40  ;;  %v22326_v51 = vand.u32 2147483647, %v22325_v31  ;;  %v22329_v15 = vand.u32 2147483647, %v12619_v57  ;;  %v22332_v23 = vand.u32 2147483647, %v22312_v52 }
 0x28e   : > { %v8198_v13 = vadd.f32 %v15009_v54, %v7980_v45  ;;  %v6742_v28 = vadd.f32 %v10180_v53, %v6741_v27  ;;  %v6756_v6 = vmul.f32 %v10182_v35, %v6755_v5  ;;  %v15238_v57 = vadd.f32 %v15024_v49, %v7961_v17 }
 0x28f   : > { %vm15217_vm5 = vcmp.eq.f32.partialorder %v22326_v51, 8.507059e+37  ;;  %vm15223_vm2 = vcmp.eq.f32.partialorder %v22329_v15, 8.507059e+37  ;;  %vm15229_vm10 = vcmp.eq.f32.partialorder %v22332_v23, 8.507059e+37  ;;  %v6020_v7 = vsub.f32 1.0, %v6019_v63  ;;  %v22343_v15 = vld [vmem:[#allocation9_spill] sm:$0xff] }
 0x290   : > { %v9381_v21 = vmul.f32 -1.442695, %v15071_v11  ;;  %v6746_v54 = vsel %vm6745_vm0, %v10180_v53, %v6742_v28  ;;  %v6757_v49 = vadd.f32 %v10182_v35, %v6756_v6  ;;  %v5742_v46 = vand.u32 2147483647, %v15186_v9  ;;  %v15290_v28 = vpop.f32.mrf.mxu2  ;;  %v15293_v6 = vld [vmem:[%s11390_s22 + $0x78] sm:$0xff] }
 0x291   : > { %v9382_v47 = vmul.f32 -1.442695, %v15085_v33  ;;  %v10186_v45 = vpop.eup %10185  ;;  %v6751_v2 = vsel %vm15178_vm12, %v6750_v1, %v6746_v54  ;;  %vm22337_vm7 = vweird.f32 %v10182_v35  ;;  %vm22338_vm11 = vweird.f32 %v15102_v8  ;;  %9261 = vmatmul.msk.f32.gmra.mxu2 %vm460_vm1, %v15293_v6 }
 0x292   : > { %vm6760_vm6 = vmor %vm22338_vm11, %vm22337_vm7  ;;  %v6021_v27 = vmul.f32 %v10184_v20, %v6020_v7  ;;  %v5744_v52 = vand.u32 2147483648, %v15186_v9  ;;  %10187 = vpow2.f32 %v9381_v21  ;;  %v8038_v17 = vmul.f32 %v6751_v2, %v14802_v3  ;;  %v22350_v21 = vld [vmem:[#allocation10_spill] sm:$0xff]  ;;  %v22353_v2 = vld [vmem:[#allocation23_spill] sm:$0xff] }
 0x293   : > { %v6761_v53 = vsel %vm6760_vm6, %v10182_v35, %v6757_v49  ;;  %vm22339_vm15 = vweird.f32 %v10184_v20  ;;  %vm22340_vm8 = vweird.f32 %v15123_v40  ;;  %v5734_v1 = vmul.f32 %v10186_v45, %v15186_v9 }
 0x294   : > { %vm15265_vm0 = vmor %vm22340_vm8, %vm22339_vm15  ;;  %vm5739_vm12 = vweird.f32 %v10186_v45  ;;  %v6766_v8 = vsel %vm15192_vm4, %v6765_v38, %v6761_v53  ;;  %v6022_v10 = vadd.f32 %v10184_v20, %v6021_v27  ;;  %10189 = vpow2.f32 %v9382_v47  ;;  %v22352_v47 = vld [vmem:[#allocation18_spill] sm:$0xff] }
 0x295   : > { %v9570_v31 = vmul.f32 -1.442695, %v15092_v16  ;;  %v8142_v3 = vadd.f32 %v15111_v39, %v8038_v17  ;;  %v8039_v35 = vmul.f32 %v6766_v8, %v15003_v61  ;;  %v5735_v40 = vsub.f32 1.0, %v5734_v1  ;;  %v22357_v53 = vld [vmem:[#allocation26_spill] sm:$0xff]  ;;  %v22358_v1 = vld [vmem:[#allocation28_spill] sm:$0xff] }
 0x296   : > { %10191 = vpow2.f32 %v15089_v19  ;;  %v7661_v51 = vsel %vm15249_vm14, %v14547_v26, %v15019_v42  ;;  %v6026_v38 = vsel %vm15265_vm0, %v10184_v20, %v6022_v10  ;;  %v15284_v43 = vadd.f32 %v15052_v30, %v15043_v62  ;;  %v22365_v30 = vld [vmem:[#allocation11_spill] sm:$0xff] }
 0x297   : > { %10193 = vpow2.f32 %v9570_v31  ;;  %v8143_v39 = vadd.f32 %v8142_v3, %v22343_v15  ;;  %v8173_v61 = vadd.f32 %v15166_v18, %v8039_v35  ;;  %v6031_v19 = vsel %vm15205_vm3, %v6030_v59, %v6026_v38  ;;  %v22349_v59 = vld [vmem:[#allocation13_spill] sm:$0xff]  ;;  %v22359_v3 = vld [vmem:[#allocation15_spill] sm:$0xff]  ;;  %v22362_v38 = vld [vmem:[#allocation16_spill] sm:$0xff] }
 0x298   : > { %v5736_v23 = vmul.f32 %v10186_v45, %v5735_v40  ;;  %v10188_v26 = vpop.eup %10187  ;;  %v7990_v42 = vmul.f32 %v6031_v19, %v15007_v37  ;;  %vm22344_vm14 = vweird.f32 %v15186_v9  ;;  %vm15305_vm6 = vcmp.eq.f32.partialorder %v5742_v46, 8.507059e+37  ;;  %v22355_v46 = vld [vmem:[#allocation25_spill] sm:$0xff]  ;;  %v22363_v19 = vld [vmem:[#allocation12_spill] sm:$0xff] }
 0x299   : > { %vm15301_vm4 = vmor %vm22344_vm14, %vm5739_vm12  ;;  %v5745_v55 = vor.u32 1.1754944e-38, %v5744_v52  ;;  %v9391_v20 = vmul.f32 -1.442695, %v15284_v43  ;;  %v8144_v7 = vadd.f32 %v8143_v39, %v22349_v59  ;;  %v8174_v5 = vadd.f32 %v8173_v61, %v22350_v21 }
 0x29a   : > { %v5737_v54 = vadd.f32 %v10186_v45, %v5736_v23  ;;  %v15312_v37 = vadd.f32 1.0, %v10188_v26  ;;  %v10190_v49 = vpop.eup %10189  ;;  %v22354_v27 = vsel %vm12466_vm13, %v22352_v47, %v22353_v2  ;;  %v22356_v52 = vsel %vm14962_vm9, %v13506_v34, %v14550_v44  ;;  %v22364_v23 = vld [vmem:[#allocation20_spill] sm:$0xff] }
 0x29b   : > { %v7516_v17 = vsel %vm15217_vm5, %v22355_v46, %v22354_v27  ;;  %v7651_v63 = vsel %vm15223_vm2, %v22357_v53, %v22356_v52  ;;  %v7666_v8 = vsel %vm15229_vm10, %v22358_v1, %v7661_v51  ;;  %v15333_v10 = vadd.f32 %v8198_v13, %v7990_v42  ;;  %v15350_v13 = vpop.f32.mrf.mxu3  ;;  %9292 = vmatmul.msk.f32.gmra.mxu3 %vm460_vm1, %v15029_v4  ;;  %v15387_v52 = vpop.f32.mrf.mxu1  ;;  %v11102_v53 = vld [vmem:[%s11390_s22 + $0xd8] sm:$0xff] }
 0x29c   : > { %v10192_v31 = vpop.eup %10191  ;;  %v8145_v35 = vadd.f32 %v8144_v7, %v22359_v3  ;;  %v8175_v40 = vadd.f32 %v8174_v5, %v22360_v29  ;;  %v5741_v12 = vsel %vm15301_vm4, %v10186_v45, %v5737_v54  ;;  %10195 = vrcp.f32 %v15312_v37  ;;  %v22361_v45 = vld [vmem:[#allocation19_spill] sm:$0xff]  ;;  %9240 = vmatmul.msk.f32.gmra.mxu1 %vm460_vm1, %v11102_v53 }
 0x29d   : > { %v10194_v34 = vpop.eup %10193  ;;  %v5746_v44 = vsel %vm15305_vm6, %v5745_v55, %v5741_v12  ;;  %10197 = vpow2.f32 %v9391_v20  ;;  %v15344_v14 = vadd.f32 %v15064_v60, %v15050_v25  ;;  %v15348_v41 = vadd.f32 %v15143_v0, %v12284_v56  ;;  %v22366_v55 = vld [vmem:[#allocation21_spill] sm:$0xff] }
 0x29e   : > { %v8146_v51 = vadd.f32 %v8145_v35, %v22361_v45  ;;  %v8176_v15 = vadd.f32 %v8175_v40, %v22362_v38  ;;  %v7971_v39 = vmul.f32 %v5746_v44, %v15038_v50  ;;  %v15357_v61 = vadd.f32 1.0, %v10190_v49  ;;  %v22367_v50 = vld [vmem:[#allocation22_spill] sm:$0xff] }
 0x29f   : > { %v8089_v60 = vmul.f32 %v7516_v17, %v22363_v19  ;;  %v8098_v26 = vmul.f32 %v7651_v63, %v22364_v23  ;;  %v15361_v42 = vadd.f32 1.0, %v10192_v31  ;;  %v15363_v0 = vadd.f32 1.0, %v10194_v34  ;;  %v15385_v17 = vpop.f32.mrf.mxu0  ;;  %9207 = vmatmul.msk.f32.gmra.mxu0 %vm460_vm1, %v11102_v53 }
 0x2a0   : > { %v8147_v18 = vadd.f32 %v8146_v51, %v22365_v30  ;;  %v8177_v4 = vadd.f32 %v8176_v15, %v22366_v55  ;;  %v15368_v20 = vadd.f32 %v15238_v57, %v7971_v39  ;;  %10199 = vrcp.f32 %v15357_v61 }
 0x2a1   : > { %v8099_v59 = vmul.f32 %v7666_v8, %v22367_v50  ;;  %v3059_v7 = vand.u32 2147483648, %v15312_v37  ;;  %10201 = vrcp.f32 %v15361_v42  ;;  %v9392_v49 = vmul.f32 -1.442695, %v15344_v14 }
 0x2a2   : > { %v15374_v21 = vpop.eup %10195  ;;  %v15376_v5 = vadd.f32 %v8147_v18, %v8098_v26  ;;  %v8178_v54 = vadd.f32 %v8177_v4, %v8089_v60  ;;  %v9599_v9 = vmul.f32 -1.442695, %v15348_v41  ;;  %v3057_v2 = vand.u32 2147483647, %v15312_v37 }
 0x2a3   : > { %v10198_v57 = vpop.eup %10197  ;;  %v3049_v47 = vmul.f32 %v15374_v21, %v15312_v37  ;;  %v3074_v27 = vand.u32 2147483648, %v15357_v61  ;;  %v6177_v46 = vand.u32 2147483647, %v15361_v42  ;;  %vm3053_vm13 = vweird.f32 %v15312_v37  ;;  %v15467_v53 = vpop.f32.mrf.mxu3  ;;  %9293 = vmatmul.msk.f32.gmra.mxu3 %vm460_vm1, %v15148_v32 }
 0x2a4   : > { %v15392_v63 = vadd.f32 %v8178_v54, %v8099_v59  ;;  %10203 = vrcp.f32 %v15363_v0  ;;  %v15398_v1 = vadd.f32 %v15145_v36, %v12599_v24  ;;  %v3060_v31 = vor.u32 1.1754944e-38, %v3059_v7 }
 0x2a5   : > { %v3050_v8 = vsub.f32 1.0, %v3049_v47  ;;  %v3072_v3 = vand.u32 2147483647, %v15357_v61  ;;  %v6179_v35 = vand.u32 2147483648, %v15361_v42  ;;  %vm3054_vm9 = vweird.f32 %v15374_v21  ;;  %v15552_v47 = vpop.f32.mrf.mxu1 }
 0x2a6   : > { %v15402_v29 = vpop.eup %10199  ;;  %vm6173_vm3 = vweird.f32 %v15361_v42  ;;  %v15406_v40 = vadd.f32 1.0, %v10198_v57  ;;  %10205 = vpow2.f32 %v9392_v49  ;;  %vm15409_vm5 = vcmp.eq.f32.partialorder %v3057_v2, 8.507059e+37  ;;  %vm15440_vm8 = vmor %vm3053_vm13, %vm3054_vm9 }
 0x2a7   : > { %v10202_v12 = vpop.eup %10201  ;;  %v3051_v34 = vmul.f32 %v15374_v21, %v3050_v8  ;;  %v3064_v44 = vmul.f32 %v15402_v29, %v15357_v61  ;;  %v15415_v45 = vor.u32 1.1754944e-38, %v3074_v27  ;;  %vm15417_vm2 = vcmp.eq.f32.partialorder %v6177_v46, 8.507059e+37  ;;  %v15465_v46 = vpop.f32.mrf.mxu2 }
 0x2a8   : > { %vm3068_vm10 = vweird.f32 %v15357_v61  ;;  %v6169_v38 = vmul.f32 %v10202_v12, %v15361_v42  ;;  %v5892_v15 = vand.u32 2147483647, %v15363_v0  ;;  %v5894_v39 = vand.u32 2147483648, %v15363_v0 }
 0x2a9   : > { %10207 = vrcp.f32 %v15406_v40  ;;  %v3052_v19 = vadd.f32 %v15374_v21, %v3051_v34  ;;  %v3065_v60 = vsub.f32 1.0, %v3064_v44  ;;  %v6180_v23 = vor.u32 1.1754944e-38, %v6179_v35 }
 0x2aa   : > { %vm5888_vm7 = vweird.f32 %v15363_v0  ;;  %v10204_v26 = vpop.eup %10203  ;;  %v6170_v30 = vsub.f32 1.0, %v6169_v38  ;;  %vm6174_vm11 = vweird.f32 %v10202_v12  ;;  %10209 = vpow2.f32 %v9599_v9 }
 0x2ab   : > { %v9580_v18 = vmul.f32 -1.442695, %v15398_v1  ;;  %v3066_v55 = vmul.f32 %v15402_v29, %v3065_v60  ;;  %vm3069_vm15 = vweird.f32 %v15402_v29  ;;  %v5884_v4 = vmul.f32 %v10204_v26, %v15363_v0  ;;  %vm15459_vm14 = vmor %vm6173_vm3, %vm6174_vm11 }
 0x2ac   : > { %v15434_v50 = vadd.f32 %v15196_v48, %v15043_v62  ;;  %v10206_v59 = vpop.eup %10205  ;;  %v6171_v54 = vmul.f32 %v10202_v12, %v6170_v30  ;;  %vm15444_vm0 = vcmp.eq.f32.partialorder %v5892_v15, 8.507059e+37  ;;  %v5895_v9 = vor.u32 1.1754944e-38, %v5894_v39  ;;  %vm15501_vm9 = vmor %vm3068_vm10, %vm3069_vm15 }
 0x2ad   : > { %v3207_v57 = vand.u32 2147483647, %v15406_v40  ;;  %v3056_v48 = vsel %vm15440_vm8, %v15374_v21, %v3052_v19  ;;  %vm15452_vm12 = vcmp.eq.f32.partialorder %v3072_v3, 8.507059e+37  ;;  %v5885_v2 = vsub.f32 1.0, %v5884_v4  ;;  %v15470_v21 = vld [vmem:[%s11390_s22 + $0x80] sm:$0xff] }
 0x2ae   : > { %vm5889_vm4 = vweird.f32 %v10204_v26  ;;  %v15463_v27 = vadd.f32 1.0, %v10206_v59  ;;  %9262 = vmatmul.msk.f32.gmra.mxu2 %vm460_vm1, %v15470_v21  ;;  %v3067_v8 = vadd.f32 %v15402_v29, %v3066_v55  ;;  %v6172_v3 = vadd.f32 %v10202_v12, %v6171_v54  ;;  %v15526_v54 = vpop.f32.mrf.mxu0 }
 0x2af   : > { %v10208_v42 = vpop.eup %10207  ;;  %vm3203_vm6 = vweird.f32 %v15406_v40  ;;  %10211 = vpow2.f32 %v9580_v18  ;;  %v5886_v35 = vmul.f32 %v10204_v26, %v5885_v2  ;;  %v9401_v44 = vmul.f32 -1.442695, %v15434_v50  ;;  %vm15491_vm13 = vmor %vm5888_vm7, %vm5889_vm4 }
 0x2b0   : > { %v3199_v34 = vmul.f32 %v10208_v42, %v15406_v40  ;;  %v15482_v38 = vadd.f32 %v15234_v22, %v15050_v25  ;;  %v10210_v15 = vpop.eup %10209  ;;  %v3061_v32 = vsel %vm15409_vm5, %v3060_v31, %v3056_v48  ;;  %v6176_v39 = vsel %vm15459_vm14, %v10202_v12, %v6172_v3 }
 0x2b1   : > { %v3209_v60 = vand.u32 2147483648, %v15406_v40  ;;  %10213 = vrcp.f32 %v15463_v27  ;;  %v6181_v31 = vsel %vm15417_vm2, %v6180_v23, %v6176_v39  ;;  %v5887_v0 = vadd.f32 %v10204_v26, %v5886_v35 }
 0x2b2   : > { %v3200_v12 = vsub.f32 1.0, %v3199_v34  ;;  %vm15507_vm3 = vcmp.eq.f32.partialorder %v3207_v57, 8.507059e+37  ;;  %v3071_v30 = vsel %vm15501_vm9, %v15402_v29, %v3067_v8  ;;  %v8000_v61 = vmul.f32 %v6181_v31, %v15059_v58  ;;  %v11104_v57 = vld [vmem:[%s11390_s22 + $0xe0] sm:$0xff] }
 0x2b3   : > { %vm3204_vm5 = vweird.f32 %v10208_v42  ;;  %v15515_v18 = vadd.f32 1.0, %v10210_v15  ;;  %v5891_v51 = vsel %vm15491_vm13, %v10204_v26, %v5887_v0  ;;  %10215 = vpow2.f32 %v9401_v44  ;;  %9208 = vmatmul.msk.f32.gmra.mxu0 %vm460_vm1, %v11104_v57  ;;  %9241 = vmatmul.msk.f32.gmra.mxu1 %vm460_vm1, %v11104_v57  ;;  %v15598_v57 = vpop.f32.mrf.mxu2 }
 0x2b4   : > { %v3201_v23 = vmul.f32 %v10208_v42, %v3200_v12  ;;  %v9402_v55 = vmul.f32 -1.442695, %v15482_v38  ;;  %v7792_v59 = vmul.f32 %v3061_v32, %v15071_v11  ;;  %v15522_v7 = vadd.f32 %v15333_v10, %v8000_v61  ;;  %vm3205_vm2 = vmor %vm3203_vm6, %vm3204_vm5 }
 0x2b5   : > { %v10212_v4 = vpop.eup %10211  ;;  %v5896_v29 = vsel %vm15444_vm0, %v5895_v9, %v5891_v51  ;;  %v3210_v58 = vor.u32 1.1754944e-38, %v3209_v60  ;;  %v3222_v37 = vand.u32 2147483647, %v15463_v27  ;;  %10217 = vrcp.f32 %v15515_v18 }
 0x2b6   : > { %v7981_v26 = vmul.f32 %v5896_v29, %v15092_v16  ;;  %v3202_v48 = vadd.f32 %v10208_v42, %v3201_v23  ;;  %v3076_v10 = vsel %vm15452_vm12, %v15415_v45, %v3071_v30  ;;  %v3224_v49 = vand.u32 2147483648, %v15463_v27 }
 0x2b7   : > { %v10214_v11 = vpop.eup %10213  ;;  %v15540_v9 = vadd.f32 1.0, %v10212_v4  ;;  %10219 = vpow2.f32 %v9402_v55  ;;  %v6327_v3 = vand.u32 2147483647, %v15515_v18  ;;  %vm3218_vm10 = vweird.f32 %v15463_v27 }
 0x2b8   : > { %v15543_v16 = vadd.f32 %v15368_v20, %v7981_v26  ;;  %v3206_v2 = vsel %vm3205_vm2, %v10208_v42, %v3202_v48  ;;  %v3214_v8 = vmul.f32 %v10214_v11, %v15463_v27  ;;  %v6329_v40 = vand.u32 2147483648, %v15515_v18  ;;  %v15600_v26 = vpop.f32.mrf.mxu3  ;;  %v15603_v48 = vld [vmem:[%s11390_s22 + $0x88] sm:$0xff]  ;;  %9294 = vmatmul.msk.f32.gmra.mxu3 %vm460_vm1, %v15293_v6 }
 0x2b9   : > { %v3211_v45 = vsel %vm15507_vm3, %v3210_v58, %v3206_v2  ;;  %10221 = vrcp.f32 %v15540_v9  ;;  %v10216_v20 = vpop.eup %10215  ;;  %v7793_v42 = vmul.f32 %v3076_v10, %v15085_v33  ;;  %vm15557_vm7 = vcmp.eq.f32.partialorder %v3222_v37, 8.507059e+37  ;;  %9263 = vmatmul.msk.f32.gmra.mxu2 %vm460_vm1, %v15603_v48 }
 0x2ba   : > { %v7802_v35 = vmul.f32 %v3211_v45, %v15284_v43  ;;  %v3215_v34 = vsub.f32 1.0, %v3214_v8  ;;  %v3225_v15 = vor.u32 1.1754944e-38, %v3224_v49  ;;  %vm6323_vm11 = vweird.f32 %v15515_v18  ;;  %v15686_v49 = vpop.f32.mrf.mxu1 }
 0x2bb   : > { %v15562_v32 = vadd.f32 1.0, %v10216_v20  ;;  %v15566_v39 = vadd.f32 %v15290_v28, %v12284_v56  ;;  %v10218_v19 = vpop.eup %10217  ;;  %vm3219_vm15 = vweird.f32 %v10214_v11  ;;  %vm15570_vm8 = vcmp.eq.f32.partialorder %v6327_v3, 8.507059e+37 }
 0x2bc   : > { %v15568_v60 = vadd.f32 %v7802_v35, %v7792_v59  ;;  %v3216_v33 = vmul.f32 %v10214_v11, %v3215_v34  ;;  %v6319_v31 = vmul.f32 %v10218_v19, %v15515_v18  ;;  %v6330_v0 = vor.u32 1.1754944e-38, %v6329_v40  ;;  %vm3220_vm12 = vmor %vm3218_vm10, %vm3219_vm15 }
 0x2bd   : > { %v10220_v22 = vpop.eup %10219  ;;  %10223 = vrcp.f32 %v15562_v32  ;;  %v15578_v12 = vadd.f32 %v15350_v13, %v12599_v24  ;;  %vm6038_vm0 = vweird.f32 %v15540_v9  ;;  %v6042_v36 = vand.u32 2147483647, %v15540_v9 }
 0x2be   : > { %v3217_v28 = vadd.f32 %v10214_v11, %v3216_v33  ;;  %v15584_v30 = vadd.f32 %v15385_v17, %v15043_v62  ;;  %v6320_v51 = vsub.f32 1.0, %v6319_v31  ;;  %vm6324_vm14 = vweird.f32 %v10218_v19 }
 0x2bf   : > { %v10222_v61 = vpop.eup %10221  ;;  %v15588_v23 = vadd.f32 1.0, %v10220_v22  ;;  %v9609_v13 = vmul.f32 -1.442695, %v15566_v39  ;;  %v6044_v59 = vand.u32 2147483648, %v15540_v9  ;;  %v3357_v29 = vand.u32 2147483647, %v15562_v32  ;;  %vm15613_vm4 = vmor %vm6323_vm11, %vm6324_vm14 }
 0x2c0   : > { %v3221_v55 = vsel %vm3220_vm12, %v10214_v11, %v3217_v28  ;;  %v6034_v4 = vmul.f32 %v10222_v61, %v15540_v9  ;;  %v6321_v58 = vmul.f32 %v10218_v19, %v6320_v51  ;;  %v9590_v27 = vmul.f32 -1.442695, %v15578_v12  ;;  %v11106_v11 = vld [vmem:[%s11390_s22 + $0xe8] sm:$0xff] }
 0x2c1   : > { %v3226_v17 = vsel %vm15557_vm7, %v3225_v15, %v3221_v55  ;;  %10225 = vrcp.f32 %v15588_v23  ;;  %vm6039_vm6 = vweird.f32 %v10222_v61  ;;  %vm15617_vm13 = vcmp.eq.f32.partialorder %v6042_v36, 8.507059e+37  ;;  %9242 = vmatmul.msk.f32.gmra.mxu1 %vm460_vm1, %v11106_v11 }
 0x2c2   : > { %v7803_v37 = vmul.f32 %v3226_v17, %v15344_v14  ;;  %v6035_v10 = vsub.f32 1.0, %v6034_v4  ;;  %v6322_v8 = vadd.f32 %v10218_v19, %v6321_v58  ;;  %v3359_v3 = vand.u32 2147483648, %v15562_v32  ;;  %vm15630_vm9 = vmor %vm6038_vm0, %vm6039_vm6 }
 0x2c3   : > { %v10224_v2 = vpop.eup %10223  ;;  %10227 = vpow2.f32 %v9609_v13  ;;  %v9411_v6 = vmul.f32 -1.442695, %v15584_v30  ;;  %v6045_v45 = vor.u32 1.1754944e-38, %v6044_v59  ;;  %vm3353_vm3 = vweird.f32 %v15562_v32 }
 0x2c4   : > { %v15623_v14 = vadd.f32 %v7803_v37, %v7793_v42  ;;  %v6036_v18 = vmul.f32 %v10222_v61, %v6035_v10  ;;  %v3349_v40 = vmul.f32 %v10224_v2, %v15562_v32  ;;  %v6326_v20 = vsel %vm15613_vm4, %v10218_v19, %v6322_v8  ;;  %v15671_v37 = vpop.f32.mrf.mxu0  ;;  %9209 = vmatmul.msk.f32.gmra.mxu0 %vm460_vm1, %v11106_v11 }
 0x2c5   : > { %vm15635_vm5 = vcmp.eq.f32.partialorder %v3357_v29, 8.507059e+37  ;;  %10229 = vpow2.f32 %v9590_v27  ;;  %v6331_v42 = vsel %vm15570_vm8, %v6330_v0, %v6326_v20  ;;  %v3360_v33 = vor.u32 1.1754944e-38, %v3359_v3 }
 0x2c6   : > { %v6037_v44 = vadd.f32 %v10222_v61, %v6036_v18  ;;  %v3350_v15 = vsub.f32 1.0, %v3349_v40  ;;  %10231 = vpow2.f32 %v9411_v6  ;;  %v8010_v9 = vmul.f32 %v6331_v42, %v15348_v41 }
 0x2c7   : > { %v10226_v19 = vpop.eup %10225  ;;  %v15644_v22 = vadd.f32 %v15387_v52, %v15050_v25  ;;  %v15648_v31 = vadd.f32 %v15465_v46, %v12284_v56  ;;  %vm3354_vm2 = vweird.f32 %v10224_v2  ;;  %v3372_v52 = vand.u32 2147483647, %v15588_v23 }
 0x2c8   : > { %v6041_v28 = vsel %vm15630_vm9, %v10222_v61, %v6037_v44  ;;  %v3351_v43 = vmul.f32 %v10224_v2, %v3350_v15  ;;  %v3364_v0 = vmul.f32 %v10226_v19, %v15588_v23  ;;  %v15654_v51 = vadd.f32 %v15522_v7, %v8010_v9  ;;  %vm3355_vm10 = vmor %vm3353_vm3, %vm3354_vm2 }
 0x2c9   : > { %v10228_v36 = vpop.eup %10227  ;;  %v6046_v41 = vsel %vm15617_vm13, %v6045_v45, %v6041_v28  ;;  %v9412_v13 = vmul.f32 -1.442695, %v15644_v22  ;;  %vm3369_vm7 = vweird.f32 %v10226_v19  ;;  %v3374_v7 = vand.u32 2147483648, %v15588_v23 }
 0x2ca   : > { %v7991_v46 = vmul.f32 %v6046_v41, %v15398_v1  ;;  %v3352_v55 = vadd.f32 %v10224_v2, %v3351_v43  ;;  %v3365_v61 = vsub.f32 1.0, %v3364_v0  ;;  %v15661_v4 = vadd.f32 1.0, %v10228_v36  ;;  %v15730_v41 = vpop.f32.mrf.mxu2 }
 0x2cb   : > { %v10230_v59 = vpop.eup %10229  ;;  %10233 = vpow2.f32 %v9412_v13  ;;  %v9619_v29 = vmul.f32 -1.442695, %v15648_v31  ;;  %vm3368_vm11 = vweird.f32 %v15588_v23  ;;  %vm15678_vm15 = vcmp.eq.f32.partialorder %v3372_v52, 8.507059e+37  ;;  %v15732_v52 = vpop.f32.mrf.mxu3  ;;  %v15735_v13 = vld [vmem:[%s11390_s22 + $0x90] sm:$0xff]  ;;  %9295 = vmatmul.msk.f32.gmra.mxu3 %vm460_vm1, %v15470_v21 }
 0x2cc   : > { %v10232_v17 = vpop.eup %10231  ;;  %v15668_v58 = vadd.f32 %v15543_v16, %v7991_v46  ;;  %v3356_v1 = vsel %vm3355_vm10, %v10224_v2, %v3352_v55  ;;  %v3366_v27 = vmul.f32 %v10226_v19, %v3365_v61  ;;  %10235 = vrcp.f32 %v15661_v4  ;;  %vm3370_vm8 = vmor %vm3368_vm11, %vm3369_vm7  ;;  %9264 = vmatmul.msk.f32.gmra.mxu2 %vm460_vm1, %v15735_v13 }
 0x2cd   : > { %v3361_v32 = vsel %vm15635_vm5, %v3360_v33, %v3356_v1  ;;  %v15684_v16 = vadd.f32 %v15467_v53, %v12599_v24  ;;  %v15690_v3 = vadd.f32 1.0, %v10230_v59  ;;  %v15692_v6 = vadd.f32 1.0, %v10232_v17 }
 0x2ce   : > { %v7812_v2 = vmul.f32 %v3361_v32, %v15434_v50  ;;  %v3367_v8 = vadd.f32 %v10226_v19, %v3366_v27  ;;  %v3375_v23 = vor.u32 1.1754944e-38, %v3374_v7  ;;  %v6477_v18 = vand.u32 2147483647, %v15661_v4 }
 0x2cf   : > { %v6479_v45 = vand.u32 2147483648, %v15661_v4  ;;  %10237 = vpow2.f32 %v9619_v29  ;;  %v15703_v50 = vadd.f32 %v15526_v54, %v15043_v62  ;;  %v9600_v34 = vmul.f32 -1.442695, %v15684_v16 }
 0x2d0   : > { %v15698_v53 = vadd.f32 %v15568_v60, %v7812_v2  ;;  %v3371_v40 = vsel %vm3370_vm8, %v10226_v19, %v3367_v8  ;;  %10239 = vrcp.f32 %v15690_v3  ;;  %v6192_v60 = vand.u32 2147483647, %v15690_v3  ;;  %v15766_v2 = vpop.f32.mrf.mxu0  ;;  %v11108_v8 = vld [vmem:[%s11390_s22 + $0xf0] sm:$0xff] }
 0x2d1   : > { %v10234_v20 = vpop.eup %10233  ;;  %v3376_v35 = vsel %vm15678_vm15, %v3375_v23, %v3371_v40  ;;  %10241 = vrcp.f32 %v15692_v6  ;;  %v6194_v15 = vand.u32 2147483648, %v15690_v3  ;;  %v15714_v19 = vadd.f32 %v15552_v47, %v15050_v25  ;;  %9210 = vmatmul.msk.f32.gmra.mxu0 %vm460_vm1, %v11108_v8 }
 0x2d2   : > { %v10236_v42 = vpop.eup %10235  ;;  %v7813_v44 = vmul.f32 %v3376_v35, %v15482_v38  ;;  %vm6473_vm0 = vweird.f32 %v15661_v4  ;;  %vm15718_vm12 = vcmp.eq.f32.partialorder %v6477_v18, 8.507059e+37  ;;  %v6480_v33 = vor.u32 1.1754944e-38, %v6479_v45 }
 0x2d3   : > { %v6469_v54 = vmul.f32 %v10236_v42, %v15661_v4  ;;  %vm6188_vm14 = vweird.f32 %v15690_v3  ;;  %v15726_v28 = vadd.f32 1.0, %v10234_v20  ;;  %v9421_v47 = vmul.f32 -1.442695, %v15703_v50 }
 0x2d4   : > { %v15723_v38 = vadd.f32 %v15623_v14, %v7813_v44  ;;  %vm6474_vm4 = vweird.f32 %v10236_v42  ;;  %v3507_v36 = vand.u32 2147483647, %v15692_v6  ;;  %10243 = vpow2.f32 %v9600_v34 }
 0x2d5   : > { %v10238_v43 = vpop.eup %10237  ;;  %v6470_v0 = vsub.f32 1.0, %v6469_v54  ;;  %vm15741_vm6 = vcmp.eq.f32.partialorder %v6192_v60, 8.507059e+37  ;;  %v6195_v55 = vor.u32 1.1754944e-38, %v6194_v15  ;;  %vm3503_vm13 = vweird.f32 %v15692_v6  ;;  %vm15755_vm9 = vmor %vm6473_vm0, %vm6474_vm4 }
 0x2d6   : > { %v10240_v14 = vpop.eup %10239  ;;  %v3509_v61 = vand.u32 2147483648, %v15692_v6  ;;  %10245 = vrcp.f32 %v15726_v28  ;;  %v15749_v17 = vadd.f32 1.0, %v10238_v43  ;;  %v9422_v21 = vmul.f32 -1.442695, %v15714_v19 }
 0x2d7   : > { %v10242_v59 = vpop.eup %10241  ;;  %v6471_v7 = vmul.f32 %v10236_v42, %v6470_v0  ;;  %v6184_v29 = vmul.f32 %v10240_v14, %v15690_v3  ;;  %v3522_v11 = vand.u32 2147483647, %v15726_v28  ;;  %v3524_v32 = vand.u32 2147483648, %v15726_v28 }
 0x2d8   : > { %v3499_v27 = vmul.f32 %v10242_v59, %v15692_v6  ;;  %v15764_v10 = vadd.f32 %v15598_v57, %v12284_v56  ;;  %vm6189_vm3 = vweird.f32 %v10240_v14  ;;  %10247 = vrcp.f32 %v15749_v17 }
 0x2d9   : > { %v6472_v4 = vadd.f32 %v10236_v42, %v6471_v7  ;;  %v6185_v23 = vsub.f32 1.0, %v6184_v29  ;;  %vm15771_vm5 = vcmp.eq.f32.partialorder %v3507_v36, 8.507059e+37  ;;  %v3510_v40 = vor.u32 1.1754944e-38, %v3509_v61  ;;  %vm15782_vm10 = vmor %vm6188_vm14, %vm6189_vm3 }
 0x2da   : > { %v3500_v18 = vsub.f32 1.0, %v3499_v27  ;;  %10249 = vpow2.f32 %v9421_v47  ;;  %v10244_v20 = vpop.eup %10243  ;;  %vm3518_vm2 = vweird.f32 %v15726_v28  ;;  %vm3504_vm7 = vweird.f32 %v10242_v59  ;;  %v15787_v47 = vpop.f32.mrf.mxu1  ;;  %9243 = vmatmul.msk.f32.gmra.mxu1 %vm460_vm1, %v11108_v8 }
 0x2db   : > { %v6476_v57 = vsel %vm15755_vm9, %v10236_v42, %v6472_v4  ;;  %v6186_v35 = vmul.f32 %v10240_v14, %v6185_v23  ;;  %10251 = vpow2.f32 %v9422_v21  ;;  %v9629_v54 = vmul.f32 -1.442695, %v15764_v10  ;;  %vm3505_vm15 = vmor %vm3503_vm13, %vm3504_vm7 }
 0x2dc   : > { %v10246_v34 = vpop.eup %10245  ;;  %v6481_v44 = vsel %vm15718_vm12, %v6480_v33, %v6476_v57  ;;  %v3501_v15 = vmul.f32 %v10242_v59, %v3500_v18  ;;  %vm15792_vm11 = vcmp.eq.f32.partialorder %v3522_v11, 8.507059e+37  ;;  %v3525_v3 = vor.u32 1.1754944e-38, %v3524_v32 }
 0x2dd   : > { %v8020_v42 = vmul.f32 %v6481_v44, %v15566_v39  ;;  %v6187_v43 = vadd.f32 %v10240_v14, %v6186_v35  ;;  %v3514_v9 = vmul.f32 %v10246_v34, %v15726_v28  ;;  %v6627_v36 = vand.u32 2147483647, %v15749_v17 }
 0x2de   : > { %v3502_v0 = vadd.f32 %v10242_v59, %v3501_v15  ;;  %v6629_v61 = vand.u32 2147483648, %v15749_v17  ;;  %v15798_v7 = vadd.f32 1.0, %v10244_v20  ;;  %v10248_v29 = vpop.eup %10247  ;;  %vm3519_vm8 = vweird.f32 %v10246_v34 }
 0x2df   : > { %v15801_v21 = vadd.f32 %v15654_v51, %v8020_v42  ;;  %v6191_v39 = vsel %vm15782_vm10, %v10240_v14, %v6187_v43  ;;  %v3515_v1 = vsub.f32 1.0, %v3514_v9  ;;  %v6619_v8 = vmul.f32 %v10248_v29, %v15749_v17  ;;  %vm3520_vm14 = vmor %vm3518_vm2, %vm3519_vm8  ;;  %v15858_v43 = vpop.f32.mrf.mxu2  ;;  %v15861_v9 = vld [vmem:[%s11390_s22 + $0x98] sm:$0xff] }
 0x2e0   : > { %v10250_v27 = vpop.eup %10249  ;;  %v6196_v11 = vsel %vm15741_vm6, %v6195_v55, %v6191_v39  ;;  %v3506_v32 = vsel %vm3505_vm15, %v10242_v59, %v3502_v0  ;;  %10253 = vpow2.f32 %v9629_v54  ;;  %vm6623_vm0 = vweird.f32 %v15749_v17  ;;  %9265 = vmatmul.msk.f32.gmra.mxu2 %vm460_vm1, %v15861_v9 }
 0x2e1   : > { %v10252_v4 = vpop.eup %10251  ;;  %v8001_v51 = vmul.f32 %v6196_v11, %v15578_v12  ;;  %v3511_v14 = vsel %vm15771_vm5, %v3510_v40, %v3506_v32  ;;  %v3516_v23 = vmul.f32 %v10246_v34, %v3515_v1  ;;  %10255 = vrcp.f32 %v15798_v7 }
 0x2e2   : > { %v7822_v6 = vmul.f32 %v3511_v14, %v15584_v30  ;;  %v6620_v18 = vsub.f32 1.0, %v6619_v8  ;;  %vm6624_vm12 = vweird.f32 %v10248_v29  ;;  %v6342_v59 = vand.u32 2147483647, %v15798_v7  ;;  %v15892_v14 = vpop.f32.mrf.mxu3  ;;  %9296 = vmatmul.msk.f32.gmra.mxu3 %vm460_vm1, %v15603_v48 }
 0x2e3   : > { %v15818_v46 = vadd.f32 %v15668_v58, %v8001_v51  ;;  %v3517_v55 = vadd.f32 %v10246_v34, %v3516_v23  ;;  %v15821_v20 = vadd.f32 1.0, %v10250_v27  ;;  %v6344_v45 = vand.u32 2147483648, %v15798_v7  ;;  %vm15832_vm4 = vmor %vm6623_vm0, %vm6624_vm12 }
 0x2e4   : > { %v15824_v12 = vadd.f32 %v15698_v53, %v7822_v6  ;;  %v6621_v30 = vmul.f32 %v10248_v29, %v6620_v18  ;;  %v15830_v17 = vadd.f32 1.0, %v10252_v4  ;;  %vm15836_vm6 = vcmp.eq.f32.partialorder %v6627_v36, 8.507059e+37 }
 0x2e5   : > { %v3521_v40 = vsel %vm3520_vm14, %v10246_v34, %v3517_v55  ;;  %v6630_v53 = vor.u32 1.1754944e-38, %v6629_v61  ;;  %10257 = vrcp.f32 %v15821_v20  ;;  %v15845_v34 = vadd.f32 %v15600_v26, %v12599_v24 }
 0x2e6   : > { %v10254_v28 = vpop.eup %10253  ;;  %v3526_v35 = vsel %vm15792_vm11, %v3525_v3, %v3521_v40  ;;  %v6622_v44 = vadd.f32 %v10248_v29, %v6621_v30  ;;  %v15849_v60 = vadd.f32 %v15671_v37, %v15043_v62  ;;  %vm6338_vm13 = vweird.f32 %v15798_v7 }
 0x2e7   : > { %v10256_v15 = vpop.eup %10255  ;;  %v7823_v54 = vmul.f32 %v3526_v35, %v15644_v22  ;;  %vm15853_vm9 = vcmp.eq.f32.partialorder %v6342_v59, 8.507059e+37  ;;  %10259 = vrcp.f32 %v15830_v17  ;;  %v6345_v37 = vor.u32 1.1754944e-38, %v6344_v45  ;;  %v11110_v35 = vld [vmem:[%s11390_s22 + $0xf8] sm:$0xff] }
 0x2e8   : > { %v6626_v26 = vsel %vm15832_vm4, %v10248_v29, %v6622_v44  ;;  %v6334_v22 = vmul.f32 %v10256_v15, %v15798_v7  ;;  %v3657_v33 = vand.u32 2147483647, %v15821_v20  ;;  %v3659_v36 = vand.u32 2147483648, %v15821_v20 }
 0x2e9   : > { %v15870_v3 = vadd.f32 %v15723_v38, %v7823_v54  ;;  %v6631_v0 = vsel %vm15836_vm6, %v6630_v53, %v6626_v26  ;;  %v3672_v61 = vand.u32 2147483647, %v15830_v17  ;;  %vm6339_vm3 = vweird.f32 %v10256_v15 }
 0x2ea   : > { %v8030_v39 = vmul.f32 %v6631_v0, %v15648_v31  ;;  %v6335_v1 = vsub.f32 1.0, %v6334_v22  ;;  %v15877_v29 = vadd.f32 1.0, %v10254_v28  ;;  %vm3653_vm5 = vweird.f32 %v15821_v20  ;;  %vm15899_vm10 = vmor %vm6338_vm13, %vm6339_vm3  ;;  %v15923_v28 = vpop.f32.mrf.mxu0  ;;  %9211 = vmatmul.msk.f32.gmra.mxu0 %vm460_vm1, %v11110_v35  ;;  %v15989_v59 = vpop.f32.mrf.mxu3  ;;  %9297 = vmatmul.msk.f32.gmra.mxu3 %vm460_vm1, %v15735_v13 }
 0x2eb   : > { %v10258_v27 = vpop.eup %10257  ;;  %v3674_v11 = vand.u32 2147483648, %v15830_v17  ;;  %v9610_v38 = vmul.f32 -1.442695, %v15845_v34  ;;  %v15884_v32 = vadd.f32 %v15686_v49, %v15050_v25  ;;  %vm3668_vm2 = vweird.f32 %v15830_v17 }
 0x2ec   : > { %v15887_v8 = vadd.f32 %v15801_v21, %v8030_v39  ;;  %v6336_v4 = vmul.f32 %v10256_v15, %v6335_v1  ;;  %v3649_v31 = vmul.f32 %v10258_v27, %v15821_v20  ;;  %v9431_v51 = vmul.f32 -1.442695, %v15849_v60 }
 0x2ed   : > { %v10260_v23 = vpop.eup %10259  ;;  %vm15903_vm7 = vcmp.eq.f32.partialorder %v3657_v33, 8.507059e+37  ;;  %v3660_v6 = vor.u32 1.1754944e-38, %v3659_v36  ;;  %10261 = vrcp.f32 %v15877_v29  ;;  %v15910_v18 = vadd.f32 %v15730_v41, %v12284_v56  ;;  %v15945_v36 = vpop.f32.mrf.mxu1  ;;  %9244 = vmatmul.msk.f32.gmra.mxu1 %vm460_vm1, %v11110_v35  ;;  %v11112_v35 = vld [vmem:[%s11390_s22] sm:$0xff] }
 0x2ee   : > { %v6337_v48 = vadd.f32 %v10256_v15, %v6336_v4  ;;  %v3650_v55 = vsub.f32 1.0, %v3649_v31  ;;  %v3664_v7 = vmul.f32 %v10260_v23, %v15830_v17  ;;  %vm15913_vm11 = vcmp.eq.f32.partialorder %v3672_v61, 8.507059e+37 }
 0x2ef   : > { %vm3654_vm15 = vweird.f32 %v10258_v27  ;;  %v3675_v30 = vor.u32 1.1754944e-38, %v3674_v11  ;;  %10263 = vpow2.f32 %v9610_v38  ;;  %v9432_v45 = vmul.f32 -1.442695, %v15884_v32 }
 0x2f0   : > { %v6341_v40 = vsel %vm15899_vm10, %v10256_v15, %v6337_v48  ;;  %v3651_v58 = vmul.f32 %v10258_v27, %v3650_v55  ;;  %v3665_v41 = vsub.f32 1.0, %v3664_v7  ;;  %10265 = vpow2.f32 %v9431_v51  ;;  %vm3655_vm0 = vmor %vm3653_vm5, %vm3654_vm15 }
 0x2f1   : > { %v6346_v57 = vsel %vm15853_vm9, %v6345_v37, %v6341_v40  ;;  %vm3669_vm8 = vweird.f32 %v10260_v23  ;;  %10267 = vpow2.f32 %v9432_v45  ;;  %v9639_v53 = vmul.f32 -1.442695, %v15910_v18 }
 0x2f2   : > { %v8011_v44 = vmul.f32 %v6346_v57, %v15684_v16  ;;  %v3652_v54 = vadd.f32 %v10258_v27, %v3651_v58  ;;  %v3666_v26 = vmul.f32 %v10260_v23, %v3665_v41  ;;  %v15930_v15 = vadd.f32 %v15732_v52, %v12599_v24  ;;  %vm3670_vm14 = vmor %vm3668_vm2, %vm3669_vm8 }
 0x2f3   : > { %v10262_v22 = vpop.eup %10261  ;;  %vm6773_vm12 = vweird.f32 %v15877_v29  ;;  %v6777_v42 = vand.u32 2147483647, %v15877_v29  ;;  %10269 = vpow2.f32 %v9639_v53  ;;  %v15939_v37 = vadd.f32 %v15766_v2, %v15043_v62  ;;  %v16008_v53 = vpop.f32.mrf.mxu0  ;;  %9312 = vmatmul.msk.f32.vlgmr.msra.gmra.mxu0 %vm460_vm1, %v11112_v35 }
 0x2f4   : > { %v15942_v16 = vadd.f32 %v15818_v46, %v8011_v44  ;;  %v3656_v33 = vsel %vm3655_vm0, %v10258_v27, %v3652_v54  ;;  %v3667_v52 = vadd.f32 %v10260_v23, %v3666_v26  ;;  %v6769_v0 = vmul.f32 %v10262_v22, %v15877_v29 }
 0x2f5   : > { %v10264_v20 = vpop.eup %10263  ;;  %v3661_v61 = vsel %vm15903_vm7, %v3660_v6, %v3656_v33  ;;  %vm6774_vm4 = vweird.f32 %v10262_v22  ;;  %v6779_v2 = vand.u32 2147483648, %v15877_v29  ;;  %v9620_v46 = vmul.f32 -1.442695, %v15930_v15  ;;  %v15987_v29 = vpop.f32.mrf.mxu2 }
 0x2f6   : > { %v10266_v39 = vpop.eup %10265  ;;  %v7832_v1 = vmul.f32 %v3661_v61, %v15703_v50  ;;  %v3671_v27 = vsel %vm3670_vm14, %v10260_v23, %v3667_v52  ;;  %v6770_v11 = vsub.f32 1.0, %v6769_v0  ;;  %v15956_v38 = vadd.f32 1.0, %v10264_v20  ;;  %vm15971_vm6 = vmor %vm6773_vm12, %vm6774_vm4 }
 0x2f7   : > { %v10268_v4 = vpop.eup %10267  ;;  %v3676_v31 = vsel %vm15913_vm11, %v3675_v30, %v3671_v27  ;;  %v15960_v51 = vadd.f32 1.0, %v10266_v39  ;;  %10271 = vpow2.f32 %v9620_v46  ;;  %v9441_v17 = vmul.f32 -1.442695, %v15939_v37  ;;  %v15992_v30 = vld [vmem:[%s11390_s22 + $0xa0] sm:$0xff] }
 0x2f8   : > { %v15964_v49 = vadd.f32 %v15824_v12, %v7832_v1  ;;  %v7833_v21 = vmul.f32 %v3676_v31, %v15714_v19  ;;  %v6771_v50 = vmul.f32 %v10262_v22, %v6770_v11  ;;  %10273 = vrcp.f32 %v15956_v38  ;;  %9266 = vmatmul.msk.f32.gmra.mxu2 %vm460_vm1, %v15992_v30 }
 0x2f9   : > { %v10270_v23 = vpop.eup %10269  ;;  %v6780_v48 = vor.u32 1.1754944e-38, %v6779_v2  ;;  %10275 = vrcp.f32 %v15960_v51  ;;  %vm15979_vm13 = vcmp.eq.f32.partialorder %v6777_v42, 8.507059e+37  ;;  %v15985_v7 = vadd.f32 %v15787_v47, %v15050_v25 }
 0x2fa   : > { %v15977_v55 = vadd.f32 %v15870_v3, %v7833_v21  ;;  %v6772_v12 = vadd.f32 %v10262_v22, %v6771_v50  ;;  %v6492_v3 = vand.u32 2147483647, %v15956_v38  ;;  %v6494_v45 = vand.u32 2147483648, %v15956_v38 }
 0x2fb   : > { %v3807_v40 = vand.u32 2147483647, %v15960_v51  ;;  %v16001_v47 = vadd.f32 1.0, %v10268_v4  ;;  %v3809_v41 = vand.u32 2147483648, %v15960_v51  ;;  %v16006_v57 = vadd.f32 1.0, %v10270_v23 }
 0x2fc   : > { %v6776_v58 = vsel %vm15971_vm6, %v10262_v22, %v6772_v12  ;;  %10277 = vpow2.f32 %v9441_v17  ;;  %v16017_v54 = vadd.f32 %v15858_v43, %v12284_v56  ;;  %vm6488_vm9 = vweird.f32 %v15956_v38 }
 0x2fd   : > { %v10272_v13 = vpop.eup %10271  ;;  %v6781_v44 = vsel %vm15979_vm13, %v6780_v48, %v6776_v58  ;;  %10279 = vrcp.f32 %v16001_v47  ;;  %v9442_v42 = vmul.f32 -1.442695, %v15985_v7  ;;  %vm16024_vm3 = vcmp.eq.f32.partialorder %v6492_v3, 8.507059e+37  ;;  %v16060_v3 = vpop.f32.mrf.mxu1  ;;  %9345 = vmatmul.msk.f32.vlgmr.msra.gmra.mxu1 %vm460_vm1, %v11112_v35 }
 0x2fe   : > { %v10274_v26 = vpop.eup %10273  ;;  %v8040_v22 = vmul.f32 %v6781_v44, %v15764_v10  ;;  %10281 = vrcp.f32 %v16006_v57  ;;  %v6495_v20 = vor.u32 1.1754944e-38, %v6494_v45  ;;  %vm3803_vm5 = vweird.f32 %v15960_v51 }
 0x2ff   : > { %v10276_v33 = vpop.eup %10275  ;;  %v6484_v52 = vmul.f32 %v10274_v26, %v15956_v38  ;;  %vm16033_vm2 = vcmp.eq.f32.partialorder %v3807_v40, 8.507059e+37  ;;  %v3810_v2 = vor.u32 1.1754944e-38, %v3809_v41  ;;  %v3822_v46 = vand.u32 2147483647, %v16001_v47 }
 0x300   : > { %v16030_v43 = vadd.f32 %v15887_v8, %v8040_v22  ;;  %v3799_v10 = vmul.f32 %v10276_v33, %v15960_v51  ;;  %vm6489_vm10 = vweird.f32 %v10274_v26  ;;  %v3824_v1 = vand.u32 2147483648, %v16001_v47 }
 0x301   : > { %v6485_v39 = vsub.f32 1.0, %v6484_v52  ;;  %v6927_v27 = vand.u32 2147483647, %v16006_v57  ;;  %vm3818_vm7 = vweird.f32 %v16001_v47  ;;  %vm6923_vm11 = vweird.f32 %v16006_v57  ;;  %vm16050_vm8 = vmor %vm6488_vm9, %vm6489_vm10 }
 0x302   : > { %v10278_v11 = vpop.eup %10277  ;;  %v3800_v4 = vsub.f32 1.0, %v3799_v10  ;;  %v6929_v8 = vand.u32 2147483648, %v16006_v57  ;;  %v16043_v31 = vadd.f32 1.0, %v10272_v13  ;;  %vm3804_vm15 = vweird.f32 %v10276_v33 }
 0x303   : > { %v10280_v17 = vpop.eup %10279  ;;  %v6486_v21 = vmul.f32 %v10274_v26, %v6485_v39  ;;  %v16045_v50 = vadd.f32 1.0, %v10278_v11  ;;  %10283 = vpow2.f32 %v9442_v42  ;;  %vm16055_vm0 = vcmp.eq.f32.partialorder %v3822_v46, 8.507059e+37  ;;  %vm3805_vm14 = vmor %vm3803_vm5, %vm3804_vm15 }
 0x304   : > { %v10282_v23 = vpop.eup %10281  ;;  %v3801_v48 = vmul.f32 %v10276_v33, %v3800_v4  ;;  %v3814_v12 = vmul.f32 %v10280_v17, %v16001_v47  ;;  %10285 = vrcp.f32 %v16043_v31  ;;  %v3825_v40 = vor.u32 1.1754944e-38, %v3824_v1 }
 0x305   : > { %v6487_v45 = vadd.f32 %v10274_v26, %v6486_v21  ;;  %v6919_v38 = vmul.f32 %v10282_v23, %v16006_v57  ;;  %vm16064_vm12 = vcmp.eq.f32.partialorder %v6927_v27, 8.507059e+37  ;;  %v6930_v44 = vor.u32 1.1754944e-38, %v6929_v8  ;;  %v16103_v21 = vpop.f32.mrf.mxu2 }
 0x306   : > { %v3802_v41 = vadd.f32 %v10276_v33, %v3801_v48  ;;  %v3815_v13 = vsub.f32 1.0, %v3814_v12  ;;  %v9649_v22 = vmul.f32 -1.442695, %v16017_v54  ;;  %vm6924_vm4 = vweird.f32 %v10282_v23 }
 0x307   : > { %v6491_v42 = vsel %vm16050_vm8, %v10274_v26, %v6487_v45  ;;  %v6920_v35 = vsub.f32 1.0, %v6919_v38  ;;  %10287 = vrcp.f32 %v16045_v50  ;;  %vm3819_vm6 = vweird.f32 %v10280_v17  ;;  %vm16087_vm13 = vmor %vm6923_vm11, %vm6924_vm4 }
 0x308   : > { %v6496_v52 = vsel %vm16024_vm3, %v6495_v20, %v6491_v42  ;;  %v3806_v10 = vsel %vm3805_vm14, %v10276_v33, %v3802_v41  ;;  %v3816_v46 = vmul.f32 %v10280_v17, %v3815_v13  ;;  %v16082_v51 = vadd.f32 %v15892_v14, %v12599_v24  ;;  %vm3820_vm3 = vmor %vm3818_vm7, %vm3819_vm6 }
 0x309   : > { %v10284_v39 = vpop.eup %10283  ;;  %v8021_v1 = vmul.f32 %v6496_v52, %v15845_v34  ;;  %v3811_v26 = vsel %vm16033_vm2, %v3810_v2, %v3806_v10  ;;  %v6921_v27 = vmul.f32 %v10282_v23, %v6920_v35  ;;  %vm6638_vm9 = vweird.f32 %v16043_v31 }
 0x30a   : > { %v10286_v11 = vpop.eup %10285  ;;  %v7842_v4 = vmul.f32 %v3811_v26, %v15849_v60  ;;  %v3817_v0 = vadd.f32 %v10280_v17, %v3816_v46  ;;  %v6642_v34 = vand.u32 2147483647, %v16043_v31  ;;  %v6644_v61 = vand.u32 2147483648, %v16043_v31  ;;  %v16149_v46 = vpop.f32.mrf.mxu3  ;;  %9298 = vmatmul.msk.f32.gmra.mxu3 %vm460_vm1, %v15861_v9 }
 0x30b   : > { %v8233_v20 = vadd.f32 %v15942_v16, %v8021_v1  ;;  %v6922_v14 = vadd.f32 %v10282_v23, %v6921_v27  ;;  %v6634_v60 = vmul.f32 %v10286_v11, %v16043_v31  ;;  %vm6639_vm5 = vweird.f32 %v10286_v11  ;;  %v16106_v16 = vld [vmem:[%s11390_s22 + $0xa8] sm:$0xff] }
 0x30c   : > { %v16099_v57 = vadd.f32 %v15964_v49, %v7842_v4  ;;  %v3821_v2 = vsel %vm3820_vm3, %v10280_v17, %v3817_v0  ;;  %vm3953_vm2 = vweird.f32 %v16045_v50  ;;  %v3957_v8 = vand.u32 2147483647, %v16045_v50  ;;  %9267 = vmatmul.msk.f32.gmra.mxu2 %vm460_vm1, %v16106_v16  ;;  %vm16133_vm7 = vmor %vm6638_vm9, %vm6639_vm5 }
 0x30d   : > { %v10288_v47 = vpop.eup %10287  ;;  %v3826_v6 = vsel %vm16055_vm0, %v3825_v40, %v3821_v2  ;;  %v6926_v49 = vsel %vm16087_vm13, %v10282_v23, %v6922_v14  ;;  %v6635_v17 = vsub.f32 1.0, %v6634_v60  ;;  %v16114_v48 = vadd.f32 1.0, %v10284_v39  ;;  %v16187_v60 = vpop.f32.mrf.mxu0 }
 0x30e   : > { %v7843_v12 = vmul.f32 %v3826_v6, %v15884_v32  ;;  %v6931_v45 = vsel %vm16064_vm12, %v6930_v44, %v6926_v49  ;;  %v3949_v38 = vmul.f32 %v10288_v47, %v16045_v50  ;;  %v3959_v41 = vand.u32 2147483648, %v16045_v50 }
 0x30f   : > { %v8050_v13 = vmul.f32 %v6931_v45, %v15910_v18  ;;  %v6636_v42 = vmul.f32 %v10286_v11, %v6635_v17  ;;  %vm16122_vm10 = vcmp.eq.f32.partialorder %v6642_v34, 8.507059e+37  ;;  %10289 = vrcp.f32 %v16114_v48 }
 0x310   : > { %v16128_v23 = vadd.f32 %v15977_v55, %v7843_v12  ;;  %v6645_v40 = vor.u32 1.1754944e-38, %v6644_v61  ;;  %v3950_v58 = vsub.f32 1.0, %v3949_v38  ;;  %vm16137_vm11 = vcmp.eq.f32.partialorder %v3957_v8, 8.507059e+37  ;;  %v11114_v61 = vld [vmem:[%s11390_s22 + $0x8] sm:$0xff]  ;;  %v16203_v12 = vpop.f32.mrf.mxu1 }
 0x311   : > { %v16142_v44 = vadd.f32 %v16030_v43, %v8050_v13  ;;  %v6637_v35 = vadd.f32 %v10286_v11, %v6636_v42  ;;  %10291 = vpow2.f32 %v9649_v22  ;;  %v9630_v55 = vmul.f32 -1.442695, %v16082_v51  ;;  %9313 = vmatmul.msk.f32.gmra.mxu0 %vm460_vm1, %v11114_v61  ;;  %9346 = vmatmul.msk.f32.gmra.mxu1 %vm460_vm1, %v11114_v61 }
 0x312   : > { %v3951_v52 = vmul.f32 %v10288_v47, %v3950_v58  ;;  %vm3954_vm15 = vweird.f32 %v10288_v47  ;;  %v3960_v31 = vor.u32 1.1754944e-38, %v3959_v41  ;;  %v16147_v10 = vadd.f32 %v15923_v28, %v15043_v62 }
 0x313   : > { %v6641_v43 = vsel %vm16133_vm7, %v10286_v11, %v6637_v35  ;;  %10293 = vpow2.f32 %v9630_v55  ;;  %v16157_v22 = vadd.f32 %v15945_v36, %v15050_v25  ;;  %v16161_v39 = vadd.f32 %v15987_v29, %v12284_v56  ;;  %vm3955_vm8 = vmor %vm3953_vm2, %vm3954_vm15 }
 0x314   : > { %v6646_v28 = vsel %vm16122_vm10, %v6645_v40, %v6641_v43  ;;  %v3952_v1 = vadd.f32 %v10288_v47, %v3951_v52  ;;  %v9451_v26 = vmul.f32 -1.442695, %v16147_v10  ;;  %v16168_v9 = vadd.f32 %v15989_v59, %v12599_v24  ;;  %v16233_v43 = vpop.f32.mrf.mxu2 }
 0x315   : > { %v10290_v27 = vpop.eup %10289  ;;  %v8031_v11 = vmul.f32 %v6646_v28, %v15930_v15  ;;  %v3972_v36 = vand.u32 2147483647, %v16114_v48  ;;  %v9452_v29 = vmul.f32 -1.442695, %v16157_v22  ;;  %v9659_v4 = vmul.f32 -1.442695, %v16161_v39  ;;  %v16235_v28 = vpop.f32.mrf.mxu3  ;;  %9299 = vmatmul.msk.f32.gmra.mxu3 %vm460_vm1, %v15992_v30 }
 0x316   : > { %v3956_v0 = vsel %vm3955_vm8, %v10288_v47, %v3952_v1  ;;  %v3964_v33 = vmul.f32 %v10290_v27, %v16114_v48  ;;  %10295 = vpow2.f32 %v9451_v26  ;;  %v16180_v59 = vadd.f32 %v16008_v53, %v15043_v62  ;;  %v16238_v1 = vld [vmem:[%s11390_s22 + $0xb0] sm:$0xff] }
 0x317   : > { %v10292_v34 = vpop.eup %10291  ;;  %v16182_v15 = vadd.f32 %v8233_v20, %v8031_v11  ;;  %v3961_v50 = vsel %vm16137_vm11, %v3960_v31, %v3956_v0  ;;  %10297 = vpow2.f32 %v9452_v29  ;;  %v9640_v14 = vmul.f32 -1.442695, %v16168_v9  ;;  %9268 = vmatmul.msk.f32.gmra.mxu2 %vm460_vm1, %v16238_v1 }
 0x318   : > { %v7852_v2 = vmul.f32 %v3961_v50, %v15939_v37  ;;  %v3965_v8 = vsub.f32 1.0, %v3964_v33  ;;  %v16192_v47 = vadd.f32 1.0, %v10292_v34  ;;  %10299 = vpow2.f32 %v9659_v4 }
 0x319   : > { %v10294_v53 = vpop.eup %10293  ;;  %v3974_v20 = vand.u32 2147483648, %v16114_v48  ;;  %v16197_v6 = vadd.f32 %v16060_v3, %v15050_v25  ;;  %vm3969_vm0 = vweird.f32 %v10290_v27  ;;  %v9461_v45 = vmul.f32 -1.442695, %v16180_v59 }
 0x31a   : > { %v16200_v49 = vadd.f32 %v16099_v57, %v7852_v2  ;;  %v3966_v17 = vmul.f32 %v10290_v27, %v3965_v8  ;;  %10301 = vrcp.f32 %v16192_v47  ;;  %v16206_v37 = vadd.f32 1.0, %v10294_v53  ;;  %v16269_v53 = vpop.f32.mrf.mxu0 }
 0x31b   : > { %vm3968_vm12 = vweird.f32 %v16114_v48  ;;  %vm3973_vm14 = vcmp.eq.f32.partialorder %v3972_v36, 8.507059e+37  ;;  %10303 = vpow2.f32 %v9640_v14  ;;  %v3975_v57 = vor.u32 1.1754944e-38, %v3974_v20  ;;  %v11116_v20 = vld [vmem:[%s11390_s22 + $0x10] sm:$0xff] }
 0x31c   : > { %v10296_v38 = vpop.eup %10295  ;;  %v3967_v41 = vadd.f32 %v10290_v27, %v3966_v17  ;;  %vm3970_vm4 = vmor %vm3968_vm12, %vm3969_vm0  ;;  %10305 = vrcp.f32 %v16206_v37  ;;  %v9462_v13 = vmul.f32 -1.442695, %v16197_v6  ;;  %v16214_v42 = vadd.f32 %v16103_v21, %v12284_v56  ;;  %9314 = vmatmul.msk.f32.gmra.mxu0 %vm460_vm1, %v11116_v20 }
 0x31d   : > { %v10298_v3 = vpop.eup %10297  ;;  %vm7073_vm6 = vweird.f32 %v16192_v47  ;;  %v7077_v48 = vand.u32 2147483647, %v16192_v47  ;;  %v16218_v40 = vadd.f32 1.0, %v10296_v38  ;;  %v7079_v18 = vand.u32 2147483648, %v16192_v47 }
 0x31e   : > { %v10300_v19 = vpop.eup %10299  ;;  %v3971_v32 = vsel %vm3970_vm4, %v10290_v27, %v3967_v41  ;;  %v16221_v35 = vadd.f32 1.0, %v10298_v3  ;;  %10307 = vpow2.f32 %v9461_v45  ;;  %v16231_v31 = vadd.f32 %v16149_v46, %v12599_v24 }
 0x31f   : > { %v3976_v58 = vsel %vm3973_vm14, %v3975_v57, %v3971_v32  ;;  %10309 = vrcp.f32 %v16218_v40  ;;  %v16227_v52 = vadd.f32 1.0, %v10300_v19  ;;  %v6792_v26 = vand.u32 2147483647, %v16206_v37 }
 0x320   : > { %v16223_v55 = vpop.eup %10301  ;;  %v7853_v21 = vmul.f32 %v3976_v58, %v15985_v7  ;;  %v6794_v46 = vand.u32 2147483648, %v16206_v37  ;;  %10311 = vpow2.f32 %v9462_v13  ;;  %vm16252_vm9 = vcmp.eq.f32.partialorder %v7077_v48, 8.507059e+37 }
 0x321   : > { %v7069_v7 = vmul.f32 %v16223_v55, %v16192_v47  ;;  %v10304_v27 = vpop.eup %10303  ;;  %vm7074_vm13 = vweird.f32 %v16223_v55  ;;  %10313 = vrcp.f32 %v16221_v35  ;;  %v4107_v4 = vand.u32 2147483647, %v16218_v40 }
 0x322   : > { %v16249_v11 = vadd.f32 %v16128_v23, %v7853_v21  ;;  %v10306_v30 = vpop.eup %10305  ;;  %v4109_v0 = vand.u32 2147483648, %v16218_v40  ;;  %v4124_v33 = vand.u32 2147483648, %v16221_v35  ;;  %v7080_v34 = vor.u32 1.1754944e-38, %v7079_v18  ;;  %vm16277_vm2 = vmor %vm7073_vm6, %vm7074_vm13 }
 0x323   : > { %v7070_v29 = vsub.f32 1.0, %v7069_v7  ;;  %v6784_v23 = vmul.f32 %v10306_v30, %v16206_v37  ;;  %vm6788_vm3 = vweird.f32 %v16206_v37  ;;  %10315 = vrcp.f32 %v16227_v52 }
 0x324   : > { %v10308_v50 = vpop.eup %10307  ;;  %vm16264_vm5 = vcmp.eq.f32.partialorder %v6792_v26, 8.507059e+37  ;;  %v6795_v2 = vor.u32 1.1754944e-38, %v6794_v46  ;;  %v4122_v8 = vand.u32 2147483647, %v16221_v35  ;;  %vm6789_vm10 = vweird.f32 %v10306_v30 }
 0x325   : > { %v7071_v14 = vmul.f32 %v16223_v55, %v7070_v29  ;;  %v10310_v17 = vpop.eup %10309  ;;  %v6785_v38 = vsub.f32 1.0, %v6784_v23  ;;  %vm4103_vm7 = vweird.f32 %v16218_v40  ;;  %v16282_v41 = vadd.f32 1.0, %v10304_v27  ;;  %vm16300_vm0 = vmor %vm6788_vm3, %vm6789_vm10 }
 0x326   : > { %v10312_v3 = vpop.eup %10311  ;;  %v4099_v13 = vmul.f32 %v10310_v17, %v16218_v40  ;;  %vm16286_vm11 = vcmp.eq.f32.partialorder %v4107_v4, 8.507059e+37  ;;  %v4110_v47 = vor.u32 1.1754944e-38, %v4109_v0  ;;  %vm4118_vm15 = vweird.f32 %v16221_v35  ;;  %v16310_v4 = vpop.f32.mrf.mxu1  ;;  %9347 = vmatmul.msk.f32.gmra.mxu1 %vm460_vm1, %v11116_v20 }
 0x327   : > { %v7072_v57 = vadd.f32 %v16223_v55, %v7071_v14  ;;  %v4125_v32 = vor.u32 1.1754944e-38, %v4124_v33  ;;  %v10314_v48 = vpop.eup %10313  ;;  %v6786_v58 = vmul.f32 %v10306_v30, %v6785_v38  ;;  %vm7223_vm8 = vweird.f32 %v16227_v52 }
 0x328   : > { %v7229_v18 = vand.u32 2147483648, %v16227_v52  ;;  %10317 = vrcp.f32 %v16282_v41  ;;  %v4100_v26 = vsub.f32 1.0, %v4099_v13  ;;  %v4114_v46 = vmul.f32 %v10314_v48, %v16221_v35 }
 0x329   : > { %v7076_v21 = vsel %vm16277_vm2, %v16223_v55, %v7072_v57  ;;  %vm16305_vm12 = vcmp.eq.f32.partialorder %v4122_v8, 8.507059e+37  ;;  %v7227_v29 = vand.u32 2147483647, %v16227_v52  ;;  %v10316_v55 = vpop.eup %10315  ;;  %v6787_v0 = vadd.f32 %v10306_v30, %v6786_v58 }
 0x32a   : > { %v7081_v37 = vsel %vm16252_vm9, %v7080_v34, %v7076_v21  ;;  %vm4104_vm14 = vweird.f32 %v10310_v17  ;;  %v16315_v33 = vadd.f32 1.0, %v10308_v50  ;;  %v4101_v14 = vmul.f32 %v10310_v17, %v4100_v26 }
 0x32b   : > { %v8060_v23 = vmul.f32 %v7081_v37, %v16017_v54  ;;  %v4115_v8 = vsub.f32 1.0, %v4114_v46  ;;  %v7219_v45 = vmul.f32 %v10316_v55, %v16227_v52  ;;  %v6791_v38 = vsel %vm16300_vm0, %v10306_v30, %v6787_v0  ;;  %vm4105_vm13 = vmor %vm4103_vm7, %vm4104_vm14  ;;  %v16359_v0 = vpop.f32.mrf.mxu2 }
 0x32c   : > { %vm4119_vm4 = vweird.f32 %v10314_v48  ;;  %v7230_v57 = vor.u32 1.1754944e-38, %v7229_v18  ;;  %vm6938_vm6 = vweird.f32 %v16282_v41  ;;  %v6796_v34 = vsel %vm16264_vm5, %v6795_v2, %v6791_v38 }
 0x32d   : > { %v8206_v36 = vadd.f32 %v16142_v44, %v8060_v23  ;;  %v4102_v50 = vadd.f32 %v10310_v17, %v4101_v14  ;;  %v4116_v20 = vmul.f32 %v10314_v48, %v4115_v8  ;;  %v8041_v54 = vmul.f32 %v6796_v34, %v16082_v51  ;;  %vm4120_vm3 = vmor %vm4118_vm15, %vm4119_vm4  ;;  %v16361_v23 = vpop.f32.mrf.mxu3  ;;  %9300 = vmatmul.msk.f32.gmra.mxu3 %vm460_vm1, %v16106_v16 }
 0x32e   : > { %v10318_v13 = vpop.eup %10317  ;;  %v7220_v58 = vsub.f32 1.0, %v7219_v45  ;;  %vm7224_vm9 = vweird.f32 %v10316_v55  ;;  %10319 = vrcp.f32 %v16315_v33  ;;  %v6942_v61 = vand.u32 2147483647, %v16282_v41 }
 0x32f   : > { %v4106_v30 = vsel %vm4105_vm13, %v10310_v17, %v4102_v50  ;;  %v4117_v18 = vadd.f32 %v10314_v48, %v4116_v20  ;;  %v6934_v44 = vmul.f32 %v10318_v13, %v16282_v41  ;;  %v8235_v2 = vadd.f32 %v16182_v15, %v8041_v54  ;;  %vm16342_vm5 = vmor %vm7223_vm8, %vm7224_vm9 }
 0x330   : > { %v4111_v21 = vsel %vm16286_vm11, %v4110_v47, %v4106_v30  ;;  %v7221_v51 = vmul.f32 %v10316_v55, %v7220_v58  ;;  %v6944_v40 = vand.u32 2147483648, %v16282_v41  ;;  %vm6939_vm2 = vweird.f32 %v10318_v13 }
 0x331   : > { %v7862_v17 = vmul.f32 %v4111_v21, %v16147_v10  ;;  %v4121_v7 = vsel %vm4120_vm3, %v10314_v48, %v4117_v18  ;;  %v6935_v15 = vsub.f32 1.0, %v6934_v44  ;;  %vm16348_vm10 = vcmp.eq.f32.partialorder %v7227_v29, 8.507059e+37  ;;  %vm16375_vm7 = vmor %vm6938_vm6, %vm6939_vm2  ;;  %v16416_v21 = vpop.f32.mrf.mxu0 }
 0x332   : > { %v4126_v19 = vsel %vm16305_vm12, %v4125_v32, %v4121_v7  ;;  %v7222_v35 = vadd.f32 %v10316_v55, %v7221_v51  ;;  %v16352_v46 = vadd.f32 1.0, %v10312_v3  ;;  %v9669_v37 = vmul.f32 -1.442695, %v16214_v42  ;;  %v16364_v32 = vld [vmem:[%s11390_s22 + $0xb8] sm:$0xff] }
 0x333   : > { %v16355_v10 = vadd.f32 %v16200_v49, %v7862_v17  ;;  %v7863_v52 = vmul.f32 %v4126_v19, %v16157_v22  ;;  %v6936_v48 = vmul.f32 %v10318_v13, %v6935_v15  ;;  %9269 = vmatmul.msk.f32.gmra.mxu2 %vm460_vm1, %v16364_v32  ;;  %vm6943_vm11 = vcmp.eq.f32.partialorder %v6942_v61, 8.507059e+37  ;;  %v11118_v51 = vld [vmem:[%s11390_s22 + $0x18] sm:$0xff]  ;;  %v16453_v22 = vpop.f32.mrf.mxu1 }
 0x334   : > { %v10320_v3 = vpop.eup %10319  ;;  %v7226_v49 = vsel %vm16342_vm5, %v10316_v55, %v7222_v35  ;;  %v6945_v27 = vor.u32 1.1754944e-38, %v6944_v40  ;;  %10321 = vrcp.f32 %v16352_v46  ;;  %v4257_v41 = vand.u32 2147483647, %v16315_v33  ;;  %9315 = vmatmul.msk.f32.gmra.mxu0 %vm460_vm1, %v11118_v51  ;;  %9348 = vmatmul.msk.f32.gmra.mxu1 %vm460_vm1, %v11118_v51 }
 0x335   : > { %v16381_v29 = vadd.f32 %v16249_v11, %v7863_v52  ;;  %v7231_v16 = vsel %vm16348_vm10, %v7230_v57, %v7226_v49  ;;  %v6937_v14 = vadd.f32 %v10318_v13, %v6936_v48  ;;  %v4249_v55 = vmul.f32 %v10320_v3, %v16315_v33 }
 0x336   : > { %v8070_v8 = vmul.f32 %v7231_v16, %v16161_v39  ;;  %v4259_v45 = vand.u32 2147483648, %v16315_v33  ;;  %10323 = vpow2.f32 %v9669_v37  ;;  %v9650_v11 = vmul.f32 -1.442695, %v16231_v31 }
 0x337   : > { %v6941_v38 = vsel %vm16375_vm7, %v10318_v13, %v6937_v14  ;;  %v4250_v34 = vsub.f32 1.0, %v4249_v55  ;;  %vm4253_vm15 = vweird.f32 %v16315_v33  ;;  %vm4254_vm8 = vweird.f32 %v10320_v3 }
 0x338   : > { %v16392_v50 = vadd.f32 %v8206_v36, %v8070_v8  ;;  %v6946_v20 = vsel %vm6943_vm11, %v6945_v27, %v6941_v38  ;;  %10325 = vpow2.f32 %v9650_v11  ;;  %v16398_v54 = vadd.f32 %v16187_v60, %v15043_v62  ;;  %vm4255_vm12 = vmor %vm4253_vm15, %vm4254_vm8 }
 0x339   : > { %v8051_v39 = vmul.f32 %v6946_v20, %v16168_v9  ;;  %v4251_v57 = vmul.f32 %v10320_v3, %v4250_v34  ;;  %vm16400_vm0 = vcmp.eq.f32.partialorder %v4257_v41, 8.507059e+37  ;;  %v4260_v36 = vor.u32 1.1754944e-38, %v4259_v45 }
 0x33a   : > { %v10322_v13 = vpop.eup %10321  ;;  %v16406_v30 = vadd.f32 %v16203_v12, %v15050_v25  ;;  %v16410_v18 = vadd.f32 %v16233_v43, %v12284_v56  ;;  %v4272_v61 = vand.u32 2147483647, %v16352_v46  ;;  %v4274_v12 = vand.u32 2147483648, %v16352_v46 }
 0x33b   : > { %v16412_v9 = vadd.f32 %v8235_v2, %v8051_v39  ;;  %v4252_v44 = vadd.f32 %v10320_v3, %v4251_v57  ;;  %v4264_v60 = vmul.f32 %v10322_v13, %v16352_v46  ;;  %v9471_v43 = vmul.f32 -1.442695, %v16398_v54 }
 0x33c   : > { %v9472_v2 = vmul.f32 -1.442695, %v16406_v30  ;;  %v16428_v40 = vadd.f32 %v16235_v28, %v12599_v24  ;;  %v10324_v17 = vpop.eup %10323  ;;  %v9679_v15 = vmul.f32 -1.442695, %v16410_v18  ;;  %v16433_v19 = vadd.f32 %v16269_v53, %v15043_v62 }
 0x33d   : > { %v4256_v7 = vsel %vm4255_vm12, %v10320_v3, %v4252_v44  ;;  %v4265_v26 = vsub.f32 1.0, %v4264_v60  ;;  %v16437_v35 = vadd.f32 1.0, %v10324_v17  ;;  %10327 = vpow2.f32 %v9471_v43  ;;  %v16503_v17 = vpop.f32.mrf.mxu3  ;;  %9301 = vmatmul.msk.f32.gmra.mxu3 %vm460_vm1, %v16238_v1 }
 0x33e   : > { %v4261_v33 = vsel %vm16400_vm0, %v4260_v36, %v4256_v7  ;;  %v16441_v47 = vadd.f32 %v16310_v4, %v15050_v25  ;;  %v10326_v28 = vpop.eup %10325  ;;  %vm4269_vm14 = vweird.f32 %v10322_v13  ;;  %10329 = vpow2.f32 %v9472_v2  ;;  %v16505_v7 = vpop.f32.mrf.mxu2 }
 0x33f   : > { %v7872_v52 = vmul.f32 %v4261_v33, %v16180_v59  ;;  %v4266_v48 = vmul.f32 %v10322_v13, %v4265_v26  ;;  %vm4268_vm4 = vweird.f32 %v16352_v46  ;;  %10331 = vrcp.f32 %v16437_v35  ;;  %v16508_v26 = vld [vmem:[%s11390_s22 + $0xc0] sm:$0xff] }
 0x340   : > { %v9660_v53 = vmul.f32 -1.442695, %v16428_v40  ;;  %v16450_v49 = vadd.f32 1.0, %v10326_v28  ;;  %v9481_v4 = vmul.f32 -1.442695, %v16433_v19  ;;  %vm4270_vm6 = vmor %vm4268_vm4, %vm4269_vm14  ;;  %v4275_v59 = vor.u32 1.1754944e-38, %v4274_v12  ;;  %9270 = vmatmul.msk.f32.gmra.mxu2 %vm460_vm1, %v16508_v26 }
 0x341   : > { %v16448_v37 = vadd.f32 %v16355_v10, %v7872_v52  ;;  %v4267_v3 = vadd.f32 %v10322_v13, %v4266_v48  ;;  %v7377_v46 = vand.u32 2147483647, %v16437_v35  ;;  %10333 = vpow2.f32 %v9679_v15 }
 0x342   : > { %v9482_v27 = vmul.f32 -1.442695, %v16441_v47  ;;  %vm4273_vm13 = vcmp.eq.f32.partialorder %v4272_v61, 8.507059e+37  ;;  %10335 = vrcp.f32 %v16450_v49  ;;  %v16461_v10 = vadd.f32 %v16359_v0, %v12284_v56 }
 0x343   : > { %v4271_v16 = vsel %vm4270_vm6, %v10322_v13, %v4267_v3  ;;  %v10328_v14 = vpop.eup %10327  ;;  %vm7373_vm9 = vweird.f32 %v16437_v35  ;;  %v7379_v8 = vand.u32 2147483648, %v16437_v35  ;;  %10337 = vpow2.f32 %v9660_v53 }
 0x344   : > { %v4276_v55 = vsel %vm4273_vm13, %v4275_v59, %v4271_v16  ;;  %v10330_v41 = vpop.eup %10329  ;;  %v7092_v38 = vand.u32 2147483647, %v16450_v49  ;;  %v16467_v34 = vadd.f32 1.0, %v10328_v14  ;;  %10339 = vpow2.f32 %v9481_v4  ;;  %v16531_v4 = vpop.f32.mrf.mxu0  ;;  %v11120_v59 = vld [vmem:[%s11390_s22 + $0x20] sm:$0xff] }
 0x345   : > { %v7873_v45 = vmul.f32 %v4276_v55, %v16197_v6  ;;  %v16469_v11 = vpop.eup %10331  ;;  %vm16471_vm3 = vcmp.eq.f32.partialorder %v7377_v46, 8.507059e+37  ;;  %v7094_v0 = vand.u32 2147483648, %v16450_v49  ;;  %v16476_v20 = vadd.f32 1.0, %v10330_v41  ;;  %9316 = vmatmul.msk.f32.gmra.mxu0 %vm460_vm1, %v11120_v59 }
 0x346   : > { %10341 = vpow2.f32 %v9482_v27  ;;  %v7369_v6 = vmul.f32 %v16469_v11, %v16437_v35  ;;  %v9689_v57 = vmul.f32 -1.442695, %v16461_v10  ;;  %v7380_v58 = vor.u32 1.1754944e-38, %v7379_v8 }
 0x347   : > { %v16479_v39 = vadd.f32 %v16381_v29, %v7873_v45  ;;  %10343 = vrcp.f32 %v16467_v34  ;;  %v10334_v13 = vpop.eup %10333  ;;  %vm7088_vm5 = vweird.f32 %v16450_v49  ;;  %v16489_v36 = vadd.f32 %v16361_v23, %v12599_v24 }
 0x348   : > { %10345 = vrcp.f32 %v16476_v20  ;;  %v16491_v29 = vpop.eup %10335  ;;  %v7370_v44 = vsub.f32 1.0, %v7369_v6  ;;  %vm7374_vm2 = vweird.f32 %v16469_v11  ;;  %vm16494_vm10 = vcmp.eq.f32.partialorder %v7092_v38, 8.507059e+37 }
 0x349   : > { %v4409_v61 = vand.u32 2147483648, %v16467_v34  ;;  %v10338_v51 = vpop.eup %10337  ;;  %v7084_v12 = vmul.f32 %v16491_v29, %v16450_v49  ;;  %v7095_v43 = vor.u32 1.1754944e-38, %v7094_v0  ;;  %v4407_v2 = vand.u32 2147483647, %v16467_v34  ;;  %vm16522_vm7 = vmor %vm7373_vm9, %vm7374_vm2 }
 0x34a   : > { %v4424_v23 = vand.u32 2147483648, %v16476_v20  ;;  %v10340_v15 = vpop.eup %10339  ;;  %v7371_v33 = vmul.f32 %v16469_v11, %v7370_v44  ;;  %v4422_v28 = vand.u32 2147483647, %v16476_v20  ;;  %v16516_v52 = vadd.f32 1.0, %v10334_v13 }
 0x34b   : > { %10347 = vpow2.f32 %v9689_v57  ;;  %v7085_v3 = vsub.f32 1.0, %v7084_v12  ;;  %vm7089_vm11 = vweird.f32 %v16491_v29  ;;  %vm4403_vm15 = vweird.f32 %v16467_v34 }
 0x34c   : > { %v10342_v48 = vpop.eup %10341  ;;  %v16529_v1 = vmul.f32 -1.442695, %v16489_v36  ;;  %v7372_v35 = vadd.f32 %v16469_v11, %v7371_v33  ;;  %v4410_v27 = vor.u32 1.1754944e-38, %v4409_v61  ;;  %vm4418_vm8 = vweird.f32 %v16476_v20  ;;  %vm16555_vm12 = vmor %vm7088_vm5, %vm7089_vm11 }
 0x34d   : > { %v10344_v46 = vpop.eup %10343  ;;  %10349 = vrcp.f32 %v16516_v52  ;;  %v16538_v16 = vadd.f32 1.0, %v10338_v51  ;;  %v7086_v55 = vmul.f32 %v16491_v29, %v7085_v3  ;;  %vm16542_vm0 = vcmp.eq.f32.partialorder %v4407_v2, 8.507059e+37 }
 0x34e   : > { %v10346_v14 = vpop.eup %10345  ;;  %v4399_v8 = vmul.f32 %v10344_v46, %v16467_v34  ;;  %v4425_v45 = vor.u32 1.1754944e-38, %v4424_v23  ;;  %v16546_v38 = vadd.f32 1.0, %v10340_v15  ;;  %v7376_v0 = vsel %vm16522_vm7, %v16469_v11, %v7372_v35 }
 0x34f   : > { %v4414_v57 = vmul.f32 %v10346_v14, %v16476_v20  ;;  %vm16560_vm14 = vcmp.eq.f32.partialorder %v4422_v28, 8.507059e+37  ;;  %vm7523_vm4 = vweird.f32 %v16516_v52  ;;  %v16565_v44 = vadd.f32 1.0, %v10342_v48 }
 0x350   : > { %v7381_v11 = vsel %vm16471_vm3, %v7380_v58, %v7376_v0  ;;  %v7087_v61 = vadd.f32 %v16491_v29, %v7086_v55  ;;  %v4400_v49 = vsub.f32 1.0, %v4399_v8  ;;  %v7527_v51 = vand.u32 2147483647, %v16516_v52  ;;  %v16579_v58 = vpop.f32.mrf.mxu1  ;;  %9349 = vmatmul.msk.f32.gmra.mxu1 %vm460_vm1, %v11120_v59 }
 0x351   : > { %v16571_v12 = vpop.eup %10347  ;;  %v8080_v2 = vmul.f32 %v7381_v11, %v16214_v42  ;;  %v4415_v23 = vsub.f32 1.0, %v4414_v57  ;;  %v7529_v15 = vand.u32 2147483648, %v16516_v52  ;;  %10351 = vrcp.f32 %v16538_v16 }
 0x352   : > { %v7091_v33 = vsel %vm16555_vm12, %v16491_v29, %v7087_v61  ;;  %v4401_v56 = vmul.f32 %v10344_v46, %v4400_v49  ;;  %vm4404_vm6 = vweird.f32 %v10344_v46  ;;  %vm4419_vm13 = vweird.f32 %v10346_v14 }
 0x353   : > { %v10350_v28 = vpop.eup %10349  ;;  %v16583_v48 = vadd.f32 %v16392_v50, %v8080_v2  ;;  %v7096_v42 = vsel %vm16494_vm10, %v7095_v43, %v7091_v33  ;;  %v4416_v53 = vmul.f32 %v10346_v14, %v4415_v23  ;;  %10353 = vrcp.f32 %v16546_v38  ;;  %vm4405_vm3 = vmor %vm4403_vm15, %vm4404_vm6  ;;  %v16633_v23 = vpop.f32.mrf.mxu3  ;;  %v16638_v33 = vld [vmem:[%s11390_s22 + $0xc8] sm:$0xff]  ;;  %9302 = vmatmul.msk.f32.gmra.mxu3 %vm460_vm1, %v16364_v32 }
 0x354   : > { %v8061_v3 = vmul.f32 %v7096_v42, %v16231_v31  ;;  %v4402_v29 = vadd.f32 %v10344_v46, %v4401_v56  ;;  %v7519_v35 = vmul.f32 %v10350_v28, %v16516_v52  ;;  %vm16590_vm9 = vcmp.eq.f32.partialorder %v7527_v51, 8.507059e+37  ;;  %vm4420_vm5 = vmor %vm4418_vm8, %vm4419_vm13 }
 0x355   : > { %v4417_v50 = vadd.f32 %v10346_v14, %v4416_v53  ;;  %v7530_v59 = vor.u32 1.1754944e-38, %v7529_v15  ;;  %v7242_v60 = vand.u32 2147483647, %v16538_v16  ;;  %v7244_v43 = vand.u32 2147483648, %v16538_v16  ;;  %v16635_v15 = vpop.f32.mrf.mxu2  ;;  %9271 = vmatmul.msk.f32.gmra.mxu2 %vm460_vm1, %v16638_v33 }
 0x356   : > { %v16599_v8 = vadd.f32 %v16412_v9, %v8061_v3  ;;  %v4406_v31 = vsel %vm4405_vm3, %v10344_v46, %v4402_v29  ;;  %v7520_v0 = vsub.f32 1.0, %v7519_v35  ;;  %vm7524_vm2 = vweird.f32 %v10350_v28  ;;  %v11122_v35 = vld [vmem:[%s11390_s22 + $0x28] sm:$0xff] }
 0x357   : > { %v10352_v6 = vpop.eup %10351  ;;  %v4411_v34 = vsel %vm16542_vm0, %v4410_v27, %v4406_v31  ;;  %v4421_v57 = vsel %vm4420_vm5, %v10346_v14, %v4417_v50  ;;  %v4557_v11 = vand.u32 2147483647, %v16546_v38  ;;  %10355 = vrcp.f32 %v16565_v44  ;;  %vm16615_vm10 = vmor %vm7523_vm4, %vm7524_vm2 }
 0x358   : > { %v7882_v61 = vmul.f32 %v4411_v34, %v16398_v54  ;;  %v4426_v9 = vsel %vm16560_vm14, %v4425_v45, %v4421_v57  ;;  %v7521_v46 = vmul.f32 %v10350_v28, %v7520_v0  ;;  %v7234_v20 = vmul.f32 %v10352_v6, %v16538_v16 }
 0x359   : > { %v10354_v49 = vpop.eup %10353  ;;  %v7883_v51 = vmul.f32 %v4426_v9, %v16406_v30  ;;  %vm7238_vm7 = vweird.f32 %v16538_v16  ;;  %vm7239_vm11 = vweird.f32 %v10352_v6  ;;  %vm16620_vm15 = vcmp.eq.f32.partialorder %v7242_v60, 8.507059e+37 }
 0x35a   : > { %v16625_v14 = vadd.f32 %v16448_v37, %v7882_v61  ;;  %v7522_v41 = vadd.f32 %v10350_v28, %v7521_v46  ;;  %v7235_v45 = vsub.f32 1.0, %v7234_v20  ;;  %v4549_v30 = vmul.f32 %v10354_v49, %v16546_v38  ;;  %vm16655_vm12 = vmor %vm7238_vm7, %vm7239_vm11 }
 0x35b   : > { %v16629_v52 = vadd.f32 %v16479_v39, %v7883_v51  ;;  %v7245_v13 = vor.u32 1.1754944e-38, %v7244_v43  ;;  %vm4553_vm8 = vweird.f32 %v16546_v38  ;;  %v4559_v2 = vand.u32 2147483648, %v16546_v38 }
 0x35c   : > { %v7526_v37 = vsel %vm16615_vm10, %v10350_v28, %v7522_v41  ;;  %v7236_v39 = vmul.f32 %v10352_v6, %v7235_v45  ;;  %v4550_v56 = vsub.f32 1.0, %v4549_v30  ;;  %vm16646_vm0 = vcmp.eq.f32.partialorder %v4557_v11, 8.507059e+37  ;;  %v16663_v28 = vpop.f32.mrf.mxu0  ;;  %9317 = vmatmul.msk.f32.gmra.mxu0 %vm460_vm1, %v11122_v35 }
 0x35d   : > { %v10356_v53 = vpop.eup %10355  ;;  %v7531_v3 = vsel %vm16590_vm9, %v7530_v59, %v7526_v37  ;;  %vm4554_vm14 = vweird.f32 %v10354_v49  ;;  %v16660_v32 = vadd.f32 1.0, %v16571_v12  ;;  %10357 = vpow2.f32 %v16529_v1 }
 0x35e   : > { %v8090_v55 = vmul.f32 %v7531_v3, %v16410_v18  ;;  %v7237_v50 = vadd.f32 %v10352_v6, %v7236_v39  ;;  %v4551_v59 = vmul.f32 %v10354_v49, %v4550_v56  ;;  %v4564_v16 = vmul.f32 %v10356_v53, %v16565_v44  ;;  %vm4555_vm4 = vmor %vm4553_vm8, %vm4554_vm14  ;;  %v16735_v39 = vld [vmem:[%s21939_s2] sm:$0xff] }
 0x35f   : > { %v4560_v60 = vor.u32 1.1754944e-38, %v4559_v2  ;;  %v4572_v43 = vand.u32 2147483647, %v16565_v44  ;;  %v4574_v31 = vand.u32 2147483648, %v16565_v44  ;;  %10359 = vrcp.f32 %v16660_v32 }
 0x360   : > { %v16673_v1 = vadd.f32 %v16583_v48, %v8090_v55  ;;  %v7241_v12 = vsel %vm16655_vm12, %v10352_v6, %v7237_v50  ;;  %v4552_v0 = vadd.f32 %v10354_v49, %v4551_v59  ;;  %v4565_v34 = vsub.f32 1.0, %v4564_v16 }
 0x361   : > { %v7246_v18 = vsel %vm16620_vm15, %v7245_v13, %v7241_v12  ;;  %vm4568_vm6 = vweird.f32 %v16565_v44  ;;  %vm4569_vm13 = vweird.f32 %v10356_v53  ;;  %v16685_v57 = vadd.f32 %v16416_v21, %v15043_v62  ;;  %v16767_v12 = vpop.f32.mrf.mxu2 }
 0x362   : > { %v8071_v48 = vmul.f32 %v7246_v18, %v16428_v40  ;;  %v4556_v11 = vsel %vm4555_vm4, %v10354_v49, %v4552_v0  ;;  %v4566_v6 = vmul.f32 %v10356_v53, %v4565_v34  ;;  %v16690_v61 = vadd.f32 %v16453_v22, %v15050_v25  ;;  %vm4570_vm3 = vmor %vm4568_vm6, %vm4569_vm13  ;;  %v16769_v0 = vpop.f32.mrf.mxu3  ;;  %v16772_v34 = vld [vmem:[%s11390_s22 + $0xd0] sm:$0xff]  ;;  %9303 = vmatmul.msk.f32.gmra.mxu3 %vm460_vm1, %v16508_v26 }
 0x363   : > { %v10358_v9 = vpop.eup %10357  ;;  %v4561_v38 = vsel %vm16646_vm0, %v4560_v60, %v4556_v11  ;;  %vm16694_vm9 = vcmp.eq.f32.partialorder %v4572_v43, 8.507059e+37  ;;  %v4575_v20 = vor.u32 1.1754944e-38, %v4574_v31  ;;  %v9491_v21 = vmul.f32 -1.442695, %v16685_v57  ;;  %9272 = vmatmul.msk.f32.gmra.mxu2 %vm460_vm1, %v16772_v34 }
 0x364   : > { %v16700_v51 = vadd.f32 %v16599_v8, %v8071_v48  ;;  %v7892_v40 = vmul.f32 %v4561_v38, %v16433_v19  ;;  %v4567_v49 = vadd.f32 %v10356_v53, %v4566_v6  ;;  %v16703_v27 = vadd.f32 1.0, %v10358_v9  ;;  %v16717_v19 = vpop.f32.mrf.mxu1  ;;  %9350 = vmatmul.msk.f32.gmra.mxu1 %vm460_vm1, %v11122_v35  ;;  %v1089_v46 = vpop.f32.mrf.mxu0 }
 0x365   : > { %v10360_v22 = vpop.eup %10359  ;;  %10361 = vpow2.f32 %v9491_v21  ;;  %v9492_v54 = vmul.f32 -1.442695, %v16690_v61  ;;  %v16711_v41 = vadd.f32 %v16503_v17, %v12599_v24  ;;  %v16715_v8 = vadd.f32 %v16531_v4, %v15043_v62 }
 0x366   : > { %v16721_v45 = vadd.f32 %v16625_v14, %v7892_v40  ;;  %v4571_v44 = vsel %vm4570_vm3, %v10356_v53, %v4567_v49  ;;  %v7669_v30 = vmul.f32 %v10360_v22, %v16660_v32  ;;  %vm7673_vm5 = vweird.f32 %v16660_v32 }
 0x367   : > { %v4576_v17 = vsel %vm16694_vm9, %v4575_v20, %v4571_v44  ;;  %v7677_v13 = vand.u32 2147483647, %v16660_v32  ;;  %v7679_v4 = vand.u32 2147483648, %v16660_v32  ;;  %10363 = vrcp.f32 %v16703_v27  ;;  %v11125_v20 = vld [vmem:[%s11390_s22 + $0x30] sm:$0xff] }
 0x368   : > { %v7893_v2 = vmul.f32 %v4576_v17, %v16441_v47  ;;  %v7670_v37 = vsub.f32 1.0, %v7669_v30  ;;  %vm7674_vm2 = vweird.f32 %v10360_v22  ;;  %10365 = vpow2.f32 %v9492_v54  ;;  %9318 = vmatmul.msk.f32.gmra.mxu0 %vm460_vm1, %v11125_v20 }
 0x369   : > { %v9680_v14 = vmul.f32 -1.442695, %v16711_v41  ;;  %v16738_v56 = vperm.slane %v16735_v39, 6  ;;  %v9501_v42 = vmul.f32 -1.442695, %v16715_v8  ;;  %vm16746_vm10 = vmor %vm7673_vm5, %vm7674_vm2  ;;  %v7680_v35 = vor.u32 1.1754944e-38, %v7679_v4 }
 0x36a   : > { %v16742_v53 = vadd.f32 %v16629_v52, %v7893_v2  ;;  %v7671_v3 = vmul.f32 %v10360_v22, %v7670_v37  ;;  %vm16754_vm7 = vcmp.eq.f32.partialorder %v7677_v13, 8.507059e+37  ;;  %vm7388_vm11 = vweird.f32 %v16703_v27 }
 0x36b   : > { %v10362_v47 = vpop.eup %10361  ;;  %10367 = vpow2.f32 %v9680_v14  ;;  %v16752_v55 = vadd.f32 %v16505_v7, %v16738_v56  ;;  %v7392_v31 = vand.u32 2147483647, %v16703_v27  ;;  %v7394_v48 = vand.u32 2147483648, %v16703_v27 }
 0x36c   : > { %v7672_v50 = vadd.f32 %v10360_v22, %v7671_v3  ;;  %v16758_v52 = vadd.f32 1.0, %v10362_v47  ;;  %10369 = vpow2.f32 %v9501_v42  ;;  %v16783_v11 = vadd.f32 %v16579_v58, %v15050_v25 }
 0x36d   : > { %v10364_v32 = vpop.eup %10363  ;;  %v9383_v16 = vmul.f32 -1.442695, %v16752_v55  ;;  %v16792_v21 = vadd.f32 %v16633_v23, %v12599_v24  ;;  %v16810_v23 = vadd.f32 %v16663_v28, %v15043_v62  ;;  %vm7393_vm0 = vcmp.eq.f32.partialorder %v7392_v31, 8.507059e+37  ;;  %v16847_v31 = vpop.f32.mrf.mxu1  ;;  %9351 = vmatmul.msk.f32.gmra.mxu1 %vm460_vm1, %v11125_v20 }
 0x36e   : > { %v10366_v60 = vpop.eup %10365  ;;  %v7676_v43 = vsel %vm16746_vm10, %v10360_v22, %v7672_v50  ;;  %v7384_v7 = vmul.f32 %v10364_v32, %v16703_v27  ;;  %10371 = vrcp.f32 %v16758_v52  ;;  %vm7389_vm15 = vweird.f32 %v10364_v32 }
 0x36f   : > { %v7681_v18 = vsel %vm16754_vm7, %v7680_v35, %v7676_v43  ;;  %v16786_v38 = vadd.f32 1.0, %v10366_v60  ;;  %10373 = vpow2.f32 %v9383_v16  ;;  %vm16801_vm8 = vmor %vm7388_vm11, %vm7389_vm15  ;;  %v7395_v22 = vor.u32 1.1754944e-38, %v7394_v48 }
 0x370   : > { %v8100_v6 = vmul.f32 %v7681_v18, %v16461_v10  ;;  %v7385_v9 = vsub.f32 1.0, %v7384_v7  ;;  %v9502_v24 = vmul.f32 -1.442695, %v16783_v11  ;;  %v4707_v17 = vand.u32 2147483647, %v16758_v52 }
 0x371   : > { %v10368_v26 = vpop.eup %10367  ;;  %10375 = vrcp.f32 %v16786_v38  ;;  %v9690_v13 = vmul.f32 -1.442695, %v16792_v21  ;;  %v4709_v37 = vand.u32 2147483648, %v16758_v52  ;;  %v16823_v28 = vadd.f32 %v16717_v19, %v15050_v25 }
 0x372   : > { %v10370_v40 = vpop.eup %10369  ;;  %v16795_v49 = vadd.f32 %v16673_v1, %v8100_v6  ;;  %v7386_v58 = vmul.f32 %v10364_v32, %v7385_v9  ;;  %v16805_v54 = vadd.f32 1.0, %v10368_v26  ;;  %v16826_v3 = vmul.f32 -1.442695, %v16810_v23 }
 0x373   : > { %v16812_v30 = vadd.f32 1.0, %v10370_v40  ;;  %vm4703_vm12 = vweird.f32 %v16758_v52  ;;  %vm16833_vm4 = vcmp.eq.f32.partialorder %v4707_v17, 8.507059e+37  ;;  %v4710_v16 = vor.u32 1.1754944e-38, %v4709_v37 }
 0x374   : > { %v10372_v1 = vpop.eup %10371  ;;  %v7387_v44 = vadd.f32 %v10364_v32, %v7386_v58  ;;  %10377 = vrcp.f32 %v16805_v54  ;;  %vm4718_vm6 = vweird.f32 %v16786_v38  ;;  %v4722_v7 = vand.u32 2147483647, %v16786_v38 }
 0x375   : > { %v4699_v27 = vmul.f32 %v10372_v1, %v16758_v52  ;;  %v10374_v4 = vpop.eup %10373  ;;  %10379 = vpow2.f32 %v9502_v24  ;;  %vm4704_vm14 = vweird.f32 %v10372_v1  ;;  %v7542_v48 = vand.u32 2147483647, %v16805_v54 }
 0x376   : > { %v7391_v2 = vsel %vm16801_vm8, %v10364_v32, %v7387_v44  ;;  %v16830_v35 = vadd.f32 1.0, %v10374_v4  ;;  %10381 = vrcp.f32 %v16812_v30  ;;  %vm4705_vm13 = vmor %vm4703_vm12, %vm4704_vm14  ;;  %v16855_v6 = vadd.f32 %v1089_v46, %v15043_v62 }
 0x377   : > { %v7396_v14 = vsel %vm7393_vm0, %v7395_v22, %v7391_v2  ;;  %v4700_v42 = vsub.f32 1.0, %v4699_v27  ;;  %v10376_v47 = vpop.eup %10375  ;;  %vm7538_vm3 = vweird.f32 %v16805_v54  ;;  %v7544_v20 = vand.u32 2147483648, %v16805_v54 }
 0x378   : > { %v8081_v29 = vmul.f32 %v7396_v14, %v16489_v36  ;;  %v4714_v59 = vmul.f32 %v10376_v47, %v16786_v38  ;;  %10383 = vrcp.f32 %v16830_v35  ;;  %v16843_v36 = vmul.f32 -1.442695, %v16823_v28 }
 0x379   : > { %v4701_v50 = vmul.f32 %v10372_v1, %v4700_v42  ;;  %10385 = vpow2.f32 %v9690_v13  ;;  %vm4719_vm9 = vweird.f32 %v10376_v47  ;;  %vm4723_vm10 = vcmp.eq.f32.partialorder %v4722_v7, 8.507059e+37  ;;  %v16896_v7 = vpop.f32.mrf.mxu3  ;;  %9304 = vmatmul.msk.f32.gmra.mxu3 %vm460_vm1, %v16638_v33  ;;  %v11127_v33 = vld [vmem:[%s11390_s22 + $0x38] sm:$0xff] }
 0x37a   : > { %v16839_v32 = vadd.f32 %v16700_v51, %v8081_v29  ;;  %v4715_v43 = vsub.f32 1.0, %v4714_v59  ;;  %v10378_v18 = vpop.eup %10377  ;;  %v4724_v51 = vand.u32 2147483648, %v16786_v38  ;;  %vm4720_vm2 = vmor %vm4718_vm6, %vm4719_vm9  ;;  %vm16871_vm7 = vcmp.eq.f32.partialorder %v7542_v48, 8.507059e+37 }
 0x37b   : > { %v4702_v60 = vadd.f32 %v10372_v1, %v4701_v50  ;;  %v10380_v9 = vpop.eup %10379  ;;  %v7534_v58 = vmul.f32 %v10378_v18, %v16805_v54  ;;  %vm7539_vm5 = vweird.f32 %v10378_v18  ;;  %v7545_v29 = vor.u32 1.1754944e-38, %v7544_v20  ;;  %v16917_v20 = vpop.f32.mrf.mxu0  ;;  %9319 = vmatmul.msk.f32.gmra.mxu0 %vm460_vm1, %v11127_v33 }
 0x37c   : > { %v4716_v40 = vmul.f32 %v10376_v47, %v4715_v43  ;;  %v16858_v10 = vpop.eup %10381  ;;  %v4725_v27 = vor.u32 1.1754944e-38, %v4724_v51  ;;  %v16875_v13 = vadd.f32 1.0, %v10380_v9  ;;  %vm16883_vm11 = vmor %vm7538_vm3, %vm7539_vm5  ;;  %v4859_v19 = vand.u32 2147483648, %v16812_v30  ;;  %v16894_v43 = vpop.f32.mrf.mxu2  ;;  %v16899_v51 = vld [vmem:[%s11390_s22 + $0xd8] sm:$0xff] }
 0x37d   : > { %v4706_v26 = vsel %vm4705_vm13, %v10372_v1, %v4702_v60  ;;  %v7535_v24 = vsub.f32 1.0, %v7534_v58  ;;  %v4849_v1 = vmul.f32 %v16858_v10, %v16812_v30  ;;  %vm4854_vm15 = vweird.f32 %v16858_v10  ;;  %9273 = vmatmul.msk.f32.gmra.mxu2 %vm460_vm1, %v16899_v51 }
 0x37e   : > { %v4711_v52 = vsel %vm16833_vm4, %v4710_v16, %v4706_v26  ;;  %v4717_v46 = vadd.f32 %v10376_v47, %v4716_v40  ;;  %v16867_v44 = vpop.eup %10383  ;;  %10387 = vrcp.f32 %v16875_v13  ;;  %v3087_v16 = vand.u32 2147483647, %v16830_v35 }
 0x37f   : > { %v7902_v22 = vmul.f32 %v4711_v52, %v16685_v57  ;;  %v7536_v2 = vmul.f32 %v10378_v18, %v7535_v24  ;;  %v3079_v37 = vmul.f32 %v16867_v44, %v16830_v35  ;;  %v10386_v14 = vpop.eup %10385  ;;  %v4850_v50 = vsub.f32 1.0, %v4849_v1 }
 0x380   : > { %v4721_v4 = vsel %vm4720_vm2, %v10376_v47, %v4717_v46  ;;  %v4857_v54 = vand.u32 2147483647, %v16812_v30  ;;  %v3089_v9 = vand.u32 2147483648, %v16830_v35  ;;  %v16911_v26 = vadd.f32 1.0, %v10386_v14 }
 0x381   : > { %v8252_v57 = vadd.f32 %v16721_v45, %v7902_v22  ;;  %v4726_v42 = vsel %vm4723_vm10, %v4725_v27, %v4721_v4  ;;  %v7537_v47 = vadd.f32 %v10378_v18, %v7536_v2  ;;  %v3080_v59 = vsub.f32 1.0, %v3079_v37 }
 0x382   : > { %v7903_v45 = vmul.f32 %v4726_v42, %v16690_v61  ;;  %v4851_v60 = vmul.f32 %v16858_v10, %v4850_v50  ;;  %vm4853_vm8 = vweird.f32 %v16812_v30  ;;  %v4860_v52 = vor.u32 1.1754944e-38, %v4859_v19  ;;  %v16964_v50 = vpop.f32.mrf.mxu1  ;;  %9352 = vmatmul.msk.f32.gmra.mxu1 %vm460_vm1, %v11127_v33 }
 0x383   : > { %v7541_v48 = vsel %vm16883_vm11, %v10378_v18, %v7537_v47  ;;  %v3081_v18 = vmul.f32 %v16867_v44, %v3080_v59  ;;  %vm4855_vm0 = vmor %vm4853_vm8, %vm4854_vm15  ;;  %v4872_v22 = vand.u32 2147483647, %v16875_v13  ;;  %10389 = vrcp.f32 %v16911_v26 }
 0x384   : > { %v16906_v61 = vadd.f32 %v16742_v53, %v7903_v45  ;;  %v7546_v40 = vsel %vm16871_vm7, %v7545_v29, %v7541_v48  ;;  %v4852_v58 = vadd.f32 %v16858_v10, %v4851_v60  ;;  %vm3083_vm12 = vweird.f32 %v16830_v35  ;;  %v10388_v24 = vpop.eup %10387 }
 0x385   : > { %v8091_v53 = vmul.f32 %v7546_v40, %v16711_v41  ;;  %vm4858_vm14 = vcmp.eq.f32.partialorder %v4857_v54, 8.507059e+37  ;;  %v16931_v46 = vadd.f32 %v16635_v15, %v16738_v56  ;;  %v3090_v1 = vor.u32 1.1754944e-38, %v3089_v9 }
 0x386   : > { %v4856_v30 = vsel %vm4855_vm0, %v16858_v10, %v4852_v58  ;;  %10391 = vpow2.f32 %v16826_v3  ;;  %vm3084_vm4 = vweird.f32 %v16867_v44  ;;  %vm16938_vm6 = vcmp.eq.f32.partialorder %v3087_v16, 8.507059e+37 }
 0x387   : > { %v16934_v41 = vadd.f32 %v16839_v32, %v8091_v53  ;;  %v4861_v27 = vsel %vm4858_vm14, %v4860_v52, %v4856_v30  ;;  %v4864_v4 = vmul.f32 %v10388_v24, %v16875_v13  ;;  %vm4868_vm13 = vweird.f32 %v16875_v13  ;;  %vm16971_vm5 = vmor %vm3083_vm12, %vm3084_vm4 }
 0x388   : > { %v7912_v10 = vmul.f32 %v4861_v27, %v16715_v8  ;;  %v3082_v15 = vadd.f32 %v16867_v44, %v3081_v18  ;;  %vm16946_vm9 = vcmp.eq.f32.partialorder %v4872_v22, 8.507059e+37  ;;  %v4874_v3 = vand.u32 2147483648, %v16875_v13 }
 0x389   : > { %v9393_v2 = vmul.f32 -1.442695, %v16931_v46  ;;  %v4865_v14 = vsub.f32 1.0, %v4864_v4  ;;  %10393 = vpow2.f32 %v16843_v36  ;;  %v16957_v8 = vadd.f32 %v16767_v12, %v16738_v56  ;;  %v10390_v42 = vpop.eup %10389  ;;  %v17022_v4 = vpop.f32.mrf.mxu2 }
 0x38a   : > { %v16952_v37 = vadd.f32 %v8252_v57, %v7912_v10  ;;  %vm7688_vm3 = vweird.f32 %v16911_v26  ;;  %v7692_v38 = vand.u32 2147483647, %v16911_v26  ;;  %v16962_v29 = vperm.slane %v16735_v39, 7 }
 0x38b   : > { %10395 = vpow2.f32 %v9393_v2  ;;  %v4866_v36 = vmul.f32 %v10388_v24, %v4865_v14  ;;  %vm4869_vm2 = vweird.f32 %v10388_v24  ;;  %v7684_v57 = vmul.f32 %v10390_v42, %v16911_v26  ;;  %v17043_v14 = vpop.f32.mrf.mxu0 }
 0x38c   : > { %v9403_v19 = vmul.f32 -1.442695, %v16957_v8  ;;  %v10392_v39 = vpop.eup %10391  ;;  %vm7689_vm10 = vweird.f32 %v10390_v42  ;;  %v7694_v45 = vand.u32 2147483648, %v16911_v26  ;;  %v16980_v47 = vadd.f32 %v16769_v0, %v16962_v29  ;;  %vm4870_vm7 = vmor %vm4868_vm13, %vm4869_vm2 }
 0x38d   : > { %v9521_v35 = vmul.f32 -1.442695, %v16855_v6  ;;  %v4867_v59 = vadd.f32 %v10388_v24, %v4866_v36  ;;  %v7685_v16 = vsub.f32 1.0, %v7684_v57  ;;  %v16983_v60 = vadd.f32 1.0, %v10392_v39  ;;  %vm17005_vm15 = vmor %vm7688_vm3, %vm7689_vm10 }
 0x38e   : > { %10397 = vpow2.f32 %v9403_v19  ;;  %v3086_v54 = vsel %vm16971_vm5, %v16867_v44, %v3082_v15  ;;  %v4875_v48 = vor.u32 1.1754944e-38, %v4874_v3  ;;  %v9384_v9 = vmul.f32 -1.442695, %v16980_v47  ;;  %v17024_v15 = vpop.f32.mrf.mxu3  ;;  %9305 = vmatmul.msk.f32.gmra.mxu3 %vm460_vm1, %v16772_v34 }
 0x38f   : > { %v16993_v0 = vadd.f32 %v16847_v31, %v15050_v25  ;;  %v10394_v40 = vpop.eup %10393  ;;  %v4871_v58 = vsel %vm4870_vm7, %v10388_v24, %v4867_v59  ;;  %v7686_v52 = vmul.f32 %v10390_v42, %v7685_v16  ;;  %vm16995_vm11 = vcmp.eq.f32.partialorder %v7692_v38, 8.507059e+37  ;;  %v11129_v38 = vld [vmem:[%s11390_s22 + $0x40] sm:$0xff] }
 0x390   : > { %10399 = vrcp.f32 %v16983_v60  ;;  %v4876_v13 = vsel %vm16946_vm9, %v4875_v48, %v4871_v58  ;;  %v7695_v53 = vor.u32 1.1754944e-38, %v7694_v45  ;;  %v17009_v18 = vadd.f32 1.0, %v10394_v40  ;;  %9320 = vmatmul.msk.f32.gmra.mxu0 %vm460_vm1, %v11129_v38 }
 0x391   : > { %v10396_v44 = vpop.eup %10395  ;;  %10401 = vpow2.f32 %v9521_v35  ;;  %v7913_v22 = vmul.f32 %v4876_v13, %v16783_v11  ;;  %v7687_v30 = vadd.f32 %v10390_v42, %v7686_v52  ;;  %v3091_v27 = vsel %vm16938_vm6, %v3090_v1, %v3086_v54  ;;  %v17027_v11 = vld [vmem:[%s11390_s22 + $0xe0] sm:$0xff] }
 0x392   : > { %v17012_v24 = vadd.f32 1.0, %v10396_v44  ;;  %10403 = vpow2.f32 %v9384_v9  ;;  %v9522_v26 = vmul.f32 -1.442695, %v16993_v0  ;;  %v17020_v10 = vadd.f32 %v16917_v20, %v15043_v62  ;;  %9274 = vmatmul.msk.f32.gmra.mxu2 %vm460_vm1, %v17027_v11 }
 0x393   : > { %10405 = vrcp.f32 %v17009_v18  ;;  %v17034_v17 = vadd.f32 %v16906_v61, %v7913_v22  ;;  %v7691_v20 = vsel %vm17005_vm15, %v10390_v42, %v7687_v30  ;;  %v5007_v32 = vand.u32 2147483647, %v16983_v60 }
 0x394   : > { %v10398_v1 = vpop.eup %10397  ;;  %10407 = vrcp.f32 %v17012_v24  ;;  %v7696_v3 = vsel %vm16995_vm11, %v7695_v53, %v7691_v20  ;;  %v5009_v2 = vand.u32 2147483648, %v16983_v60  ;;  %v17048_v61 = vmul.f32 %v3091_v27, %v16752_v55 }
 0x395   : > { %v8101_v42 = vmul.f32 %v7696_v3, %v16792_v21  ;;  %v17051_v12 = vadd.f32 1.0, %v10398_v1  ;;  %vm5003_vm8 = vweird.f32 %v16983_v60  ;;  %10409 = vpow2.f32 %v9522_v26 }
 0x396   : > { %v10400_v34 = vpop.eup %10399  ;;  %v17056_v19 = vmul.f32 -1.442695, %v17020_v10  ;;  %v3237_v55 = vand.u32 2147483647, %v17012_v24  ;;  %vm17062_vm0 = vcmp.eq.f32.partialorder %v5007_v32, 8.507059e+37  ;;  %v3239_v59 = vand.u32 2147483648, %v17012_v24  ;;  %v17087_v32 = vpop.f32.mrf.mxu1  ;;  %9353 = vmatmul.msk.f32.gmra.mxu1 %vm460_vm1, %v11129_v38 }
 0x397   : > { %v10402_v36 = vpop.eup %10401  ;;  %v4999_v57 = vmul.f32 %v10400_v34, %v16983_v60  ;;  %v17059_v45 = vadd.f32 %v16934_v41, %v8101_v42  ;;  %10411 = vrcp.f32 %v17051_v12  ;;  %v5010_v54 = vor.u32 1.1754944e-38, %v5009_v2 }
 0x398   : > { %v10404_v39 = vpop.eup %10403  ;;  %vm5018_vm12 = vweird.f32 %v17009_v18  ;;  %vm3233_vm14 = vweird.f32 %v17012_v24  ;;  %v17073_v40 = vadd.f32 1.0, %v10402_v36  ;;  %vm5004_vm4 = vweird.f32 %v10400_v34 }
 0x399   : > { %v10406_v21 = vpop.eup %10405  ;;  %v5000_v16 = vsub.f32 1.0, %v4999_v57  ;;  %v17071_v9 = vadd.f32 1.0, %v10404_v39  ;;  %v5024_v33 = vand.u32 2147483648, %v17009_v18  ;;  %vm17077_vm6 = vcmp.eq.f32.partialorder %v3237_v55, 8.507059e+37  ;;  %vm5005_vm9 = vmor %vm5003_vm8, %vm5004_vm4 }
 0x39a   : > { %v10408_v48 = vpop.eup %10407  ;;  %v5014_v41 = vmul.f32 %v10406_v21, %v17009_v18  ;;  %v5022_v31 = vand.u32 2147483647, %v17009_v18  ;;  %v3240_v30 = vor.u32 1.1754944e-38, %v3239_v59  ;;  %vm5019_vm3 = vweird.f32 %v10406_v21 }
 0x39b   : > { %v3229_v58 = vmul.f32 %v10408_v48, %v17012_v24  ;;  %v5001_v52 = vmul.f32 %v10400_v34, %v5000_v16  ;;  %10413 = vrcp.f32 %v17071_v9  ;;  %v10410_v53 = vpop.eup %10409  ;;  %vm3234_vm13 = vweird.f32 %v10408_v48  ;;  %vm5020_vm10 = vmor %vm5018_vm12, %vm5019_vm3 }
 0x39c   : > { %v5015_v13 = vsub.f32 1.0, %v5014_v41  ;;  %v3387_v20 = vand.u32 2147483647, %v17051_v12  ;;  %10415 = vrcp.f32 %v17073_v40  ;;  %v5025_v42 = vor.u32 1.1754944e-38, %v5024_v33  ;;  %vm17094_vm5 = vmor %vm3233_vm14, %vm3234_vm13 }
 0x39d   : > { %v3230_v22 = vsub.f32 1.0, %v3229_v58  ;;  %v5002_v27 = vadd.f32 %v10400_v34, %v5001_v52  ;;  %v10412_v26 = vpop.eup %10411  ;;  %vm3383_vm2 = vweird.f32 %v17051_v12  ;;  %v3389_v38 = vand.u32 2147483648, %v17051_v12 }
 0x39e   : > { %v5016_v1 = vmul.f32 %v10406_v21, %v5015_v13  ;;  %v3379_v36 = vmul.f32 %v10412_v26, %v17051_v12  ;;  %vm3384_vm7 = vweird.f32 %v10412_v26  ;;  %vm5023_vm11 = vcmp.eq.f32.partialorder %v5022_v31, 8.507059e+37 }
 0x39f   : > { %v3231_v3 = vmul.f32 %v10408_v48, %v3230_v22  ;;  %v5006_v2 = vsel %vm5005_vm9, %v10400_v34, %v5002_v27  ;;  %vm17108_vm15 = vcmp.eq.f32.partialorder %v3387_v20, 8.507059e+37  ;;  %vm17126_vm8 = vmor %vm3383_vm2, %vm3384_vm7  ;;  %v5157_v22 = vand.u32 2147483647, %v17073_v40  ;;  %v17144_v20 = vpop.f32.mrf.mxu2 }
 0x3a0   : > { %v5011_v57 = vsel %vm17062_vm0, %v5010_v54, %v5006_v2  ;;  %v5017_v39 = vadd.f32 %v10406_v21, %v5016_v1  ;;  %v3380_v24 = vsub.f32 1.0, %v3379_v36  ;;  %v17114_v54 = vadd.f32 %v16964_v50, %v15050_v25 }
 0x3a1   : > { %v3232_v55 = vadd.f32 %v10408_v48, %v3231_v3  ;;  %v7922_v34 = vmul.f32 %v5011_v57, %v16810_v23  ;;  %v17106_v59 = vpop.eup %10413  ;;  %v3390_v50 = vor.u32 1.1754944e-38, %v3389_v38  ;;  %vm3098_vm0 = vweird.f32 %v17071_v9  ;;  %v17146_v3 = vpop.f32.mrf.mxu3  ;;  %9306 = vmatmul.msk.f32.gmra.mxu3 %vm460_vm1, %v16899_v51 }
 0x3a2   : > { %v5021_v16 = vsel %vm5020_vm10, %v10406_v21, %v5017_v39  ;;  %v3381_v58 = vmul.f32 %v10412_v26, %v3380_v24  ;;  %v10416_v52 = vpop.eup %10415  ;;  %vm3099_vm12 = vweird.f32 %v17106_v59  ;;  %v17158_v2 = vadd.f32 1.0, %v10410_v53  ;;  %v1098_v51 = vpop.f32.mrf.mxu0  ;;  %v11131_v39 = vld [vmem:[%s11390_s22 + $0x48] sm:$0xff] }
 0x3a3   : > { %v3236_v23 = vsel %vm17094_vm5, %v10408_v48, %v3232_v55  ;;  %v17119_v18 = vadd.f32 %v16952_v37, %v7922_v34  ;;  %v5026_v41 = vsel %vm5023_vm11, %v5025_v42, %v5021_v16  ;;  %v3094_v37 = vmul.f32 %v17106_v59, %v17071_v9  ;;  %9321 = vmatmul.msk.f32.gmra.mxu0 %vm460_vm1, %v11131_v39 }
 0x3a4   : > { %v3241_v21 = vsel %vm17077_vm6, %v3240_v30, %v3236_v23  ;;  %v7923_v33 = vmul.f32 %v5026_v41, %v16823_v28  ;;  %v3382_v31 = vadd.f32 %v10412_v26, %v3381_v58  ;;  %v5149_v44 = vmul.f32 %v10416_v52, %v17073_v40  ;;  %vm17183_vm6 = vmor %vm3098_vm0, %vm3099_vm12 }
 0x3a5   : > { %v7804_v48 = vmul.f32 %v3241_v21, %v16931_v46  ;;  %v3095_v12 = vsub.f32 1.0, %v3094_v37  ;;  %v5159_v46 = vand.u32 2147483648, %v17073_v40  ;;  %v17162_v42 = vadd.f32 %v16894_v43, %v16738_v56  ;;  %v1211_v43 = vpop.f32.mrf.mxu1  ;;  %9354 = vmatmul.msk.f32.gmra.mxu1 %vm460_vm1, %v11131_v39 }
 0x3a6   : > { %v17136_v28 = vadd.f32 %v17034_v17, %v7923_v33  ;;  %v3386_v27 = vsel %vm17126_vm8, %v10412_v26, %v3382_v31  ;;  %v5150_v1 = vsub.f32 1.0, %v5149_v44  ;;  %v17149_v17 = vld [vmem:[%s11390_s22 + $0xe8] sm:$0xff]  ;;  %vm5154_vm14 = vweird.f32 %v10416_v52 }
 0x3a7   : > { %v8304_v30 = vadd.f32 %v7804_v48, %v17048_v61  ;;  %9275 = vmatmul.msk.f32.gmra.mxu2 %vm460_vm1, %v17149_v17  ;;  %v3391_v61 = vsel %vm17108_vm15, %v3390_v50, %v3386_v27  ;;  %v3096_v26 = vmul.f32 %v17106_v59, %v3095_v12  ;;  %v17167_v57 = vadd.f32 %v16896_v7, %v16962_v29 }
 0x3a8   : > { %v7814_v36 = vmul.f32 %v3391_v61, %v16957_v8  ;;  %v5151_v60 = vmul.f32 %v10416_v52, %v5150_v1  ;;  %v3102_v38 = vand.u32 2147483647, %v17071_v9  ;;  %v3104_v53 = vand.u32 2147483648, %v17071_v9 }
 0x3a9   : > { %vm5153_vm4 = vweird.f32 %v17073_v40  ;;  %10417 = vrcp.f32 %v17158_v2  ;;  %v3097_v7 = vadd.f32 %v17106_v59, %v3096_v26  ;;  %v9413_v40 = vmul.f32 -1.442695, %v17162_v42 }
 0x3aa   : > { %v17176_v8 = vadd.f32 %v8304_v30, %v7814_v36  ;;  %v5152_v34 = vadd.f32 %v10416_v52, %v5151_v60  ;;  %vm5155_vm13 = vmor %vm5153_vm4, %vm5154_vm14  ;;  %v5160_v24 = vor.u32 1.1754944e-38, %v5159_v46  ;;  %v9394_v16 = vmul.f32 -1.442695, %v17167_v57  ;;  %v17235_v36 = vpop.f32.mrf.mxu2  ;;  %v17240_v60 = vld [vmem:[%s11390_s22 + $0xf0] sm:$0xff] }
 0x3ab   : > { %10419 = vpow2.f32 %v17056_v19  ;;  %vm5158_vm9 = vcmp.eq.f32.partialorder %v5157_v22, 8.507059e+37  ;;  %v3105_v23 = vor.u32 1.1754944e-38, %v3104_v53  ;;  %v9532_v9 = vmul.f32 -1.442695, %v17114_v54 }
 0x3ac   : > { %v5156_v35 = vsel %vm5155_vm13, %v10416_v52, %v5152_v34  ;;  %10421 = vpow2.f32 %v9413_v40  ;;  %v3101_v58 = vsel %vm17183_vm6, %v17106_v59, %v3097_v7  ;;  %vm3103_vm3 = vcmp.eq.f32.partialorder %v3102_v38, 8.507059e+37  ;;  %v11133_v40 = vld [vmem:[%s11390_s22 + $0x50] sm:$0xff] }
 0x3ad   : > { %v5161_v41 = vsel %vm5158_vm9, %v5160_v24, %v5156_v35  ;;  %10423 = vpow2.f32 %v9394_v16  ;;  %v17198_v33 = vadd.f32 %v17022_v4, %v16738_v56  ;;  %v5172_v52 = vand.u32 2147483647, %v17158_v2 }
 0x3ae   : > { %v7932_v21 = vmul.f32 %v5161_v41, %v16855_v6  ;;  %v5174_v13 = vand.u32 2147483648, %v17158_v2  ;;  %10425 = vpow2.f32 %v9532_v9  ;;  %v17204_v50 = vadd.f32 %v17043_v14, %v15043_v62 }
 0x3af   : > { %v10418_v19 = vpop.eup %10417  ;;  %v9423_v6 = vmul.f32 -1.442695, %v17198_v33  ;;  %v3106_v4 = vsel %vm3103_vm3, %v3105_v23, %v3101_v58  ;;  %vm5168_vm5 = vweird.f32 %v17158_v2  ;;  %v17214_v31 = vadd.f32 %v17087_v32, %v15050_v25  ;;  %9276 = vmatmul.msk.f32.gmra.mxu2 %vm460_vm1, %v17240_v60 }
 0x3b0   : > { %v17207_v37 = vadd.f32 %v17119_v18, %v7932_v21  ;;  %v5164_v59 = vmul.f32 %v10418_v19, %v17158_v2  ;;  %v17217_v44 = vadd.f32 %v1098_v51, %v15043_v62  ;;  %v17223_v22 = vadd.f32 %v17024_v15, %v16962_v29  ;;  %v17237_v15 = vpop.f32.mrf.mxu3  ;;  %9307 = vmatmul.msk.f32.gmra.mxu3 %vm460_vm1, %v17027_v11  ;;  %v17259_v11 = vpop.f32.mrf.mxu0 }
 0x3b1   : > { %v10420_v48 = vpop.eup %10419  ;;  %10427 = vpow2.f32 %v9423_v6  ;;  %vm17225_vm2 = vcmp.eq.f32.partialorder %v5172_v52, 8.507059e+37  ;;  %v5175_v32 = vor.u32 1.1754944e-38, %v5174_v13  ;;  %v9541_v46 = vmul.f32 -1.442695, %v17204_v50  ;;  %9322 = vmatmul.msk.f32.gmra.mxu0 %vm460_vm1, %v11133_v40 }
 0x3b2   : > { %v10422_v14 = vpop.eup %10421  ;;  %v5165_v12 = vsub.f32 1.0, %v5164_v59  ;;  %v17219_v18 = vadd.f32 1.0, %v10420_v48  ;;  %vm5169_vm10 = vweird.f32 %v10418_v19  ;;  %v17247_v39 = vmul.f32 %v3106_v4, %v16980_v47 }
 0x3b3   : > { %v10424_v30 = vpop.eup %10423  ;;  %v17229_v1 = vadd.f32 1.0, %v10422_v14  ;;  %v9542_v38 = vmul.f32 -1.442695, %v17214_v31  ;;  %v17252_v53 = vadd.f32 %v1211_v43, %v15050_v25  ;;  %v9404_v55 = vmul.f32 -1.442695, %v17223_v22  ;;  %vm5170_vm7 = vmor %vm5168_vm5, %vm5169_vm10 }
 0x3b4   : > { %v5166_v61 = vmul.f32 %v10418_v19, %v5165_v12  ;;  %v17232_v26 = vadd.f32 1.0, %v10424_v30  ;;  %10429 = vrcp.f32 %v17219_v18  ;;  %v10426_v51 = vpop.eup %10425  ;;  %v17257_v34 = vmul.f32 -1.442695, %v17217_v44 }
 0x3b5   : > { %10431 = vrcp.f32 %v17229_v1  ;;  %v3537_v47 = vand.u32 2147483647, %v17229_v1  ;;  %v3539_v43 = vand.u32 2147483648, %v17229_v1  ;;  %vm5303_vm11 = vweird.f32 %v17219_v18 }
 0x3b6   : > { %v5167_v7 = vadd.f32 %v10418_v19, %v5166_v61  ;;  %10433 = vrcp.f32 %v17232_v26  ;;  %v3252_v24 = vand.u32 2147483647, %v17232_v26  ;;  %v3254_v23 = vand.u32 2147483648, %v17232_v26 }
 0x3b7   : > { %10435 = vpow2.f32 %v9541_v46  ;;  %v10428_v16 = vpop.eup %10427  ;;  %v17271_v41 = vadd.f32 1.0, %v10426_v51  ;;  %vm3533_vm15 = vweird.f32 %v17229_v1  ;;  %v5307_v2 = vand.u32 2147483647, %v17219_v18 }
 0x3b8   : > { %v5171_v35 = vsel %vm5170_vm7, %v10418_v19, %v5167_v7  ;;  %v17277_v58 = vadd.f32 1.0, %v10428_v16  ;;  %vm3248_vm8 = vweird.f32 %v17232_v26  ;;  %v5309_v19 = vand.u32 2147483648, %v17219_v18 }
 0x3b9   : > { %v5176_v9 = vsel %vm17225_vm2, %v5175_v32, %v5171_v35  ;;  %10437 = vrcp.f32 %v17271_v41  ;;  %vm17283_vm0 = vcmp.eq.f32.partialorder %v3537_v47, 8.507059e+37  ;;  %v3540_v6 = vor.u32 1.1754944e-38, %v3539_v43 }
 0x3ba   : > { %v10430_v21 = vpop.eup %10429  ;;  %v7933_v52 = vmul.f32 %v5176_v9, %v16993_v0  ;;  %vm17287_vm12 = vcmp.eq.f32.partialorder %v3252_v24, 8.507059e+37  ;;  %v3255_v30 = vor.u32 1.1754944e-38, %v3254_v23  ;;  %10439 = vrcp.f32 %v17277_v58 }
 0x3bb   : > { %v10432_v13 = vpop.eup %10431  ;;  %v5299_v4 = vmul.f32 %v10430_v21, %v17219_v18  ;;  %vm5304_vm14 = vweird.f32 %v10430_v21  ;;  %vm17298_vm4 = vcmp.eq.f32.partialorder %v5307_v2, 8.507059e+37  ;;  %v5310_v7 = vor.u32 1.1754944e-38, %v5309_v19  ;;  %v17321_v19 = vpop.f32.mrf.mxu1  ;;  %9355 = vmatmul.msk.f32.gmra.mxu1 %vm460_vm1, %v11133_v40 }
 0x3bc   : > { %v10434_v14 = vpop.eup %10433  ;;  %v17293_v0 = vadd.f32 %v17136_v28, %v7933_v52  ;;  %v3529_v12 = vmul.f32 %v10432_v13, %v17229_v1  ;;  %vm3534_vm6 = vweird.f32 %v10432_v13  ;;  %v5322_v28 = vand.u32 2147483647, %v17271_v41  ;;  %vm17306_vm3 = vmor %vm5303_vm11, %vm5304_vm14 }
 0x3bd   : > { %v10436_v27 = vpop.eup %10435  ;;  %v3244_v32 = vmul.f32 %v10434_v14, %v17232_v26  ;;  %v5300_v46 = vsub.f32 1.0, %v5299_v4  ;;  %vm3249_vm13 = vweird.f32 %v10434_v14  ;;  %vm5318_vm9 = vweird.f32 %v17271_v41  ;;  %vm17316_vm2 = vmor %vm3533_vm15, %vm3534_vm6 }
 0x3be   : > { %v3530_v51 = vsub.f32 1.0, %v3529_v12  ;;  %10441 = vpow2.f32 %v9404_v55  ;;  %v5324_v23 = vand.u32 2147483648, %v17271_v41  ;;  %vm3683_vm5 = vweird.f32 %v17277_v58  ;;  %vm17327_vm10 = vmor %vm3248_vm8, %vm3249_vm13 }
 0x3bf   : > { %v3245_v47 = vsub.f32 1.0, %v3244_v32  ;;  %v5301_v43 = vmul.f32 %v10430_v21, %v5300_v46  ;;  %v10438_v24 = vpop.eup %10437  ;;  %v17312_v9 = vadd.f32 1.0, %v10436_v27  ;;  %10443 = vpow2.f32 %v9542_v38 }
 0x3c0   : > { %v3531_v16 = vmul.f32 %v10432_v13, %v3530_v51  ;;  %v5314_v18 = vmul.f32 %v10438_v24, %v17271_v41  ;;  %v10440_v4 = vpop.eup %10439  ;;  %v3687_v27 = vand.u32 2147483647, %v17277_v58  ;;  %v3689_v32 = vand.u32 2147483648, %v17277_v58 }
 0x3c1   : > { %v3246_v55 = vmul.f32 %v10434_v14, %v3245_v47  ;;  %v5302_v52 = vadd.f32 %v10430_v21, %v5301_v43  ;;  %10445 = vrcp.f32 %v17312_v9  ;;  %v3679_v51 = vmul.f32 %v10440_v4, %v17277_v58 }
 0x3c2   : > { %v3532_v12 = vadd.f32 %v10432_v13, %v3531_v16  ;;  %v5315_v40 = vsub.f32 1.0, %v5314_v18  ;;  %vm5319_vm7 = vweird.f32 %v10438_v24  ;;  %vm3684_vm11 = vweird.f32 %v10440_v4 }
 0x3c3   : > { %v3247_v38 = vadd.f32 %v10434_v14, %v3246_v55  ;;  %v5306_v46 = vsel %vm17306_vm3, %v10430_v21, %v5302_v52  ;;  %v3680_v2 = vsub.f32 1.0, %v3679_v51  ;;  %vm5320_vm15 = vmor %vm5318_vm9, %vm5319_vm7  ;;  %vm5323_vm8 = vcmp.eq.f32.partialorder %v5322_v28, 8.507059e+37  ;;  %v17396_v51 = vld [vmem:[%s11390_s22 + $0xf8] sm:$0xff] }
 0x3c4   : > { %v3536_v26 = vsel %vm17316_vm2, %v10432_v13, %v3532_v12  ;;  %v5311_v47 = vsel %vm17298_vm4, %v5310_v7, %v5306_v46  ;;  %v10442_v43 = vpop.eup %10441  ;;  %v5316_v35 = vmul.f32 %v10438_v24, %v5315_v40  ;;  %vm5453_vm14 = vweird.f32 %v17312_v9  ;;  %v17393_v40 = vpop.f32.mrf.mxu3  ;;  %9308 = vmatmul.msk.f32.gmra.mxu3 %vm460_vm1, %v17149_v17  ;;  %v11135_v17 = vld [vmem:[%s11390_s22 + $0x58] sm:$0xff] }
 0x3c5   : > { %v3541_v16 = vsel %vm17283_vm0, %v3540_v6, %v3536_v26  ;;  %v3251_v55 = vsel %vm17327_vm10, %v10434_v14, %v3247_v38  ;;  %v7942_v21 = vmul.f32 %v5311_v47, %v17020_v10  ;;  %v17349_v61 = vadd.f32 1.0, %v10442_v43  ;;  %v10444_v7 = vpop.eup %10443  ;;  %vm17367_vm0 = vmor %vm3683_vm5, %vm3684_vm11 }
 0x3c6   : > { %v7824_v52 = vmul.f32 %v3541_v16, %v17162_v42  ;;  %v3256_v13 = vsel %vm17287_vm12, %v3255_v30, %v3251_v55  ;;  %v5317_v6 = vadd.f32 %v10438_v24, %v5316_v35  ;;  %v5457_v14 = vand.u32 2147483647, %v17312_v9  ;;  %v17411_v55 = vpop.f32.mrf.mxu0  ;;  %9323 = vmatmul.msk.f32.gmra.mxu0 %vm460_vm1, %v11135_v17 }
 0x3c7   : > { %v7805_v18 = vmul.f32 %v3256_v13, %v17167_v57  ;;  %v17353_v59 = vadd.f32 %v17207_v37, %v7942_v21  ;;  %v10446_v12 = vpop.eup %10445  ;;  %v5325_v42 = vor.u32 1.1754944e-38, %v5324_v23  ;;  %v3681_v48 = vmul.f32 %v10440_v4, %v3680_v2 }
 0x3c8   : > { %v8306_v10 = vadd.f32 %v17176_v8, %v7824_v52  ;;  %10447 = vrcp.f32 %v17349_v61  ;;  %v5321_v57 = vsel %vm5320_vm15, %v10438_v24, %v5317_v6  ;;  %v3690_v8 = vor.u32 1.1754944e-38, %v3689_v32 }
 0x3c9   : > { %v17362_v30 = vadd.f32 %v7805_v18, %v17247_v39  ;;  %v5326_v41 = vsel %vm5323_vm8, %v5325_v42, %v5321_v57  ;;  %v3682_v1 = vadd.f32 %v10440_v4, %v3681_v48  ;;  %vm17371_vm12 = vcmp.eq.f32.partialorder %v3687_v27, 8.507059e+37 }
 0x3ca   : > { %v5449_v39 = vmul.f32 %v10446_v12, %v17312_v9  ;;  %v7943_v24 = vmul.f32 %v5326_v41, %v17114_v54  ;;  %vm17378_vm4 = vcmp.eq.f32.partialorder %v5457_v14, 8.507059e+37  ;;  %v9552_v28 = vmul.f32 -1.442695, %v17252_v53  ;;  %v17391_v54 = vpop.f32.mrf.mxu2  ;;  %9277 = vmatmul.msk.f32.gmra.mxu2 %vm460_vm1, %v17396_v51 }
 0x3cb   : > { %v3686_v32 = vsel %vm17367_vm0, %v10440_v4, %v3682_v1  ;;  %v17385_v27 = vadd.f32 1.0, %v10444_v7  ;;  %v17389_v46 = vadd.f32 %v17144_v20, %v16738_v56  ;;  %v5459_v26 = vand.u32 2147483648, %v17312_v9 }
 0x3cc   : > { %v5450_v38 = vsub.f32 1.0, %v5449_v39  ;;  %v17403_v4 = vadd.f32 %v17293_v0, %v7943_v24  ;;  %v3691_v20 = vsel %vm17371_vm12, %v3690_v8, %v3686_v32  ;;  %10449 = vpow2.f32 %v17257_v34  ;;  %v17461_v32 = vpop.f32.mrf.mxu1  ;;  %9356 = vmatmul.msk.f32.gmra.mxu1 %vm460_vm1, %v11135_v17 }
 0x3cd   : > { %v7834_v43 = vmul.f32 %v3691_v20, %v17198_v33  ;;  %vm5454_vm6 = vweird.f32 %v10446_v12  ;;  %10451 = vrcp.f32 %v17385_v27  ;;  %vm3398_vm13 = vweird.f32 %v17349_v61 }
 0x3ce   : > { %v10448_v47 = vpop.eup %10447  ;;  %v5451_v16 = vmul.f32 %v10446_v12, %v5450_v38  ;;  %v3402_v21 = vand.u32 2147483647, %v17349_v61  ;;  %v3404_v34 = vand.u32 2147483648, %v17349_v61  ;;  %v9433_v52 = vmul.f32 -1.442695, %v17389_v46  ;;  %vm5455_vm3 = vmor %vm5453_vm14, %vm5454_vm6 }
 0x3cf   : > { %v3394_v0 = vmul.f32 %v10448_v47, %v17349_v61  ;;  %v17419_v35 = vadd.f32 %v8306_v10, %v7834_v43  ;;  %v17424_v13 = vadd.f32 %v17146_v3, %v16962_v29  ;;  %vm3399_vm9 = vweird.f32 %v10448_v47 }
 0x3d0   : > { %v5452_v33 = vadd.f32 %v10446_v12, %v5451_v16  ;;  %v5460_v7 = vor.u32 1.1754944e-38, %v5459_v26  ;;  %10453 = vpow2.f32 %v9552_v28  ;;  %v17432_v14 = vadd.f32 %v17235_v36, %v16738_v56  ;;  %vm17439_vm5 = vmor %vm3398_vm13, %vm3399_vm9 }
 0x3d1   : > { %v3395_v2 = vsub.f32 1.0, %v3394_v0  ;;  %10455 = vpow2.f32 %v9433_v52  ;;  %v9414_v6 = vmul.f32 -1.442695, %v17424_v13  ;;  %v3405_v3 = vor.u32 1.1754944e-38, %v3404_v34 }
 0x3d2   : > { %v5456_v18 = vsel %vm5455_vm3, %v10446_v12, %v5452_v33  ;;  %v10450_v10 = vpop.eup %10449  ;;  %v5472_v57 = vand.u32 2147483647, %v17385_v27  ;;  %v9443_v8 = vmul.f32 -1.442695, %v17432_v14  ;;  %v8473_v41 = vrot.slane %v16795_v49, 4 }
 0x3d3   : > { %v3396_v42 = vmul.f32 %v10448_v47, %v3395_v2  ;;  %v5461_v48 = vsel %vm17378_vm4, %v5460_v7, %v5456_v18  ;;  %v10452_v9 = vpop.eup %10451  ;;  %10457 = vpow2.f32 %v9414_v6  ;;  %v17444_v36 = vadd.f32 1.0, %v10450_v10 }
 0x3d4   : > { %v7952_v37 = vmul.f32 %v5461_v48, %v17204_v50  ;;  %vm3403_vm2 = vcmp.eq.f32.partialorder %v3402_v21, 8.507059e+37  ;;  %v5464_v23 = vmul.f32 %v10452_v9, %v17385_v27  ;;  %vm5468_vm10 = vweird.f32 %v17385_v27 }
 0x3d5   : > { %v3397_v1 = vadd.f32 %v10448_v47, %v3396_v42  ;;  %v5474_v61 = vand.u32 2147483648, %v17385_v27  ;;  %10459 = vrcp.f32 %v17444_v36  ;;  %v17459_v28 = vadd.f32 %v17259_v11, %v15043_v62 }
 0x3d6   : > { %v17450_v39 = vadd.f32 %v17353_v59, %v7952_v37  ;;  %v10454_v50 = vpop.eup %10453  ;;  %v5465_v58 = vsub.f32 1.0, %v5464_v23  ;;  %10461 = vpow2.f32 %v9443_v8  ;;  %vm17464_vm7 = vcmp.eq.f32.partialorder %v5472_v57, 8.507059e+37 }
 0x3d7   : > { %v3401_v24 = vsel %vm17439_vm5, %v10448_v47, %v3397_v1  ;;  %v10456_v59 = vpop.eup %10455  ;;  %v5609_v26 = vand.u32 2147483648, %v17444_v36  ;;  %v17469_v43 = vadd.f32 1.0, %v10454_v50  ;;  %vm5469_vm11 = vweird.f32 %v10452_v9  ;;  %v17518_v50 = vpop.f32.mrf.mxu3  ;;  %9309 = vmatmul.msk.f32.gmra.mxu3 %vm460_vm1, %v17240_v60 }
 0x3d8   : > { %v3406_v38 = vsel %vm3403_vm2, %v3405_v3, %v3401_v24  ;;  %v5466_v16 = vmul.f32 %v10452_v9, %v5465_v58  ;;  %v17472_v11 = vadd.f32 1.0, %v10456_v59  ;;  %v5475_v21 = vor.u32 1.1754944e-38, %v5474_v61  ;;  %vm5470_vm15 = vmor %vm5468_vm10, %vm5469_vm11 }
 0x3d9   : > { %v7815_v47 = vmul.f32 %v3406_v38, %v17223_v22  ;;  %v10458_v0 = vpop.eup %10457  ;;  %v5607_v17 = vand.u32 2147483647, %v17444_v36  ;;  %10463 = vrcp.f32 %v17469_v43  ;;  %v17478_v34 = vadd.f32 %v17321_v19, %v15050_v25 }
 0x3da   : > { %v5467_v52 = vadd.f32 %v10452_v9, %v5466_v16  ;;  %10465 = vrcp.f32 %v17472_v11  ;;  %v9561_v22 = vmul.f32 -1.442695, %v17459_v28  ;;  %v17489_v7 = vadd.f32 1.0, %v10458_v0  ;;  %v11136_v16 = vld [vmem:[%s11390_s22 + $0x60] sm:$0xff] }
 0x3db   : > { %v17481_v33 = vadd.f32 %v17362_v30, %v7815_v47  ;;  %v17485_v2 = vpop.eup %10459  ;;  %vm5603_vm8 = vweird.f32 %v17444_v36  ;;  %v5610_v18 = vor.u32 1.1754944e-38, %v5609_v26  ;;  %v5622_v19 = vand.u32 2147483647, %v17469_v43 }
 0x3dc   : > { %v17495_v30 = vadd.f32 %v17237_v15, %v16962_v29  ;;  %v10462_v6 = vpop.eup %10461  ;;  %v5471_v10 = vsel %vm5470_vm15, %v10452_v9, %v5467_v52  ;;  %v3837_v42 = vand.u32 2147483647, %v17472_v11  ;;  %v5599_v3 = vmul.f32 %v17485_v2, %v17444_v36 }
 0x3dd   : > { %v5624_v27 = vand.u32 2147483648, %v17469_v43  ;;  %v5476_v48 = vsel %vm17464_vm7, %v5475_v21, %v5471_v10  ;;  %vm3833_vm0 = vweird.f32 %v17472_v11  ;;  %v3839_v57 = vand.u32 2147483648, %v17472_v11 }
 0x3de   : > { %10467 = vrcp.f32 %v17489_v7  ;;  %vm17506_vm12 = vcmp.eq.f32.partialorder %v5607_v17, 8.507059e+37  ;;  %v7953_v9 = vmul.f32 %v5476_v48, %v17214_v31  ;;  %v3552_v12 = vand.u32 2147483647, %v17489_v7 }
 0x3df   : > { %v3554_v37 = vand.u32 2147483648, %v17489_v7  ;;  %vm5604_vm14 = vweird.f32 %v17485_v2  ;;  %vm5618_vm4 = vweird.f32 %v17469_v43  ;;  %v10464_v8 = vpop.eup %10463  ;;  %v5600_v1 = vsub.f32 1.0, %v5599_v3 }
 0x3e0   : > { %v17515_v23 = vadd.f32 1.0, %v10462_v6  ;;  %v9424_v61 = vmul.f32 -1.442695, %v17495_v30  ;;  %10469 = vpow2.f32 %v9561_v22  ;;  %v10466_v31 = vpop.eup %10465  ;;  %v17523_v24 = vadd.f32 %v17403_v4, %v7953_v9  ;;  %v17537_v4 = vpop.f32.mrf.mxu0  ;;  %9324 = vmatmul.msk.f32.gmra.mxu0 %vm460_vm1, %v11136_v16  ;;  %vm5605_vm2 = vmor %vm5603_vm8, %vm5604_vm14 }
 0x3e1   : > { %vm17525_vm6 = vcmp.eq.f32.partialorder %v3837_v42, 8.507059e+37  ;;  %v5614_v59 = vmul.f32 %v10464_v8, %v17469_v43  ;;  %vm17530_vm13 = vcmp.eq.f32.partialorder %v5622_v19, 8.507059e+37  ;;  %v5625_v20 = vor.u32 1.1754944e-38, %v5624_v27 }
 0x3e2   : > { %v3829_v26 = vmul.f32 %v10466_v31, %v17472_v11  ;;  %v3840_v47 = vor.u32 1.1754944e-38, %v3839_v57  ;;  %vm3548_vm9 = vweird.f32 %v17489_v7  ;;  %v5601_v60 = vmul.f32 %v17485_v2, %v5600_v1  ;;  %v17565_v1 = vpop.f32.mrf.mxu1  ;;  %9357 = vmatmul.msk.f32.gmra.mxu1 %vm460_vm1, %v11136_v16 }
 0x3e3   : > { %vm17541_vm3 = vcmp.eq.f32.partialorder %v3552_v12, 8.507059e+37  ;;  %v3555_v21 = vor.u32 1.1754944e-38, %v3554_v37  ;;  %v5615_v17 = vsub.f32 1.0, %v5614_v59  ;;  %10471 = vrcp.f32 %v17515_v23 }
 0x3e4   : > { %v10468_v52 = vpop.eup %10467  ;;  %v3830_v22 = vsub.f32 1.0, %v3829_v26  ;;  %vm3834_vm5 = vweird.f32 %v10466_v31  ;;  %v5602_v19 = vadd.f32 %v17485_v2, %v5601_v60  ;;  %10473 = vpow2.f32 %v9424_v61 }
 0x3e5   : > { %v3544_v6 = vmul.f32 %v10468_v52, %v17489_v7  ;;  %v5616_v10 = vmul.f32 %v10464_v8, %v5615_v17  ;;  %vm5619_vm10 = vweird.f32 %v10464_v8  ;;  %vm3983_vm7 = vweird.f32 %v17515_v23  ;;  %vm17557_vm15 = vmor %vm3833_vm0, %vm3834_vm5 }
 0x3e6   : > { %v10470_v42 = vpop.eup %10469  ;;  %v3831_v3 = vmul.f32 %v10466_v31, %v3830_v22  ;;  %vm3549_vm11 = vweird.f32 %v10468_v52  ;;  %v5606_v27 = vsel %vm5605_vm2, %v17485_v2, %v5602_v19  ;;  %v9562_v48 = vmul.f32 -1.442695, %v17478_v34  ;;  %vm5620_vm8 = vmor %vm5618_vm4, %vm5619_vm10 }
 0x3e7   : > { %v3545_v9 = vsub.f32 1.0, %v3544_v6  ;;  %v5611_v36 = vsel %vm17506_vm12, %v5610_v18, %v5606_v27  ;;  %v5617_v12 = vadd.f32 %v10464_v8, %v5616_v10  ;;  %v17563_v37 = vadd.f32 1.0, %v10470_v42  ;;  %vm17583_vm0 = vmor %vm3548_vm9, %vm3549_vm11 }
 0x3e8   : > { %v3832_v2 = vadd.f32 %v10466_v31, %v3831_v3  ;;  %v7962_v61 = vmul.f32 %v5611_v36, %v17217_v44  ;;  %v3987_v11 = vand.u32 2147483647, %v17515_v23  ;;  %10475 = vpow2.f32 %v9562_v48 }
 0x3e9   : > { %v10472_v59 = vpop.eup %10471  ;;  %v3546_v15 = vmul.f32 %v10468_v52, %v3545_v9  ;;  %v5621_v18 = vsel %vm5620_vm8, %v10464_v8, %v5617_v12  ;;  %10477 = vrcp.f32 %v17563_v37  ;;  %v17576_v26 = vadd.f32 %v17391_v54, %v16738_v56 }
 0x3ea   : > { %v10474_v60 = vpop.eup %10473  ;;  %v3836_v44 = vsel %vm17557_vm15, %v10466_v31, %v3832_v2  ;;  %v17588_v16 = vadd.f32 %v17450_v39, %v7962_v61  ;;  %v5626_v8 = vsel %vm17530_vm13, %v5625_v20, %v5621_v18  ;;  %v3979_v54 = vmul.f32 %v10472_v59, %v17515_v23 }
 0x3eb   : > { %v3841_v17 = vsel %vm17525_vm6, %v3840_v47, %v3836_v44  ;;  %v3547_v22 = vadd.f32 %v10468_v52, %v3546_v15  ;;  %v7963_v31 = vmul.f32 %v5626_v8, %v17252_v53  ;;  %v3989_v7 = vand.u32 2147483648, %v17515_v23  ;;  %v8545_v44 = vld [vmem:[#allocation3 + $0x70] sm:$0xff] }
 0x3ec   : > { %v7844_v19 = vmul.f32 %v3841_v17, %v17389_v46  ;;  %v3980_v6 = vsub.f32 1.0, %v3979_v54  ;;  %vm3984_vm12 = vweird.f32 %v10472_v59  ;;  %v17598_v10 = vadd.f32 1.0, %v10474_v60  ;;  %v17653_v60 = vpop.f32.mrf.mxu3  ;;  %9310 = vmatmul.msk.f32.gmra.mxu3 %vm460_vm1, %v17396_v51 }
 0x3ed   : > { %v3551_v39 = vsel %vm17583_vm0, %v10468_v52, %v3547_v22  ;;  %v17603_v38 = vadd.f32 %v17523_v24, %v7963_v31  ;;  %v9453_v58 = vmul.f32 -1.442695, %v17576_v26  ;;  %v17613_v3 = vadd.f32 %v8473_v41, %v16795_v49  ;;  %vm3985_vm14 = vmor %vm3983_vm7, %vm3984_vm12 }
 0x3ee   : > { %v10476_v20 = vpop.eup %10475  ;;  %v8308_v47 = vadd.f32 %v17419_v35, %v7844_v19  ;;  %v3556_v53 = vsel %vm17541_vm3, %v3555_v21, %v3551_v39  ;;  %v3981_v42 = vmul.f32 %v10472_v59, %v3980_v6  ;;  %10479 = vrcp.f32 %v17598_v10  ;;  %v11137_v19 = vld [vmem:[%s11390_s22 + $0x68] sm:$0xff] }
 0x3ef   : > { %v10478_v46 = vpop.eup %10477  ;;  %v7825_v24 = vmul.f32 %v3556_v53, %v17424_v13  ;;  %v3990_v52 = vor.u32 1.1754944e-38, %v3989_v7  ;;  %vm3988_vm4 = vcmp.eq.f32.partialorder %v3987_v11, 8.507059e+37  ;;  %vm5753_vm6 = vweird.f32 %v17563_v37  ;;  %v8546_v11 = vld [vmem:[#allocation3 + $0x78] sm:$0xff]  ;;  %v17669_v7 = vpop.f32.mrf.mxu0  ;;  %9325 = vmatmul.msk.f32.gmra.mxu0 %vm460_vm1, %v11137_v19 }
 0x3f0   : > { %v3982_v27 = vadd.f32 %v10472_v59, %v3981_v42  ;;  %v5749_v35 = vmul.f32 %v10478_v46, %v17563_v37  ;;  %v3702_v21 = vand.u32 2147483647, %v17598_v10  ;;  %v5757_v49 = vand.u32 2147483647, %v17563_v37  ;;  %8692 = vmatpush.msrb.mxu2 %v8546_v11 }
 0x3f1   : > { %v17621_v0 = vadd.f32 %v17481_v33, %v7825_v24  ;;  %v5759_v41 = vand.u32 2147483648, %v17563_v37  ;;  %v17626_v23 = vadd.f32 1.0, %v10476_v20  ;;  %10481 = vpow2.f32 %v9453_v58  ;;  %v1297_v58 = vpop.f32.mrf.mxu2  ;;  %v17689_v24 = vpop.f32.mrf.mxu1  ;;  %9358 = vmatmul.msk.f32.gmra.mxu1 %vm460_vm1, %v11137_v19  ;;  %v8541_v19 = vld [vmem:[#allocation3 + $0x50] sm:$0xff] }
 0x3f2   : > { %v3986_v13 = vsel %vm3985_vm14, %v10472_v59, %v3982_v27  ;;  %v5750_v48 = vsub.f32 1.0, %v5749_v35  ;;  %vm5754_vm13 = vweird.f32 %v10478_v46  ;;  %v17630_v9 = vadd.f32 %v17393_v40, %v16962_v29  ;;  %8693 = vmatpush.msrb.mxu2 %v8545_v44 }
 0x3f3   : > { %v3991_v57 = vsel %vm3988_vm4, %v3990_v52, %v3986_v13  ;;  %v17634_v33 = vadd.f32 %v17411_v55, %v15043_v62  ;;  %10483 = vrcp.f32 %v17626_v23  ;;  %v17640_v61 = vadd.f32 %v17461_v32, %v15050_v25  ;;  %vm5755_vm10 = vmor %vm5753_vm6, %vm5754_vm13  ;;  %v8543_v55 = vld [vmem:[#allocation3 + $0x60] sm:$0xff] }
 0x3f4   : > { %v10480_v36 = vpop.eup %10479  ;;  %v7854_v12 = vmul.f32 %v3991_v57, %v17432_v14  ;;  %v5751_v2 = vmul.f32 %v10478_v46, %v5750_v48  ;;  %vm3698_vm9 = vweird.f32 %v17598_v10  ;;  %v3704_v40 = vand.u32 2147483648, %v17598_v10  ;;  %v8544_v48 = vld [vmem:[#allocation3 + $0x68] sm:$0xff] }
 0x3f5   : > { %v3694_v59 = vmul.f32 %v10480_v36, %v17598_v10  ;;  %vm17645_vm3 = vcmp.eq.f32.partialorder %v5757_v49, 8.507059e+37  ;;  %v9434_v18 = vmul.f32 -1.442695, %v17630_v9  ;;  %v9571_v32 = vmul.f32 -1.442695, %v17634_v33  ;;  %8694 = vmatpush.msrb.mxu2 %v8544_v48 }
 0x3f6   : > { %v17649_v14 = vadd.f32 %v8308_v47, %v7854_v12  ;;  %v5752_v15 = vadd.f32 %v10478_v46, %v5751_v2  ;;  %vm3699_vm5 = vweird.f32 %v10480_v36  ;;  %vm17657_vm2 = vcmp.eq.f32.partialorder %v3702_v21, 8.507059e+37 }
 0x3f7   : > { %v3695_v43 = vsub.f32 1.0, %v3694_v59  ;;  %v5760_v54 = vor.u32 1.1754944e-38, %v5759_v41  ;;  %v10482_v17 = vpop.eup %10481  ;;  %10485 = vpow2.f32 %v9434_v18  ;;  %v9572_v31 = vmul.f32 -1.442695, %v17640_v61  ;;  %vm17680_vm7 = vmor %vm3698_vm9, %vm3699_vm5  ;;  %8695 = vmatpush.msrb.mxu2 %v8543_v55 }
 0x3f8   : > { %v5756_v22 = vsel %vm5755_vm10, %v10478_v46, %v5752_v15  ;;  %v17667_v51 = vadd.f32 %v17537_v4, %v15043_v62  ;;  %v17675_v39 = vadd.f32 1.0, %v10482_v17  ;;  %10487 = vpow2.f32 %v9571_v32 }
 0x3f9   : > { %v3696_v6 = vmul.f32 %v10480_v36, %v3695_v43  ;;  %v5761_v37 = vsel %vm17645_vm3, %v5760_v54, %v5756_v22  ;;  %v10484_v20 = vpop.eup %10483  ;;  %v3705_v47 = vor.u32 1.1754944e-38, %v3704_v40  ;;  %v5772_v42 = vand.u32 2147483647, %v17626_v23  ;;  %v8542_v43 = vld [vmem:[#allocation3 + $0x58] sm:$0xff] }
 0x3fa   : > { %v7972_v53 = vmul.f32 %v5761_v37, %v17459_v28  ;;  %v17687_v46 = vadd.f32 %v1297_v58, %v16738_v56  ;;  %v5764_v27 = vmul.f32 %v10484_v20, %v17626_v23  ;;  %v5774_v10 = vand.u32 2147483648, %v17626_v23  ;;  %8696 = vmatpush.msrb.mxu2 %v8542_v43 }
 0x3fb   : > { %v3697_v52 = vadd.f32 %v10480_v36, %v3696_v6  ;;  %10489 = vrcp.f32 %v17675_v39  ;;  %v9581_v28 = vmul.f32 -1.442695, %v17667_v51  ;;  %v17701_v21 = vadd.f32 %v17565_v1, %v15050_v25 }
 0x3fc   : > { %v17696_v35 = vadd.f32 %v17588_v16, %v7972_v53  ;;  %10491 = vpow2.f32 %v9572_v31  ;;  %v5765_v41 = vsub.f32 1.0, %v5764_v27  ;;  %vm5769_vm11 = vweird.f32 %v10484_v20  ;;  %8697 = vmatpush.msrb.mxu2 %v8541_v19  ;;  %v17754_v27 = vld [vmem:[%s11390_s22 + $0x70] sm:$0xff] }
 0x3fd   : > { %v3701_v49 = vsel %vm17680_vm7, %v10480_v36, %v3697_v52  ;;  %v9463_v13 = vmul.f32 -1.442695, %v17687_v46  ;;  %v10486_v57 = vpop.eup %10485  ;;  %v4137_v12 = vand.u32 2147483647, %v17675_v39  ;;  %v4139_v2 = vand.u32 2147483648, %v17675_v39  ;;  %v17751_v52 = vpop.f32.mrf.mxu0  ;;  %9326 = vmatmul.msk.f32.gmra.mxu0 %vm460_vm1, %v17754_v27 }
 0x3fe   : > { %v3706_v16 = vsel %vm17657_vm2, %v3705_v47, %v3701_v49  ;;  %v17712_v1 = vadd.f32 %v17518_v50, %v16962_v29  ;;  %v10488_v11 = vpop.eup %10487  ;;  %v5766_v59 = vmul.f32 %v10484_v20, %v5765_v41  ;;  %v17715_v40 = vadd.f32 1.0, %v10486_v57 }
 0x3ff   : > { %v7835_v36 = vmul.f32 %v3706_v16, %v17495_v30  ;;  %10493 = vpow2.f32 %v9463_v13  ;;  %vm5768_vm15 = vweird.f32 %v17626_v23  ;;  %vm17718_vm8 = vcmp.eq.f32.partialorder %v5772_v42, 8.507059e+37 }
 0x400   : > { %v17722_v18 = vadd.f32 1.0, %v10488_v11  ;;  %10495 = vpow2.f32 %v9581_v28  ;;  %v5767_v30 = vadd.f32 %v10484_v20, %v5766_v59  ;;  %v5775_v44 = vor.u32 1.1754944e-38, %v5774_v10  ;;  %vm5770_vm0 = vmor %vm5768_vm15, %vm5769_vm11 }
 0x401   : > { %v10490_v50 = vpop.eup %10489  ;;  %v17725_v32 = vadd.f32 %v17621_v0, %v7835_v36  ;;  %10497 = vrcp.f32 %v17715_v40  ;;  %vm4133_vm12 = vweird.f32 %v17675_v39  ;;  %vm17731_vm14 = vcmp.eq.f32.partialorder %v4137_v12, 8.507059e+37 }
 0x402   : > { %v10492_v8 = vpop.eup %10491  ;;  %v4129_v23 = vmul.f32 %v10490_v50, %v17675_v39  ;;  %v9444_v17 = vmul.f32 -1.442695, %v17712_v1  ;;  %v5771_v0 = vsel %vm5770_vm0, %v10484_v20, %v5767_v30  ;;  %v4140_v22 = vor.u32 1.1754944e-38, %v4139_v2 }
 0x403   : > { %10499 = vrcp.f32 %v17722_v18  ;;  %v17738_v31 = vmul.f32 -1.442695, %v17701_v21  ;;  %v5776_v6 = vsel %vm17718_vm8, %v5775_v44, %v5771_v0  ;;  %vm4134_vm4 = vweird.f32 %v10490_v50 }
 0x404   : > { %v4130_v37 = vsub.f32 1.0, %v4129_v23  ;;  %v3852_v58 = vand.u32 2147483647, %v17715_v40  ;;  %v7973_v47 = vmul.f32 %v5776_v6, %v17478_v34  ;;  %v3854_v20 = vand.u32 2147483648, %v17715_v40  ;;  %vm17767_vm13 = vmor %vm4133_vm12, %vm4134_vm4 }
 0x405   : > { %v10494_v4 = vpop.eup %10493  ;;  %v17745_v53 = vadd.f32 1.0, %v10492_v8  ;;  %v17749_v42 = vadd.f32 %v17669_v7, %v15043_v62  ;;  %vm3848_vm6 = vweird.f32 %v17715_v40  ;;  %10501 = vpow2.f32 %v9444_v17 }
 0x406   : > { %v10496_v10 = vpop.eup %10495  ;;  %v4131_v28 = vmul.f32 %v10490_v50, %v4130_v37  ;;  %v17759_v34 = vadd.f32 1.0, %v10494_v4  ;;  %v17762_v41 = vadd.f32 %v17603_v38, %v7973_v47  ;;  %v5907_v13 = vand.u32 2147483647, %v17722_v18 }
 0x407   : > { %v10498_v49 = vpop.eup %10497  ;;  %v5909_v48 = vand.u32 2147483648, %v17722_v18  ;;  %10503 = vrcp.f32 %v17745_v53  ;;  %vm17775_vm9 = vcmp.eq.f32.partialorder %v3852_v58, 8.507059e+37  ;;  %vm5903_vm3 = vweird.f32 %v17722_v18 }
 0x408   : > { %v4132_v57 = vadd.f32 %v10490_v50, %v4131_v28  ;;  %v3844_v16 = vmul.f32 %v10498_v49, %v17715_v40  ;;  %vm3849_vm5 = vweird.f32 %v10498_v49  ;;  %v3855_v39 = vor.u32 1.1754944e-38, %v3854_v20 }
 0x409   : > { %v10500_v38 = vpop.eup %10499  ;;  %10505 = vrcp.f32 %v17759_v34  ;;  %v17781_v2 = vadd.f32 1.0, %v10496_v10  ;;  %v5922_v55 = vand.u32 2147483647, %v17745_v53  ;;  %vm17789_vm2 = vcmp.eq.f32.partialorder %v5907_v13, 8.507059e+37  ;;  %vm17800_vm11 = vmor %vm3848_vm6, %vm3849_vm5 }
 0x40a   : > { %v4136_v11 = vsel %vm17767_vm13, %v10490_v50, %v4132_v57  ;;  %v3845_v36 = vsub.f32 1.0, %v3844_v16  ;;  %v5899_v59 = vmul.f32 %v10500_v38, %v17722_v18  ;;  %v5910_v44 = vor.u32 1.1754944e-38, %v5909_v48 }
 0x40b   : > { %v4141_v15 = vsel %vm17731_vm14, %v4140_v22, %v4136_v11  ;;  %v5924_v43 = vand.u32 2147483648, %v17745_v53  ;;  %v10502_v8 = vpop.eup %10501  ;;  %vm5918_vm10 = vweird.f32 %v17745_v53  ;;  %vm4283_vm7 = vweird.f32 %v17759_v34  ;;  %v17836_v11 = vpop.f32.mrf.mxu1  ;;  %9359 = vmatmul.msk.f32.gmra.mxu1 %vm460_vm1, %v17754_v27 }
 0x40c   : > { %v7864_v23 = vmul.f32 %v4141_v15, %v17576_v26  ;;  %v3846_v17 = vmul.f32 %v10498_v49, %v3845_v36  ;;  %v5900_v50 = vsub.f32 1.0, %v5899_v59  ;;  %vm5904_vm15 = vweird.f32 %v10500_v38  ;;  %v1300_v59 = vpop.f32.mrf.mxu2 }
 0x40d   : > { %v10504_v0 = vpop.eup %10503  ;;  %v4287_v22 = vand.u32 2147483647, %v17759_v34  ;;  %v17805_v19 = vadd.f32 1.0, %v10502_v8  ;;  %10507 = vrcp.f32 %v17781_v2  ;;  %vm17812_vm8 = vcmp.eq.f32.partialorder %v5922_v55, 8.507059e+37  ;;  %vm5905_vm0 = vmor %vm5903_vm3, %vm5904_vm15  ;;  %v8540_v8 = vld [vmem:[#allocation3 + $0x48] sm:$0xff] }
 0x40e   : > { %v17809_v26 = vadd.f32 %v17649_v14, %v7864_v23  ;;  %v3847_v6 = vadd.f32 %v10498_v49, %v3846_v17  ;;  %v5901_v37 = vmul.f32 %v10500_v38, %v5900_v50  ;;  %v5914_v58 = vmul.f32 %v10504_v0, %v17745_v53  ;;  %8698 = vmatpush.msrb.mxu2 %v8540_v8  ;;  %v8539_v50 = vld [vmem:[#allocation3 + $0x40] sm:$0xff] }
 0x40f   : > { %v17816_v4 = vpop.eup %10505  ;;  %v5925_v47 = vor.u32 1.1754944e-38, %v5924_v43  ;;  %v4289_v20 = vand.u32 2147483648, %v17759_v34  ;;  %10509 = vrcp.f32 %v17805_v19  ;;  %v6057_v10 = vand.u32 2147483647, %v17781_v2 }
 0x410   : > { %v3851_v14 = vsel %vm17800_vm11, %v10498_v49, %v3847_v6  ;;  %v5902_v28 = vadd.f32 %v10500_v38, %v5901_v37  ;;  %v5915_v7 = vsub.f32 1.0, %v5914_v58  ;;  %v4279_v13 = vmul.f32 %v17816_v4, %v17759_v34  ;;  %8699 = vmatpush.msrb.mxu2 %v8539_v50  ;;  %v8538_v58 = vld [vmem:[#allocation3 + $0x38] sm:$0xff] }
 0x411   : > { %v3856_v48 = vsel %vm17775_vm9, %v3855_v39, %v3851_v14  ;;  %vm5919_vm12 = vweird.f32 %v10504_v0  ;;  %vm17830_vm14 = vcmp.eq.f32.partialorder %v4287_v22, 8.507059e+37  ;;  %v4002_v16 = vand.u32 2147483647, %v17805_v19  ;;  %v8562_v34 = vld [vmem:[#allocation3 + $0xf8] sm:$0xff] }
 0x412   : > { %v4004_v49 = vand.u32 2147483648, %v17805_v19  ;;  %v7845_v12 = vmul.f32 %v3856_v48, %v17630_v9  ;;  %v5906_v39 = vsel %vm5905_vm0, %v10500_v38, %v5902_v28  ;;  %v5916_v36 = vmul.f32 %v10504_v0, %v5915_v7  ;;  %vm5920_vm3 = vmor %vm5918_vm10, %vm5919_vm12  ;;  %8700 = vmatpush.msrb.mxu2 %v8538_v58  ;;  %8712 = vmatpush.msra.mxu3 %v8562_v34  ;;  %v8537_v7 = vld [vmem:[#allocation3 + $0x30] sm:$0xff] }
 0x413   : > { %v4280_v18 = vsub.f32 1.0, %v4279_v13  ;;  %v17841_v55 = vpop.eup %10507  ;;  %v5911_v15 = vsel %vm17789_vm2, %v5910_v44, %v5906_v39  ;;  %vm4284_vm4 = vweird.f32 %v17816_v4  ;;  %v4290_v43 = vor.u32 1.1754944e-38, %v4289_v20  ;;  %v8561_v13 = vld [vmem:[#allocation3 + $0xf0] sm:$0xff] }
 0x414   : > { %vm3998_vm6 = vweird.f32 %v17805_v19  ;;  %vm6053_vm13 = vweird.f32 %v17781_v2  ;;  %v17849_v27 = vadd.f32 %v17725_v32, %v7845_v12  ;;  %v7982_v9 = vmul.f32 %v5911_v15, %v17634_v33  ;;  %vm17874_vm5 = vmor %vm4283_vm7, %vm4284_vm4  ;;  %8701 = vmatpush.msrb.mxu2 %v8537_v7  ;;  %8713 = vmatpush.msra.mxu3 %v8561_v13  ;;  %v11139_v15 = vld [vmem:[%s11390_s22 + $0x78] sm:$0xff] }
 0x415   : > { %v5917_v38 = vadd.f32 %v10504_v0, %v5916_v36  ;;  %v4281_v23 = vmul.f32 %v17816_v4, %v4280_v18  ;;  %vm17853_vm9 = vcmp.eq.f32.partialorder %v4002_v16, 8.507059e+37  ;;  %v17857_v30 = vpop.eup %10509  ;;  %v4005_v44 = vor.u32 1.1754944e-38, %v4004_v49  ;;  %v17920_v18 = vpop.f32.mrf.mxu0  ;;  %9327 = vmatmul.msk.f32.gmra.mxu0 %vm460_vm1, %v11139_v15 }
 0x416   : > { %v6049_v32 = vmul.f32 %v17841_v55, %v17781_v2  ;;  %v6059_v33 = vand.u32 2147483648, %v17781_v2  ;;  %10511 = vpow2.f32 %v17738_v31  ;;  %v17867_v54 = vadd.f32 %v17696_v35, %v7982_v9  ;;  %v1303_v9 = vpop.f32.mrf.mxu2 }
 0x417   : > { %v5921_v22 = vsel %vm5920_vm3, %v10504_v0, %v5917_v38  ;;  %v4282_v6 = vadd.f32 %v17816_v4, %v4281_v23  ;;  %v3994_v37 = vmul.f32 %v17857_v30, %v17805_v19  ;;  %vm6054_vm2 = vweird.f32 %v17841_v55 }
 0x418   : > { %v5926_v31 = vsel %vm17812_vm8, %v5925_v47, %v5921_v22  ;;  %v6050_v35 = vsub.f32 1.0, %v6049_v32  ;;  %vm17883_vm10 = vcmp.eq.f32.partialorder %v6057_v10, 8.507059e+37  ;;  %vm3999_vm7 = vweird.f32 %v17857_v30  ;;  %vm6055_vm15 = vmor %vm6053_vm13, %vm6054_vm2 }
 0x419   : > { %v7983_v20 = vmul.f32 %v5926_v31, %v17640_v61  ;;  %v3995_v14 = vsub.f32 1.0, %v3994_v37  ;;  %v17890_v28 = vadd.f32 %v1300_v59, %v16738_v56  ;;  %v4286_v40 = vsel %vm17874_vm5, %v17816_v4, %v4282_v6  ;;  %vm17910_vm11 = vmor %vm3998_vm6, %vm3999_vm7  ;;  %v17922_v59 = vpop.f32.mrf.mxu1  ;;  %9360 = vmatmul.msk.f32.gmra.mxu1 %vm460_vm1, %v11139_v15 }
 0x41a   : > { %v6051_v47 = vmul.f32 %v17841_v55, %v6050_v35  ;;  %v17898_v10 = vadd.f32 %v17653_v60, %v16962_v29  ;;  %v9591_v61 = vmul.f32 -1.442695, %v17749_v42  ;;  %v6060_v49 = vor.u32 1.1754944e-38, %v6059_v33 }
 0x41b   : > { %v17902_v48 = vadd.f32 %v17762_v41, %v7983_v20  ;;  %v3996_v16 = vmul.f32 %v17857_v30, %v3995_v14  ;;  %v9473_v12 = vmul.f32 -1.442695, %v17890_v28  ;;  %v17918_v36 = vadd.f32 %v17689_v24, %v15050_v25  ;;  %v8536_v14 = vld [vmem:[#allocation3 + $0x28] sm:$0xff] }
 0x41c   : > { %v10512_v4 = vpop.eup %10511  ;;  %v6052_v39 = vadd.f32 %v17841_v55, %v6051_v47  ;;  %v9454_v41 = vmul.f32 -1.442695, %v17898_v10  ;;  %10513 = vpow2.f32 %v9591_v61  ;;  %v4291_v19 = vsel %vm17830_vm14, %v4290_v43, %v4286_v40  ;;  %8702 = vmatpush.msrb.mxu2 %v8536_v14 }
 0x41d   : > { %v3997_v8 = vadd.f32 %v17857_v30, %v3996_v16  ;;  %v17934_v24 = vadd.f32 1.0, %v10512_v4  ;;  %10515 = vpow2.f32 %v9473_v12  ;;  %v9592_v23 = vmul.f32 -1.442695, %v17918_v36  ;;  %v8535_v16 = vld [vmem:[#allocation3 + $0x20] sm:$0xff]  ;;  %v18048_v14 = vpop.f32.mrf.mxu0 }
 0x41e   : > { %v6056_v38 = vsel %vm6055_vm15, %v17841_v55, %v6052_v39  ;;  %10517 = vpow2.f32 %v9454_v41  ;;  %v17939_v32 = vadd.f32 %v1303_v9, %v16738_v56  ;;  %v8475_v43 = vrot.slane %v17613_v3, 2  ;;  %8703 = vmatpush.msrb.mxu2 %v8535_v16  ;;  %v8558_v9 = vld [vmem:[#allocation3 + $0xd8] sm:$0xff] }
 0x41f   : > { %v4001_v57 = vsel %vm17910_vm11, %v17857_v30, %v3997_v8  ;;  %v6061_v2 = vsel %vm17883_vm10, %v6060_v49, %v6056_v38  ;;  %10519 = vrcp.f32 %v17934_v24  ;;  %v7874_v50 = vmul.f32 %v4291_v19, %v17687_v46  ;;  %v1410_v30 = vpop.f32.mrf.mxu3  ;;  %v8559_v49 = vld [vmem:[#allocation3 + $0xe0] sm:$0xff]  ;;  %v8534_v8 = vld [vmem:[#allocation3 + $0x18] sm:$0xff] }
 0x420   : > { %v4006_v55 = vsel %vm17853_vm9, %v4005_v44, %v4001_v57  ;;  %v7992_v33 = vmul.f32 %v6061_v2, %v17667_v51  ;;  %10521 = vpow2.f32 %v9592_v23  ;;  %v9483_v6 = vmul.f32 -1.442695, %v17939_v32  ;;  %8704 = vmatpush.msrb.mxu2 %v8534_v8 }
 0x421   : > { %v7855_v22 = vmul.f32 %v4006_v55, %v17712_v1  ;;  %v6072_v31 = vand.u32 2147483647, %v17934_v24  ;;  %v6074_v35 = vand.u32 2147483648, %v17934_v24  ;;  %v17960_v17 = vadd.f32 %v1410_v30, %v16962_v29  ;;  %v8557_v55 = vld [vmem:[#allocation3 + $0xd0] sm:$0xff] }
 0x422   : > { %v10514_v53 = vpop.eup %10513  ;;  %v17955_v37 = vadd.f32 %v17867_v54, %v7992_v33  ;;  %10523 = vpow2.f32 %v9483_v6  ;;  %v17969_v44 = vadd.f32 %v17751_v52, %v15043_v62  ;;  %v17972_v0 = vadd.f32 %v8475_v43, %v17613_v3  ;;  %v8560_v52 = vld [vmem:[#allocation3 + $0xe8] sm:$0xff]  ;;  %v8533_v43 = vld [vmem:[#allocation3 + $0x10] sm:$0xff] }
 0x423   : > { %v10516_v51 = vpop.eup %10515  ;;  %v17963_v46 = vadd.f32 %v17849_v27, %v7855_v22  ;;  %v17965_v1 = vadd.f32 1.0, %v10514_v53  ;;  %v17979_v20 = vadd.f32 %v17809_v26, %v7874_v50  ;;  %vm6068_vm8 = vweird.f32 %v17934_v24  ;;  %8714 = vmatpush.msra.mxu3 %v8560_v52  ;;  %8705 = vmatpush.msrb.mxu2 %v8533_v43  ;;  %v11140_v52 = vld [vmem:[%s11390_s22 + $0x80] sm:$0xff] }
 0x424   : > { %v10518_v54 = vpop.eup %10517  ;;  %v17974_v58 = vadd.f32 1.0, %v10516_v51  ;;  %vm17987_vm0 = vcmp.eq.f32.partialorder %v6072_v31, 8.507059e+37  ;;  %v6075_v47 = vor.u32 1.1754944e-38, %v6074_v35  ;;  %v17994_v61 = vmul.f32 -1.442695, %v17960_v17  ;;  %9328 = vmatmul.msk.f32.gmra.mxu0 %vm460_vm1, %v11140_v52 }
 0x425   : > { %v17976_v34 = vpop.eup %10519  ;;  %v17982_v27 = vadd.f32 1.0, %v10518_v54  ;;  %10525 = vrcp.f32 %v17965_v1  ;;  %v17997_v7 = vmul.f32 -1.442695, %v17969_v44  ;;  %v18001_v13 = vadd.f32 %v17836_v11, %v15050_v25  ;;  %8715 = vmatpush.msra.mxu3 %v8559_v49 }
 0x426   : > { %v6064_v40 = vmul.f32 %v17976_v34, %v17934_v24  ;;  %10527 = vrcp.f32 %v17974_v58  ;;  %v10522_v26 = vpop.eup %10521  ;;  %v4439_v4 = vand.u32 2147483648, %v17974_v58  ;;  %v6207_v39 = vand.u32 2147483647, %v17965_v1 }
 0x427   : > { %10529 = vrcp.f32 %v17982_v27  ;;  %v4152_v60 = vand.u32 2147483647, %v17982_v27  ;;  %v4154_v15 = vand.u32 2147483648, %v17982_v27  ;;  %vm6203_vm12 = vweird.f32 %v17965_v1  ;;  %8716 = vmatpush.msra.mxu3 %v8558_v9  ;;  %v1413_v9 = vpop.f32.mrf.mxu3 }
 0x428   : > { %v6065_v12 = vsub.f32 1.0, %v6064_v40  ;;  %v10524_v41 = vpop.eup %10523  ;;  %v18008_v19 = vadd.f32 1.0, %v10522_v26  ;;  %v18012_v11 = vadd.f32 %v17920_v18, %v15043_v62  ;;  %vm6069_vm14 = vweird.f32 %v17976_v34 }
 0x429   : > { %vm4433_vm4 = vweird.f32 %v17974_v58  ;;  %v18017_v23 = vadd.f32 1.0, %v10524_v41  ;;  %v4437_v2 = vand.u32 2147483647, %v17974_v58  ;;  %vm4148_vm6 = vweird.f32 %v17982_v27  ;;  %8717 = vmatpush.msra.mxu3 %v8557_v55  ;;  %vm6070_vm3 = vmor %vm6068_vm8, %vm6069_vm14  ;;  %v18064_v41 = vpop.f32.mrf.mxu1  ;;  %9361 = vmatmul.msk.f32.gmra.mxu1 %vm460_vm1, %v11140_v52 }
 0x42a   : > { %v6066_v38 = vmul.f32 %v17976_v34, %v6065_v12  ;;  %v6209_v18 = vand.u32 2147483648, %v17965_v1  ;;  %10531 = vrcp.f32 %v18008_v19  ;;  %v18028_v22 = vor.u32 1.1754944e-38, %v4439_v4 }
 0x42b   : > { %v18019_v57 = vpop.eup %10525  ;;  %vm18030_vm13 = vcmp.eq.f32.partialorder %v4152_v60, 8.507059e+37  ;;  %vm18036_vm9 = vcmp.eq.f32.partialorder %v6207_v39, 8.507059e+37  ;;  %v4155_v51 = vor.u32 1.1754944e-38, %v4154_v15  ;;  %v6222_v54 = vand.u32 2147483647, %v18008_v19 }
 0x42c   : > { %v18025_v33 = vpop.eup %10527  ;;  %v6067_v50 = vadd.f32 %v17976_v34, %v6066_v38  ;;  %v6199_v30 = vmul.f32 %v18019_v57, %v17965_v1  ;;  %10533 = vrcp.f32 %v18017_v23  ;;  %vm6204_vm5 = vweird.f32 %v18019_v57 }
 0x42d   : > { %v10530_v31 = vpop.eup %10529  ;;  %v4429_v35 = vmul.f32 %v18025_v33, %v17974_v58  ;;  %vm4434_vm2 = vweird.f32 %v18025_v33  ;;  %vm18058_vm10 = vcmp.eq.f32.partialorder %v4437_v2, 8.507059e+37  ;;  %v6210_v4 = vor.u32 1.1754944e-38, %v6209_v18  ;;  %vm18070_vm11 = vmor %vm6203_vm12, %vm6204_vm5 }
 0x42e   : > { %v6071_v40 = vsel %vm6070_vm3, %v17976_v34, %v6067_v50  ;;  %v4144_v26 = vmul.f32 %v10530_v31, %v17982_v27  ;;  %v6200_v16 = vsub.f32 1.0, %v6199_v30  ;;  %vm4149_vm7 = vweird.f32 %v10530_v31  ;;  %vm18082_vm8 = vmor %vm4433_vm4, %vm4434_vm2 }
 0x42f   : > { %v6076_v24 = vsel %vm17987_vm0, %v6075_v47, %v6071_v40  ;;  %v4430_v49 = vsub.f32 1.0, %v4429_v35  ;;  %vm6218_vm15 = vweird.f32 %v18008_v19  ;;  %10535 = vpow2.f32 %v17994_v61  ;;  %vm18098_vm12 = vmor %vm4148_vm6, %vm4149_vm7 }
 0x430   : > { %v7993_v60 = vmul.f32 %v6076_v24, %v17701_v21  ;;  %v4145_v39 = vsub.f32 1.0, %v4144_v26  ;;  %v6201_v34 = vmul.f32 %v18019_v57, %v6200_v16  ;;  %v10532_v3 = vpop.eup %10531  ;;  %v6224_v21 = vand.u32 2147483648, %v18008_v19 }
 0x431   : > { %v4431_v47 = vmul.f32 %v18025_v33, %v4430_v49  ;;  %v6214_v2 = vmul.f32 %v10532_v3, %v18008_v19  ;;  %vm18088_vm0 = vcmp.eq.f32.partialorder %v6222_v54, 8.507059e+37  ;;  %vm4583_vm14 = vweird.f32 %v18017_v23 }
 0x432   : > { %v8292_v8 = vadd.f32 %v17902_v48, %v7993_v60  ;;  %v4146_v1 = vmul.f32 %v10530_v31, %v4145_v39  ;;  %v6202_v38 = vadd.f32 %v18019_v57, %v6201_v34  ;;  %v18092_v61 = vpop.eup %10533  ;;  %v4587_v43 = vand.u32 2147483647, %v18017_v23 }
 0x433   : > { %v4432_v48 = vadd.f32 %v18025_v33, %v4431_v47  ;;  %v9602_v55 = vmul.f32 -1.442695, %v18001_v13  ;;  %v6215_v35 = vsub.f32 1.0, %v6214_v2  ;;  %v4579_v54 = vmul.f32 %v18092_v61, %v18017_v23 }
 0x434   : > { %v4147_v50 = vadd.f32 %v10530_v31, %v4146_v1  ;;  %v6206_v30 = vsel %vm18070_vm11, %v18019_v57, %v6202_v38  ;;  %vm6219_vm4 = vweird.f32 %v10532_v3  ;;  %v4589_v52 = vand.u32 2147483648, %v18017_v23  ;;  %v8532_v1 = vld [vmem:[#allocation3 + $0x8] sm:$0xff] }
 0x435   : > { %v6211_v27 = vsel %vm18036_vm9, %v6210_v4, %v6206_v30  ;;  %10537 = vpow2.f32 %v17997_v7  ;;  %v4436_v40 = vsel %vm18082_vm8, %v18025_v33, %v4432_v48  ;;  %v6216_v16 = vmul.f32 %v10532_v3, %v6215_v35  ;;  %v10536_v24 = vpop.eup %10535  ;;  %vm6220_vm9 = vmor %vm6218_vm15, %vm6219_vm4  ;;  %v8556_v38 = vld [vmem:[#allocation3 + $0xc8] sm:$0xff]  ;;  %8706 = vmatpush.msrb.mxu2 %v8532_v1 }
 0x436   : > { %v4151_v26 = vsel %vm18098_vm12, %v10530_v31, %v4147_v50  ;;  %v8002_v57 = vmul.f32 %v6211_v27, %v17749_v42  ;;  %v4580_v49 = vsub.f32 1.0, %v4579_v54  ;;  %vm4584_vm6 = vweird.f32 %v18092_v61  ;;  %v1306_v31 = vpop.f32.mrf.mxu2  ;;  %8718 = vmatpush.msra.mxu3 %v8556_v38  ;;  %v8555_v50 = vld [vmem:[#allocation3 + $0xc0] sm:$0xff] }
 0x437   : > { %v4156_v53 = vsel %vm18030_vm13, %v4155_v51, %v4151_v26  ;;  %10539 = vpow2.f32 %v9602_v55  ;;  %v6217_v33 = vadd.f32 %v10532_v3, %v6216_v16  ;;  %v18127_v60 = vadd.f32 1.0, %v10536_v24  ;;  %vm18147_vm13 = vmor %vm4583_vm14, %vm4584_vm6  ;;  %v8531_v55 = vld [vmem:[#allocation3] sm:$0xff]  ;;  %v8577_v24 = vld [vmem:[#allocation3 + $0x170] sm:$0xff] }
 0x438   : > { %v7865_v7 = vmul.f32 %v4156_v53, %v17898_v10  ;;  %v18125_v4 = vadd.f32 %v17955_v37, %v8002_v57  ;;  %v6225_v42 = vor.u32 1.1754944e-38, %v6224_v21  ;;  %v4581_v6 = vmul.f32 %v18092_v61, %v4580_v49  ;;  %8707 = vmatpush.msrb.mxu2 %v8531_v55  ;;  %8719 = vmatpush.msra.mxu3 %v8555_v50 }
 0x439   : > { %v18134_v51 = vadd.f32 %v1306_v31, %v16738_v56  ;;  %v9611_v39 = vmul.f32 -1.442695, %v18012_v11  ;;  %v4441_v10 = vsel %vm18058_vm10, %v18028_v22, %v4436_v40  ;;  %v6221_v34 = vsel %vm6220_vm9, %v10532_v3, %v6217_v33  ;;  %v8554_v40 = vld [vmem:[#allocation3 + $0xb8] sm:$0xff] }
 0x43a   : > { %v18141_v37 = vadd.f32 %v17963_v46, %v7865_v7  ;;  %10541 = vrcp.f32 %v18127_v60  ;;  %v6226_v15 = vsel %vm18088_vm0, %v6225_v42, %v6221_v34  ;;  %v4582_v22 = vadd.f32 %v18092_v61, %v4581_v6  ;;  %8720 = vmatpush.msra.mxu3 %v8554_v40  ;;  %v18208_v34 = vpop.f32.mrf.mxu0  ;;  %v8551_v7 = vld [vmem:[#allocation3 + $0xa0] sm:$0xff] }
 0x43b   : > { %v10538_v47 = vpop.eup %10537  ;;  %vm18155_vm3 = vcmp.eq.f32.partialorder %v4587_v43, 8.507059e+37  ;;  %v4590_v12 = vor.u32 1.1754944e-38, %v4589_v52  ;;  %v8003_v3 = vmul.f32 %v6226_v15, %v17918_v36  ;;  %v9493_v21 = vmul.f32 -1.442695, %v18134_v51 }
 0x43c   : > { %v18160_v23 = vadd.f32 1.0, %v10538_v47  ;;  %10543 = vpow2.f32 %v9611_v39  ;;  %v7884_v18 = vmul.f32 %v4441_v10, %v17890_v28  ;;  %v4586_v48 = vsel %vm18147_vm13, %v18092_v61, %v4582_v22  ;;  %v8578_v61 = vld [vmem:[#allocation3 + $0x178] sm:$0xff] }
 0x43d   : > { %v10540_v2 = vpop.eup %10539  ;;  %v18168_v58 = vadd.f32 %v1413_v9, %v16962_v29  ;;  %v18170_v36 = vadd.f32 %v8292_v8, %v8003_v3  ;;  %v4302_v43 = vand.u32 2147483647, %v18127_v60  ;;  %v4591_v28 = vsel %vm18155_vm3, %v4590_v12, %v4586_v48  ;;  %8732 = vmatpush.msra.mxu2 %v8578_v61  ;;  %v8550_v48 = vld [vmem:[#allocation3 + $0x98] sm:$0xff] }
 0x43e   : > { %10545 = vrcp.f32 %v18160_v23  ;;  %v4304_v30 = vand.u32 2147483648, %v18127_v60  ;;  %v18177_v35 = vadd.f32 1.0, %v10540_v2  ;;  %v8477_v8 = vrot.slane %v17972_v0, 1  ;;  %v1309_v2 = vpop.f32.mrf.mxu2 }
 0x43f   : > { %10547 = vpow2.f32 %v9493_v21  ;;  %v9474_v27 = vmul.f32 -1.442695, %v18168_v58  ;;  %v18185_v52 = vadd.f32 %v17922_v59, %v15050_v25  ;;  %v8479_v26 = vrot.slane %v17059_v45, 4  ;;  %8733 = vmatpush.msra.mxu2 %v8577_v24 }
 0x440   : > { %v18179_v54 = vpop.eup %10541  ;;  %v8312_v57 = vadd.f32 %v17979_v20, %v7884_v18  ;;  %vm4298_vm5 = vweird.f32 %v18127_v60  ;;  %v7894_v49 = vmul.f32 %v4591_v28, %v17939_v32  ;;  %vm18193_vm2 = vcmp.eq.f32.partialorder %v4302_v43, 8.507059e+37  ;;  %v8553_v20 = vld [vmem:[#allocation3 + $0xb0] sm:$0xff] }
 0x441   : > { %v4294_v16 = vmul.f32 %v18179_v54, %v18127_v60  ;;  %10549 = vrcp.f32 %v18177_v35  ;;  %v18200_v59 = vadd.f32 %v18048_v14, %v15043_v62  ;;  %v4305_v31 = vor.u32 1.1754944e-38, %v4304_v30  ;;  %8721 = vmatpush.msra.mxu3 %v8553_v20  ;;  %v11141_v14 = vld [vmem:[%s11390_s22 + $0x88] sm:$0xff] }
 0x442   : > { %v10544_v53 = vpop.eup %10543  ;;  %10551 = vpow2.f32 %v9474_v27  ;;  %vm4299_vm10 = vweird.f32 %v18179_v54  ;;  %v6357_v6 = vand.u32 2147483647, %v18160_v23  ;;  %v6359_v39 = vand.u32 2147483648, %v18160_v23  ;;  %9329 = vmatmul.msk.f32.gmra.mxu0 %vm460_vm1, %v11141_v14 }
 0x443   : > { %v4295_v33 = vsub.f32 1.0, %v4294_v16  ;;  %v18202_v42 = vadd.f32 1.0, %v10544_v53  ;;  %v9612_v10 = vmul.f32 -1.442695, %v18185_v52  ;;  %vm6353_vm7 = vweird.f32 %v18160_v23  ;;  %vm18226_vm11 = vmor %vm4298_vm5, %vm4299_vm10 }
 0x444   : > { %v10546_v32 = vpop.eup %10545  ;;  %v6372_v15 = vand.u32 2147483647, %v18177_v35  ;;  %v18216_v46 = vadd.f32 %v8312_v57, %v7894_v49  ;;  %v6374_v12 = vand.u32 2147483648, %v18177_v35  ;;  %v9621_v3 = vmul.f32 -1.442695, %v18200_v59  ;;  %v18256_v57 = vpop.f32.mrf.mxu1  ;;  %9362 = vmatmul.msk.f32.gmra.mxu1 %vm460_vm1, %v11141_v14  ;;  %v8576_v49 = vld [vmem:[#allocation3 + $0x168] sm:$0xff] }
 0x445   : > { %v4296_v19 = vmul.f32 %v18179_v54, %v4295_v33  ;;  %v6349_v47 = vmul.f32 %v10546_v32, %v18160_v23  ;;  %v10548_v22 = vpop.eup %10547  ;;  %10553 = vrcp.f32 %v18202_v42  ;;  %vm18234_vm15 = vcmp.eq.f32.partialorder %v6357_v6, 8.507059e+37  ;;  %8734 = vmatpush.msra.mxu2 %v8576_v49  ;;  %v8552_v23 = vld [vmem:[#allocation3 + $0xa8] sm:$0xff]  ;;  %v1416_v49 = vpop.f32.mrf.mxu3 }
 0x446   : > { %v18230_v38 = vadd.f32 1.0, %v10548_v22  ;;  %10555 = vpow2.f32 %v9612_v10  ;;  %v6360_v43 = vor.u32 1.1754944e-38, %v6359_v39  ;;  %vm6368_vm8 = vweird.f32 %v18177_v35  ;;  %8722 = vmatpush.msra.mxu3 %v8552_v23 }
 0x447   : > { %v4297_v21 = vadd.f32 %v18179_v54, %v4296_v19  ;;  %v6350_v1 = vsub.f32 1.0, %v6349_v47  ;;  %v18232_v18 = vpop.eup %10549  ;;  %v18240_v60 = vadd.f32 %v1309_v2, %v16738_v56  ;;  %vm6354_vm0 = vweird.f32 %v10546_v32  ;;  %v8575_v47 = vld [vmem:[#allocation3 + $0x160] sm:$0xff] }
 0x448   : > { %v10552_v55 = vpop.eup %10551  ;;  %v6364_v28 = vmul.f32 %v18232_v18, %v18177_v35  ;;  %vm18244_vm12 = vcmp.eq.f32.partialorder %v6372_v15, 8.507059e+37  ;;  %v6375_v27 = vor.u32 1.1754944e-38, %v6374_v12  ;;  %10557 = vrcp.f32 %v18230_v38  ;;  %vm6355_vm14 = vmor %vm6353_vm7, %vm6354_vm0  ;;  %8735 = vmatpush.msra.mxu2 %v8575_v47  ;;  %8723 = vmatpush.msra.mxu3 %v8551_v7 }
 0x449   : > { %v6351_v50 = vmul.f32 %v10546_v32, %v6350_v1  ;;  %v4301_v61 = vsel %vm18226_vm11, %v18179_v54, %v4297_v21  ;;  %v18254_v40 = vadd.f32 %v18064_v41, %v15050_v25  ;;  %v6509_v53 = vand.u32 2147483648, %v18202_v42  ;;  %v8574_v21 = vld [vmem:[#allocation3 + $0x158] sm:$0xff] }
 0x44a   : > { %v6365_v24 = vsub.f32 1.0, %v6364_v28  ;;  %10559 = vpow2.f32 %v9621_v3  ;;  %vm6369_vm4 = vweird.f32 %v18232_v18  ;;  %v18266_v41 = vadd.f32 1.0, %v10552_v55  ;;  %8736 = vmatpush.msra.mxu2 %v8574_v21  ;;  %v8573_v28 = vld [vmem:[#allocation3 + $0x150] sm:$0xff]  ;;  %8724 = vmatpush.msra.mxu3 %v8550_v48 }
 0x44b   : > { %v6352_v16 = vadd.f32 %v10546_v32, %v6351_v50  ;;  %v18260_v20 = vpop.eup %10553  ;;  %v6507_v54 = vand.u32 2147483647, %v18202_v42  ;;  %v9503_v33 = vmul.f32 -1.442695, %v18240_v60  ;;  %v4306_v39 = vsel %vm18193_vm2, %v4305_v31, %v4301_v61  ;;  %vm6370_vm9 = vmor %vm6368_vm8, %vm6369_vm4 }
 0x44c   : > { %v10556_v6 = vpop.eup %10555  ;;  %v6366_v14 = vmul.f32 %v18232_v18, %v6365_v24  ;;  %v4737_v19 = vand.u32 2147483647, %v18230_v38  ;;  %v4739_v22 = vand.u32 2147483648, %v18230_v38  ;;  %10561 = vrcp.f32 %v18266_v41  ;;  %8737 = vmatpush.msra.mxu2 %v8573_v28 }
 0x44d   : > { %v6356_v10 = vsel %vm6355_vm14, %v10546_v32, %v6352_v16  ;;  %vm6503_vm6 = vweird.f32 %v18202_v42  ;;  %v6499_v12 = vmul.f32 %v18260_v20, %v18202_v42  ;;  %v6510_v3 = vor.u32 1.1754944e-38, %v6509_v53 }
 0x44e   : > { %v6361_v15 = vsel %vm18234_vm15, %v6360_v43, %v6356_v10  ;;  %v6367_v32 = vadd.f32 %v18232_v18, %v6366_v14  ;;  %v18283_v9 = vpop.eup %10557  ;;  %v7875_v1 = vmul.f32 %v4306_v39, %v17960_v17  ;;  %vm4733_vm13 = vweird.f32 %v18230_v38 }
 0x44f   : > { %v8012_v31 = vmul.f32 %v6361_v15, %v17969_v44  ;;  %vm18291_vm3 = vcmp.eq.f32.partialorder %v6507_v54, 8.507059e+37  ;;  %v18295_v2 = vadd.f32 1.0, %v10556_v6  ;;  %10563 = vpow2.f32 %v9503_v33  ;;  %v18320_v6 = vpop.f32.mrf.mxu0  ;;  %v8568_v44 = vld [vmem:[#allocation3 + $0x128] sm:$0xff] }
 0x450   : > { %v10560_v43 = vpop.eup %10559  ;;  %v6371_v55 = vsel %vm6370_vm9, %v18232_v18, %v6367_v32  ;;  %v4729_v35 = vmul.f32 %v18283_v9, %v18230_v38  ;;  %vm18301_vm5 = vcmp.eq.f32.partialorder %v4737_v19, 8.507059e+37  ;;  %v4740_v16 = vor.u32 1.1754944e-38, %v4739_v22 }
 0x451   : > { %v8263_v17 = vadd.f32 %v18125_v4, %v8012_v31  ;;  %v6376_v61 = vsel %vm18244_vm12, %v6375_v27, %v6371_v55  ;;  %v6500_v24 = vsub.f32 1.0, %v6499_v12  ;;  %10565 = vrcp.f32 %v18295_v2  ;;  %v8549_v4 = vld [vmem:[#allocation3 + $0x90] sm:$0xff] }
 0x452   : > { %v8013_v18 = vmul.f32 %v6376_v61, %v18001_v13  ;;  %v4730_v53 = vsub.f32 1.0, %v4729_v35  ;;  %vm4734_vm2 = vweird.f32 %v18283_v9  ;;  %vm4448_vm10 = vweird.f32 %v18266_v41  ;;  %v18311_v54 = vpop.eup %10561  ;;  %8725 = vmatpush.msra.mxu3 %v8549_v4  ;;  %v11142_v13 = vld [vmem:[%s11390_s22 + $0x90] sm:$0xff] }
 0x453   : > { %v6501_v30 = vmul.f32 %v18260_v20, %v6500_v24  ;;  %vm6504_vm7 = vweird.f32 %v18260_v20  ;;  %v18316_v27 = vadd.f32 %v1416_v49, %v16962_v29  ;;  %v18318_v33 = vadd.f32 1.0, %v10560_v43  ;;  %9330 = vmatmul.msk.f32.gmra.mxu0 %vm460_vm1, %v11142_v13  ;;  %vm18335_vm11 = vmor %vm4733_vm13, %vm4734_vm2  ;;  %v18370_v24 = vpop.f32.mrf.mxu1  ;;  %9363 = vmatmul.msk.f32.gmra.mxu1 %vm460_vm1, %v11142_v13 }
 0x454   : > { %v18325_v39 = vadd.f32 %v18170_v36, %v8013_v18  ;;  %v4731_v10 = vmul.f32 %v18283_v9, %v4730_v53  ;;  %v4444_v14 = vmul.f32 %v18311_v54, %v18266_v41  ;;  %v4452_v19 = vand.u32 2147483647, %v18266_v41  ;;  %vm6505_vm15 = vmor %vm6503_vm6, %vm6504_vm7 }
 0x455   : > { %v10564_v23 = vpop.eup %10563  ;;  %v4454_v15 = vand.u32 2147483648, %v18266_v41  ;;  %v6502_v36 = vadd.f32 %v18260_v20, %v6501_v30  ;;  %v6522_v22 = vand.u32 2147483647, %v18295_v2  ;;  %v9484_v7 = vmul.f32 -1.442695, %v18316_v27  ;;  %v8548_v30 = vld [vmem:[#allocation3 + $0x88] sm:$0xff] }
 0x456   : > { %v4732_v31 = vadd.f32 %v18283_v9, %v4731_v10  ;;  %v4445_v32 = vsub.f32 1.0, %v4444_v14  ;;  %v18348_v38 = vadd.f32 1.0, %v10564_v23  ;;  %10567 = vrcp.f32 %v18318_v33  ;;  %8726 = vmatpush.msra.mxu3 %v8548_v30  ;;  %v8571_v14 = vld [vmem:[#allocation3 + $0x140] sm:$0xff] }
 0x457   : > { %v18351_v12 = vpop.eup %10565  ;;  %vm4449_vm8 = vweird.f32 %v18311_v54  ;;  %v6506_v21 = vsel %vm6505_vm15, %v18260_v20, %v6502_v36  ;;  %v6524_v48 = vand.u32 2147483648, %v18295_v2  ;;  %10569 = vpow2.f32 %v9484_v7  ;;  %v8547_v36 = vld [vmem:[#allocation3 + $0x80] sm:$0xff] }
 0x458   : > { %v4736_v43 = vsel %vm18335_vm11, %v18283_v9, %v4732_v31  ;;  %v4446_v42 = vmul.f32 %v18311_v54, %v4445_v32  ;;  %v6511_v55 = vsel %vm18291_vm3, %v6510_v3, %v6506_v21  ;;  %v6514_v35 = vmul.f32 %v18351_v12, %v18295_v2  ;;  %vm18384_vm12 = vmor %vm4448_vm10, %vm4449_vm8  ;;  %8727 = vmatpush.msra.mxu3 %v8547_v36  ;;  %v8570_v21 = vld [vmem:[#allocation3 + $0x138] sm:$0xff] }
 0x459   : > { %v18365_v28 = vadd.f32 %v18141_v37, %v7875_v1  ;;  %v8022_v20 = vmul.f32 %v6511_v55, %v18012_v11  ;;  %10571 = vrcp.f32 %v18348_v38  ;;  %v9622_v61 = vmul.f32 -1.442695, %v18254_v40  ;;  %v1419_v11 = vpop.f32.mrf.mxu3 }
 0x45a   : > { %v4741_v9 = vsel %vm18301_vm5, %v4740_v16, %v4736_v43  ;;  %v4447_v3 = vadd.f32 %v18311_v54, %v4446_v42  ;;  %vm18376_vm0 = vcmp.eq.f32.partialorder %v4452_v19, 8.507059e+37  ;;  %v6515_v37 = vsub.f32 1.0, %v6514_v35  ;;  %v8572_v16 = vld [vmem:[#allocation3 + $0x148] sm:$0xff] }
 0x45b   : > { %v4455_v1 = vor.u32 1.1754944e-38, %v4454_v15  ;;  %v18388_v4 = vadd.f32 %v8263_v17, %v8022_v20  ;;  %vm6518_vm14 = vweird.f32 %v18295_v2  ;;  %vm18391_vm4 = vcmp.eq.f32.partialorder %v6522_v22, 8.507059e+37  ;;  %8738 = vmatpush.msra.mxu2 %v8572_v16 }
 0x45c   : > { %v18395_v18 = vpop.eup %10567  ;;  %v6516_v53 = vmul.f32 %v18351_v12, %v6515_v37  ;;  %vm6519_vm6 = vweird.f32 %v18351_v12  ;;  %v6525_v41 = vor.u32 1.1754944e-38, %v6524_v48  ;;  %v6657_v49 = vand.u32 2147483647, %v18318_v33  ;;  %v8594_v48 = vld [vmem:[#allocation3 + $0x1f8] sm:$0xff] }
 0x45d   : > { %v10570_v17 = vpop.eup %10569  ;;  %v18401_v13 = vmul.f32 %v4741_v9, %v18134_v51  ;;  %vm4883_vm9 = vweird.f32 %v18348_v38  ;;  %v6649_v10 = vmul.f32 %v18395_v18, %v18318_v33  ;;  %vm6653_vm13 = vweird.f32 %v18318_v33  ;;  %v1312_v51 = vpop.f32.mrf.mxu2  ;;  %8739 = vmatpush.msra.mxu2 %v8571_v14  ;;  %vm18418_vm3 = vmor %vm6518_vm14, %vm6519_vm6  ;;  %8752 = vmatpush.msrb.mxu3 %v8594_v48 }
 0x45e   : > { %v4451_v19 = vsel %vm18384_vm12, %v18311_v54, %v4447_v3  ;;  %v6517_v23 = vadd.f32 %v18351_v12, %v6516_v53  ;;  %v4887_v47 = vand.u32 2147483647, %v18348_v38  ;;  %v18412_v15 = vadd.f32 1.0, %v10570_v17  ;;  %v18467_v17 = vpop.f32.mrf.mxu0 }
 0x45f   : > { %v10572_v22 = vpop.eup %10571  ;;  %v4889_v54 = vand.u32 2147483648, %v18348_v38  ;;  %v6650_v31 = vsub.f32 1.0, %v6649_v10  ;;  %10573 = vpow2.f32 %v9622_v61  ;;  %v18424_v32 = vadd.f32 %v1312_v51, %v16738_v56  ;;  %8740 = vmatpush.msra.mxu2 %v8570_v21  ;;  %v8593_v61 = vld [vmem:[#allocation3 + $0x1f0] sm:$0xff] }
 0x460   : > { %v6521_v43 = vsel %vm18418_vm3, %v18351_v12, %v6517_v23  ;;  %v4879_v2 = vmul.f32 %v10572_v22, %v18348_v38  ;;  %vm18430_vm5 = vcmp.eq.f32.partialorder %v6657_v49, 8.507059e+37  ;;  %v6659_v55 = vand.u32 2147483648, %v18318_v33  ;;  %v8569_v12 = vld [vmem:[#allocation3 + $0x130] sm:$0xff]  ;;  %8753 = vmatpush.msrb.mxu3 %v8593_v61 }
 0x461   : > { %v4456_v35 = vsel %vm18376_vm0, %v4455_v1, %v4451_v19  ;;  %v6526_v20 = vsel %vm18391_vm4, %v6525_v41, %v6521_v43  ;;  %10575 = vrcp.f32 %v18412_v15  ;;  %vm6654_vm2 = vweird.f32 %v18395_v18  ;;  %8741 = vmatpush.msra.mxu2 %v8569_v12  ;;  %v11143_v10 = vld [vmem:[%s11390_s22 + $0x98] sm:$0xff] }
 0x462   : > { %v8023_v9 = vmul.f32 %v6526_v20, %v18185_v52  ;;  %v4880_v3 = vsub.f32 1.0, %v4879_v2  ;;  %vm4884_vm10 = vweird.f32 %v10572_v22  ;;  %v6651_v37 = vmul.f32 %v18395_v18, %v6650_v31  ;;  %vm18463_vm11 = vmor %vm6653_vm13, %vm6654_vm2  ;;  %9331 = vmatmul.msk.f32.gmra.mxu0 %vm460_vm1, %v11143_v10 }
 0x463   : > { %vm18443_vm7 = vcmp.eq.f32.partialorder %v4887_v47, 8.507059e+37  ;;  %v9513_v1 = vmul.f32 -1.442695, %v18424_v32  ;;  %v18449_v50 = vadd.f32 %v1419_v11, %v16962_v29  ;;  %v18453_v52 = vadd.f32 %v18208_v34, %v15043_v62  ;;  %vm18474_vm15 = vmor %vm4883_vm9, %vm4884_vm10  ;;  %8742 = vmatpush.msra.mxu2 %v8568_v44 }
 0x464   : > { %v18456_v16 = vadd.f32 %v18325_v39, %v8023_v9  ;;  %v4881_v53 = vmul.f32 %v10572_v22, %v4880_v3  ;;  %v4890_v41 = vor.u32 1.1754944e-38, %v4889_v54  ;;  %v6652_v49 = vadd.f32 %v18395_v18, %v6651_v37 }
 0x465   : > { %v10574_v34 = vpop.eup %10573  ;;  %v6660_v14 = vor.u32 1.1754944e-38, %v6659_v55  ;;  %10577 = vpow2.f32 %v9513_v1  ;;  %v9494_v33 = vmul.f32 -1.442695, %v18449_v50  ;;  %v18481_v19 = vadd.f32 %v18256_v57, %v15050_v25  ;;  %v8592_v1 = vld [vmem:[#allocation3 + $0x1e8] sm:$0xff] }
 0x466   : > { %v7885_v23 = vmul.f32 %v4456_v35, %v18168_v58  ;;  %v4882_v47 = vadd.f32 %v10572_v22, %v4881_v53  ;;  %v6656_v51 = vsel %vm18463_vm11, %v18395_v18, %v6652_v49  ;;  %v18487_v38 = vadd.f32 1.0, %v10574_v34  ;;  %8754 = vmatpush.msrb.mxu3 %v8592_v1 }
 0x467   : > { %v10576_v36 = vpop.eup %10575  ;;  %vm4598_vm8 = vweird.f32 %v18412_v15  ;;  %v6661_v7 = vsel %vm18430_vm5, %v6660_v14, %v6656_v51  ;;  %10579 = vpow2.f32 %v9494_v33  ;;  %v9631_v54 = vmul.f32 -1.442695, %v18453_v52 }
 0x468   : > { %v4886_v57 = vsel %vm18474_vm15, %v10572_v22, %v4882_v47  ;;  %v4594_v58 = vmul.f32 %v10576_v36, %v18412_v15  ;;  %v4602_v31 = vand.u32 2147483647, %v18412_v15  ;;  %v8032_v18 = vmul.f32 %v6661_v7, %v18200_v59  ;;  %v8591_v47 = vld [vmem:[#allocation3 + $0x1e0] sm:$0xff] }
 0x469   : > { %v4891_v21 = vsel %vm18443_vm7, %v4890_v41, %v4886_v57  ;;  %v4604_v48 = vand.u32 2147483648, %v18412_v15  ;;  %10581 = vrcp.f32 %v18487_v38  ;;  %v9632_v43 = vmul.f32 -1.442695, %v18481_v19  ;;  %8755 = vmatpush.msrb.mxu3 %v8591_v47 }
 0x46a   : > { %v4595_v2 = vsub.f32 1.0, %v4594_v58  ;;  %vm4599_vm0 = vweird.f32 %v10576_v36  ;;  %v18504_v42 = vadd.f32 %v18388_v4, %v8032_v18  ;;  %v18508_v22 = vadd.f32 %v18320_v6, %v15043_v62  ;;  %v1315_v6 = vpop.f32.mrf.mxu2 }
 0x46b   : > { %v10578_v55 = vpop.eup %10577  ;;  %v8314_v59 = vadd.f32 %v18216_v46, %v18401_v13  ;;  %v6672_v35 = vand.u32 2147483647, %v18487_v38  ;;  %10583 = vpow2.f32 %v9631_v54  ;;  %v18515_v20 = vadd.f32 %v18370_v24, %v15050_v25  ;;  %vm18527_vm12 = vmor %vm4598_vm8, %vm4599_vm0  ;;  %v18534_v13 = vpop.f32.mrf.mxu1  ;;  %9364 = vmatmul.msk.f32.gmra.mxu1 %vm460_vm1, %v11143_v10 }
 0x46c   : > { %v7914_v12 = vmul.f32 %v4891_v21, %v18240_v60  ;;  %v4596_v61 = vmul.f32 %v10576_v36, %v4595_v2  ;;  %v6674_v4 = vand.u32 2147483648, %v18487_v38  ;;  %v18519_v9 = vadd.f32 1.0, %v10578_v55 }
 0x46d   : > { %v10580_v3 = vpop.eup %10579  ;;  %v18522_v37 = vadd.f32 %v18365_v28, %v7885_v23  ;;  %v4605_v24 = vor.u32 1.1754944e-38, %v4604_v48  ;;  %10585 = vpow2.f32 %v9632_v43  ;;  %v18532_v60 = vadd.f32 %v1315_v6, %v16738_v56  ;;  %v8567_v23 = vld [vmem:[#allocation3 + $0x120] sm:$0xff] }
 0x46e   : > { %v4597_v11 = vadd.f32 %v10576_v36, %v4596_v61  ;;  %vm18537_vm14 = vcmp.eq.f32.partialorder %v4602_v31, 8.507059e+37  ;;  %10587 = vrcp.f32 %v18519_v9  ;;  %v9641_v15 = vmul.f32 -1.442695, %v18508_v22  ;;  %8743 = vmatpush.msra.mxu2 %v8567_v23  ;;  %v1422_v31 = vpop.f32.mrf.mxu3 }
 0x46f   : > { %v10582_v53 = vpop.eup %10581  ;;  %vm6668_vm4 = vweird.f32 %v18487_v38  ;;  %v18544_v41 = vadd.f32 1.0, %v10580_v3  ;;  %v9523_v49 = vmul.f32 -1.442695, %v18532_v60  ;;  %v18548_v30 = vmul.f32 -1.442695, %v18515_v20 }
 0x470   : > { %v18550_v10 = vadd.f32 %v8314_v59, %v7914_v12  ;;  %v4601_v34 = vsel %vm18527_vm12, %v10576_v36, %v4597_v11  ;;  %v6664_v39 = vmul.f32 %v10582_v53, %v18487_v38  ;;  %vm18555_vm6 = vcmp.eq.f32.partialorder %v6672_v35, 8.507059e+37 }
 0x471   : > { %v6675_v33 = vor.u32 1.1754944e-38, %v6674_v4  ;;  %v10584_v51 = vpop.eup %10583  ;;  %v4606_v7 = vsel %vm18537_vm14, %v4605_v24, %v4601_v34  ;;  %v5037_v54 = vand.u32 2147483647, %v18519_v9  ;;  %10589 = vrcp.f32 %v18544_v41 }
 0x472   : > { %v18565_v36 = vadd.f32 %v18467_v17, %v15043_v62  ;;  %v6665_v57 = vsub.f32 1.0, %v6664_v39  ;;  %v5039_v58 = vand.u32 2147483648, %v18519_v9  ;;  %10591 = vpow2.f32 %v9641_v15 }
 0x473   : > { %v8461_v18 = vrot.slane %v15376_v5, 4  ;;  %v10586_v21 = vpop.eup %10585  ;;  %vm5033_vm9 = vweird.f32 %v18519_v9  ;;  %v18570_v48 = vadd.f32 1.0, %v10584_v51  ;;  %10593 = vpow2.f32 %v9523_v49 }
 0x474   : > { %v18573_v43 = vadd.f32 %v1422_v31, %v16962_v29  ;;  %v10588_v17 = vpop.eup %10587  ;;  %v7895_v2 = vmul.f32 %v4606_v7, %v18316_v27  ;;  %v6666_v55 = vmul.f32 %v10582_v53, %v6665_v57  ;;  %vm6669_vm13 = vweird.f32 %v10582_v53 }
 0x475   : > { %v4752_v59 = vand.u32 2147483647, %v18544_v41  ;;  %v5029_v35 = vmul.f32 %v10588_v17, %v18519_v9  ;;  %vm18578_vm3 = vcmp.eq.f32.partialorder %v5037_v54, 8.507059e+37  ;;  %v4754_v61 = vand.u32 2147483648, %v18544_v41  ;;  %vm6670_vm2 = vmor %vm6668_vm4, %vm6669_vm13 }
 0x476   : > { %10595 = vrcp.f32 %v18570_v48  ;;  %v6667_v4 = vadd.f32 %v10582_v53, %v6666_v55  ;;  %v5040_v6 = vor.u32 1.1754944e-38, %v5039_v58  ;;  %vm4748_vm5 = vweird.f32 %v18544_v41 }
 0x477   : > { %v18585_v3 = vadd.f32 1.0, %v10586_v21  ;;  %v18587_v27 = vpop.eup %10589  ;;  %v5030_v46 = vsub.f32 1.0, %v5029_v35  ;;  %vm5034_vm10 = vweird.f32 %v10588_v17  ;;  %v9504_v24 = vmul.f32 -1.442695, %v18573_v43 }
 0x478   : > { %v18593_v11 = vmul.f32 -1.442695, %v18565_v36  ;;  %v10592_v28 = vpop.eup %10591  ;;  %v18596_v15 = vadd.f32 %v18522_v37, %v7895_v2  ;;  %v6671_v44 = vsel %vm6670_vm2, %v10582_v53, %v6667_v4  ;;  %v4744_v1 = vmul.f32 %v18587_v27, %v18544_v41  ;;  %vm18610_vm11 = vmor %vm5033_vm9, %vm5034_vm10 }
 0x479   : > { %vm18600_vm7 = vcmp.eq.f32.partialorder %v4752_v59, 8.507059e+37  ;;  %v10594_v38 = vpop.eup %10593  ;;  %v6676_v34 = vsel %vm18555_vm6, %v6675_v33, %v6671_v44  ;;  %v5031_v39 = vmul.f32 %v10588_v17, %v5030_v46  ;;  %v4755_v23 = vor.u32 1.1754944e-38, %v4754_v61 }
 0x47a   : > { %10597 = vrcp.f32 %v18585_v3  ;;  %v8033_v47 = vmul.f32 %v6676_v34, %v18254_v40  ;;  %v4745_v53 = vsub.f32 1.0, %v4744_v1  ;;  %vm4749_vm15 = vweird.f32 %v18587_v27 }
 0x47b   : > { %vm6803_vm8 = vweird.f32 %v18570_v48  ;;  %v6807_v14 = vand.u32 2147483647, %v18570_v48  ;;  %v5032_v51 = vadd.f32 %v10588_v17, %v5031_v39  ;;  %v18617_v7 = vadd.f32 1.0, %v10594_v38  ;;  %vm18631_vm0 = vmor %vm4748_vm5, %vm4749_vm15 }
 0x47c   : > { %v10596_v33 = vpop.eup %10595  ;;  %10599 = vpow2.f32 %v9504_v24  ;;  %v18619_v54 = vadd.f32 1.0, %v10592_v28  ;;  %v18622_v40 = vadd.f32 %v18456_v16, %v8033_v47  ;;  %v4746_v9 = vmul.f32 %v18587_v27, %v4745_v53 }
 0x47d   : > { %v6799_v57 = vmul.f32 %v10596_v33, %v18570_v48  ;;  %10601 = vpow2.f32 %v18548_v30  ;;  %v5036_v58 = vsel %vm18610_vm11, %v10588_v17, %v5032_v51  ;;  %v6809_v21 = vand.u32 2147483648, %v18570_v48 }
 0x47e   : > { %v6822_v16 = vand.u32 2147483647, %v18585_v3  ;;  %10603 = vrcp.f32 %v18617_v7  ;;  %v5041_v2 = vsel %vm18578_vm3, %v5040_v6, %v5036_v58  ;;  %v4747_v30 = vadd.f32 %v18587_v27, %v4746_v9 }
 0x47f   : > { %v6800_v55 = vsub.f32 1.0, %v6799_v57  ;;  %v6824_v17 = vand.u32 2147483648, %v18585_v3  ;;  %v7924_v41 = vmul.f32 %v5041_v2, %v18424_v32  ;;  %vm6804_vm12 = vweird.f32 %v10596_v33  ;;  %v1318_v2 = vpop.f32.mrf.mxu2 }
 0x480   : > { %v10598_v59 = vpop.eup %10597  ;;  %vm18643_vm14 = vcmp.eq.f32.partialorder %v6807_v14, 8.507059e+37  ;;  %10605 = vrcp.f32 %v18619_v54  ;;  %v4751_v12 = vsel %vm18631_vm0, %v18587_v27, %v4747_v30  ;;  %v5187_v6 = vand.u32 2147483647, %v18617_v7  ;;  %vm6805_vm9 = vmor %vm6803_vm8, %vm6804_vm12 }
 0x481   : > { %v6801_v61 = vmul.f32 %v10596_v33, %v6800_v55  ;;  %v6814_v4 = vmul.f32 %v10598_v59, %v18585_v3  ;;  %v6810_v24 = vor.u32 1.1754944e-38, %v6809_v21  ;;  %vm6818_vm4 = vweird.f32 %v18585_v3 }
 0x482   : > { %v10600_v46 = vpop.eup %10599  ;;  %vm18654_vm6 = vcmp.eq.f32.partialorder %v6822_v16, 8.507059e+37  ;;  %v5189_v28 = vand.u32 2147483648, %v18617_v7  ;;  %v6825_v34 = vor.u32 1.1754944e-38, %v6824_v17  ;;  %v8316_v47 = vadd.f32 %v18550_v10, %v7924_v41 }
 0x483   : > { %v10602_v44 = vpop.eup %10601  ;;  %v6802_v1 = vadd.f32 %v10596_v33, %v6801_v61  ;;  %v6815_v38 = vsub.f32 1.0, %v6814_v4  ;;  %v18659_v27 = vadd.f32 1.0, %v10600_v46  ;;  %v4756_v37 = vsel %vm18600_vm7, %v4755_v23, %v4751_v12 }
 0x484   : > { %v10604_v39 = vpop.eup %10603  ;;  %vm6819_vm13 = vweird.f32 %v10598_v59  ;;  %vm5183_vm3 = vweird.f32 %v18617_v7  ;;  %vm18669_vm5 = vcmp.eq.f32.partialorder %v5187_v6, 8.507059e+37  ;;  %v5190_v49 = vor.u32 1.1754944e-38, %v5189_v28 }
 0x485   : > { %v6806_v53 = vsel %vm6805_vm9, %v10596_v33, %v6802_v1  ;;  %v6816_v14 = vmul.f32 %v10598_v59, %v6815_v38  ;;  %v5179_v51 = vmul.f32 %v10604_v39, %v18617_v7  ;;  %10607 = vrcp.f32 %v18659_v27  ;;  %vm6820_vm10 = vmor %vm6818_vm4, %vm6819_vm13  ;;  %v1425_v38 = vpop.f32.mrf.mxu3 }
 0x486   : > { %v10606_v57 = vpop.eup %10605  ;;  %v6811_v10 = vsel %vm18643_vm14, %v6810_v24, %v6806_v53  ;;  %v18676_v48 = vadd.f32 1.0, %v10602_v44  ;;  %vm5184_vm2 = vweird.f32 %v10604_v39  ;;  %v18680_v31 = vmul.f32 %v4756_v37, %v18449_v50 }
 0x487   : > { %v8042_v23 = vmul.f32 %v6811_v10, %v18453_v52  ;;  %v6817_v58 = vadd.f32 %v10598_v59, %v6816_v14  ;;  %v5180_v33 = vsub.f32 1.0, %v5179_v51  ;;  %v6949_v21 = vmul.f32 %v10606_v57, %v18619_v54  ;;  %vm18694_vm11 = vmor %vm5183_vm3, %vm5184_vm2 }
 0x488   : > { %vm6953_vm7 = vweird.f32 %v18619_v54  ;;  %v6957_v16 = vand.u32 2147483647, %v18619_v54  ;;  %v4902_v17 = vand.u32 2147483647, %v18659_v27  ;;  %vm4898_vm15 = vweird.f32 %v18659_v27 }
 0x489   : > { %v8266_v30 = vadd.f32 %v18504_v42, %v8042_v23  ;;  %v6821_v52 = vsel %vm6820_vm10, %v10598_v59, %v6817_v58  ;;  %v5181_v55 = vmul.f32 %v10604_v39, %v5180_v33  ;;  %v6950_v41 = vsub.f32 1.0, %v6949_v21  ;;  %v1321_v23 = vpop.f32.mrf.mxu2 }
 0x48a   : > { %v6826_v50 = vsel %vm18654_vm6, %v6825_v34, %v6821_v52  ;;  %v6959_v35 = vand.u32 2147483648, %v18619_v54  ;;  %v4904_v12 = vand.u32 2147483648, %v18659_v27  ;;  %10609 = vrcp.f32 %v18676_v48 }
 0x48b   : > { %v8043_v42 = vmul.f32 %v6826_v50, %v18481_v19  ;;  %v5182_v59 = vadd.f32 %v10604_v39, %v5181_v55  ;;  %v10608_v61 = vpop.eup %10607  ;;  %v6951_v4 = vmul.f32 %v10606_v57, %v6950_v41  ;;  %vm6954_vm8 = vweird.f32 %v10606_v57 }
 0x48c   : > { %vm18703_vm0 = vcmp.eq.f32.partialorder %v6957_v16, 8.507059e+37  ;;  %v18708_v6 = vadd.f32 %v1318_v2, %v16738_v56  ;;  %v4894_v24 = vmul.f32 %v10608_v61, %v18659_v27  ;;  %vm18716_vm12 = vcmp.eq.f32.partialorder %v4902_v17, 8.507059e+37  ;;  %vm6955_vm4 = vmor %vm6953_vm7, %vm6954_vm8 }
 0x48d   : > { %v18711_v46 = vadd.f32 %v18622_v40, %v8043_v42  ;;  %v5186_v19 = vsel %vm18694_vm11, %v10604_v39, %v5182_v59  ;;  %vm4899_vm14 = vweird.f32 %v10608_v61  ;;  %v6952_v44 = vadd.f32 %v10606_v57, %v6951_v4 }
 0x48e   : > { %v5191_v28 = vsel %vm18669_vm5, %v5190_v49, %v5186_v19  ;;  %v6960_v1 = vor.u32 1.1754944e-38, %v6959_v35  ;;  %v4895_v40 = vsub.f32 1.0, %v4894_v24  ;;  %v9533_v39 = vmul.f32 -1.442695, %v18708_v6  ;;  %v8566_v49 = vld [vmem:[#allocation3 + $0x118] sm:$0xff]  ;;  %vm18744_vm6 = vmor %vm4898_vm15, %vm4899_vm14 }
 0x48f   : > { %v7934_v34 = vmul.f32 %v5191_v28, %v18532_v60  ;;  %v18727_v37 = vadd.f32 %v1425_v38, %v16962_v29  ;;  %v6956_v53 = vsel %vm6955_vm4, %v10606_v57, %v6952_v44  ;;  %10611 = vpow2.f32 %v18593_v11  ;;  %v8590_v57 = vld [vmem:[#allocation3 + $0x1d8] sm:$0xff]  ;;  %8744 = vmatpush.msra.mxu2 %v8566_v49 }
 0x490   : > { %v18732_v14 = vadd.f32 %v18534_v13, %v15050_v25  ;;  %v8462_v60 = vadd.f32 %v8461_v18, %v15376_v5  ;;  %v10610_v51 = vpop.eup %10609  ;;  %v4896_v54 = vmul.f32 %v10608_v61, %v4895_v40  ;;  %v6961_v10 = vsel %vm18703_vm0, %v6960_v1, %v6956_v53  ;;  %8756 = vmatpush.msrb.mxu3 %v8590_v57 }
 0x491   : > { %v18737_v9 = vadd.f32 %v8316_v47, %v7934_v34  ;;  %10613 = vpow2.f32 %v9533_v39  ;;  %v4905_v11 = vor.u32 1.1754944e-38, %v4904_v12  ;;  %v8052_v5 = vmul.f32 %v6961_v10, %v18508_v22 }
 0x492   : > { %v6964_v18 = vmul.f32 %v10610_v51, %v18676_v48  ;;  %v9514_v47 = vmul.f32 -1.442695, %v18727_v37  ;;  %v4897_v58 = vadd.f32 %v10608_v61, %v4896_v54  ;;  %v9652_v33 = vmul.f32 -1.442695, %v18732_v14 }
 0x493   : > { %v8463_v21 = vrot.slane %v8462_v60, 2  ;;  %v18753_v27 = vadd.f32 %v1321_v23, %v16738_v56  ;;  %v18755_v16 = vadd.f32 %v8266_v30, %v8052_v5  ;;  %v6974_v52 = vand.u32 2147483648, %v18676_v48 }
 0x494   : > { %v6965_v2 = vsub.f32 1.0, %v6964_v18  ;;  %10615 = vpow2.f32 %v9514_v47  ;;  %v4901_v22 = vsel %vm18744_vm6, %v10608_v61, %v4897_v58  ;;  %v8467_v17 = vrot.slane %v15392_v63, 4 }
 0x495   : > { %10617 = vpow2.f32 %v9652_v33  ;;  %v9543_v55 = vmul.f32 -1.442695, %v18753_v27  ;;  %v10612_v50 = vpop.eup %10611  ;;  %v18765_v3 = vadd.f32 %v8477_v8, %v17972_v0  ;;  %vm6969_vm9 = vweird.f32 %v10610_v51 }
 0x496   : > { %v6966_v30 = vmul.f32 %v10610_v51, %v6965_v2  ;;  %v6972_v41 = vand.u32 2147483647, %v18676_v48  ;;  %v18771_v42 = vadd.f32 %v8479_v26, %v17059_v45  ;;  %v4906_v59 = vsel %vm18716_vm12, %v4905_v11, %v4901_v22 }
 0x497   : > { %v10614_v35 = vpop.eup %10613  ;;  %v18775_v12 = vadd.f32 1.0, %v10612_v50  ;;  %v8464_v61 = vadd.f32 %v8463_v21, %v8462_v60  ;;  %vm6968_vm13 = vweird.f32 %v18676_v48  ;;  %10619 = vpow2.f32 %v9543_v55 }
 0x498   : > { %v6967_v4 = vadd.f32 %v10610_v51, %v6966_v30  ;;  %v18778_v0 = vadd.f32 1.0, %v10614_v35  ;;  %v8345_v8 = vadd.f32 %v18596_v15, %v18680_v31  ;;  %vm6970_vm3 = vmor %vm6968_vm13, %vm6969_vm9  ;;  %v6975_v7 = vor.u32 1.1754944e-38, %v6974_v52  ;;  %v8565_v30 = vld [vmem:[#allocation3 + $0x110] sm:$0xff]  ;;  %v1131_v35 = vpop.f32.mrf.mxu0 }
 0x499   : > { %10621 = vrcp.f32 %v18775_v12  ;;  %v18784_v45 = vadd.f32 %v8467_v17, %v15392_v63  ;;  %v7915_v19 = vmul.f32 %v4906_v59, %v18573_v43  ;;  %vm6973_vm5 = vcmp.eq.f32.partialorder %v6972_v41, 8.507059e+37  ;;  %v1428_v43 = vpop.f32.mrf.mxu3  ;;  %v8589_v41 = vld [vmem:[#allocation3 + $0x1d0] sm:$0xff]  ;;  %v11144_v59 = vld [vmem:[%s11390_s22 + $0xa0] sm:$0xff]  ;;  %8745 = vmatpush.msra.mxu2 %v8565_v30 }
 0x49a   : > { %v10616_v26 = vpop.eup %10615  ;;  %v6971_v24 = vsel %vm6970_vm3, %v10610_v51, %v6967_v4  ;;  %10623 = vrcp.f32 %v18778_v0  ;;  %v5337_v28 = vand.u32 2147483647, %v18778_v0  ;;  %v8465_v15 = vrot.slane %v8464_v61, 1  ;;  %9332 = vmatmul.msk.f32.gmra.mxu0 %vm460_vm1, %v11144_v59  ;;  %8757 = vmatpush.msrb.mxu3 %v8589_v41  ;;  %v8586_v41 = vld [vmem:[#allocation3 + $0x1b8] sm:$0xff] }
 0x49b   : > { %v10618_v48 = vpop.eup %10617  ;;  %v6976_v32 = vsel %vm6973_vm5, %v6975_v7, %v6971_v24  ;;  %v18789_v44 = vadd.f32 1.0, %v10616_v26  ;;  %v5339_v1 = vand.u32 2147483648, %v18778_v0  ;;  %v7107_v63 = vand.u32 2147483647, %v18775_v12 }
 0x49c   : > { %v8053_v31 = vmul.f32 %v6976_v32, %v18515_v20  ;;  %v18794_v38 = vadd.f32 1.0, %v10618_v48  ;;  %v7109_v34 = vand.u32 2147483648, %v18775_v12  ;;  %v18799_v40 = vadd.f32 %v1428_v43, %v16962_v29 }
 0x49d   : > { %10625 = vrcp.f32 %v18789_v44  ;;  %v8469_v39 = vrot.slane %v18784_v45, 2  ;;  %v10620_v53 = vpop.eup %10619  ;;  %v5052_v20 = vand.u32 2147483647, %v18789_v44  ;;  %v5054_v51 = vand.u32 2147483648, %v18789_v44 }
 0x49e   : > { %v18803_v60 = vadd.f32 %v18711_v46, %v8053_v31  ;;  %10627 = vrcp.f32 %v18794_v38  ;;  %v18810_v10 = vadd.f32 %v8345_v8, %v7915_v19  ;;  %vm5333_vm2 = vweird.f32 %v18778_v0 }
 0x49f   : > { %v18808_v54 = vpop.eup %10621  ;;  %vm18813_vm10 = vcmp.eq.f32.partialorder %v5337_v28, 8.507059e+37  ;;  %vm7103_vm7 = vweird.f32 %v18775_v12  ;;  %v5340_v57 = vor.u32 1.1754944e-38, %v5339_v1  ;;  %vm18822_vm11 = vcmp.eq.f32.partialorder %v7107_v63, 8.507059e+37 }
 0x4a0   : > { %v18818_v46 = vpop.eup %10623  ;;  %v7099_v13 = vmul.f32 %v18808_v54, %v18775_v12  ;;  %v7124_v5 = vand.u32 2147483648, %v18794_v38  ;;  %v8466_v18 = vadd.f32 %v8465_v15, %v8464_v61  ;;  %vm5048_vm15 = vweird.f32 %v18789_v44 }
 0x4a1   : > { %v5329_v47 = vmul.f32 %v18818_v46, %v18778_v0  ;;  %v7110_v23 = vor.u32 1.1754944e-38, %v7109_v34  ;;  %v7122_v58 = vand.u32 2147483647, %v18794_v38  ;;  %vm18831_vm8 = vcmp.eq.f32.partialorder %v5052_v20, 8.507059e+37 }
 0x4a2   : > { %v18835_v21 = vor.u32 1.1754944e-38, %v5054_v51  ;;  %v7100_v2 = vsub.f32 1.0, %v7099_v13  ;;  %v8521_v52 = vmul.f32 0.00390625, %v8466_v18  ;;  %v18837_v22 = vadd.f32 1.0, %v10620_v53 }
 0x4a3   : > { %v18839_v55 = vpop.eup %10625  ;;  %v5330_v17 = vsub.f32 1.0, %v5329_v47  ;;  %vm5334_vm0 = vweird.f32 %v18818_v46  ;;  %vm7104_vm12 = vweird.f32 %v18808_v54  ;;  %vm7118_vm14 = vweird.f32 %v18794_v38 }
 0x4a4   : > { %v9524_v50 = vmul.f32 -1.442695, %v18799_v40  ;;  %v18847_v61 = vpop.eup %10627  ;;  %v5044_v4 = vmul.f32 %v18839_v55, %v18789_v44  ;;  %v7101_v8 = vmul.f32 %v18808_v54, %v7100_v2  ;;  %v7125_v7 = vor.u32 1.1754944e-38, %v7124_v5  ;;  %8708 = vmatmul.f32.vlgmr.msrb.gmra.mxu2 %v8521_v52  ;;  %vm18868_vm9 = vmor %vm5333_vm2, %vm5334_vm0  ;;  %v8588_v2 = vld [vmem:[#allocation3 + $0x1c8] sm:$0xff]  ;;  %v8563_v52 = vld [vmem:[#allocation3 + $0x100] sm:$0xff] }
 0x4a5   : > { %10629 = vrcp.f32 %v18837_v22  ;;  %v5331_v26 = vmul.f32 %v18818_v46, %v5330_v17  ;;  %vm5049_vm4 = vweird.f32 %v18839_v55  ;;  %v7114_v19 = vmul.f32 %v18847_v61, %v18794_v38  ;;  %vm7105_vm5 = vmor %vm7103_vm7, %vm7104_vm12  ;;  %8758 = vmatpush.msrb.mxu3 %v8588_v2 }
 0x4a6   : > { %vm18857_vm6 = vcmp.eq.f32.partialorder %v7122_v58, 8.507059e+37  ;;  %v18862_v48 = vadd.f32 %v8469_v39, %v18784_v45  ;;  %v5045_v28 = vsub.f32 1.0, %v5044_v4  ;;  %v7102_v15 = vadd.f32 %v18808_v54, %v7101_v8  ;;  %v1244_v39 = vpop.f32.mrf.mxu1  ;;  %9365 = vmatmul.msk.f32.gmra.mxu1 %vm460_vm1, %v11144_v59  ;;  %vm18895_vm2 = vmor %vm5048_vm15, %vm5049_vm4  ;;  %v8564_v58 = vld [vmem:[#allocation3 + $0x108] sm:$0xff]  ;;  %v1324_v4 = vpop.f32.mrf.mxu2 }
 0x4a7   : > { %vm7119_vm13 = vweird.f32 %v18847_v61  ;;  %vm5483_vm3 = vweird.f32 %v18837_v22  ;;  %v5332_v31 = vadd.f32 %v18818_v46, %v5331_v26  ;;  %v7115_v45 = vsub.f32 1.0, %v7114_v19  ;;  %8746 = vmatpush.msra.mxu2 %v8564_v58  ;;  %v1431_v19 = vpop.f32.mrf.mxu3 }
 0x4a8   : > { %10631 = vpow2.f32 %v9524_v50  ;;  %v18881_v0 = vadd.f32 %v1131_v35, %v15043_v62  ;;  %v5046_v1 = vmul.f32 %v18839_v55, %v5045_v28  ;;  %v7106_v63 = vsel %vm7105_vm5, %v18808_v54, %v7102_v15 }
 0x4a9   : > { %v5487_v43 = vand.u32 2147483647, %v18837_v22  ;;  %v5489_v34 = vand.u32 2147483648, %v18837_v22  ;;  %v5336_v12 = vsel %vm18868_vm9, %v18818_v46, %v5332_v31  ;;  %v7111_v20 = vsel %vm18822_vm11, %v7110_v23, %v7106_v63  ;;  %8747 = vmatpush.msra.mxu2 %v8563_v52  ;;  %v1134_v31 = vpop.f32.mrf.mxu0 }
 0x4aa   : > { %v7116_v51 = vmul.f32 %v18847_v61, %v7115_v45  ;;  %v9661_v54 = vmul.f32 -1.442695, %v18881_v0  ;;  %v5341_v5 = vsel %vm18813_vm10, %v5340_v57, %v5336_v12  ;;  %v5047_v46 = vadd.f32 %v18839_v55, %v5046_v1  ;;  %vm7120_vm10 = vmor %vm7118_vm14, %vm7119_vm13  ;;  %v11145_v45 = vld [vmem:[%s11390_s22 + $0xa8] sm:$0xff] }
 0x4ab   : > { %v10630_v13 = vpop.eup %10629  ;;  %v8062_v18 = vmul.f32 %v7111_v20, %v18565_v36  ;;  %v18908_v44 = vadd.f32 %v1244_v39, %v15050_v25  ;;  %v7944_v47 = vmul.f32 %v5341_v5, %v18708_v6  ;;  %v8587_v6 = vld [vmem:[#allocation3 + $0x1c0] sm:$0xff]  ;;  %v8523_v33 = vmul.f32 0.00390625, %v18765_v3  ;;  %9333 = vmatmul.msk.f32.gmra.mxu0 %vm460_vm1, %v11145_v45 }
 0x4ac   : > { %v7117_v11 = vadd.f32 %v18847_v61, %v7116_v51  ;;  %v5479_v23 = vmul.f32 %v10630_v13, %v18837_v22  ;;  %vm5484_vm7 = vweird.f32 %v10630_v13  ;;  %v5051_v49 = vsel %vm18895_vm2, %v18839_v55, %v5047_v46  ;;  %8759 = vmatpush.msrb.mxu3 %v8587_v6 }
 0x4ad   : > { %v18917_v57 = vadd.f32 %v18755_v16, %v8062_v18  ;;  %10633 = vpow2.f32 %v9661_v54  ;;  %v9662_v36 = vmul.f32 -1.442695, %v18908_v44  ;;  %v8318_v50 = vadd.f32 %v18737_v9, %v7944_v47  ;;  %vm18946_vm11 = vmor %vm5483_vm3, %vm5484_vm7  ;;  %8748 = vmatmul.f32.vlgmr.msra.gmra.mxu2 %v8523_v33 }
 0x4ae   : > { %v10632_v17 = vpop.eup %10631  ;;  %v5056_v55 = vsel %vm18831_vm8, %v18835_v21, %v5051_v49  ;;  %v7121_v16 = vsel %vm7120_vm10, %v18847_v61, %v7117_v11  ;;  %v5480_v30 = vsub.f32 1.0, %v5479_v23  ;;  %v18937_v21 = vadd.f32 %v1324_v4, %v16738_v56  ;;  %8760 = vmatpush.msrb.mxu3 %v8586_v41  ;;  %v1247_v18 = vpop.f32.mrf.mxu1  ;;  %9366 = vmatmul.msk.f32.gmra.mxu1 %vm460_vm1, %v11145_v45 }
 0x4af   : > { %v7925_v38 = vmul.f32 %v5056_v55, %v18727_v37  ;;  %v7126_v35 = vsel %vm18857_vm6, %v7125_v7, %v7121_v16  ;;  %v18932_v59 = vadd.f32 1.0, %v10632_v17  ;;  %10635 = vpow2.f32 %v9662_v36 }
 0x4b0   : > { %v8063_v9 = vmul.f32 %v7126_v35, %v18732_v14  ;;  %v5481_v8 = vmul.f32 %v10630_v13, %v5480_v30  ;;  %v8481_v61 = vrot.slane %v18771_v42, 2  ;;  %v5490_v26 = vor.u32 1.1754944e-38, %v5489_v34  ;;  %v8583_v35 = vld [vmem:[#allocation3 + $0x1a0] sm:$0xff] }
 0x4b1   : > { %v18941_v37 = vadd.f32 %v18810_v10, %v7925_v38  ;;  %10637 = vrcp.f32 %v18932_v59  ;;  %vm5488_vm15 = vcmp.eq.f32.partialorder %v5487_v43, 8.507059e+37  ;;  %v9553_v10 = vmul.f32 -1.442695, %v18937_v21  ;;  %v8584_v38 = vld [vmem:[#allocation3 + $0x1a8] sm:$0xff] }
 0x4b2   : > { %v18952_v14 = vadd.f32 %v18803_v60, %v8063_v9  ;;  %v5482_v3 = vadd.f32 %v10630_v13, %v5481_v8  ;;  %v18956_v22 = vadd.f32 %v1431_v19, %v16962_v29  ;;  %v8471_v32 = vrot.slane %v18862_v48, 1  ;;  %v8585_v60 = vld [vmem:[#allocation3 + $0x1b0] sm:$0xff] }
 0x4b3   : > { %v10634_v24 = vpop.eup %10633  ;;  %10639 = vpow2.f32 %v9553_v10  ;;  %8761 = vmatpush.msrb.mxu3 %v8585_v60  ;;  %v18967_v34 = vadd.f32 %v1134_v31, %v15043_v62  ;;  %v18970_v39 = vadd.f32 %v8481_v61, %v18771_v42  ;;  %v5202_v46 = vand.u32 2147483647, %v18932_v59 }
 0x4b4   : > { %v5486_v28 = vsel %vm18946_vm11, %v10630_v13, %v5482_v3  ;;  %v18961_v15 = vadd.f32 1.0, %v10634_v24  ;;  %v9534_v43 = vmul.f32 -1.442695, %v18956_v22  ;;  %v8472_v54 = vadd.f32 %v8471_v32, %v18862_v48 }
 0x4b5   : > { %v10636_v1 = vpop.eup %10635  ;;  %v5491_v63 = vsel %vm5488_vm15, %v5490_v26, %v5486_v28  ;;  %v9671_v51 = vmul.f32 -1.442695, %v18967_v34  ;;  %v5204_v42 = vand.u32 2147483648, %v18932_v59  ;;  %vm5198_vm8 = vweird.f32 %v18932_v59  ;;  %8762 = vmatpush.msrb.mxu3 %v8584_v38  ;;  %v8582_v26 = vld [vmem:[#allocation3 + $0x198] sm:$0xff] }
 0x4b6   : > { %v7954_v12 = vmul.f32 %v5491_v63, %v18753_v27  ;;  %10641 = vrcp.f32 %v18961_v15  ;;  %v18974_v20 = vadd.f32 1.0, %v10636_v1  ;;  %v7257_v27 = vand.u32 2147483647, %v18961_v15 }
 0x4b7   : > { %v10638_v53 = vpop.eup %10637  ;;  %10643 = vpow2.f32 %v9534_v43  ;;  %v18988_v48 = vadd.f32 %v1247_v18, %v15050_v25  ;;  %v8483_v23 = vrot.slane %v18970_v39, 1  ;;  %v7259_v58 = vand.u32 2147483648, %v18961_v15  ;;  %8763 = vmatpush.msrb.mxu3 %v8583_v35  ;;  %v1327_v43 = vpop.f32.mrf.mxu2 }
 0x4b8   : > { %v18978_v13 = vadd.f32 %v8318_v50, %v7954_v12  ;;  %v5194_v5 = vmul.f32 %v10638_v53, %v18932_v59  ;;  %10645 = vrcp.f32 %v18974_v20  ;;  %vm5199_vm0 = vweird.f32 %v10638_v53 }
 0x4b9   : > { %v10640_v47 = vpop.eup %10639  ;;  %10647 = vpow2.f32 %v9671_v51  ;;  %v8522_v52 = vmul.f32 0.00390625, %v8472_v54  ;;  %vm18994_vm12 = vcmp.eq.f32.partialorder %v5202_v46, 8.507059e+37  ;;  %v5205_v17 = vor.u32 1.1754944e-38, %v5204_v42  ;;  %vm19001_vm14 = vmor %vm5198_vm8, %vm5199_vm0  ;;  %8764 = vmatpush.msrb.mxu3 %v8582_v26 }
 0x4ba   : > { %v5195_v11 = vsub.f32 1.0, %v5194_v5  ;;  %v18992_v2 = vadd.f32 1.0, %v10640_v47  ;;  %v9672_v50 = vmul.f32 -1.442695, %v18988_v48  ;;  %vm7253_vm4 = vweird.f32 %v18961_v15 }
 0x4bb   : > { %vm19007_vm6 = vcmp.eq.f32.partialorder %v7257_v27, 8.507059e+37  ;;  %8728 = vmatmul.f32.vlgmr.msra.gmra.mxu3 %v8522_v52  ;;  %v7272_v59 = vand.u32 2147483647, %v18974_v20  ;;  %v7274_v9 = vand.u32 2147483648, %v18974_v20  ;;  %v7260_v7 = vor.u32 1.1754944e-38, %v7259_v58 }
 0x4bc   : > { %v10642_v49 = vpop.eup %10641  ;;  %v5196_v36 = vmul.f32 %v10638_v53, %v5195_v11  ;;  %10649 = vrcp.f32 %v18992_v2  ;;  %vm7268_vm9 = vweird.f32 %v18974_v20  ;;  %v5637_v24 = vand.u32 2147483647, %v18992_v2 }
 0x4bd   : > { %v10644_v55 = vpop.eup %10643  ;;  %v7249_v30 = vmul.f32 %v10642_v49, %v18961_v15  ;;  %10651 = vpow2.f32 %v9672_v50  ;;  %vm7254_vm13 = vweird.f32 %v10642_v49  ;;  %v5639_v60 = vand.u32 2147483648, %v18992_v2 }
 0x4be   : > { %v5197_v4 = vadd.f32 %v10638_v53, %v5196_v36  ;;  %v19014_v8 = vadd.f32 1.0, %v10644_v55  ;;  %v10646_v33 = vpop.eup %10645  ;;  %vm19026_vm3 = vcmp.eq.f32.partialorder %v7272_v59, 8.507059e+37  ;;  %v7275_v63 = vor.u32 1.1754944e-38, %v7274_v9  ;;  %vm7255_vm2 = vmor %vm7253_vm4, %vm7254_vm13 }
 0x4bf   : > { %v7250_v61 = vsub.f32 1.0, %v7249_v30  ;;  %v10648_v3 = vpop.eup %10647  ;;  %v7264_v19 = vmul.f32 %v10646_v33, %v18974_v20  ;;  %vm5633_vm5 = vweird.f32 %v18992_v2  ;;  %v19034_v54 = vadd.f32 %v1327_v43, %v16738_v56 }
 0x4c0   : > { %v5201_v10 = vsel %vm19001_vm14, %v10638_v53, %v5197_v4  ;;  %10653 = vrcp.f32 %v19014_v8  ;;  %v19031_v51 = vadd.f32 1.0, %v10648_v3  ;;  %vm7269_vm7 = vweird.f32 %v10646_v33 }
 0x4c1   : > { %v5206_v32 = vsel %vm18994_vm12, %v5205_v17, %v5201_v10  ;;  %v7251_v28 = vmul.f32 %v10642_v49, %v7250_v61  ;;  %v7265_v45 = vsub.f32 1.0, %v7264_v19  ;;  %vm19043_vm10 = vcmp.eq.f32.partialorder %v5637_v24, 8.507059e+37  ;;  %vm7270_vm15 = vmor %vm7268_vm9, %vm7269_vm7  ;;  %v1434_v61 = vpop.f32.mrf.mxu3  ;;  %v1137_v19 = vpop.f32.mrf.mxu0  ;;  %v11146_v24 = vld [vmem:[%s11390_s22 + $0xb0] sm:$0xff] }
 0x4c2   : > { %v7935_v31 = vmul.f32 %v5206_v32, %v18799_v40  ;;  %v10650_v12 = vpop.eup %10649  ;;  %v5640_v47 = vor.u32 1.1754944e-38, %v5639_v60  ;;  %10655 = vrcp.f32 %v19031_v51  ;;  %vm5348_vm8 = vweird.f32 %v19014_v8  ;;  %9334 = vmatmul.msk.f32.gmra.mxu0 %vm460_vm1, %v11146_v24 }
 0x4c3   : > { %v7252_v53 = vadd.f32 %v10642_v49, %v7251_v28  ;;  %v7266_v40 = vmul.f32 %v10646_v33, %v7265_v45  ;;  %v5629_v46 = vmul.f32 %v10650_v12, %v18992_v2  ;;  %v10652_v42 = vpop.eup %10651  ;;  %vm5634_vm11 = vweird.f32 %v10650_v12 }
 0x4c4   : > { %v19037_v5 = vadd.f32 %v18941_v37, %v7935_v31  ;;  %v9563_v36 = vmul.f32 -1.442695, %v19034_v54  ;;  %v5352_v55 = vand.u32 2147483647, %v19014_v8  ;;  %vm5635_vm0 = vmor %vm5633_vm5, %vm5634_vm11  ;;  %v5354_v20 = vand.u32 2147483648, %v19014_v8 }
 0x4c5   : > { %v7256_v18 = vsel %vm7255_vm2, %v10642_v49, %v7252_v53  ;;  %v7267_v11 = vadd.f32 %v10646_v33, %v7266_v40  ;;  %v5630_v58 = vsub.f32 1.0, %v5629_v46  ;;  %v19054_v49 = vadd.f32 1.0, %v10652_v42 }
 0x4c6   : > { %v7261_v37 = vsel %vm19007_vm6, %v7260_v7, %v7256_v18  ;;  %v10654_v15 = vpop.eup %10653  ;;  %vm19084_vm4 = vcmp.eq.f32.partialorder %v5352_v55, 8.507059e+37  ;;  %v19091_v10 = vadd.f32 %v1434_v61, %v16962_v29  ;;  %vm7403_vm6 = vweird.f32 %v19031_v51 }
 0x4c7   : > { %v8072_v52 = vmul.f32 %v7261_v37, %v18881_v0  ;;  %v7271_v6 = vsel %vm7270_vm15, %v10646_v33, %v7267_v11  ;;  %v5631_v17 = vmul.f32 %v10650_v12, %v5630_v58  ;;  %v5344_v50 = vmul.f32 %v10654_v15, %v19014_v8  ;;  %v8581_v8 = vld [vmem:[#allocation3 + $0x190] sm:$0xff] }
 0x4c8   : > { %v7276_v0 = vsel %vm19026_vm3, %v7275_v63, %v7271_v6  ;;  %vm5349_vm12 = vweird.f32 %v10654_v15  ;;  %10657 = vrcp.f32 %v19054_v49  ;;  %v10656_v35 = vpop.eup %10655  ;;  %v7407_v32 = vand.u32 2147483647, %v19031_v51  ;;  %8765 = vmatpush.msrb.mxu3 %v8581_v8  ;;  %v1330_v6 = vpop.f32.mrf.mxu2 }
 0x4c9   : > { %v19060_v16 = vadd.f32 %v18917_v57, %v8072_v52  ;;  %v8073_v30 = vmul.f32 %v7276_v0, %v18908_v44  ;;  %v5632_v41 = vadd.f32 %v10650_v12, %v5631_v17  ;;  %v5345_v38 = vsub.f32 1.0, %v5344_v50  ;;  %vm19080_vm14 = vmor %vm5348_vm8, %vm5349_vm12  ;;  %v1140_v61 = vpop.f32.mrf.mxu0 }
 0x4ca   : > { %v8484_v57 = vadd.f32 %v8483_v23, %v18970_v39  ;;  %10659 = vpow2.f32 %v9563_v36  ;;  %v7399_v9 = vmul.f32 %v10656_v35, %v19031_v51  ;;  %v7409_v23 = vand.u32 2147483648, %v19031_v51 }
 0x4cb   : > { %v19073_v4 = vadd.f32 %v18952_v14, %v8073_v30  ;;  %v5636_v2 = vsel %vm5635_vm0, %v10650_v12, %v5632_v41  ;;  %v5346_v59 = vmul.f32 %v10654_v15, %v5345_v38  ;;  %v5355_v14 = vor.u32 1.1754944e-38, %v5354_v20  ;;  %v1437_v30 = vpop.f32.mrf.mxu3 }
 0x4cc   : > { %v5641_v44 = vsel %vm19043_vm10, %v5640_v47, %v5636_v2  ;;  %v7400_v3 = vsub.f32 1.0, %v7399_v9  ;;  %vm7404_vm9 = vweird.f32 %v10656_v35  ;;  %v19098_v28 = vadd.f32 %v1137_v19, %v15043_v62 }
 0x4cd   : > { %v7964_v7 = vmul.f32 %v5641_v44, %v18937_v21  ;;  %v5347_v26 = vadd.f32 %v10654_v15, %v5346_v59  ;;  %v1250_v21 = vpop.f32.mrf.mxu1  ;;  %9367 = vmatmul.msk.f32.gmra.mxu1 %vm460_vm1, %v11146_v24  ;;  %v9544_v63 = vmul.f32 -1.442695, %v19091_v10  ;;  %v7410_v53 = vor.u32 1.1754944e-38, %v7409_v23  ;;  %vm7405_vm13 = vmor %vm7403_vm6, %vm7404_vm9 }
 0x4ce   : > { %v10658_v60 = vpop.eup %10657  ;;  %v7401_v1 = vmul.f32 %v10656_v35, %v7400_v3  ;;  %v9681_v46 = vmul.f32 -1.442695, %v19098_v28  ;;  %v7424_v47 = vand.u32 2147483648, %v19054_v49  ;;  %v19119_v37 = vadd.f32 %v1250_v21, %v15050_v25 }
 0x4cf   : > { %v19102_v31 = vadd.f32 %v18978_v13, %v7964_v7  ;;  %v5351_v45 = vsel %vm19080_vm14, %v10654_v15, %v5347_v26  ;;  %v7414_v40 = vmul.f32 %v10658_v60, %v19054_v49  ;;  %10661 = vpow2.f32 %v9544_v63  ;;  %v8579_v15 = vld [vmem:[#allocation3 + $0x180] sm:$0xff]  ;;  %v19149_v7 = vld [vmem:[%s11390_s22 + $0xb8] sm:$0xff] }
 0x4d0   : > { %v10660_v43 = vpop.eup %10659  ;;  %v5356_v12 = vsel %vm19084_vm4, %v5355_v14, %v5351_v45  ;;  %v7402_v18 = vadd.f32 %v10656_v35, %v7401_v1  ;;  %10663 = vpow2.f32 %v9681_v46  ;;  %vm7408_vm3 = vcmp.eq.f32.partialorder %v7407_v32, 8.507059e+37  ;;  %9335 = vmatmul.msk.f32.gmra.mxu0 %vm460_vm1, %v19149_v7 }
 0x4d1   : > { %v7945_v42 = vmul.f32 %v5356_v12, %v18956_v22  ;;  %v19112_v13 = vadd.f32 1.0, %v10660_v43  ;;  %v7415_v27 = vsub.f32 1.0, %v7414_v40  ;;  %v8580_v22 = vld [vmem:[#allocation3 + $0x188] sm:$0xff]  ;;  %vm7419_vm5 = vweird.f32 %v10658_v60 }
 0x4d2   : > { %v7406_v58 = vsel %vm7405_vm13, %v10656_v35, %v7402_v18  ;;  %v7422_v51 = vand.u32 2147483647, %v19054_v49  ;;  %8766 = vmatpush.msrb.mxu3 %v8580_v22  ;;  %v9682_v50 = vmul.f32 -1.442695, %v19119_v37  ;;  %v8524_v55 = vmul.f32 0.00390625, %v8484_v57 }
 0x4d3   : > { %v19122_v11 = vadd.f32 %v19037_v5, %v7945_v42  ;;  %10665 = vrcp.f32 %v19112_v13  ;;  %v7411_v52 = vsel %vm7408_vm3, %v7410_v53, %v7406_v58  ;;  %v7416_v36 = vmul.f32 %v10658_v60, %v7415_v27 }
 0x4d4   : > { %v8082_v17 = vmul.f32 %v7411_v52, %v18967_v34  ;;  %v19129_v5 = vadd.f32 %v1330_v6, %v16738_v56  ;;  %vm7418_vm2 = vweird.f32 %v19054_v49  ;;  %v7425_v20 = vor.u32 1.1754944e-38, %v7424_v47  ;;  %8767 = vmatpush.msrb.mxu3 %v8579_v15 }
 0x4d5   : > { %v7417_v0 = vadd.f32 %v10658_v60, %v7416_v36  ;;  %v10662_v41 = vpop.eup %10661  ;;  %vm7420_vm7 = vmor %vm7418_vm2, %vm7419_vm5  ;;  %10667 = vpow2.f32 %v9682_v50  ;;  %8768 = vmatmul.f32.vlgmr.msrb.gmra.mxu3 %v8524_v55  ;;  %v19138_v35 = vadd.f32 %v1437_v30, %v16962_v29  ;;  %vm7423_vm10 = vcmp.eq.f32.partialorder %v7422_v51, 8.507059e+37 }
 0x4d6   : > { %v19133_v38 = vadd.f32 %v19060_v16, %v8082_v17  ;;  %v9573_v34 = vmul.f32 -1.442695, %v19129_v5  ;;  %v10664_v57 = vpop.eup %10663  ;;  %v2835_v49 = vadd.f32 1.0, %v10662_v41  ;;  %v5787_v14 = vand.u32 2147483647, %v19112_v13 }
 0x4d7   : > { %v7421_v2 = vsel %vm7420_vm7, %v10658_v60, %v7417_v0  ;;  %v19140_v44 = vadd.f32 1.0, %v10664_v57  ;;  %v9554_v16 = vmul.f32 -1.442695, %v19138_v35  ;;  %v5789_v23 = vand.u32 2147483648, %v19112_v13 }
 0x4d8   : > { %v7426_v9 = vsel %vm7423_vm10, %v7425_v20, %v7421_v2  ;;  %10669 = vpow2.f32 %v9573_v34  ;;  %vm5783_vm11 = vweird.f32 %v19112_v13  ;;  %vm19163_vm0 = vcmp.eq.f32.partialorder %v5787_v14, 8.507059e+37 }
 0x4d9   : > { %v10666_v59 = vpop.eup %10665  ;;  %v8083_v33 = vmul.f32 %v7426_v9, %v18988_v48  ;;  %10671 = vrcp.f32 %v2835_v49  ;;  %vm5498_vm12 = vweird.f32 %v2835_v49  ;;  %v5502_v1 = vand.u32 2147483647, %v2835_v49 }
 0x4da   : > { %v5779_v39 = vmul.f32 %v10666_v59, %v19112_v13  ;;  %10673 = vrcp.f32 %v19140_v44  ;;  %vm5784_vm15 = vweird.f32 %v10666_v59  ;;  %v5504_v12 = vand.u32 2147483648, %v2835_v49 }
 0x4db   : > { %v19154_v26 = vadd.f32 %v19073_v4, %v8083_v33  ;;  %v10668_v48 = vpop.eup %10667  ;;  %10675 = vpow2.f32 %v9554_v16  ;;  %vm19159_vm8 = vmor %vm5783_vm11, %vm5784_vm15  ;;  %v5790_v4 = vor.u32 1.1754944e-38, %v5789_v23  ;;  %v19171_v40 = vadd.f32 %v1140_v61, %v15043_v62 }
 0x4dc   : > { %v5780_v3 = vsub.f32 1.0, %v5779_v39  ;;  %v19157_v19 = vadd.f32 1.0, %v10668_v48  ;;  %v7557_v18 = vand.u32 2147483647, %v19140_v44  ;;  %v7559_v13 = vand.u32 2147483648, %v19140_v44 }
 0x4dd   : > { %vm7553_vm4 = vweird.f32 %v19140_v44  ;;  %vm19183_vm6 = vcmp.eq.f32.partialorder %v5502_v1, 8.507059e+37  ;;  %v9691_v51 = vmul.f32 -1.442695, %v19171_v40 }
 0x4de   : > { %v5781_v8 = vmul.f32 %v10666_v59, %v5780_v3  ;;  %v10670_v24 = vpop.eup %10669  ;;  %10677 = vrcp.f32 %v19157_v19  ;;  %vm19198_vm3 = vcmp.eq.f32.partialorder %v7557_v18, 8.507059e+37  ;;  %v7560_v30 = vor.u32 1.1754944e-38, %v7559_v13  ;;  %v1253_v18 = vpop.f32.mrf.mxu1  ;;  %9368 = vmatmul.msk.f32.gmra.mxu1 %vm460_vm1, %v19149_v7 }
 0x4df   : > { %v10672_v60 = vpop.eup %10671  ;;  %v19168_v53 = vadd.f32 1.0, %v10670_v24  ;;  %v7574_v57 = vand.u32 2147483648, %v19157_v19  ;;  %vm7568_vm11 = vweird.f32 %v19157_v19 }
 0x4e0   : > { %v5782_v45 = vadd.f32 %v10666_v59, %v5781_v8  ;;  %v10674_v63 = vpop.eup %10673  ;;  %v5494_v43 = vmul.f32 %v10672_v60, %v2835_v49  ;;  %vm5499_vm14 = vweird.f32 %v10672_v60 }
 0x4e1   : > { %v7549_v42 = vmul.f32 %v10674_v63, %v19140_v44  ;;  %v10676_v27 = vpop.eup %10675  ;;  %10679 = vrcp.f32 %v19168_v53  ;;  %vm19194_vm9 = vmor %vm5498_vm12, %vm5499_vm14  ;;  %vm7554_vm13 = vweird.f32 %v10674_v63  ;;  %v5937_v9 = vand.u32 2147483647, %v19168_v53 }
 0x4e2   : > { %v5786_v46 = vsel %vm19159_vm8, %v10666_v59, %v5782_v45  ;;  %v5495_v58 = vsub.f32 1.0, %v5494_v43  ;;  %v19187_v36 = vadd.f32 1.0, %v10676_v27  ;;  %vm7555_vm5 = vmor %vm7553_vm4, %vm7554_vm13  ;;  %v5939_v14 = vand.u32 2147483648, %v19168_v53 }
 0x4e3   : > { %v5791_v47 = vsel %vm19163_vm0, %v5790_v4, %v5786_v46  ;;  %v7550_v22 = vsub.f32 1.0, %v7549_v42  ;;  %vm5933_vm7 = vweird.f32 %v19168_v53  ;;  %v7575_v21 = vor.u32 1.1754944e-38, %v7574_v57 }
 0x4e4   : > { %v7974_v62 = vmul.f32 %v5791_v47, %v19034_v54  ;;  %v5496_v15 = vmul.f32 %v10672_v60, %v5495_v58  ;;  %v10678_v6 = vpop.eup %10677  ;;  %v5505_v54 = vor.u32 1.1754944e-38, %v5504_v12  ;;  %10681 = vrcp.f32 %v19187_v36 }
 0x4e5   : > { %v7551_v55 = vmul.f32 %v10674_v63, %v7550_v22  ;;  %v7564_v41 = vmul.f32 %v10678_v6, %v19157_v19  ;;  %10683 = vpow2.f32 %v9691_v51  ;;  %vm7569_vm2 = vweird.f32 %v10678_v6 }
 0x4e6   : > { %v19191_v17 = vadd.f32 %v19102_v31, %v7974_v62  ;;  %v5497_v0 = vadd.f32 %v10672_v60, %v5496_v15  ;;  %v7572_v31 = vand.u32 2147483647, %v19157_v19  ;;  %vm7570_vm8 = vmor %vm7568_vm11, %vm7569_vm2  ;;  %vm19225_vm0 = vcmp.eq.f32.partialorder %v5937_v9, 8.507059e+37  ;;  %v414_v9 = vld [vmem:[%s21939_s2 + $0x8] sm:$0x3] }
 0x4e7   : > { %v7552_v34 = vadd.f32 %v10674_v63, %v7551_v55  ;;  %v10680_v2 = vpop.eup %10679  ;;  %v7565_v59 = vsub.f32 1.0, %v7564_v41  ;;  %vm5648_vm14 = vweird.f32 %v19187_v36  ;;  %v5654_v43 = vand.u32 2147483648, %v19187_v36 }
 0x4e8   : > { %v5501_v49 = vsel %vm19194_vm9, %v10672_v60, %v5497_v0  ;;  %v5929_v39 = vmul.f32 %v10680_v2, %v19168_v53  ;;  %vm5934_vm10 = vweird.f32 %v10680_v2  ;;  %vm7573_vm15 = vcmp.eq.f32.partialorder %v7572_v31, 8.507059e+37  ;;  %v1333_v31 = vpop.f32.mrf.mxu2 }
 0x4e9   : > { %v5506_v16 = vsel %vm19183_vm6, %v5505_v54, %v5501_v49  ;;  %v7556_v33 = vsel %vm7555_vm5, %v10674_v63, %v7552_v34  ;;  %v7566_v3 = vmul.f32 %v10678_v6, %v7565_v59  ;;  %vm19229_vm12 = vmor %vm5933_vm7, %vm5934_vm10  ;;  %v5652_v42 = vand.u32 2147483647, %v19187_v36 }
 0x4ea   : > { %v7955_v23 = vmul.f32 %v5506_v16, %v19091_v10  ;;  %v7561_v61 = vsel %vm19198_vm3, %v7560_v30, %v7556_v33  ;;  %v5930_v48 = vsub.f32 1.0, %v5929_v39  ;;  %v10682_v32 = vpop.eup %10681  ;;  %v5655_v62 = vor.u32 1.1754944e-38, %v5654_v43  ;;  %v1499_v16 = vpop.f32.mrf.mxu0  ;;  %v11148_v33 = vld [vmem:[%s11390_s22 + $0xc0] sm:$0xff] }
 0x4eb   : > { %v8092_v44 = vmul.f32 %v7561_v61, %v19098_v28  ;;  %v7567_v24 = vadd.f32 %v10678_v6, %v7566_v3  ;;  %v10684_v28 = vpop.eup %10683  ;;  %v5644_v19 = vmul.f32 %v10682_v32, %v19187_v36  ;;  %vm5649_vm4 = vweird.f32 %v10682_v32  ;;  %9336 = vmatmul.msk.f32.gmra.mxu0 %vm460_vm1, %v11148_v33  ;;  %v1612_v3 = vpop.f32.mrf.mxu1  ;;  %9369 = vmatmul.msk.f32.gmra.mxu1 %vm460_vm1, %v11148_v33 }
 0x4ec   : > { %v8350_v8 = vadd.f32 %v19122_v11, %v7955_v23  ;;  %v5931_v4 = vmul.f32 %v10680_v2, %v5930_v48  ;;  %v5940_v11 = vor.u32 1.1754944e-38, %v5939_v14  ;;  %v2982_v12 = vadd.f32 1.0, %v10684_v28  ;;  %vm5650_vm6 = vmor %vm5648_vm14, %vm5649_vm4 }
 0x4ed   : > { %v19223_v10 = vadd.f32 %v19133_v38, %v8092_v44  ;;  %v7571_v45 = vsel %vm7570_vm8, %v10678_v6, %v7567_v24  ;;  %v5645_v46 = vsub.f32 1.0, %v5644_v19  ;;  %v19251_v22 = vadd.f32 %v1253_v18, %v15050_v25 }
 0x4ee   : > { %v7576_v38 = vsel %vm7573_vm15, %v7575_v21, %v7571_v45  ;;  %v5932_v63 = vadd.f32 %v10680_v2, %v5931_v4  ;;  %10685 = vrcp.f32 %v2982_v12  ;;  %vm5653_vm9 = vcmp.eq.f32.partialorder %v5652_v42, 8.507059e+37 }
 0x4ef   : > { %v8093_v53 = vmul.f32 %v7576_v38, %v19119_v37  ;;  %v5646_v58 = vmul.f32 %v10682_v32, %v5645_v46  ;;  %v7709_v55 = vand.u32 2147483648, %v2982_v12  ;;  %v7707_v0 = vand.u32 2147483647, %v2982_v12 }
 0x4f0   : > { %v5936_v13 = vsel %vm19229_vm12, %v10680_v2, %v5932_v63  ;;  %vm7703_vm3 = vweird.f32 %v2982_v12  ;;  %v19261_v57 = vadd.f32 %v1333_v31, %v16738_v56  ;;  %v1440_v2 = vpop.f32.mrf.mxu3  ;;  %v19273_v14 = vperm.slane %v414_v9, 0  ;;  %v1336_v60 = vpop.f32.mrf.mxu2 }
 0x4f1   : > { %v19243_v27 = vadd.f32 %v19154_v26, %v8093_v53  ;;  %v5941_v47 = vsel %vm19225_vm0, %v5940_v11, %v5936_v13  ;;  %v5647_v7 = vadd.f32 %v10682_v32, %v5646_v58  ;;  %v9692_v26 = vmul.f32 -1.442695, %v19251_v22 }
 0x4f2   : > { %v7984_v37 = vmul.f32 %v5941_v47, %v19129_v5  ;;  %v7710_v41 = vor.u32 1.1754944e-38, %v7709_v55  ;;  %vm7708_vm2 = vcmp.eq.f32.partialorder %v7707_v0, 8.507059e+37  ;;  %v19265_v59 = vadd.f32 %v1440_v2, %v16962_v29 }
 0x4f3   : > { %v5651_v52 = vsel %vm5650_vm6, %v10682_v32, %v5647_v7  ;;  %10687 = vpow2.f32 %v9692_v26  ;;  %v9583_v39 = vmul.f32 -1.442695, %v19261_v57  ;;  %v19279_v61 = vperm.slane %v414_v9, 1  ;;  %v1502_v9 = vpop.f32.mrf.mxu0 }
 0x4f4   : > { %v19254_v15 = vadd.f32 %v19191_v17, %v7984_v37  ;;  %v10686_v51 = vpop.eup %10685  ;;  %v5656_v6 = vsel %vm5653_vm9, %v5655_v62, %v5651_v52  ;;  %v19283_v44 = vadd.f32 %v1499_v16, %v19273_v14  ;;  %v19291_v43 = vadd.f32 %v1336_v60, %v16738_v56  ;;  %v11149_v16 = vld [vmem:[%s11390_s22 + $0xc8] sm:$0xff] }
 0x4f5   : > { %v7965_v5 = vmul.f32 %v5656_v6, %v19138_v35  ;;  %v7699_v50 = vmul.f32 %v10686_v51, %v2982_v12  ;;  %vm7704_vm13 = vweird.f32 %v10686_v51  ;;  %9337 = vmatmul.msk.f32.gmra.mxu0 %vm460_vm1, %v11149_v16 }
 0x4f6   : > { %vm7705_vm5 = vmor %vm7703_vm3, %vm7704_vm13  ;;  %v9385_v32 = vmul.f32 -1.442695, %v19283_v44  ;;  %v9593_v58 = vmul.f32 -1.442695, %v19291_v43 }
 0x4f7   : > { %v19258_v36 = vadd.f32 %v8350_v8, %v7965_v5  ;;  %v7700_v54 = vsub.f32 1.0, %v7699_v50  ;;  %v19286_v8 = vadd.f32 %v1612_v3, %v19279_v61 }
 0x4f9   : > { %v7701_v25 = vmul.f32 %v10686_v51, %v7700_v54  ;;  %v10688_v20 = vpop.eup %10687 }
 0x4fa   : > { %v2983_v17 = vadd.f32 1.0, %v10688_v20 }
 0x4fb   : > { %v7702_v30 = vadd.f32 %v10686_v51, %v7701_v25 }
 0x4fc   : > { %10689 = vrcp.f32 %v2983_v17  ;;  %v7724_v4 = vand.u32 2147483648, %v2983_v17  ;;  %v7722_v1 = vand.u32 2147483647, %v2983_v17  ;;  %vm7718_vm10 = vweird.f32 %v2983_v17 }
 0x4fd   : > { %v7706_v34 = vsel %vm7705_vm5, %v10686_v51, %v7702_v30  ;;  %10691 = vpow2.f32 %v9583_v39  ;;  %v1443_v51 = vpop.f32.mrf.mxu3 }
 0x4fe   : > { %v7711_v35 = vsel %vm7708_vm2, %v7710_v41, %v7706_v34  ;;  %v7725_v12 = vor.u32 1.1754944e-38, %v7724_v4  ;;  %vm7723_vm15 = vcmp.eq.f32.partialorder %v7722_v1, 8.507059e+37  ;;  %v19305_v25 = vadd.f32 %v1443_v51, %v16962_v29  ;;  %v1505_v51 = vpop.f32.mrf.mxu0 }
 0x4ff   : > { %v8102_v49 = vmul.f32 %v7711_v35, %v19171_v40  ;;  %v9564_v40 = vmul.f32 -1.442695, %v19265_v59  ;;  %v19337_v1 = vadd.f32 %v1502_v9, %v19273_v14 }
 0x501   : > { %v19276_v23 = vadd.f32 %v19223_v10, %v8102_v49  ;;  %10693 = vpow2.f32 %v9564_v40  ;;  %v9386_v10 = vmul.f32 -1.442695, %v19286_v8  ;;  %v9574_v49 = vmul.f32 -1.442695, %v19305_v25 }
 0x502   : > { %v10690_v48 = vpop.eup %10689  ;;  %10695 = vpow2.f32 %v9385_v32 }
 0x503   : > { %v7714_v24 = vmul.f32 %v10690_v48, %v2983_v17  ;;  %v10692_v28 = vpop.eup %10691  ;;  %vm7719_vm7 = vweird.f32 %v10690_v48  ;;  %10697 = vpow2.f32 %v9386_v10 }
 0x504   : > { %v2874_v19 = vadd.f32 1.0, %v10692_v28  ;;  %vm7720_vm11 = vmor %vm7718_vm10, %vm7719_vm7 }
 0x505   : > { %v7715_v21 = vsub.f32 1.0, %v7714_v24 }
 0x506   : > { %10699 = vrcp.f32 %v2874_v19  ;;  %vm6083_vm8 = vweird.f32 %v2874_v19  ;;  %v6087_v6 = vand.u32 2147483647, %v2874_v19  ;;  %v6089_v5 = vand.u32 2147483648, %v2874_v19 }
 0x507   : > { %v7716_v45 = vmul.f32 %v10690_v48, %v7715_v21  ;;  %v10694_v11 = vpop.eup %10693 }
 0x508   : > { %v2855_v63 = vadd.f32 1.0, %v10694_v11  ;;  %v10696_v53 = vpop.eup %10695  ;;  %v6090_v17 = vor.u32 1.1754944e-38, %v6089_v5  ;;  %vm6088_vm6 = vcmp.eq.f32.partialorder %v6087_v6, 8.507059e+37  ;;  %v8626_v11 = vld [vmem:[#allocation3 + $0x2f8] sm:$0xff]  ;;  %v11150_v6 = vld [vmem:[%s11390_s22 + $0xd0] sm:$0xff] }
 0x509   : > { %v7717_v38 = vadd.f32 %v10690_v48, %v7716_v45  ;;  %v10698_v18 = vpop.eup %10697  ;;  %v19294_v47 = vadd.f32 1.0, %v10696_v53  ;;  %8792 = vmatpush.msra.mxu3 %v8626_v11  ;;  %9338 = vmatmul.msk.f32.gmra.mxu0 %vm460_vm1, %v11150_v6 }
 0x50a   : > { %10701 = vrcp.f32 %v2855_v63  ;;  %v19301_v7 = vadd.f32 1.0, %v10698_v18  ;;  %vm5798_vm0 = vweird.f32 %v2855_v63  ;;  %v5802_v54 = vand.u32 2147483647, %v2855_v63 }
 0x50b   : > { %v7721_v46 = vsel %vm7720_vm11, %v10690_v48, %v7717_v38  ;;  %10703 = vrcp.f32 %v19294_v47  ;;  %v5804_v55 = vand.u32 2147483648, %v2855_v63  ;;  %v9395_v38 = vmul.f32 -1.442695, %v19337_v1 }
 0x50c   : > { %v7726_v42 = vsel %vm7723_vm15, %v7725_v12, %v7721_v46  ;;  %v10700_v62 = vpop.eup %10699  ;;  %10705 = vpow2.f32 %v9593_v58  ;;  %vm5803_vm13 = vcmp.eq.f32.partialorder %v5802_v54, 8.507059e+37  ;;  %v8485_v18 = vrot.slane %v19276_v23, 4  ;;  %v1446_v58 = vpop.f32.mrf.mxu3 }
 0x50d   : > { %v8103_v13 = vmul.f32 %v7726_v42, %v19251_v22  ;;  %v6079_v52 = vmul.f32 %v10700_v62, %v2874_v19  ;;  %vm6084_vm12 = vweird.f32 %v10700_v62  ;;  %10707 = vrcp.f32 %v19301_v7  ;;  %v8609_v19 = vld [vmem:[#allocation3 + $0x270] sm:$0xff]  ;;  %v1339_v42 = vpop.f32.mrf.mxu2 }
 0x50e   : > { %vm19310_vm4 = vmor %vm6083_vm8, %vm6084_vm12  ;;  %v5805_v35 = vor.u32 1.1754944e-38, %v5804_v55  ;;  %10709 = vpow2.f32 %v9574_v49  ;;  %v3119_v54 = vand.u32 2147483648, %v19294_v47  ;;  %v19370_v30 = vadd.f32 %v8485_v18, %v19276_v23 }
 0x50f   : > { %v19298_v37 = vadd.f32 %v19243_v27, %v8103_v13  ;;  %v6080_v50 = vsub.f32 1.0, %v6079_v52  ;;  %v8624_v52 = vld [vmem:[#allocation3 + $0x2e8] sm:$0xff]  ;;  %vm3113_vm5 = vweird.f32 %v19294_v47  ;;  %vm3128_vm7 = vweird.f32 %v19301_v7 }
 0x510   : > { %v10702_v26 = vpop.eup %10701 }
 0x511   : > { %v5794_v22 = vmul.f32 %v10702_v26, %v2855_v63  ;;  %vm5799_vm14 = vweird.f32 %v10702_v26  ;;  %v6081_v0 = vmul.f32 %v10700_v62, %v6080_v50  ;;  %v19307_v20 = vpop.eup %10703  ;;  %v8625_v63 = vld [vmem:[#allocation3 + $0x2f0] sm:$0xff]  ;;  %v19360_v50 = vadd.f32 %v1339_v42, %v16738_v56 }
 0x512   : > { %v10706_v34 = vpop.eup %10705  ;;  %vm5800_vm9 = vmor %vm5798_vm0, %vm5799_vm14  ;;  %v3109_v39 = vmul.f32 %v19307_v20, %v19294_v47  ;;  %8793 = vmatpush.msra.mxu3 %v8625_v63  ;;  %vm3114_vm3 = vweird.f32 %v19307_v20 }
 0x513   : > { %v5795_v27 = vsub.f32 1.0, %v5794_v22  ;;  %v6082_v31 = vadd.f32 %v10700_v62, %v6081_v0  ;;  %v19322_v40 = vpop.eup %10707  ;;  %v19331_v28 = vadd.f32 1.0, %v10706_v34  ;;  %vm19377_vm2 = vmor %vm3113_vm5, %vm3114_vm3  ;;  %v9603_v9 = vmul.f32 -1.442695, %v19360_v50 }
 0x514   : > { %v3110_v4 = vsub.f32 1.0, %v3109_v39  ;;  %v3124_v60 = vmul.f32 %v19322_v40, %v19301_v7  ;;  %v10710_v46 = vpop.eup %10709  ;;  %8794 = vmatpush.msra.mxu3 %v8624_v52  ;;  %vm3129_vm10 = vweird.f32 %v19322_v40  ;;  %v3132_v39 = vand.u32 2147483647, %v19301_v7 }
 0x515   : > { %v5796_v41 = vmul.f32 %v10702_v26, %v5795_v27  ;;  %v6086_v33 = vsel %vm19310_vm4, %v10700_v62, %v6082_v31  ;;  %10711 = vrcp.f32 %v19331_v28  ;;  %v19348_v13 = vadd.f32 1.0, %v10710_v46  ;;  %vm19404_vm15 = vmor %vm3128_vm7, %vm3129_vm10  ;;  %v1342_v31 = vpop.f32.mrf.mxu2 }
 0x516   : > { %v6091_v3 = vsel %vm6088_vm6, %v6090_v17, %v6086_v33  ;;  %v3125_v12 = vsub.f32 1.0, %v3124_v60  ;;  %10713 = vpow2.f32 %v9395_v38  ;;  %v19352_v62 = vadd.f32 %v1446_v58, %v16962_v29 }
 0x517   : > { %v5797_v2 = vadd.f32 %v10702_v26, %v5796_v41  ;;  %v7994_v24 = vmul.f32 %v6091_v3, %v19261_v57  ;;  %v1615_v57 = vpop.f32.mrf.mxu1  ;;  %9370 = vmatmul.msk.f32.gmra.mxu1 %vm460_vm1, %v11149_v16  ;;  %v19365_v27 = vadd.f32 %v1505_v51, %v19273_v14  ;;  %v8491_v17 = vrot.slane %v19298_v37, 4 }
 0x518   : > { %v3126_v22 = vmul.f32 %v19322_v40, %v3125_v12  ;;  %v9584_v55 = vmul.f32 -1.442695, %v19352_v62  ;;  %v3117_v41 = vand.u32 2147483647, %v19294_v47  ;;  %v3120_v33 = vor.u32 1.1754944e-38, %v3119_v54 }
 0x519   : > { %v5801_v48 = vsel %vm5800_vm9, %v10702_v26, %v5797_v2  ;;  %v19327_v21 = vadd.f32 %v19254_v15, %v7994_v24  ;;  %v8610_v15 = vld [vmem:[#allocation3 + $0x278] sm:$0xff]  ;;  %v8608_v26 = vld [vmem:[#allocation3 + $0x268] sm:$0xff]  ;;  %v9405_v23 = vmul.f32 -1.442695, %v19365_v27  ;;  %v19396_v24 = vadd.f32 %v8491_v17, %v19298_v37 }
 0x51a   : > { %v5806_v32 = vsel %vm5803_vm13, %v5805_v35, %v5801_v48  ;;  %8772 = vmatpush.msrb.mxu2 %v8610_v15  ;;  %v3127_v47 = vadd.f32 %v19322_v40, %v3126_v22  ;;  %vm3118_vm11 = vcmp.eq.f32.partialorder %v3117_v41, 8.507059e+37  ;;  %vm5948_vm8 = vweird.f32 %v19348_v13  ;;  %v8607_v41 = vld [vmem:[#allocation3 + $0x260] sm:$0xff] }
 0x51b   : > { %v7975_v10 = vmul.f32 %v5806_v32, %v19265_v59  ;;  %v19341_v59 = vadd.f32 %v1615_v57, %v19279_v61  ;;  %v19367_v0 = vpop.eup %10711  ;;  %v5954_v57 = vand.u32 2147483648, %v19348_v13  ;;  %vm3133_vm12 = vcmp.eq.f32.partialorder %v3132_v39, 8.507059e+37 }
 0x51c   : > { %8773 = vmatpush.msrb.mxu2 %v8609_v19  ;;  %v10714_v34 = vpop.eup %10713  ;;  %v3131_v60 = vsel %vm19404_vm15, %v19322_v40, %v3127_v47  ;;  %v5952_v19 = vand.u32 2147483647, %v19348_v13 }
 0x51d   : > { %v19334_v45 = vadd.f32 %v19258_v36, %v7975_v10  ;;  %v3111_v36 = vmul.f32 %v19307_v20, %v3110_v4  ;;  %v9396_v53 = vmul.f32 -1.442695, %v19341_v59  ;;  %v19388_v49 = vadd.f32 1.0, %v10714_v34  ;;  %v8623_v34 = vld [vmem:[#allocation3 + $0x2e0] sm:$0xff] }
 0x51e   : > { %8774 = vmatpush.msrb.mxu2 %v8608_v26  ;;  %v19410_v4 = vmul.f32 %v19367_v0, %v19331_v28  ;;  %v5955_v26 = vor.u32 1.1754944e-38, %v5954_v57  ;;  %vm19441_vm4 = vcmp.eq.f32.partialorder %v5952_v19, 8.507059e+37  ;;  %8795 = vmatpush.msra.mxu3 %v8623_v34 }
 0x51f   : > { %10715 = vpow2.f32 %v9396_v53  ;;  %v3112_v5 = vadd.f32 %v19307_v20, %v3111_v36  ;;  %v1618_v16 = vpop.f32.mrf.mxu1  ;;  %9371 = vmatmul.msk.f32.gmra.mxu1 %vm460_vm1, %v11150_v6  ;;  %v3267_v63 = vand.u32 2147483647, %v19388_v49  ;;  %v3269_v36 = vand.u32 2147483648, %v19388_v49 }
 0x520   : > { %10717 = vrcp.f32 %v19348_v13  ;;  %v6230_v46 = vsub.f32 1.0, %v19410_v4  ;;  %vm3263_vm6 = vweird.f32 %v19388_v49  ;;  %8775 = vmatpush.msrb.mxu2 %v8607_v41 }
 0x521   : > { %10719 = vpow2.f32 %v9584_v55  ;;  %v3116_v2 = vsel %vm19377_vm2, %v19307_v20, %v3112_v5  ;;  %v3134_v20 = vand.u32 2147483648, %v19301_v7  ;;  %v19419_v7 = vadd.f32 %v1618_v16, %v19279_v61  ;;  %v8622_v16 = vld [vmem:[#allocation3 + $0x2d8] sm:$0xff] }
 0x522   : > { %10721 = vpow2.f32 %v9405_v23  ;;  %v3121_v32 = vsel %vm3118_vm11, %v3120_v33, %v3116_v2  ;;  %vm19448_vm9 = vcmp.eq.f32.partialorder %v3267_v63, 8.507059e+37  ;;  %v3270_v55 = vor.u32 1.1754944e-38, %v3269_v36  ;;  %8796 = vmatpush.msra.mxu3 %v8622_v16  ;;  %v1508_v16 = vpop.f32.mrf.mxu0 }
 0x523   : > { %10723 = vrcp.f32 %v19388_v49  ;;  %v3135_v38 = vor.u32 1.1754944e-38, %v3134_v20  ;;  %v19428_v53 = vmul.f32 %v3121_v32, %v19283_v44  ;;  %v9406_v52 = vmul.f32 -1.442695, %v19419_v7  ;;  %v8605_v20 = vld [vmem:[#allocation3 + $0x250] sm:$0xff] }
 0x524   : > { %v8621_v32 = vld [vmem:[#allocation3 + $0x2d0] sm:$0xff] }
 0x525   : > { %v10716_v35 = vpop.eup %10715  ;;  %v3136_v58 = vsel %vm3133_vm12, %v3135_v38, %v3131_v60  ;;  %8797 = vmatpush.msra.mxu3 %v8621_v32  ;;  %vm6233_vm12 = vweird.f32 %v19331_v28  ;;  %v6237_v32 = vand.u32 2147483647, %v19331_v28 }
 0x526   : > { %v19393_v3 = vadd.f32 1.0, %v10716_v35  ;;  %v10718_v48 = vpop.eup %10717 }
 0x527   : > { %v5944_v37 = vmul.f32 %v10718_v48, %v19348_v13  ;;  %v10720_v15 = vpop.eup %10719  ;;  %vm5949_vm0 = vweird.f32 %v10718_v48 }
 0x528   : > { %10725 = vrcp.f32 %v19393_v3  ;;  %v19425_v12 = vadd.f32 1.0, %v10720_v15  ;;  %v10722_v40 = vpop.eup %10721  ;;  %vm19433_vm14 = vmor %vm5948_vm8, %vm5949_vm0  ;;  %vm3278_vm13 = vweird.f32 %v19393_v3  ;;  %v3284_v2 = vand.u32 2147483648, %v19393_v3 }
 0x529   : > { %10727 = vpow2.f32 %v9603_v9  ;;  %v5945_v11 = vsub.f32 1.0, %v5944_v37  ;;  %v19431_v18 = vpop.eup %10723  ;;  %v19458_v47 = vadd.f32 1.0, %v10722_v40  ;;  %v8606_v9 = vld [vmem:[#allocation3 + $0x258] sm:$0xff]  ;;  %v19467_v37 = vadd.f32 %v1342_v31, %v16738_v56 }
 0x52a   : > { %10729 = vrcp.f32 %v19425_v12  ;;  %v3259_v5 = vmul.f32 %v19431_v18, %v19388_v49  ;;  %vm3264_vm3 = vweird.f32 %v19431_v18  ;;  %8776 = vmatpush.msrb.mxu2 %v8606_v9  ;;  %v3282_v15 = vand.u32 2147483647, %v19393_v3  ;;  %v8620_v9 = vld [vmem:[#allocation3 + $0x2c8] sm:$0xff] }
 0x52b   : > { %v5946_v42 = vmul.f32 %v10718_v48, %v5945_v11  ;;  %10731 = vpow2.f32 %v9406_v52  ;;  %v3285_v38 = vor.u32 1.1754944e-38, %v3284_v2  ;;  %vm3265_vm2 = vmor %vm3263_vm6, %vm3264_vm3  ;;  %vm6098_vm7 = vweird.f32 %v19425_v12  ;;  %v8604_v2 = vld [vmem:[#allocation3 + $0x248] sm:$0xff]  ;;  %8798 = vmatpush.msra.mxu3 %v8620_v9 }
 0x52c   : > { %v3260_v35 = vsub.f32 1.0, %v3259_v5  ;;  %10733 = vrcp.f32 %v19458_v47  ;;  %8777 = vmatpush.msrb.mxu2 %v8605_v20  ;;  %v6102_v40 = vand.u32 2147483647, %v19425_v12  ;;  %v9613_v49 = vmul.f32 -1.442695, %v19467_v37 }
 0x52d   : > { %v5947_v44 = vadd.f32 %v10718_v48, %v5946_v42  ;;  %v7797_v52 = vmul.f32 %v3136_v58, %v19286_v8  ;;  %vm3283_vm15 = vcmp.eq.f32.partialorder %v3282_v15, 8.507059e+37  ;;  %v3417_v4 = vand.u32 2147483647, %v19458_v47 }
 0x52e   : > { %v19439_v51 = vpop.eup %10725  ;;  %v3261_v10 = vmul.f32 %v19431_v18, %v3260_v35  ;;  %vm19506_vm0 = vcmp.eq.f32.partialorder %v6102_v40, 8.507059e+37  ;;  %v3419_v35 = vand.u32 2147483648, %v19458_v47  ;;  %8778 = vmatpush.msrb.mxu2 %v8604_v2  ;;  %vm3413_vm6 = vweird.f32 %v19458_v47 }
 0x52f   : > { %v10728_v22 = vpop.eup %10727  ;;  %v3274_v17 = vmul.f32 %v19439_v51, %v19393_v3  ;;  %v5951_v23 = vsel %vm19433_vm14, %v10718_v48, %v5947_v44  ;;  %vm3279_vm5 = vweird.f32 %v19439_v51 }
 0x530   : > { %v5956_v33 = vsel %vm19441_vm4, %v5955_v26, %v5951_v23  ;;  %v10730_v60 = vpop.eup %10729  ;;  %v19472_v11 = vadd.f32 1.0, %v10728_v22  ;;  %v3262_v19 = vadd.f32 %v19431_v18, %v3261_v10  ;;  %vm3280_vm10 = vmor %vm3278_vm13, %vm3279_vm5  ;;  %v6231_v23 = vmul.f32 %v19367_v0, %v6230_v46 }
 0x531   : > { %v3275_v39 = vsub.f32 1.0, %v3274_v17  ;;  %v7985_v48 = vmul.f32 %v5956_v33, %v19305_v25  ;;  %v6094_v63 = vmul.f32 %v10730_v60, %v19425_v12  ;;  %vm6099_vm11 = vweird.f32 %v10730_v60  ;;  %v10732_v26 = vpop.eup %10731  ;;  %v1449_v17 = vpop.f32.mrf.mxu3  ;;  %v11151_v33 = vld [vmem:[%s11390_s22 + $0xd8] sm:$0xff] }
 0x532   : > { %v3266_v42 = vsel %vm3265_vm2, %v19431_v18, %v3262_v19  ;;  %v10734_v5 = vpop.eup %10733  ;;  %10735 = vrcp.f32 %v19472_v11  ;;  %vm19502_vm8 = vmor %vm6098_vm7, %vm6099_vm11  ;;  %v19514_v34 = vadd.f32 1.0, %v10732_v26  ;;  %v19520_v31 = vadd.f32 %v1449_v17, %v16962_v29  ;;  %9339 = vmatmul.msk.f32.gmra.mxu0 %vm460_vm1, %v11151_v33  ;;  %v1621_v19 = vpop.f32.mrf.mxu1  ;;  %9372 = vmatmul.msk.f32.gmra.mxu1 %vm460_vm1, %v11151_v33 }
 0x533   : > { %v3276_v57 = vmul.f32 %v19439_v51, %v3275_v39  ;;  %v19475_v25 = vadd.f32 %v19334_v45, %v7985_v48  ;;  %v6104_v45 = vand.u32 2147483648, %v19425_v12  ;;  %v6095_v13 = vsub.f32 1.0, %v6094_v63 }
 0x534   : > { %v3271_v44 = vsel %vm19448_vm9, %v3270_v55, %v3266_v42  ;;  %10737 = vpow2.f32 %v9613_v49  ;;  %vm3414_vm14 = vweird.f32 %v10734_v5  ;;  %v9594_v10 = vmul.f32 -1.442695, %v19520_v31 }
 0x535   : > { %v3277_v36 = vadd.f32 %v19439_v51, %v3276_v57  ;;  %v7806_v18 = vmul.f32 %v3271_v44, %v19337_v1  ;;  %v6096_v3 = vmul.f32 %v10730_v60, %v6095_v13  ;;  %v3409_v1 = vmul.f32 %v10734_v5, %v19458_v47  ;;  %vm3415_vm9 = vmor %vm3413_vm6, %vm3414_vm14 }
 0x536   : > { %10739 = vrcp.f32 %v19514_v34  ;;  %vm6234_vm4 = vweird.f32 %v19367_v0  ;;  %v6239_v57 = vand.u32 2147483648, %v19331_v28  ;;  %v6232_v40 = vadd.f32 %v19367_v0, %v6231_v23  ;;  %v8619_v28 = vld [vmem:[#allocation3 + $0x2c0] sm:$0xff] }
 0x537   : > { %v3281_v6 = vsel %vm3280_vm10, %v19439_v51, %v3277_v36  ;;  %v6105_v51 = vor.u32 1.1754944e-38, %v6104_v45  ;;  %v19512_v54 = vadd.f32 %v7806_v18, %v19428_v53  ;;  %v6097_v55 = vadd.f32 %v10730_v60, %v6096_v3  ;;  %vm19561_vm3 = vmor %vm6233_vm12, %vm6234_vm4  ;;  %v8602_v18 = vld [vmem:[#allocation3 + $0x238] sm:$0xff]  ;;  %8799 = vmatpush.msra.mxu3 %v8619_v28 }
 0x538   : > { %v3286_v22 = vsel %vm3283_vm15, %v3285_v38, %v3281_v6  ;;  %v3410_v12 = vsub.f32 1.0, %v3409_v1  ;;  %v19534_v46 = vpop.eup %10735  ;;  %10741 = vpow2.f32 %v9594_v10  ;;  %vm3418_vm13 = vcmp.eq.f32.partialorder %v3417_v4, 8.507059e+37 }
 0x539   : > { %v7807_v41 = vmul.f32 %v3286_v22, %v19341_v59  ;;  %v6101_v53 = vsel %vm19502_vm8, %v10730_v60, %v6097_v55  ;;  %v19540_v60 = vadd.f32 %v1508_v16, %v19273_v14  ;;  %v19553_v42 = vadd.f32 %v1621_v19, %v19279_v61  ;;  %v1345_v22 = vpop.f32.mrf.mxu2  ;;  %v8601_v55 = vld [vmem:[#allocation3 + $0x230] sm:$0xff]  ;;  %v1452_v16 = vpop.f32.mrf.mxu3 }
 0x53a   : > { %v6106_v39 = vsel %vm19506_vm0, %v6105_v51, %v6101_v53  ;;  %v3411_v20 = vmul.f32 %v10734_v5, %v3410_v12  ;;  %v10738_v38 = vpop.eup %10737  ;;  %v6379_v13 = vmul.f32 %v19534_v46, %v19472_v11  ;;  %v8487_v26 = vrot.slane %v19370_v30, 2  ;;  %v8617_v12 = vld [vmem:[#allocation3 + $0x2b0] sm:$0xff] }
 0x53b   : > { %v19517_v59 = vadd.f32 %v7807_v41, %v7797_v52  ;;  %v7995_v48 = vmul.f32 %v6106_v39, %v19352_v62  ;;  %v3420_v62 = vor.u32 1.1754944e-38, %v3419_v35  ;;  %v9415_v36 = vmul.f32 -1.442695, %v19540_v60 }
 0x53c   : > { %v3412_v15 = vadd.f32 %v10734_v5, %v3411_v20  ;;  %v19555_v47 = vpop.eup %10739  ;;  %v19571_v6 = vadd.f32 1.0, %v10738_v38  ;;  %v8493_v3 = vrot.slane %v19396_v24, 2  ;;  %vm19574_vm5 = vcmp.eq.f32.partialorder %v6237_v32, 8.507059e+37  ;;  %v8600_v38 = vld [vmem:[#allocation3 + $0x228] sm:$0xff] }
 0x53d   : > { %v19547_v63 = vadd.f32 %v19475_v25, %v7995_v48  ;;  %10743 = vpow2.f32 %v9415_v36  ;;  %v3424_v44 = vmul.f32 %v19555_v47, %v19514_v34  ;;  %v6240_v41 = vor.u32 1.1754944e-38, %v6239_v57  ;;  %v1511_v36 = vpop.f32.mrf.mxu0 }
 0x53e   : > { %v3416_v45 = vsel %vm3415_vm9, %v10734_v5, %v3412_v15  ;;  %v8603_v5 = vld [vmem:[#allocation3 + $0x240] sm:$0xff]  ;;  %v9416_v8 = vmul.f32 -1.442695, %v19553_v42  ;;  %v6236_v58 = vsel %vm19561_vm3, %v19367_v0, %v6232_v40  ;;  %v19586_v23 = vadd.f32 %v1345_v22, %v16738_v56  ;;  %v10742_v53 = vpop.eup %10741  ;;  %v11152_v40 = vld [vmem:[%s11390_s22 + $0xe0] sm:$0xff] }
 0x53f   : > { %v3421_v49 = vsel %vm3418_vm13, %v3420_v62, %v3416_v45  ;;  %8779 = vmatpush.msrb.mxu2 %v8603_v5  ;;  %v3425_v1 = vsub.f32 1.0, %v3424_v44  ;;  %v6380_v35 = vsub.f32 1.0, %v6379_v13  ;;  %v3432_v2 = vand.u32 2147483647, %v19514_v34  ;;  %v8616_v62 = vld [vmem:[#allocation3 + $0x2a8] sm:$0xff]  ;;  %9340 = vmatmul.msk.f32.gmra.mxu0 %vm460_vm1, %v11152_v40 }
 0x540   : > { %v7816_v52 = vmul.f32 %v3421_v49, %v19365_v27  ;;  %v8618_v27 = vld [vmem:[#allocation3 + $0x2b8] sm:$0xff]  ;;  %v3434_v9 = vand.u32 2147483648, %v19514_v34  ;;  %10745 = vpow2.f32 %v9416_v8  ;;  %vm3429_vm2 = vweird.f32 %v19555_v47 }
 0x541   : > { %8780 = vmatpush.msrb.mxu2 %v8602_v18  ;;  %8800 = vmatpush.msra.mxu3 %v8618_v27  ;;  %v3426_v0 = vmul.f32 %v19555_v47, %v3425_v1  ;;  %10747 = vrcp.f32 %v19571_v6  ;;  %v8488_v39 = vadd.f32 %v8487_v26, %v19370_v30  ;;  %v19596_v20 = vadd.f32 %v1452_v16, %v16962_v29 }
 0x542   : > { %v19583_v51 = vadd.f32 %v19512_v54, %v7816_v52  ;;  %v9623_v54 = vmul.f32 -1.442695, %v19586_v23  ;;  %v8494_v4 = vadd.f32 %v8493_v3, %v19396_v24  ;;  %vm3428_vm7 = vweird.f32 %v19514_v34 }
 0x543   : > { %v10744_v33 = vpop.eup %10743  ;;  %8781 = vmatpush.msrb.mxu2 %v8601_v55  ;;  %8801 = vmatpush.msra.mxu3 %v8617_v12  ;;  %v3427_v32 = vadd.f32 %v19555_v47, %v3426_v0  ;;  %v19601_v48 = vadd.f32 1.0, %v10742_v53  ;;  %v6241_v10 = vsel %vm19574_vm5, %v6240_v41, %v6236_v58  ;;  %v6381_v57 = vmul.f32 %v19534_v46, %v6380_v35  ;;  %vm19608_vm10 = vmor %vm3428_vm7, %vm3429_vm2  ;;  %v1624_v12 = vpop.f32.mrf.mxu1 }
 0x544   : > { %v3435_v15 = vor.u32 1.1754944e-38, %v3434_v9  ;;  %v19612_v24 = vadd.f32 1.0, %v10744_v33  ;;  %vm3433_vm11 = vcmp.eq.f32.partialorder %v3432_v2, 8.507059e+37  ;;  %10749 = vpow2.f32 %v9623_v54  ;;  %9373 = vmatmul.msk.f32.gmra.mxu1 %vm460_vm1, %v11152_v40 }
 0x545   : > { %v3431_v34 = vsel %vm19608_vm10, %v19555_v47, %v3427_v32  ;;  %v9604_v19 = vmul.f32 -1.442695, %v19596_v20  ;;  %vm6383_vm15 = vweird.f32 %v19472_v11  ;;  %vm6384_vm8 = vweird.f32 %v19534_v46  ;;  %8782 = vmatpush.msrb.mxu2 %v8600_v38  ;;  %8802 = vmatpush.msra.mxu3 %v8616_v62 }
 0x546   : > { %v10746_v45 = vpop.eup %10745  ;;  %v3436_v25 = vsel %vm3433_vm11, %v3435_v15, %v3431_v34  ;;  %10751 = vrcp.f32 %v19612_v24  ;;  %v6387_v13 = vand.u32 2147483647, %v19472_v11  ;;  %v6389_v49 = vand.u32 2147483648, %v19472_v11  ;;  %vm19637_vm0 = vmor %vm6383_vm15, %vm6384_vm8 }
 0x547   : > { %v19623_v47 = vpop.eup %10747  ;;  %v7817_v26 = vmul.f32 %v3436_v25, %v19419_v7  ;;  %10753 = vrcp.f32 %v19601_v48  ;;  %v6382_v52 = vadd.f32 %v19534_v46, %v6381_v57  ;;  %v19630_v44 = vadd.f32 1.0, %v10746_v45 }
 0x548   : > { %10755 = vpow2.f32 %v9604_v19  ;;  %v19633_v5 = vadd.f32 %v1511_v36, %v19273_v14  ;;  %v8489_v7 = vrot.slane %v8488_v39, 1  ;;  %v8495_v22 = vrot.slane %v8494_v4, 1 }
 0x549   : > { %v19642_v18 = vadd.f32 %v19517_v59, %v7817_v26  ;;  %v6529_v3 = vmul.f32 %v19623_v47, %v19571_v6  ;;  %10757 = vrcp.f32 %v19630_v44  ;;  %v8004_v41 = vmul.f32 %v6241_v10, %v19291_v43 }
 0x54a   : > { %v10750_v17 = vpop.eup %10749  ;;  %v6390_v8 = vor.u32 1.1754944e-38, %v6389_v49  ;;  %v6386_v11 = vsel %vm19637_vm0, %v19534_v46, %v6382_v52  ;;  %vm6388_vm12 = vcmp.eq.f32.partialorder %v6387_v13, 8.507059e+37  ;;  %v9425_v59 = vmul.f32 -1.442695, %v19633_v5 }
 0x54b   : > { %v19655_v55 = vadd.f32 1.0, %v10750_v17  ;;  %v19658_v43 = vadd.f32 %v8489_v7, %v8488_v39  ;;  %v19660_v35 = vadd.f32 %v8495_v22, %v8494_v4  ;;  %v6530_v2 = vsub.f32 1.0, %v6529_v3 }
 0x54c   : > { %v10752_v27 = vpop.eup %10751  ;;  %v19663_v46 = vadd.f32 %v19327_v21, %v8004_v41  ;;  %v6391_v9 = vsel %vm6388_vm12, %v6390_v8, %v6386_v11  ;;  %v3569_v54 = vand.u32 2147483648, %v19612_v24  ;;  %v3567_v32 = vand.u32 2147483647, %v19612_v24  ;;  %v8599_v41 = vld [vmem:[#allocation3 + $0x220] sm:$0xff] }
 0x54d   : > { %v19652_v58 = vpop.eup %10753  ;;  %v3559_v1 = vmul.f32 %v10752_v27, %v19612_v24  ;;  %10759 = vpow2.f32 %v9425_v59  ;;  %vm3564_vm14 = vweird.f32 %v10752_v27  ;;  %v19674_v21 = vmul.f32 %v6391_v9, %v19360_v50  ;;  %v8615_v8 = vld [vmem:[#allocation3 + $0x2a0] sm:$0xff]  ;;  %8783 = vmatpush.msrb.mxu2 %v8599_v41 }
 0x54e   : > { %v10756_v53 = vpop.eup %10755  ;;  %v6244_v33 = vmul.f32 %v19652_v58, %v19601_v48  ;;  %10761 = vrcp.f32 %v19655_v55  ;;  %v6531_v57 = vmul.f32 %v19623_v47, %v6530_v2  ;;  %vm6533_vm4 = vweird.f32 %v19571_v6  ;;  %8803 = vmatpush.msra.mxu3 %v8615_v8  ;;  %v8595_v9 = vld [vmem:[#allocation3 + $0x200] sm:$0xff] }
 0x54f   : > { %v3560_v0 = vsub.f32 1.0, %v3559_v1  ;;  %v10758_v16 = vpop.eup %10757  ;;  %v19669_v10 = vadd.f32 1.0, %v10756_v53  ;;  %vm3563_vm6 = vweird.f32 %v19612_v24  ;;  %v3570_v15 = vor.u32 1.1754944e-38, %v3569_v54  ;;  %v8614_v1 = vld [vmem:[#allocation3 + $0x298] sm:$0xff] }
 0x550   : > { %v3574_v4 = vmul.f32 %v10758_v16, %v19630_v44  ;;  %v3584_v19 = vand.u32 2147483648, %v19630_v44  ;;  %v6245_v38 = vsub.f32 1.0, %v6244_v33  ;;  %vm3565_vm9 = vmor %vm3563_vm6, %vm3564_vm14  ;;  %vm3579_vm13 = vweird.f32 %v10758_v16  ;;  %v8613_v33 = vld [vmem:[#allocation3 + $0x290] sm:$0xff]  ;;  %8804 = vmatpush.msra.mxu3 %v8614_v1 }
 0x551   : > { %v3561_v39 = vmul.f32 %v10752_v27, %v3560_v0  ;;  %10763 = vrcp.f32 %v19669_v10  ;;  %v19682_v62 = vadd.f32 %v1624_v12, %v19279_v61  ;;  %vm3568_vm3 = vcmp.eq.f32.partialorder %v3567_v32, 8.507059e+37  ;;  %v1348_v12 = vpop.f32.mrf.mxu2 }
 0x552   : > { %v3575_v34 = vsub.f32 1.0, %v3574_v4  ;;  %v3582_v40 = vand.u32 2147483647, %v19630_v44  ;;  %vm6534_vm5 = vweird.f32 %v19623_v47  ;;  %v6537_v24 = vand.u32 2147483647, %v19571_v6  ;;  %8805 = vmatpush.msra.mxu3 %v8613_v33 }
 0x553   : > { %v3562_v30 = vadd.f32 %v10752_v27, %v3561_v39  ;;  %v10760_v45 = vpop.eup %10759  ;;  %vm3578_vm2 = vweird.f32 %v19630_v44  ;;  %v6539_v49 = vand.u32 2147483648, %v19571_v6  ;;  %v6532_v22 = vadd.f32 %v19623_v47, %v6531_v57  ;;  %vm19706_vm10 = vmor %vm6533_vm4, %vm6534_vm5  ;;  %v1455_v57 = vpop.f32.mrf.mxu3 }
 0x554   : > { %v3576_v36 = vmul.f32 %v10758_v16, %v3575_v34  ;;  %v19688_v13 = vpop.eup %10761  ;;  %vm19693_vm7 = vmor %vm3578_vm2, %vm3579_vm13  ;;  %v19697_v7 = vadd.f32 1.0, %v10760_v45  ;;  %v6246_v3 = vmul.f32 %v19652_v58, %v6245_v38  ;;  %v3585_v17 = vor.u32 1.1754944e-38, %v3584_v19  ;;  %v8596_v45 = vld [vmem:[#allocation3 + $0x208] sm:$0xff] }
 0x555   : > { %v3566_v50 = vsel %vm3565_vm9, %v10752_v27, %v3562_v30  ;;  %v9426_v44 = vmul.f32 -1.442695, %v19682_v62  ;;  %v8598_v27 = vld [vmem:[#allocation3 + $0x218] sm:$0xff]  ;;  %vm6248_vm11 = vweird.f32 %v19601_v48  ;;  %vm3583_vm15 = vcmp.eq.f32.partialorder %v3582_v40, 8.507059e+37 }
 0x556   : > { %v3571_v25 = vsel %vm3568_vm3, %v3570_v15, %v3566_v50  ;;  %v3577_v52 = vadd.f32 %v10758_v16, %v3576_v36  ;;  %vm6249_vm8 = vweird.f32 %v19652_v58  ;;  %v6679_v2 = vmul.f32 %v19688_v13, %v19655_v55  ;;  %8784 = vmatpush.msrb.mxu2 %v8598_v27 }
 0x557   : > { %v7826_v26 = vmul.f32 %v3571_v25, %v19540_v60  ;;  %v19716_v53 = vpop.eup %10763  ;;  %10765 = vrcp.f32 %v19697_v7  ;;  %vm19722_vm0 = vcmp.eq.f32.partialorder %v6537_v24, 8.507059e+37  ;;  %v6540_v0 = vor.u32 1.1754944e-38, %v6539_v49  ;;  %vm19741_vm12 = vmor %vm6248_vm11, %vm6249_vm8  ;;  %v8612_v24 = vld [vmem:[#allocation3 + $0x288] sm:$0xff]  ;;  %v1514_v25 = vpop.f32.mrf.mxu0  ;;  %v11153_v49 = vld [vmem:[%s11390_s22 + $0xe8] sm:$0xff] }
 0x558   : > { %v3581_v59 = vsel %vm19693_vm7, %v10758_v16, %v3577_v52  ;;  %v6254_v54 = vand.u32 2147483648, %v19601_v48  ;;  %v6536_v32 = vsel %vm19706_vm10, %v19623_v47, %v6532_v22  ;;  %v19732_v39 = vadd.f32 %v19652_v58, %v6246_v3  ;;  %9341 = vmatmul.msk.f32.gmra.mxu0 %vm460_vm1, %v11153_v49  ;;  %8806 = vmatpush.msra.mxu3 %v8612_v24 }
 0x559   : > { %v19712_v11 = vadd.f32 %v19583_v51, %v7826_v26  ;;  %v3586_v6 = vsel %vm3583_vm15, %v3585_v17, %v3581_v59  ;;  %v8597_v51 = vld [vmem:[#allocation3 + $0x210] sm:$0xff]  ;;  %10767 = vpow2.f32 %v9426_v44  ;;  %v19735_v4 = vadd.f32 %v1348_v12, %v16738_v56  ;;  %v1627_v44 = vpop.f32.mrf.mxu1  ;;  %9374 = vmatmul.msk.f32.gmra.mxu1 %vm460_vm1, %v11153_v49  ;;  %v1351_v33 = vpop.f32.mrf.mxu2 }
 0x55a   : > { %v7827_v16 = vmul.f32 %v3586_v6, %v19553_v42  ;;  %v6252_v30 = vand.u32 2147483647, %v19601_v48  ;;  %v6689_v15 = vand.u32 2147483648, %v19655_v55  ;;  %v6394_v34 = vmul.f32 %v19716_v53, %v19669_v10  ;;  %8785 = vmatpush.msrb.mxu2 %v8597_v51 }
 0x55b   : > { %v6680_v19 = vsub.f32 1.0, %v6679_v2  ;;  %v6687_v38 = vand.u32 2147483647, %v19655_v55  ;;  %v9633_v50 = vmul.f32 -1.442695, %v19735_v4  ;;  %v19755_v36 = vadd.f32 %v1455_v57, %v16962_v29 }
 0x55c   : > { %v19747_v47 = vadd.f32 %v19642_v18, %v7827_v16  ;;  %v19759_v48 = vadd.f32 %v19663_v46, %v19674_v21  ;;  %v19763_v18 = vsel %vm19722_vm0, %v6540_v0, %v6536_v32  ;;  %v19765_v40 = vor.u32 1.1754944e-38, %v6254_v54  ;;  %8786 = vmatpush.msrb.mxu2 %v8596_v45  ;;  %v8611_v0 = vld [vmem:[#allocation3 + $0x280] sm:$0xff] }
 0x55d   : > { %vm6683_vm14 = vweird.f32 %v19655_v55  ;;  %v19770_v26 = vpop.eup %10765  ;;  %v6251_v46 = vsel %vm19741_vm12, %v19652_v58, %v19732_v39  ;;  %10769 = vpow2.f32 %v9633_v50  ;;  %v9614_v21 = vmul.f32 -1.442695, %v19755_v36  ;;  %8807 = vmatpush.msra.mxu3 %v8611_v0 }
 0x55e   : > { %v19778_v52 = vadd.f32 %v1514_v25, %v19273_v14  ;;  %vm19780_vm4 = vcmp.eq.f32.partialorder %v6252_v30, 8.507059e+37  ;;  %vm6684_vm6 = vweird.f32 %v19688_v13  ;;  %v19785_v22 = vor.u32 1.1754944e-38, %v6689_v15  ;;  %8787 = vmatpush.msrb.mxu2 %v8595_v9  ;;  %v1458_v25 = vpop.f32.mrf.mxu3  ;;  %v19895_v9 = vld [vmem:[%s11390_s22 + $0xf0] sm:$0xff] }
 0x55f   : > { %v6395_v3 = vsub.f32 1.0, %v6394_v34  ;;  %v3709_v17 = vmul.f32 %v19770_v26, %v19697_v7  ;;  %v10768_v41 = vpop.eup %10767  ;;  %v6681_v8 = vmul.f32 %v19688_v13, %v6680_v19  ;;  %vm19791_vm9 = vcmp.eq.f32.partialorder %v6687_v38, 8.507059e+37  ;;  %vm19819_vm5 = vmor %vm6683_vm14, %vm6684_vm6 }
 0x560   : > { %10771 = vpow2.f32 %v9614_v21  ;;  %v9435_v60 = vmul.f32 -1.442695, %v19778_v52  ;;  %v19797_v59 = vadd.f32 %v1627_v44, %v19279_v61  ;;  %v3717_v12 = vand.u32 2147483647, %v19697_v7 }
 0x561   : > { %v3710_v1 = vsub.f32 1.0, %v3709_v17  ;;  %v3719_v6 = vand.u32 2147483648, %v19697_v7  ;;  %v19801_v2 = vadd.f32 1.0, %v10768_v41  ;;  %v8525_v54 = vmul.f32 0.00390625, %v19658_v43 }
 0x562   : > { %10773 = vpow2.f32 %v9435_v60  ;;  %v9436_v51 = vmul.f32 -1.442695, %v19797_v59  ;;  %v8526_v16 = vmul.f32 0.00390625, %v19660_v35  ;;  %v6396_v32 = vmul.f32 %v19716_v53, %v6395_v3 }
 0x563   : > { %v3711_v57 = vmul.f32 %v19770_v26, %v3710_v1  ;;  %vm3714_vm13 = vweird.f32 %v19770_v26  ;;  %10775 = vrcp.f32 %v19801_v2  ;;  %v10770_v30 = vpop.eup %10769  ;;  %v6682_v15 = vadd.f32 %v19688_v13, %v6681_v8  ;;  %8788 = vmatmul.f32.vlgmr.msrb.gmra.mxu2 %v8525_v54 }
 0x564   : > { %vm6398_vm3 = vweird.f32 %v19669_v10  ;;  %10777 = vpow2.f32 %v9436_v51  ;;  %8808 = vmatmul.f32.vlgmr.msra.gmra.mxu3 %v8526_v16  ;;  %v19813_v43 = vadd.f32 %v1351_v33, %v16738_v56  ;;  %vm6399_vm2 = vweird.f32 %v19716_v53  ;;  %v1517_v51 = vpop.f32.mrf.mxu0  ;;  %9342 = vmatmul.msk.f32.gmra.mxu0 %vm460_vm1, %v19895_v9 }
 0x565   : > { %v3712_v34 = vadd.f32 %v19770_v26, %v3711_v57  ;;  %vm3713_vm7 = vweird.f32 %v19697_v7  ;;  %v19826_v19 = vadd.f32 1.0, %v10770_v30  ;;  %v6402_v50 = vand.u32 2147483647, %v19669_v10  ;;  %vm19843_vm15 = vmor %vm6398_vm3, %vm6399_vm2 }
 0x566   : > { %v10772_v38 = vpop.eup %10771  ;;  %v6404_v45 = vand.u32 2147483648, %v19669_v10  ;;  %vm3715_vm10 = vmor %vm3713_vm7, %vm3714_vm13  ;;  %v3720_v55 = vor.u32 1.1754944e-38, %v3719_v6  ;;  %v9643_v24 = vmul.f32 -1.442695, %v19813_v43  ;;  %v6397_v49 = vadd.f32 %v19716_v53, %v6396_v32 }
 0x567   : > { %v3716_v21 = vsel %vm3715_vm10, %v19770_v26, %v3712_v34  ;;  %vm3718_vm11 = vcmp.eq.f32.partialorder %v3717_v12, 8.507059e+37  ;;  %10779 = vrcp.f32 %v19826_v19  ;;  %v6686_v3 = vsel %vm19819_vm5, %v19688_v13, %v6682_v15 }
 0x568   : > { %v10774_v7 = vpop.eup %10773  ;;  %v3721_v44 = vsel %vm3718_vm11, %v3720_v55, %v3716_v21  ;;  %v19847_v41 = vadd.f32 1.0, %v10772_v38  ;;  %10781 = vpow2.f32 %v9643_v24  ;;  %v8024_v8 = vmul.f32 %v19763_v18, %v19467_v37 }
 0x569   : > { %v10776_v26 = vpop.eup %10775  ;;  %v7836_v60 = vmul.f32 %v3721_v44, %v19633_v5  ;;  %v19852_v1 = vadd.f32 1.0, %v10774_v7  ;;  %v19855_v13 = vadd.f32 %v1458_v25, %v16962_v29  ;;  %v6256_v12 = vsel %vm19780_vm4, %v19765_v40, %v6251_v46 }
 0x56a   : > { %v10778_v10 = vpop.eup %10777  ;;  %vm19865_vm8 = vcmp.eq.f32.partialorder %v6402_v50, 8.507059e+37  ;;  %v3724_v37 = vmul.f32 %v10776_v26, %v19801_v2  ;;  %10783 = vrcp.f32 %v19847_v41  ;;  %v6691_v5 = vsel %vm19791_vm9, %v19785_v22, %v6686_v3 }
 0x56b   : > { %v6401_v58 = vsel %vm19843_vm15, %v19716_v53, %v6397_v49  ;;  %v6405_v39 = vor.u32 1.1754944e-38, %v6404_v45  ;;  %v19878_v42 = vadd.f32 %v19712_v11, %v7836_v60  ;;  %v3732_v40 = vand.u32 2147483647, %v19801_v2 }
 0x56c   : > { %v3725_v18 = vsub.f32 1.0, %v3724_v37  ;;  %v3734_v46 = vand.u32 2147483648, %v19801_v2  ;;  %10785 = vrcp.f32 %v19852_v1  ;;  %v19886_v27 = vadd.f32 %v19759_v48, %v8024_v8  ;;  %v1461_v8 = vpop.f32.mrf.mxu3 }
 0x56d   : > { %v19883_v28 = vpop.eup %10779  ;;  %v19889_v22 = vmul.f32 %v6256_v12, %v19520_v31  ;;  %v19891_v53 = vadd.f32 1.0, %v10778_v10  ;;  %v9624_v11 = vmul.f32 -1.442695, %v19855_v13  ;;  %v19900_v54 = vmul.f32 %v6691_v5, %v19586_v23 }
 0x56e   : > { %v10782_v0 = vpop.eup %10781  ;;  %v3726_v16 = vmul.f32 %v10776_v26, %v3725_v18  ;;  %vm3729_vm0 = vweird.f32 %v10776_v26  ;;  %v6829_v31 = vmul.f32 %v19883_v28, %v19826_v19  ;;  %v19906_v48 = vsel %vm19865_vm8, %v6405_v39, %v6401_v58 }
 0x56f   : > { %vm3728_vm12 = vweird.f32 %v19801_v2  ;;  %v6839_v33 = vand.u32 2147483648, %v19826_v19  ;;  %10787 = vrcp.f32 %v19891_v53  ;;  %vm3733_vm14 = vcmp.eq.f32.partialorder %v3732_v40, 8.507059e+37 }
 0x570   : > { %v19911_v32 = vpop.eup %10783  ;;  %v3727_v57 = vadd.f32 %v10776_v26, %v3726_v16  ;;  %v3735_v23 = vor.u32 1.1754944e-38, %v3734_v46  ;;  %v19913_v30 = vadd.f32 1.0, %v10782_v0  ;;  %vm3730_vm4 = vmor %vm3728_vm12, %vm3729_vm0  ;;  %v6830_v15 = vsub.f32 1.0, %v6829_v31  ;;  %v11155_v46 = vld [vmem:[%s11390_s22 + $0xf8] sm:$0xff]  ;;  %s8948_s22 = sshll.u32 %s8944_s25, 4  ;;  %s8949_s22 = int_to_ptr.hbm [resolvable:$true] %s8948_s22 }
 0x571   : > { %v6837_v35 = vand.u32 2147483647, %v19826_v19  ;;  %v3867_v34 = vand.u32 2147483647, %v19852_v1  ;;  %10789 = vpow2.f32 %v9624_v11  ;;  %v6544_v50 = vmul.f32 %v19911_v32, %v19847_v41  ;;  %s11200_s19 = sshra.s32 %s8949_s22, 4  ;;  %s11201_s19 = int_to_ptr.hbm [resolvable:$true] %s11200_s19 }
 0x572   : > { %v10786_v38 = vpop.eup %10785  ;;  %v3731_v2 = vsel %vm3730_vm4, %v10776_v26, %v3727_v57  ;;  %v3869_v45 = vand.u32 2147483648, %v19852_v1  ;;  %10791 = vrcp.f32 %v19913_v30  ;;  %vm6833_vm6 = vweird.f32 %v19826_v19  ;;  %p11207_p5 = scmp.lt.s32.totalorder %s11201_s19, %s21945_s8 }
 0x573   : > { %v3736_v55 = vsel %vm3733_vm14, %v3735_v23, %v3731_v2  ;;  %v19922_v24 = vor.u32 1.1754944e-38, %v6839_v33  ;;  %v3859_v25 = vmul.f32 %v10786_v38, %v19852_v1  ;;  %vm6548_vm9 = vweird.f32 %v19847_v41 }
 0x574   : > { %v7837_v49 = vmul.f32 %v3736_v55, %v19682_v62  ;;  %v6552_v21 = vand.u32 2147483647, %v19847_v41  ;;  %v6554_v7 = vand.u32 2147483648, %v19847_v41  ;;  %vm3863_vm13 = vweird.f32 %v19852_v1 }
 0x575   : > { %v10788_v3 = vpop.eup %10787  ;;  %v6831_v17 = vmul.f32 %v19883_v28, %v6830_v15  ;;  %vm6834_vm3 = vweird.f32 %v19883_v28  ;;  %v3860_v44 = vsub.f32 1.0, %v3859_v25  ;;  %vm19932_vm5 = vcmp.eq.f32.partialorder %v3867_v34, 8.507059e+37 }
 0x576   : > { %v19937_v62 = vadd.f32 %v19747_v47, %v7837_v49  ;;  %vm19939_vm2 = vcmp.eq.f32.partialorder %v6837_v35, 8.507059e+37  ;;  %v6545_v60 = vsub.f32 1.0, %v6544_v50  ;;  %v3870_v10 = vor.u32 1.1754944e-38, %v3869_v45  ;;  %vm19957_vm15 = vmor %vm6833_vm6, %vm6834_vm3  ;;  %v1630_v35 = vpop.f32.mrf.mxu1  ;;  %9375 = vmatmul.msk.f32.gmra.mxu1 %vm460_vm1, %v19895_v9  ;;  %v1354_v49 = vpop.f32.mrf.mxu2 }
 0x577   : > { %v3874_v12 = vmul.f32 %v10788_v3, %v19891_v53  ;;  %v10790_v6 = vpop.eup %10789  ;;  %v3861_v37 = vmul.f32 %v10786_v38, %v3860_v44  ;;  %vm3864_vm7 = vweird.f32 %v10786_v38  ;;  %v3882_v5 = vand.u32 2147483647, %v19891_v53 }
 0x578   : > { %v3884_v58 = vand.u32 2147483648, %v19891_v53  ;;  %v19946_v39 = vpop.eup %10791  ;;  %vm6549_vm10 = vweird.f32 %v19911_v32  ;;  %vm3878_vm11 = vweird.f32 %v19891_v53  ;;  %v19950_v18 = vadd.f32 1.0, %v10790_v6  ;;  %vm3865_vm8 = vmor %vm3863_vm13, %vm3864_vm7 }
 0x579   : > { %v3875_v47 = vsub.f32 1.0, %v3874_v12  ;;  %v6832_v40 = vadd.f32 %v19883_v28, %v6831_v17  ;;  %v3862_v11 = vadd.f32 %v10786_v38, %v3861_v37  ;;  %v6979_v0 = vmul.f32 %v19946_v39, %v19913_v30  ;;  %vm19997_vm13 = vmor %vm6548_vm9, %vm6549_vm10 }
 0x57a   : > { %v19964_v16 = vadd.f32 %v1517_v51, %v19273_v14  ;;  %v6546_v31 = vmul.f32 %v19911_v32, %v6545_v60  ;;  %vm3879_vm0 = vweird.f32 %v10788_v3  ;;  %10793 = vrcp.f32 %v19950_v18 }
 0x57b   : > { %v3876_v33 = vmul.f32 %v10788_v3, %v3875_v47  ;;  %v3866_v19 = vsel %vm3865_vm8, %v10786_v38, %v3862_v11  ;;  %vm19970_vm12 = vcmp.eq.f32.partialorder %v3882_v5, 8.507059e+37  ;;  %v3885_v23 = vor.u32 1.1754944e-38, %v3884_v58  ;;  %vm3880_vm4 = vmor %vm3878_vm11, %vm3879_vm0 }
 0x57c   : > { %v6980_v15 = vsub.f32 1.0, %v6979_v0  ;;  %v3871_v51 = vsel %vm19932_vm5, %v3870_v10, %v3866_v19  ;;  %vm6983_vm14 = vweird.f32 %v19913_v30  ;;  %v6987_v34 = vand.u32 2147483647, %v19913_v30 }
 0x57d   : > { %v3877_v1 = vadd.f32 %v10788_v3, %v3876_v33  ;;  %v6836_v38 = vsel %vm19957_vm15, %v19883_v28, %v6832_v40  ;;  %v7846_v2 = vmul.f32 %v3871_v51, %v19778_v52  ;;  %v9445_v9 = vmul.f32 -1.442695, %v19964_v16  ;;  %v1520_v40 = vpop.f32.mrf.mxu0  ;;  %9343 = vmatmul.msk.f32.gmra.mxu0 %vm460_vm1, %v11155_v46 }
 0x57e   : > { %v6981_v50 = vmul.f32 %v19946_v39, %v6980_v15  ;;  %v6547_v45 = vadd.f32 %v19911_v32, %v6546_v31  ;;  %vm6984_vm6 = vweird.f32 %v19946_v39  ;;  %v19991_v25 = vadd.f32 %v1630_v35, %v19279_v61  ;;  %v1633_v33 = vpop.f32.mrf.mxu1  ;;  %9376 = vmatmul.msk.f32.gmra.mxu1 %vm460_vm1, %v11155_v46  ;;  %v1357_v52 = vpop.f32.mrf.mxu2 }
 0x57f   : > { %v3881_v55 = vsel %vm3880_vm4, %v10788_v3, %v3877_v1  ;;  %v20002_v28 = vadd.f32 %v19878_v42, %v7846_v2  ;;  %v6989_v3 = vand.u32 2147483648, %v19913_v30  ;;  %10795 = vpow2.f32 %v9445_v9  ;;  %vm20030_vm3 = vmor %vm6983_vm14, %vm6984_vm6 }
 0x580   : > { %v3886_v53 = vsel %vm19970_vm12, %v3885_v23, %v3881_v55  ;;  %v20007_v17 = vpop.eup %10793  ;;  %v6982_v26 = vadd.f32 %v19946_v39, %v6981_v50  ;;  %v9446_v60 = vmul.f32 -1.442695, %v19991_v25  ;;  %v20013_v10 = vadd.f32 %v1354_v49, %v16738_v56 }
 0x581   : > { %v7847_v44 = vmul.f32 %v3886_v53, %v19797_v59  ;;  %v6841_v42 = vsel %vm19939_vm2, %v19922_v24, %v6836_v38  ;;  %vm20020_vm9 = vcmp.eq.f32.partialorder %v6552_v21, 8.507059e+37  ;;  %v6555_v59 = vor.u32 1.1754944e-38, %v6554_v7 }
 0x582   : > { %v6694_v24 = vmul.f32 %v20007_v17, %v19950_v18  ;;  %v6551_v21 = vsel %vm19997_vm13, %v19911_v32, %v6547_v45  ;;  %10797 = vpow2.f32 %v9446_v60  ;;  %v9653_v7 = vmul.f32 -1.442695, %v20013_v10 }
 0x583   : > { %v20040_v41 = vadd.f32 %v19937_v62, %v7847_v44  ;;  %v8015_v30 = vmul.f32 %v19906_v48, %v19596_v20  ;;  %v6990_v37 = vor.u32 1.1754944e-38, %v6989_v3  ;;  %v20046_v58 = vadd.f32 %v1461_v8, %v16962_v29 }
 0x584   : > { %v6695_v5 = vsub.f32 1.0, %v6694_v24  ;;  %v8044_v47 = vmul.f32 %v6841_v42, %v19735_v4  ;;  %v6986_v32 = vsel %vm20030_vm3, %v19946_v39, %v6982_v26  ;;  %vm20052_vm5 = vcmp.eq.f32.partialorder %v6987_v34, 8.507059e+37 }
 0x585   : > { %10799 = vpow2.f32 %v9653_v7  ;;  %v10796_v20 = vpop.eup %10795  ;;  %v6556_v48 = vsel %vm20020_vm9, %v6555_v59, %v6551_v21  ;;  %v9634_v4 = vmul.f32 -1.442695, %v20046_v58  ;;  %v20063_v0 = vadd.f32 %v1520_v40, %v19273_v14 }
 0x586   : > { %v6696_v11 = vmul.f32 %v20007_v17, %v6695_v5  ;;  %vm6698_vm2 = vweird.f32 %v19950_v18  ;;  %vm6699_vm7 = vweird.f32 %v20007_v17  ;;  %v6704_v39 = vand.u32 2147483648, %v19950_v18 }
 0x587   : > { %v20068_v31 = vadd.f32 1.0, %v10796_v20  ;;  %v6991_v19 = vsel %vm20052_vm5, %v6990_v37, %v6986_v32  ;;  %10801 = vpow2.f32 %v9634_v4  ;;  %v9455_v57 = vmul.f32 -1.442695, %v20063_v0  ;;  %vm20088_vm1 = vmor %vm6698_vm2, %vm6699_vm7 }
 0x588   : > { %v20075_v23 = vadd.f32 %v1633_v33, %v19279_v61  ;;  %v10798_v15 = vpop.eup %10797  ;;  %v8355_v35 = vadd.f32 %v19547_v63, %v19889_v22  ;;  %v6697_v51 = vadd.f32 %v20007_v17, %v6696_v11  ;;  %v6702_v1 = vand.u32 2147483647, %v19950_v18 }
 0x589   : > { %10803 = vrcp.f32 %v20068_v31  ;;  %v8327_v34 = vadd.f32 %v19886_v27, %v19900_v54  ;;  %v20092_v2 = vadd.f32 1.0, %v10798_v15  ;;  %v8025_v50 = vmul.f32 %v6556_v48, %v19755_v36 }
 0x58a   : > { %10805 = vpow2.f32 %v9455_v57  ;;  %v9456_v63 = vmul.f32 -1.442695, %v20075_v23  ;;  %v8054_v9 = vmul.f32 %v6991_v19, %v19813_v43  ;;  %v8356_v45 = vadd.f32 %v8355_v35, %v8015_v30  ;;  %v1464_v35 = vpop.f32.mrf.mxu3 }
 0x58b   : > { %v10800_v22 = vpop.eup %10799  ;;  %v8328_v27 = vadd.f32 %v8327_v34, %v8044_v47  ;;  %v6705_v54 = vor.u32 1.1754944e-38, %v6704_v39  ;;  %10807 = vrcp.f32 %v20092_v2  ;;  %v6701_v18 = vsel %vm20088_vm1, %v20007_v17, %v6697_v51 }
 0x58c   : > { %vm6703_vm10 = vcmp.eq.f32.partialorder %v6702_v1, 8.507059e+37  ;;  %v4017_v55 = vand.u32 2147483647, %v20068_v31  ;;  %v20102_v49 = vadd.f32 1.0, %v10800_v22  ;;  %v4019_v36 = vand.u32 2147483648, %v20068_v31 }
 0x58d   : > { %v10802_v53 = vpop.eup %10801  ;;  %10809 = vpow2.f32 %v9456_v63  ;;  %v20105_v3 = vadd.f32 %v8356_v45, %v8025_v50  ;;  %v20107_v44 = vadd.f32 %v8328_v27, %v8054_v9  ;;  %v20111_v26 = vadd.f32 %v1357_v52, %v16738_v56 }
 0x58e   : > { %10811 = vrcp.f32 %v20102_v49  ;;  %v6706_v60 = vsel %vm6703_vm10, %v6705_v54, %v6701_v18  ;;  %vm4013_vm11 = vweird.f32 %v20068_v31  ;;  %v20115_v12 = vadd.f32 1.0, %v10802_v53 }
 0x58f   : > { %v10804_v43 = vpop.eup %10803  ;;  %vm20117_vm15 = vcmp.eq.f32.partialorder %v4017_v55, 8.507059e+37  ;;  %v4032_v6 = vand.u32 2147483647, %v20092_v2  ;;  %v4034_v24 = vand.u32 2147483648, %v20092_v2  ;;  %v4020_v30 = vor.u32 1.1754944e-38, %v4019_v36  ;;  %v1523_v36 = vpop.f32.mrf.mxu0 }
 0x590   : > { %v10806_v17 = vpop.eup %10805  ;;  %v4009_v42 = vmul.f32 %v10804_v43, %v20068_v31  ;;  %v7139_v37 = vand.u32 2147483648, %v20102_v49  ;;  %10813 = vrcp.f32 %v20115_v12  ;;  %v20128_v5 = vmul.f32 %v6706_v60, %v19855_v13 }
 0x591   : > { %v20123_v8 = vadd.f32 1.0, %v10806_v17  ;;  %v10808_v21 = vpop.eup %10807  ;;  %v7137_v32 = vand.u32 2147483647, %v20102_v49  ;;  %v9663_v62 = vmul.f32 -1.442695, %v20111_v26  ;;  %vm4014_vm8 = vweird.f32 %v10804_v43 }
 0x592   : > { %v4010_v7 = vsub.f32 1.0, %v4009_v42  ;;  %v4024_v47 = vmul.f32 %v10808_v21, %v20092_v2  ;;  %vm4028_vm0 = vweird.f32 %v20092_v2  ;;  %vm20137_vm12 = vcmp.eq.f32.partialorder %v4032_v6, 8.507059e+37  ;;  %vm4015_vm6 = vmor %vm4013_vm11, %vm4014_vm8  ;;  %v1636_v42 = vpop.f32.mrf.mxu1 }
 0x593   : > { %v10810_v40 = vpop.eup %10809  ;;  %10815 = vrcp.f32 %v20123_v8  ;;  %v4035_v13 = vor.u32 1.1754944e-38, %v4034_v24  ;;  %vm7133_vm14 = vweird.f32 %v20102_v49  ;;  %v7140_v33 = vor.u32 1.1754944e-38, %v7139_v37 }
 0x594   : > { %v4011_v46 = vmul.f32 %v10804_v43, %v4010_v7  ;;  %v20135_v20 = vpop.eup %10811  ;;  %v4025_v48 = vsub.f32 1.0, %v4024_v47  ;;  %vm6848_vm4 = vweird.f32 %v20115_v12  ;;  %vm4029_vm13 = vweird.f32 %v10808_v21 }
 0x595   : > { %v7129_v39 = vmul.f32 %v20135_v20, %v20102_v49  ;;  %vm20147_vm9 = vcmp.eq.f32.partialorder %v7137_v32, 8.507059e+37  ;;  %v20151_v15 = vadd.f32 1.0, %v10810_v40  ;;  %10817 = vpow2.f32 %v9663_v62  ;;  %vm4030_vm2 = vmor %vm4028_vm0, %vm4029_vm13 }
 0x596   : > { %v4012_v4 = vadd.f32 %v10804_v43, %v4011_v46  ;;  %v4026_v19 = vmul.f32 %v10808_v21, %v4025_v48  ;;  %v20153_v51 = vpop.eup %10813  ;;  %v6852_v38 = vand.u32 2147483647, %v20115_v12  ;;  %v6854_v63 = vand.u32 2147483648, %v20115_v12 }
 0x597   : > { %v7130_v34 = vsub.f32 1.0, %v7129_v39  ;;  %vm7134_vm3 = vweird.f32 %v20135_v20  ;;  %v6844_v50 = vmul.f32 %v20153_v51, %v20115_v12  ;;  %vm4163_vm5 = vweird.f32 %v20123_v8 }
 0x598   : > { %v4016_v1 = vsel %vm4015_vm6, %v10804_v43, %v4012_v4  ;;  %v4027_v22 = vadd.f32 %v10808_v21, %v4026_v19  ;;  %v4167_v54 = vand.u32 2147483647, %v20123_v8  ;;  %10819 = vrcp.f32 %v20151_v15  ;;  %vm20182_vm7 = vmor %vm7133_vm14, %vm7134_vm3  ;;  %v1467_v4 = vpop.f32.mrf.mxu3 }
 0x599   : > { %v4021_v31 = vsel %vm20117_vm15, %v4020_v30, %v4016_v1  ;;  %v10816_v9 = vpop.eup %10815  ;;  %v7131_v27 = vmul.f32 %v20135_v20, %v7130_v34  ;;  %v6845_v55 = vsub.f32 1.0, %v6844_v50  ;;  %v20172_v53 = vadd.f32 %v1464_v35, %v16962_v29 }
 0x59a   : > { %v7856_v45 = vmul.f32 %v4021_v31, %v19964_v16  ;;  %v4031_v18 = vsel %vm4030_vm2, %v10808_v21, %v4027_v22  ;;  %v4159_v52 = vmul.f32 %v10816_v9, %v20123_v8  ;;  %v4169_v60 = vand.u32 2147483648, %v20123_v8  ;;  %v1360_v21 = vpop.f32.mrf.mxu2  ;;  %v1526_v22 = vpop.f32.mrf.mxu0 }
 0x59b   : > { %v4036_v2 = vsel %vm20137_vm12, %v4035_v13, %v4031_v18  ;;  %v7132_v43 = vadd.f32 %v20135_v20, %v7131_v27  ;;  %v10818_v59 = vpop.eup %10817  ;;  %vm6849_vm1 = vweird.f32 %v20153_v51  ;;  %vm4164_vm10 = vweird.f32 %v10816_v9  ;;  %v1639_v27 = vpop.f32.mrf.mxu1 }
 0x59c   : > { %v8371_v16 = vadd.f32 %v20002_v28, %v7856_v45  ;;  %v7857_v6 = vmul.f32 %v4036_v2, %v19991_v25  ;;  %v6846_v28 = vmul.f32 %v20153_v51, %v6845_v55  ;;  %v4160_v24 = vsub.f32 1.0, %v4159_v52  ;;  %vm20214_vm15 = vmor %vm6848_vm4, %vm6849_vm1 }
 0x59d   : > { %v4182_v7 = vand.u32 2147483647, %v20151_v15  ;;  %v4184_v49 = vand.u32 2147483648, %v20151_v15  ;;  %v20192_v30 = vadd.f32 1.0, %v10818_v59  ;;  %v7136_v25 = vsel %vm20182_vm7, %v20135_v20, %v7132_v43  ;;  %vm4165_vm0 = vmor %vm4163_vm5, %vm4164_vm10 }
 0x59e   : > { %v20195_v37 = vadd.f32 %v20040_v41, %v7857_v6  ;;  %v4161_v47 = vmul.f32 %v10816_v9, %v4160_v24  ;;  %v9644_v32 = vmul.f32 -1.442695, %v20172_v53  ;;  %v10820_v62 = vpop.eup %10819  ;;  %v6847_v40 = vadd.f32 %v20153_v51, %v6846_v28 }
 0x59f   : > { %vm20202_vm11 = vcmp.eq.f32.partialorder %v6852_v38, 8.507059e+37  ;;  %10821 = vrcp.f32 %v20192_v30  ;;  %v20208_v48 = vadd.f32 %v1523_v36, %v19273_v14  ;;  %v6855_v20 = vor.u32 1.1754944e-38, %v6854_v63 }
 0x5a0   : > { %v4162_v11 = vadd.f32 %v10816_v9, %v4161_v47  ;;  %vm4168_vm8 = vcmp.eq.f32.partialorder %v4167_v54, 8.507059e+37  ;;  %v4174_v13 = vmul.f32 %v10820_v62, %v20151_v15  ;;  %v7141_v39 = vsel %vm20147_vm9, %v7140_v33, %v7136_v25 }
 0x5a1   : > { %v4170_v19 = vor.u32 1.1754944e-38, %v4169_v60  ;;  %vm4178_vm12 = vweird.f32 %v20151_v15  ;;  %vm20225_vm14 = vcmp.eq.f32.partialorder %v4182_v7, 8.507059e+37  ;;  %v4185_v34 = vor.u32 1.1754944e-38, %v4184_v49  ;;  %v1470_v49 = vpop.f32.mrf.mxu3 }
 0x5a2   : > { %v4166_v35 = vsel %vm4165_vm0, %v10816_v9, %v4162_v11  ;;  %v4175_v1 = vsub.f32 1.0, %v4174_v13  ;;  %10823 = vpow2.f32 %v9644_v32  ;;  %v6851_v57 = vsel %vm20214_vm15, %v20153_v51, %v6847_v40  ;;  %v1363_v52 = vpop.f32.mrf.mxu2 }
 0x5a3   : > { %v4171_v33 = vsel %vm4168_vm8, %v4170_v19, %v4166_v35  ;;  %vm7283_vm4 = vweird.f32 %v20192_v30  ;;  %v9465_v8 = vmul.f32 -1.442695, %v20208_v48  ;;  %vm4179_vm6 = vweird.f32 %v10820_v62 }
 0x5a4   : > { %v7866_v38 = vmul.f32 %v4171_v33, %v20063_v0  ;;  %v4176_v63 = vmul.f32 %v10820_v62, %v4175_v1  ;;  %v20236_v31 = vadd.f32 %v1636_v42, %v19279_v61  ;;  %v7287_v9 = vand.u32 2147483647, %v20192_v30  ;;  %vm4180_vm13 = vmor %vm4178_vm12, %vm4179_vm6 }
 0x5a5   : > { %v10822_v50 = vpop.eup %10821  ;;  %10825 = vpow2.f32 %v9465_v8  ;;  %v20240_v45 = vadd.f32 %v1360_v21, %v16738_v56  ;;  %v20243_v51 = vadd.f32 %v1467_v4, %v16962_v29  ;;  %v7289_v55 = vand.u32 2147483648, %v20192_v30 }
 0x5a6   : > { %v20245_v54 = vadd.f32 %v8371_v16, %v7866_v38  ;;  %v4177_v0 = vadd.f32 %v10820_v62, %v4176_v63  ;;  %v7279_v18 = vmul.f32 %v10822_v50, %v20192_v30  ;;  %vm7284_vm9 = vweird.f32 %v10822_v50 }
 0x5a7   : > { %v9466_v36 = vmul.f32 -1.442695, %v20236_v31  ;;  %v9673_v2 = vmul.f32 -1.442695, %v20240_v45  ;;  %v20254_v43 = vadd.f32 %v1526_v22, %v19273_v14  ;;  %v9654_v42 = vmul.f32 -1.442695, %v20243_v51  ;;  %vm20273_vm3 = vmor %vm7283_vm4, %vm7284_vm9  ;;  %v1529_v22 = vpop.f32.mrf.mxu0 }
 0x5a8   : > { %v10824_v17 = vpop.eup %10823  ;;  %v4181_v16 = vsel %vm4180_vm13, %v10820_v62, %v4177_v0  ;;  %v7280_v60 = vsub.f32 1.0, %v7279_v18  ;;  %v20258_v59 = vadd.f32 %v1639_v27, %v19279_v61  ;;  %v20265_v28 = vadd.f32 %v1363_v52, %v16738_v56 }
 0x5a9   : > { %v4186_v15 = vsel %vm20225_vm14, %v4185_v34, %v4181_v16  ;;  %v20262_v6 = vadd.f32 1.0, %v10824_v17  ;;  %10827 = vpow2.f32 %v9466_v36  ;;  %v6856_v24 = vsel %vm20202_vm11, %v6855_v20, %v6851_v57 }
 0x5aa   : > { %v7867_v21 = vmul.f32 %v4186_v15, %v20075_v23  ;;  %v7281_v7 = vmul.f32 %v10822_v50, %v7280_v60  ;;  %10829 = vpow2.f32 %v9673_v2  ;;  %vm20277_vm5 = vcmp.eq.f32.partialorder %v7287_v9, 8.507059e+37 }
 0x5ab   : > { %v10826_v25 = vpop.eup %10825  ;;  %v7290_v62 = vor.u32 1.1754944e-38, %v7289_v55  ;;  %10831 = vrcp.f32 %v20262_v6  ;;  %v9475_v23 = vmul.f32 -1.442695, %v20254_v43  ;;  %v9476_v30 = vmul.f32 -1.442695, %v20258_v59 }
 0x5ac   : > { %v20284_v40 = vadd.f32 %v20195_v37, %v7867_v21  ;;  %v7282_v46 = vadd.f32 %v10822_v50, %v7281_v7  ;;  %v20286_v41 = vadd.f32 1.0, %v10826_v25  ;;  %v8358_v20 = vadd.f32 %v20105_v3, %v20128_v5 }
 0x5ad   : > { %10833 = vpow2.f32 %v9654_v42  ;;  %v9683_v11 = vmul.f32 -1.442695, %v20265_v28  ;;  %v20293_v13 = vadd.f32 %v1470_v49, %v16962_v29  ;;  %v8064_v4 = vmul.f32 %v7141_v39, %v20013_v10 }
 0x5ae   : > { %v8045_v19 = vmul.f32 %v6856_v24, %v20046_v58  ;;  %v7286_v37 = vsel %vm20273_vm3, %v10822_v50, %v7282_v46  ;;  %10835 = vrcp.f32 %v20286_v41  ;;  %v7002_v3 = vand.u32 2147483647, %v20262_v6 }
 0x5af   : > { %v10828_v12 = vpop.eup %10827  ;;  %v7291_v35 = vsel %vm20277_vm5, %v7290_v62, %v7286_v37  ;;  %v7004_v5 = vand.u32 2147483648, %v20262_v6  ;;  %10837 = vpow2.f32 %v9475_v23  ;;  %v4319_v34 = vand.u32 2147483648, %v20286_v41 }
 0x5b0   : > { %v10830_v1 = vpop.eup %10829  ;;  %v20305_v10 = vadd.f32 1.0, %v10828_v12  ;;  %10839 = vpow2.f32 %v9476_v30  ;;  %v9664_v58 = vmul.f32 -1.442695, %v20293_v13  ;;  %v8074_v57 = vmul.f32 %v7291_v35, %v20111_v26 }
 0x5b1   : > { %v20308_v39 = vpop.eup %10831  ;;  %v4317_v33 = vand.u32 2147483647, %v20286_v41  ;;  %v20312_v8 = vadd.f32 1.0, %v10830_v1  ;;  %10841 = vpow2.f32 %v9683_v11  ;;  %v8330_v38 = vadd.f32 %v20107_v44, %v8064_v4 }
 0x5b2   : > { %v6994_v63 = vmul.f32 %v20308_v39, %v20262_v6  ;;  %10843 = vrcp.f32 %v20305_v10  ;;  %v20318_v9 = vadd.f32 %v8358_v20, %v8045_v19  ;;  %vm6998_vm2 = vweird.f32 %v20262_v6 }
 0x5b3   : > { %v10834_v50 = vpop.eup %10833  ;;  %v20321_v27 = vor.u32 1.1754944e-38, %v7004_v5  ;;  %10845 = vrcp.f32 %v20312_v8  ;;  %vm4313_vm7 = vweird.f32 %v20286_v41  ;;  %v4320_v44 = vor.u32 1.1754944e-38, %v4319_v34 }
 0x5b4   : > { %v10836_v26 = vpop.eup %10835  ;;  %v6995_v0 = vsub.f32 1.0, %v6994_v63  ;;  %10847 = vpow2.f32 %v9664_v58  ;;  %v20325_v55 = vadd.f32 %v8330_v38, %v8074_v57  ;;  %vm20327_vm1 = vcmp.eq.f32.partialorder %v7002_v3, 8.507059e+37 }
 0x5b5   : > { %v10838_v18 = vpop.eup %10837  ;;  %v4309_v36 = vmul.f32 %v10836_v26, %v20286_v41  ;;  %vm20332_vm10 = vcmp.eq.f32.partialorder %v4317_v33, 8.507059e+37  ;;  %v4332_v17 = vand.u32 2147483647, %v20305_v10  ;;  %v20338_v16 = vadd.f32 %v1529_v22, %v19273_v14 }
 0x5b6   : > { %v10840_v60 = vpop.eup %10839  ;;  %v6996_v42 = vmul.f32 %v20308_v39, %v6995_v0  ;;  %v4334_v15 = vand.u32 2147483648, %v20305_v10  ;;  %v7437_v24 = vand.u32 2147483647, %v20312_v8  ;;  %v20343_v21 = vadd.f32 1.0, %v10834_v50 }
 0x5b7   : > { %v10842_v7 = vpop.eup %10841  ;;  %vm6999_vm11 = vweird.f32 %v20308_v39  ;;  %v4310_v49 = vsub.f32 1.0, %v4309_v36  ;;  %vm4328_vm15 = vweird.f32 %v20305_v10  ;;  %v7439_v25 = vand.u32 2147483648, %v20312_v8 }
 0x5b8   : > { %v10844_v47 = vpop.eup %10843  ;;  %vm4314_vm8 = vweird.f32 %v10836_v26  ;;  %vm7433_vm0 = vweird.f32 %v20312_v8  ;;  %10849 = vrcp.f32 %v20343_v21  ;;  %v20350_v32 = vadd.f32 1.0, %v10838_v18  ;;  %vm20364_vm14 = vmor %vm6998_vm2, %vm6999_vm11 }
 0x5b9   : > { %v10846_v62 = vpop.eup %10845  ;;  %v6997_v23 = vadd.f32 %v20308_v39, %v6996_v42  ;;  %v4311_v46 = vmul.f32 %v10836_v26, %v4310_v49  ;;  %v4324_v30 = vmul.f32 %v10844_v47, %v20305_v10  ;;  %vm20354_vm12 = vcmp.eq.f32.partialorder %v4332_v17, 8.507059e+37  ;;  %vm4315_vm6 = vmor %vm4313_vm7, %vm4314_vm8 }
 0x5ba   : > { %v20358_v11 = vpop.eup %10847  ;;  %v4335_v19 = vor.u32 1.1754944e-38, %v4334_v15  ;;  %v7429_v37 = vmul.f32 %v10846_v62, %v20312_v8  ;;  %vm20369_vm4 = vcmp.eq.f32.partialorder %v7437_v24, 8.507059e+37  ;;  %v20373_v35 = vadd.f32 1.0, %v10840_v60 }
 0x5bb   : > { %v4312_v3 = vadd.f32 %v10836_v26, %v4311_v46  ;;  %v4325_v5 = vsub.f32 1.0, %v4324_v30  ;;  %v7440_v1 = vor.u32 1.1754944e-38, %v7439_v25  ;;  %v20375_v34 = vadd.f32 1.0, %v10842_v7 }
 0x5bc   : > { %v7430_v6 = vsub.f32 1.0, %v7429_v37  ;;  %vm7434_vm13 = vweird.f32 %v10846_v62  ;;  %v7152_v58 = vand.u32 2147483647, %v20343_v21  ;;  %10851 = vrcp.f32 %v20350_v32 }
 0x5bd   : > { %v7001_v57 = vsel %vm20364_vm14, %v20308_v39, %v6997_v23  ;;  %v4316_v33 = vsel %vm4315_vm6, %v10836_v26, %v4312_v3  ;;  %v4326_v38 = vmul.f32 %v10844_v47, %v4325_v5  ;;  %vm4329_vm9 = vweird.f32 %v10844_v47  ;;  %vm20394_vm5 = vmor %vm7433_vm0, %vm7434_vm13 }
 0x5be   : > { %v20385_v63 = vpop.eup %10849  ;;  %v4321_v22 = vsel %vm20332_vm10, %v4320_v44, %v4316_v33  ;;  %v7431_v41 = vmul.f32 %v10846_v62, %v7430_v6  ;;  %vm7148_vm3 = vweird.f32 %v20343_v21  ;;  %10853 = vrcp.f32 %v20373_v35  ;;  %vm4330_vm2 = vmor %vm4328_vm15, %vm4329_vm9 }
 0x5bf   : > { %v7876_v50 = vmul.f32 %v4321_v22, %v20208_v48  ;;  %v4327_v0 = vadd.f32 %v10844_v47, %v4326_v38  ;;  %v7144_v26 = vmul.f32 %v20385_v63, %v20343_v21  ;;  %v7154_v18 = vand.u32 2147483648, %v20343_v21 }
 0x5c0   : > { %v7006_v44 = vsel %vm20327_vm1, %v20321_v27, %v7001_v57  ;;  %v7432_v48 = vadd.f32 %v10846_v62, %v7431_v41  ;;  %v4467_v36 = vand.u32 2147483647, %v20350_v32  ;;  %v4469_v8 = vand.u32 2147483648, %v20350_v32  ;;  %v1642_v27 = vpop.f32.mrf.mxu1  ;;  %v1532_v57 = vpop.f32.mrf.mxu0 }
 0x5c1   : > { %v20409_v2 = vadd.f32 %v20245_v54, %v7876_v50  ;;  %v4331_v17 = vsel %vm4330_vm2, %v10844_v47, %v4327_v0  ;;  %v7145_v60 = vsub.f32 1.0, %v7144_v26  ;;  %vm7149_vm7 = vweird.f32 %v20385_v63  ;;  %v20422_v54 = vpop.f32.mrf.mxu3 }
 0x5c2   : > { %vm20412_vm10 = vcmp.eq.f32.partialorder %v7152_v58, 8.507059e+37  ;;  %v10852_v52 = vpop.eup %10851  ;;  %v4336_v10 = vsel %vm20354_vm12, %v4335_v19, %v4331_v17  ;;  %v7436_v15 = vsel %vm20394_vm5, %v10846_v62, %v7432_v48  ;;  %v4482_v24 = vand.u32 2147483647, %v20373_v35  ;;  %vm20447_vm15 = vmor %vm7148_vm3, %vm7149_vm7 }
 0x5c3   : > { %10855 = vrcp.f32 %v20375_v34  ;;  %v7877_v7 = vmul.f32 %v4336_v10, %v20236_v31  ;;  %v7441_v49 = vsel %vm20369_vm4, %v7440_v1, %v7436_v15  ;;  %v7146_v25 = vmul.f32 %v20385_v63, %v7145_v60 }
 0x5c4   : > { %v4459_v47 = vmul.f32 %v10852_v52, %v20350_v32  ;;  %v10854_v23 = vpop.eup %10853  ;;  %v20430_v46 = vmul.f32 %v7006_v44, %v20172_v53  ;;  %v7155_v62 = vor.u32 1.1754944e-38, %v7154_v18  ;;  %vm4463_vm1 = vweird.f32 %v20350_v32  ;;  %v1366_v18 = vpop.f32.mrf.mxu2 }
 0x5c5   : > { %vm20433_vm11 = vcmp.eq.f32.partialorder %v4467_v36, 8.507059e+37  ;;  %v8404_v31 = vadd.f32 %v20284_v40, %v7877_v7  ;;  %v7147_v20 = vadd.f32 %v20385_v63, %v7146_v25  ;;  %v4474_v19 = vmul.f32 %v10854_v23, %v20373_v35 }
 0x5c6   : > { %v4460_v4 = vsub.f32 1.0, %v4459_v47  ;;  %v20441_v37 = vmul.f32 %v7441_v49, %v20240_v45  ;;  %v4470_v12 = vor.u32 1.1754944e-38, %v4469_v8  ;;  %vm4478_vm8 = vweird.f32 %v20373_v35 }
 0x5c7   : > { %v4484_v40 = vand.u32 2147483648, %v20373_v35  ;;  %vm4464_vm0 = vweird.f32 %v10852_v52  ;;  %v4475_v5 = vsub.f32 1.0, %v4474_v19  ;;  %vm20453_vm12 = vcmp.eq.f32.partialorder %v4482_v24, 8.507059e+37 }
 0x5c8   : > { %v4461_v3 = vmul.f32 %v10852_v52, %v4460_v4  ;;  %vm4479_vm14 = vweird.f32 %v10854_v23  ;;  %v7587_v21 = vand.u32 2147483647, %v20375_v34  ;;  %v20459_v6 = vadd.f32 1.0, %v20358_v11  ;;  %vm4465_vm4 = vmor %vm4463_vm1, %vm4464_vm0  ;;  %v1535_v19 = vpop.f32.mrf.mxu0 }
 0x5c9   : > { %v10856_v45 = vpop.eup %10855  ;;  %v9485_v58 = vmul.f32 -1.442695, %v20338_v16  ;;  %v7151_v33 = vsel %vm20447_vm15, %v20385_v63, %v7147_v20  ;;  %v4476_v22 = vmul.f32 %v10854_v23, %v4475_v5  ;;  %v4485_v50 = vor.u32 1.1754944e-38, %v4484_v40  ;;  %v1645_v63 = vpop.f32.mrf.mxu1  ;;  %vm4480_vm9 = vmor %vm4478_vm8, %vm4479_vm14 }
 0x5ca   : > { %v4462_v38 = vadd.f32 %v10852_v52, %v4461_v3  ;;  %v7579_v41 = vmul.f32 %v10856_v45, %v20375_v34  ;;  %vm7583_vm6 = vweird.f32 %v20375_v34  ;;  %v7589_v11 = vand.u32 2147483648, %v20375_v34  ;;  %v1476_v36 = vpop.f32.mrf.mxu3 }
 0x5cb   : > { %10857 = vrcp.f32 %v20459_v6  ;;  %v4477_v39 = vadd.f32 %v10854_v23, %v4476_v22  ;;  %vm7584_vm13 = vweird.f32 %v10856_v45  ;;  %v7156_v44 = vsel %vm20412_vm10, %v7155_v62, %v7151_v33 }
 0x5cc   : > { %v4466_v0 = vsel %vm4465_vm4, %v10852_v52, %v4462_v38  ;;  %v7580_v26 = vsub.f32 1.0, %v7579_v41  ;;  %vm20478_vm3 = vcmp.eq.f32.partialorder %v7587_v21, 8.507059e+37  ;;  %10859 = vpow2.f32 %v9485_v58  ;;  %vm20490_vm5 = vmor %vm7583_vm6, %vm7584_vm13 }
 0x5cd   : > { %v4471_v32 = vsel %vm20433_vm11, %v4470_v12, %v4466_v0  ;;  %v4481_v17 = vsel %vm4480_vm9, %v10854_v23, %v4477_v39  ;;  %v20484_v42 = vadd.f32 %v1642_v27, %v19279_v61  ;;  %v7590_v10 = vor.u32 1.1754944e-38, %v7589_v11  ;;  %v8641_v0 = vld [vmem:[#allocation3 + $0x370] sm:$0xff] }
 0x5ce   : > { %v7886_v8 = vmul.f32 %v4471_v32, %v20254_v43  ;;  %v7581_v60 = vmul.f32 %v10856_v45, %v7580_v26  ;;  %v4486_v52 = vsel %vm20453_vm12, %v4485_v50, %v4481_v17  ;;  %vm7298_vm2 = vweird.f32 %v20459_v6  ;;  %v8640_v32 = vld [vmem:[#allocation3 + $0x368] sm:$0xff] }
 0x5cf   : > { %v20496_v15 = vadd.f32 %v1366_v18, %v16738_v56  ;;  %v7887_v27 = vmul.f32 %v4486_v52, %v20258_v59  ;;  %v9486_v7 = vmul.f32 -1.442695, %v20484_v42  ;;  %v20508_v25 = vadd.f32 %v20422_v54, %v16962_v29 }
 0x5d0   : > { %v20499_v43 = vadd.f32 %v20409_v2, %v7886_v8  ;;  %v7582_v24 = vadd.f32 %v10856_v45, %v7581_v60  ;;  %v20511_v47 = vadd.f32 %v1532_v57, %v19273_v14  ;;  %v20514_v56 = vadd.f32 %v1645_v63, %v19279_v61 }
 0x5d1   : > { %v20503_v49 = vpop.eup %10857  ;;  %v9693_v34 = vmul.f32 -1.442695, %v20496_v15  ;;  %v20516_v2 = vadd.f32 %v8404_v31, %v7887_v27  ;;  %v7302_v62 = vand.u32 2147483647, %v20459_v6  ;;  %v7304_v54 = vand.u32 2147483648, %v20459_v6  ;;  %v1648_v21 = vpop.f32.mrf.mxu1  ;;  %v8639_v27 = vld [vmem:[#allocation3 + $0x360] sm:$0xff] }
 0x5d2   : > { %v7586_v59 = vsel %vm20490_vm5, %v10856_v45, %v7582_v24  ;;  %v7294_v23 = vmul.f32 %v20503_v49, %v20459_v6  ;;  %v10860_v30 = vpop.eup %10859  ;;  %10861 = vpow2.f32 %v9486_v7  ;;  %v9674_v20 = vmul.f32 -1.442695, %v20508_v25 }
 0x5d3   : > { %v9495_v4 = vmul.f32 -1.442695, %v20511_v47  ;;  %vm7299_vm7 = vweird.f32 %v20503_v49  ;;  %v20527_v31 = vadd.f32 1.0, %v10860_v30  ;;  %10863 = vpow2.f32 %v9693_v34 }
 0x5d4   : > { %v7295_v53 = vsub.f32 1.0, %v7294_v23  ;;  %v7591_v12 = vsel %vm20478_vm3, %v7590_v10, %v7586_v59  ;;  %10865 = vpow2.f32 %v9674_v20  ;;  %v9496_v40 = vmul.f32 -1.442695, %v20514_v56  ;;  %vm20544_vm10 = vmor %vm7298_vm2, %vm7299_vm7  ;;  %v1538_v10 = vpop.f32.mrf.mxu0 }
 0x5d5   : > { %v20533_v3 = vadd.f32 %v1476_v36, %v16962_v29  ;;  %v8360_v5 = vadd.f32 %v20318_v9, %v20430_v46  ;;  %v8332_v1 = vadd.f32 %v20325_v55, %v20441_v37  ;;  %10867 = vrcp.f32 %v20527_v31  ;;  %v1479_v55 = vpop.f32.mrf.mxu3  ;;  %v8642_v46 = vld [vmem:[#allocation3 + $0x378] sm:$0xff] }
 0x5d6   : > { %v7296_v45 = vmul.f32 %v20503_v49, %v7295_v53  ;;  %v8065_v58 = vmul.f32 %v7156_v44, %v20243_v51  ;;  %vm20548_vm1 = vcmp.eq.f32.partialorder %v7302_v62, 8.507059e+37  ;;  %10869 = vpow2.f32 %v9495_v4  ;;  %8812 = vmatpush.msra.mxu2 %v8642_v46 }
 0x5d7   : > { %v9684_v9 = vmul.f32 -1.442695, %v20533_v3  ;;  %v8094_v37 = vmul.f32 %v7591_v12, %v20265_v28  ;;  %v7305_v51 = vor.u32 1.1754944e-38, %v7304_v54  ;;  %v4617_v6 = vand.u32 2147483647, %v20527_v31 }
 0x5d8   : > { %v7297_v38 = vadd.f32 %v20503_v49, %v7296_v45  ;;  %v10862_v22 = vpop.eup %10861  ;;  %v4619_v41 = vand.u32 2147483648, %v20527_v31  ;;  %10871 = vpow2.f32 %v9496_v40  ;;  %v20558_v50 = vadd.f32 %v1535_v19, %v19273_v14  ;;  %8813 = vmatpush.msra.mxu2 %v8641_v0  ;;  %v8638_v45 = vld [vmem:[#allocation3 + $0x358] sm:$0xff] }
 0x5d9   : > { %v20561_v11 = vadd.f32 %v1648_v21, %v19279_v61  ;;  %v10864_v39 = vpop.eup %10863  ;;  %v20566_v26 = vadd.f32 1.0, %v10862_v22  ;;  %10873 = vpow2.f32 %v9684_v9  ;;  %v20569_v18 = vadd.f32 %v1479_v55, %v16962_v29 }
 0x5da   : > { %v7301_v28 = vsel %vm20544_vm10, %v20503_v49, %v7297_v38  ;;  %v10866_v63 = vpop.eup %10865  ;;  %v20571_v44 = vadd.f32 1.0, %v10864_v39  ;;  %v20573_v36 = vadd.f32 %v8360_v5, %v8065_v58  ;;  %v20575_v8 = vadd.f32 %v8332_v1, %v8094_v37  ;;  %8814 = vmatpush.msra.mxu2 %v8640_v32 }
 0x5db   : > { %v10868_v48 = vpop.eup %10867  ;;  %vm4613_vm11 = vweird.f32 %v20527_v31  ;;  %10875 = vrcp.f32 %v20566_v26  ;;  %v7306_v29 = vsel %vm20548_vm1, %v7305_v51, %v7301_v28  ;;  %vm20582_vm15 = vcmp.eq.f32.partialorder %v4617_v6, 8.507059e+37  ;;  %v8637_v6 = vld [vmem:[#allocation3 + $0x350] sm:$0xff]  ;;  %v8636_v28 = vld [vmem:[#allocation3 + $0x348] sm:$0xff] }
 0x5dc   : > { %v10870_v17 = vpop.eup %10869  ;;  %v4609_v60 = vmul.f32 %v10868_v48, %v20527_v31  ;;  %10877 = vrcp.f32 %v20571_v44  ;;  %v20588_v35 = vmul.f32 -1.442695, %v20558_v50  ;;  %v4620_v24 = vor.u32 1.1754944e-38, %v4619_v41  ;;  %8815 = vmatpush.msra.mxu2 %v8639_v27  ;;  %v20691_v33 = vpop.f32.mrf.mxu0 }
 0x5dd   : > { %v4634_v7 = vand.u32 2147483648, %v20566_v26  ;;  %v20592_v49 = vmul.f32 -1.442695, %v20561_v11  ;;  %v20595_v34 = vmul.f32 -1.442695, %v20569_v18  ;;  %v20599_v54 = vadd.f32 1.0, %v10866_v63 }
 0x5de   : > { %v10872_v59 = vpop.eup %10871  ;;  %v4610_v23 = vsub.f32 1.0, %v4609_v60  ;;  %v4632_v62 = vand.u32 2147483647, %v20566_v26  ;;  %v7737_v30 = vand.u32 2147483647, %v20571_v44  ;;  %v20602_v4 = vmul.f32 %v7306_v29, %v20293_v13  ;;  %8816 = vmatpush.msra.mxu2 %v8638_v45 }
 0x5df   : > { %v10874_v20 = vpop.eup %10873  ;;  %v7739_v19 = vand.u32 2147483648, %v20571_v44  ;;  %v20605_v53 = vadd.f32 1.0, %v10870_v17  ;;  %v20608_v12 = vadd.f32 %v1538_v10, %v19273_v14  ;;  %vm4614_vm8 = vweird.f32 %v10868_v48  ;;  %v8656_v10 = vld [vmem:[#allocation3 + $0x3e8] sm:$0xff] }
 0x5e0   : > { %v4611_v40 = vmul.f32 %v10868_v48, %v4610_v23  ;;  %vm4628_vm0 = vweird.f32 %v20566_v26  ;;  %10879 = vrcp.f32 %v20599_v54  ;;  %v4635_v1 = vor.u32 1.1754944e-38, %v4634_v7  ;;  %vm4615_vm6 = vmor %vm4613_vm11, %vm4614_vm8  ;;  %8817 = vmatpush.msra.mxu2 %v8637_v6 }
 0x5e1   : > { %v10876_v5 = vpop.eup %10875  ;;  %vm7733_vm12 = vweird.f32 %v20571_v44  ;;  %10881 = vrcp.f32 %v20605_v53  ;;  %v20614_v13 = vadd.f32 1.0, %v10872_v59  ;;  %vm20617_vm14 = vcmp.eq.f32.partialorder %v4632_v62, 8.507059e+37 }
 0x5e2   : > { %v10878_v21 = vpop.eup %10877  ;;  %v4612_v58 = vadd.f32 %v10868_v48, %v4611_v40  ;;  %v4624_v57 = vmul.f32 %v10876_v5, %v20566_v26  ;;  %vm20621_vm4 = vcmp.eq.f32.partialorder %v7737_v30, 8.507059e+37  ;;  %v20625_v55 = vadd.f32 1.0, %v10874_v20  ;;  %8818 = vmatpush.msra.mxu2 %v8636_v28  ;;  %v20664_v30 = vpop.f32.mrf.mxu1 }
 0x5e3   : > { %v7729_v46 = vmul.f32 %v10878_v21, %v20571_v44  ;;  %v7740_v37 = vor.u32 1.1754944e-38, %v7739_v19  ;;  %v7452_v38 = vand.u32 2147483647, %v20599_v54  ;;  %v7454_v51 = vand.u32 2147483648, %v20599_v54 }
 0x5e4   : > { %v4616_v22 = vsel %vm4615_vm6, %v10868_v48, %v4612_v58  ;;  %v4625_v41 = vsub.f32 1.0, %v4624_v57  ;;  %vm7448_vm13 = vweird.f32 %v20599_v54  ;;  %v4767_v0 = vand.u32 2147483647, %v20605_v53 }
 0x5e5   : > { %v4621_v39 = vsel %vm20582_vm15, %v4620_v24, %v4616_v22  ;;  %v7730_v31 = vsub.f32 1.0, %v7729_v46  ;;  %vm7734_vm9 = vweird.f32 %v10878_v21  ;;  %10883 = vrcp.f32 %v20614_v13  ;;  %v8635_v24 = vld [vmem:[#allocation3 + $0x340] sm:$0xff] }
 0x5e6   : > { %v20638_v63 = vpop.eup %10879  ;;  %v7896_v32 = vmul.f32 %v4621_v39, %v20338_v16  ;;  %v4626_v17 = vmul.f32 %v10876_v5, %v4625_v41  ;;  %vm4629_vm3 = vweird.f32 %v10876_v5  ;;  %vm4763_vm5 = vweird.f32 %v20605_v53  ;;  %vm20655_vm7 = vmor %vm7733_vm12, %vm7734_vm9  ;;  %8819 = vmatpush.msra.mxu2 %v8635_v24 }
 0x5e7   : > { %v4769_v48 = vand.u32 2147483648, %v20605_v53  ;;  %v10882_v29 = vpop.eup %10881  ;;  %v7731_v60 = vmul.f32 %v10878_v21, %v7730_v31  ;;  %v7444_v52 = vmul.f32 %v20638_v63, %v20599_v54  ;;  %vm20645_vm2 = vcmp.eq.f32.partialorder %v7452_v38, 8.507059e+37  ;;  %vm4630_vm1 = vmor %vm4628_vm0, %vm4629_vm3  ;;  %v8658_v31 = vld [vmem:[#allocation3 + $0x3f8] sm:$0xff] }
 0x5e8   : > { %v7455_v27 = vor.u32 1.1754944e-38, %v7454_v51  ;;  %v20650_v16 = vadd.f32 %v20499_v43, %v7896_v32  ;;  %v4627_v7 = vadd.f32 %v10876_v5, %v4626_v17  ;;  %v4759_v23 = vmul.f32 %v10882_v29, %v20605_v53  ;;  %8832 = vmatpush.msrb.mxu3 %v8658_v31  ;;  %v8628_v31 = vld [vmem:[#allocation3 + $0x308] sm:$0xff] }
 0x5e9   : > { %vm20660_vm10 = vcmp.eq.f32.partialorder %v4767_v0, 8.507059e+37  ;;  %v7732_v43 = vadd.f32 %v10878_v21, %v7731_v60  ;;  %v7445_v20 = vsub.f32 1.0, %v7444_v52  ;;  %vm7449_vm11 = vweird.f32 %v20638_v63  ;;  %v8633_v60 = vld [vmem:[#allocation3 + $0x330] sm:$0xff] }
 0x5ea   : > { %v4784_v44 = vand.u32 2147483648, %v20614_v13  ;;  %v4631_v19 = vsel %vm4630_vm1, %v10876_v5, %v4627_v7  ;;  %v4760_v40 = vsub.f32 1.0, %v4759_v23  ;;  %v4770_v45 = vor.u32 1.1754944e-38, %v4769_v48  ;;  %vm20685_vm0 = vmor %vm7448_vm13, %vm7449_vm11  ;;  %v8657_v52 = vld [vmem:[#allocation3 + $0x3f0] sm:$0xff]  ;;  %v20724_v59 = vpop.f32.mrf.mxu1 }
 0x5eb   : > { %vm4778_vm15 = vweird.f32 %v20614_v13  ;;  %10885 = vrcp.f32 %v20625_v55  ;;  %v20673_v58 = vpop.eup %10883  ;;  %v4636_v57 = vsel %vm20617_vm14, %v4635_v1, %v4631_v19  ;;  %v7736_v26 = vsel %vm20655_vm7, %v10878_v21, %v7732_v43  ;;  %8833 = vmatpush.msrb.mxu3 %v8657_v52 }
 0x5ec   : > { %v7446_v46 = vmul.f32 %v20638_v63, %v7445_v20  ;;  %vm4764_vm8 = vweird.f32 %v10882_v29  ;;  %v7897_v38 = vmul.f32 %v4636_v57, %v20484_v42  ;;  %v7741_v5 = vsel %vm20621_vm4, %v7740_v37, %v7736_v26  ;;  %v20753_v26 = vpop.f32.mrf.mxu0 }
 0x5ed   : > { %v4761_v6 = vmul.f32 %v10882_v29, %v4760_v40  ;;  %v4774_v1 = vmul.f32 %v20673_v58, %v20614_v13  ;;  %v8104_v21 = vmul.f32 %v7741_v5, %v20496_v15  ;;  %v4782_v42 = vand.u32 2147483647, %v20614_v13  ;;  %vm4765_vm14 = vmor %vm4763_vm5, %vm4764_vm8  ;;  %8834 = vmatpush.msrb.mxu3 %v8656_v10  ;;  %v8655_v40 = vld [vmem:[#allocation3 + $0x3e0] sm:$0xff]  ;;  %v8654_v5 = vld [vmem:[#allocation3 + $0x3d8] sm:$0xff] }
 0x5ee   : > { %v7447_v22 = vadd.f32 %v20638_v63, %v7446_v46  ;;  %v4785_v9 = vor.u32 1.1754944e-38, %v4784_v44  ;;  %v20697_v37 = vadd.f32 %v20516_v2, %v7897_v38  ;;  %vm7598_vm12 = vweird.f32 %v20625_v55  ;;  %v8634_v2 = vld [vmem:[#allocation3 + $0x338] sm:$0xff] }
 0x5ef   : > { %v4762_v54 = vadd.f32 %v10882_v29, %v4761_v6  ;;  %v4775_v41 = vsub.f32 1.0, %v4774_v1  ;;  %v8334_v0 = vadd.f32 %v20575_v8, %v8104_v21  ;;  %v7602_v15 = vand.u32 2147483647, %v20625_v55  ;;  %8820 = vmatpush.msra.mxu2 %v8634_v2  ;;  %8835 = vmatpush.msrb.mxu3 %v8655_v40 }
 0x5f0   : > { %v7451_v39 = vsel %vm20685_vm0, %v20638_v63, %v7447_v22  ;;  %10887 = vpow2.f32 %v20588_v35  ;;  %vm4779_vm4 = vweird.f32 %v20673_v58  ;;  %v7604_v8 = vand.u32 2147483648, %v20625_v55 }
 0x5f1   : > { %v20709_v28 = vpop.eup %10885  ;;  %v4766_v32 = vsel %vm4765_vm14, %v10882_v29, %v4762_v54  ;;  %v4776_v17 = vmul.f32 %v20673_v58, %v4775_v41  ;;  %v8497_v63 = vrot.slane %v8334_v0, 4  ;;  %v9515_v48 = vmul.f32 -1.442695, %v20608_v12  ;;  %8821 = vmatpush.msra.mxu2 %v8633_v60  ;;  %vm4780_vm6 = vmor %vm4778_vm15, %vm4779_vm4  ;;  %8836 = vmatpush.msrb.mxu3 %v8654_v5  ;;  %v8629_v41 = vld [vmem:[#allocation3 + $0x310] sm:$0xff] }
 0x5f2   : > { %v4771_v53 = vsel %vm20660_vm10, %v4770_v45, %v4766_v32  ;;  %v7594_v35 = vmul.f32 %v20709_v28, %v20625_v55  ;;  %v7456_v29 = vsel %vm20645_vm2, %v7455_v27, %v7451_v39  ;;  %10889 = vpow2.f32 %v20592_v49  ;;  %v8630_v55 = vld [vmem:[#allocation3 + $0x318] sm:$0xff] }
 0x5f3   : > { %v7906_v24 = vmul.f32 %v4771_v53, %v20511_v47  ;;  %v4777_v7 = vadd.f32 %v20673_v58, %v4776_v17  ;;  %v8498_v23 = vadd.f32 %v8497_v63, %v8334_v0  ;;  %vm7599_vm13 = vweird.f32 %v20709_v28  ;;  %v8632_v47 = vld [vmem:[#allocation3 + $0x328] sm:$0xff]  ;;  %v8653_v0 = vld [vmem:[#allocation3 + $0x3d0] sm:$0xff]  ;;  %v20785_v17 = vpop.f32.mrf.mxu1  ;;  %v8627_v53 = vld [vmem:[#allocation3 + $0x300] sm:$0xff] }
 0x5f4   : > { %v7595_v62 = vsub.f32 1.0, %v7594_v35  ;;  %10891 = vpow2.f32 %v20595_v34  ;;  %vm4783_vm9 = vcmp.eq.f32.partialorder %v4782_v42, 8.507059e+37  ;;  %v20738_v43 = vadd.f32 %v20664_v30, %v19279_v61  ;;  %8822 = vmatpush.msra.mxu2 %v8632_v47  ;;  %v8631_v34 = vld [vmem:[#allocation3 + $0x320] sm:$0xff]  ;;  %vm20746_vm3 = vmor %vm7598_vm12, %vm7599_vm13  ;;  %8837 = vmatpush.msrb.mxu3 %v8653_v0 }
 0x5f5   : > { %v20733_v27 = vadd.f32 %v20650_v16, %v7906_v24  ;;  %v4781_v49 = vsel %vm4780_vm6, %v20673_v58, %v4777_v7  ;;  %v8499_v20 = vrot.slane %v8498_v23, 2  ;;  %10893 = vpow2.f32 %v9515_v48  ;;  %v8651_v35 = vld [vmem:[#allocation3 + $0x3c0] sm:$0xff] }
 0x5f6   : > { %v10888_v13 = vpop.eup %10887  ;;  %v4786_v44 = vsel %vm4783_vm9, %v4785_v9, %v4781_v49  ;;  %v7596_v19 = vmul.f32 %v20709_v28, %v7595_v62  ;;  %v7605_v30 = vor.u32 1.1754944e-38, %v7604_v8  ;;  %v9516_v57 = vmul.f32 -1.442695, %v20738_v43  ;;  %8823 = vmatpush.msra.mxu2 %v8631_v34  ;;  %v8650_v62 = vld [vmem:[#allocation3 + $0x3b8] sm:$0xff]  ;;  %v8649_v34 = vld [vmem:[#allocation3 + $0x3b0] sm:$0xff] }
 0x5f7   : > { %v7907_v16 = vmul.f32 %v4786_v44, %v20514_v56  ;;  %v20750_v58 = vadd.f32 1.0, %v10888_v13  ;;  %v8500_v46 = vadd.f32 %v8499_v20, %v8498_v23  ;;  %vm20756_vm5 = vcmp.eq.f32.partialorder %v7602_v15, 8.507059e+37  ;;  %v20811_v13 = vpop.f32.mrf.mxu0 }
 0x5f8   : > { %v7597_v56 = vadd.f32 %v20709_v28, %v7596_v19  ;;  %v10890_v51 = vpop.eup %10889  ;;  %v8362_v6 = vadd.f32 %v20573_v36, %v20602_v4  ;;  %8824 = vmatpush.msra.mxu2 %v8630_v55  ;;  %v8085_v42 = vmul.f32 %v7456_v29, %v20508_v25  ;;  %v20789_v63 = vadd.f32 %v20724_v59, %v19279_v61  ;;  %v8648_v55 = vld [vmem:[#allocation3 + $0x3a8] sm:$0xff] }
 0x5f9   : > { %v20763_v1 = vadd.f32 %v20697_v37, %v7907_v16  ;;  %10895 = vrcp.f32 %v20750_v58  ;;  %v8501_v22 = vrot.slane %v8500_v46, 1  ;;  %v20770_v54 = vadd.f32 1.0, %v10890_v51 }
 0x5fa   : > { %v10892_v21 = vpop.eup %10891  ;;  %v7601_v9 = vsel %vm20746_vm3, %v20709_v28, %v7597_v56  ;;  %10897 = vpow2.f32 %v9516_v57  ;;  %v20778_v37 = vadd.f32 %v20691_v33, %v19273_v14  ;;  %8825 = vmatpush.msra.mxu2 %v8629_v41  ;;  %v4917_v15 = vand.u32 2147483647, %v20750_v58  ;;  %v8652_v28 = vld [vmem:[#allocation3 + $0x3c8] sm:$0xff] }
 0x5fb   : > { %v7606_v36 = vsel %vm20756_vm5, %v7605_v30, %v7601_v9  ;;  %v20774_v4 = vadd.f32 1.0, %v10892_v21  ;;  %v10894_v25 = vpop.eup %10893  ;;  %v8502_v39 = vadd.f32 %v8501_v22, %v8500_v46  ;;  %v4919_v2 = vand.u32 2147483648, %v20750_v58  ;;  %8838 = vmatpush.msrb.mxu3 %v8652_v28 }
 0x5fc   : > { %10899 = vrcp.f32 %v20770_v54  ;;  %v8095_v32 = vmul.f32 %v7606_v36, %v20533_v3  ;;  %8826 = vmatpush.msra.mxu2 %v8628_v31  ;;  %v8363_v8 = vadd.f32 %v8362_v6, %v8085_v42  ;;  %vm4913_vm2 = vweird.f32 %v20750_v58  ;;  %v8647_v42 = vld [vmem:[#allocation3 + $0x3a0] sm:$0xff]  ;;  %v20846_v36 = vpop.f32.mrf.mxu1 }
 0x5fd   : > { %10901 = vrcp.f32 %v20774_v4  ;;  %v8527_v33 = vmul.f32 0.00390625, %v8502_v39  ;;  %v4932_v3 = vand.u32 2147483647, %v20770_v54  ;;  %v4934_v60 = vand.u32 2147483648, %v20770_v54  ;;  %8839 = vmatpush.msrb.mxu3 %v8651_v35 }
 0x5fe   : > { %v20796_v52 = vadd.f32 1.0, %v10894_v25  ;;  %8827 = vmatpush.msra.mxu2 %v8627_v53  ;;  %vm20800_vm7 = vcmp.eq.f32.partialorder %v4917_v15, 8.507059e+37  ;;  %v4920_v7 = vor.u32 1.1754944e-38, %v4919_v2  ;;  %v7752_v59 = vand.u32 2147483647, %v20774_v4 }
 0x5ff   : > { %v20791_v48 = vpop.eup %10895  ;;  %v9525_v23 = vmul.f32 -1.442695, %v20778_v37  ;;  %8828 = vmatmul.f32.vlgmr.msra.gmra.mxu2 %v8527_v33  ;;  %v20806_v10 = vadd.f32 %v8363_v8, %v8095_v32  ;;  %vm4928_vm10 = vweird.f32 %v20770_v54  ;;  %v7754_v49 = vand.u32 2147483648, %v20774_v4  ;;  %8840 = vmatpush.msrb.mxu3 %v8650_v62  ;;  %v8646_v8 = vld [vmem:[#allocation3 + $0x398] sm:$0xff]  ;;  %v20876_v24 = vpop.f32.mrf.mxu0 }
 0x600   : > { %v4909_v29 = vmul.f32 %v20791_v48, %v20750_v58  ;;  %v10898_v47 = vpop.eup %10897  ;;  %10903 = vrcp.f32 %v20796_v52  ;;  %vm7748_vm1 = vweird.f32 %v20774_v4  ;;  %vm20820_vm11 = vcmp.eq.f32.partialorder %v4932_v3, 8.507059e+37 }
 0x601   : > { %v20816_v19 = vadd.f32 1.0, %v10898_v47  ;;  %10905 = vpow2.f32 %v9525_v23  ;;  %v4935_v30 = vor.u32 1.1754944e-38, %v4934_v60  ;;  %v9526_v57 = vmul.f32 -1.442695, %v20789_v63  ;;  %8841 = vmatpush.msrb.mxu3 %v8649_v34  ;;  %v8644_v34 = vld [vmem:[#allocation3 + $0x388] sm:$0xff] }
 0x602   : > { %v20813_v20 = vpop.eup %10899  ;;  %v4910_v44 = vsub.f32 1.0, %v4909_v29  ;;  %vm4914_vm15 = vweird.f32 %v20791_v48  ;;  %vm20828_vm8 = vcmp.eq.f32.partialorder %v7752_v59, 8.507059e+37  ;;  %v7755_v51 = vor.u32 1.1754944e-38, %v7754_v49 }
 0x603   : > { %v10902_v40 = vpop.eup %10901  ;;  %v4924_v16 = vmul.f32 %v20813_v20, %v20770_v54  ;;  %v5067_v6 = vand.u32 2147483647, %v20796_v52  ;;  %10907 = vrcp.f32 %v20816_v19  ;;  %8842 = vmatpush.msrb.mxu3 %v8648_v55  ;;  %vm4915_vm12 = vmor %vm4913_vm2, %vm4914_vm15  ;;  %vm4929_vm14 = vweird.f32 %v20813_v20 }
 0x604   : > { %v4911_v46 = vmul.f32 %v20791_v48, %v4910_v44  ;;  %v7744_v56 = vmul.f32 %v10902_v40, %v20774_v4  ;;  %vm7749_vm0 = vweird.f32 %v10902_v40  ;;  %10909 = vpow2.f32 %v9526_v57  ;;  %vm4930_vm9 = vmor %vm4928_vm10, %vm4929_vm14  ;;  %v8643_v57 = vld [vmem:[#allocation3 + $0x380] sm:$0xff] }
 0x605   : > { %v4925_v5 = vsub.f32 1.0, %v4924_v16  ;;  %vm5063_vm4 = vweird.f32 %v20796_v52  ;;  %v20844_v0 = vadd.f32 %v20753_v26, %v19273_v14  ;;  %8843 = vmatpush.msrb.mxu3 %v8647_v42  ;;  %v5069_v2 = vand.u32 2147483648, %v20796_v52  ;;  %vm20857_vm6 = vmor %vm7748_vm1, %vm7749_vm0 }
 0x606   : > { %v4912_v21 = vadd.f32 %v20791_v48, %v4911_v46  ;;  %v7745_v22 = vsub.f32 1.0, %v7744_v56  ;;  %v10904_v9 = vpop.eup %10903  ;;  %vm20861_vm13 = vcmp.eq.f32.partialorder %v5067_v6, 8.507059e+37  ;;  %vm5078_vm5 = vweird.f32 %v20816_v19 }
 0x607   : > { %v4926_v41 = vmul.f32 %v20813_v20, %v4925_v5  ;;  %v10906_v25 = vpop.eup %10905  ;;  %v5059_v58 = vmul.f32 %v10904_v9, %v20796_v52  ;;  %8844 = vmatpush.msrb.mxu3 %v8646_v8  ;;  %vm5064_vm3 = vweird.f32 %v10904_v9  ;;  %v9535_v29 = vmul.f32 -1.442695, %v20844_v0  ;;  %v1663_v5 = vpop.f32.mrf.mxu1 }
 0x608   : > { %v4916_v39 = vsel %vm4915_vm12, %v20791_v48, %v4912_v21  ;;  %v7746_v15 = vmul.f32 %v10902_v40, %v7745_v22  ;;  %v20865_v33 = vadd.f32 1.0, %v10906_v25  ;;  %v5082_v48 = vand.u32 2147483647, %v20816_v19  ;;  %vm5065_vm2 = vmor %vm5063_vm4, %vm5064_vm3 }
 0x609   : > { %v4921_v31 = vsel %vm20800_vm7, %v4920_v7, %v4916_v39  ;;  %v4927_v28 = vadd.f32 %v20813_v20, %v4926_v41  ;;  %v5060_v4 = vsub.f32 1.0, %v5059_v58  ;;  %v10908_v3 = vpop.eup %10907  ;;  %v5084_v45 = vand.u32 2147483648, %v20816_v19 }
 0x60a   : > { %v7916_v53 = vmul.f32 %v4921_v31, %v20558_v50  ;;  %v7747_v35 = vadd.f32 %v10902_v40, %v7746_v15  ;;  %10911 = vrcp.f32 %v20865_v33  ;;  %v8645_v50 = vld [vmem:[#allocation3 + $0x390] sm:$0xff]  ;;  %v10910_v7 = vpop.eup %10909  ;;  %v5074_v44 = vmul.f32 %v10908_v3, %v20816_v19 }
 0x60b   : > { %v4931_v60 = vsel %vm4930_vm9, %v20813_v20, %v4927_v28  ;;  %v5061_v62 = vmul.f32 %v10904_v9, %v5060_v4  ;;  %8845 = vmatpush.msrb.mxu3 %v8645_v50  ;;  %v5070_v20 = vor.u32 1.1754944e-38, %v5069_v2  ;;  %10913 = vpow2.f32 %v9535_v29  ;;  %v1553_v2 = vpop.f32.mrf.mxu0 }
 0x60c   : > { %v8377_v54 = vadd.f32 %v20733_v27, %v7916_v53  ;;  %v4936_v59 = vsel %vm20820_vm11, %v4935_v30, %v4931_v60  ;;  %v7751_v23 = vsel %vm20857_vm6, %v10902_v40, %v7747_v35  ;;  %v20894_v30 = vadd.f32 1.0, %v10910_v7 }
 0x60d   : > { %v7917_v47 = vmul.f32 %v4936_v59, %v20561_v11  ;;  %v7756_v49 = vsel %vm20828_vm8, %v7755_v51, %v7751_v23  ;;  %v5062_v27 = vadd.f32 %v10904_v9, %v5061_v62  ;;  %8846 = vmatpush.msrb.mxu3 %v8644_v34  ;;  %v5075_v11 = vsub.f32 1.0, %v5074_v44 }
 0x60e   : > { %v8105_v16 = vmul.f32 %v7756_v49, %v20569_v18  ;;  %vm20897_vm7 = vcmp.eq.f32.partialorder %v5082_v48, 8.507059e+37  ;;  %v20903_v38 = vadd.f32 %v20785_v17, %v19279_v61  ;;  %vm5079_vm10 = vweird.f32 %v10908_v3 }
 0x60f   : > { %v8408_v40 = vadd.f32 %v20763_v1, %v7917_v47  ;;  %v5066_v18 = vsel %vm5065_vm2, %v10904_v9, %v5062_v27  ;;  %8847 = vmatpush.msrb.mxu3 %v8643_v57  ;;  %v5076_v55 = vmul.f32 %v10908_v3, %v5075_v11  ;;  %10915 = vrcp.f32 %v20894_v30  ;;  %vm5080_vm1 = vmor %vm5078_vm5, %vm5079_vm10  ;;  %v1666_v47 = vpop.f32.mrf.mxu1 }
 0x610   : > { %v8365_v46 = vadd.f32 %v20806_v10, %v8105_v16  ;;  %v10912_v1 = vpop.eup %10911  ;;  %v5071_v52 = vsel %vm20861_vm13, %v5070_v20, %v5066_v18  ;;  %v5085_v6 = vor.u32 1.1754944e-38, %v5084_v45  ;;  %v5217_v17 = vand.u32 2147483647, %v20865_v33 }
 0x611   : > { %v7926_v51 = vmul.f32 %v5071_v52, %v20608_v12  ;;  %v5209_v21 = vmul.f32 %v10912_v1, %v20865_v33  ;;  %v5077_v22 = vadd.f32 %v10908_v3, %v5076_v55  ;;  %v5219_v42 = vand.u32 2147483648, %v20865_v33  ;;  %v10914_v12 = vpop.eup %10913 }
 0x612   : > { %v8503_v10 = vrot.slane %v8365_v46, 4  ;;  %v9536_v9 = vmul.f32 -1.442695, %v20903_v38  ;;  %v20917_v15 = vadd.f32 %v20811_v13, %v19273_v14  ;;  %vm5213_vm11 = vweird.f32 %v20865_v33 }
 0x613   : > { %v8378_v25 = vadd.f32 %v8377_v54, %v7926_v51  ;;  %v5210_v39 = vsub.f32 1.0, %v5209_v21  ;;  %v5081_v58 = vsel %vm5080_vm1, %v10908_v3, %v5077_v22  ;;  %vm5214_vm15 = vweird.f32 %v10912_v1 }
 0x614   : > { %v8504_v41 = vadd.f32 %v8503_v10, %v8365_v46  ;;  %10917 = vpow2.f32 %v9536_v9  ;;  %v5086_v28 = vsel %vm20897_vm7, %v5085_v6, %v5081_v58  ;;  %v20922_v32 = vadd.f32 1.0, %v10914_v12  ;;  %vm5215_vm0 = vmor %vm5213_vm11, %vm5214_vm15  ;;  %v1556_v46 = vpop.f32.mrf.mxu0 }
 0x615   : > { %v5211_v26 = vmul.f32 %v10912_v1, %v5210_v39  ;;  %v10916_v19 = vpop.eup %10915  ;;  %v7927_v8 = vmul.f32 %v5086_v28, %v20738_v43  ;;  %vm20925_vm8 = vcmp.eq.f32.partialorder %v5217_v17, 8.507059e+37  ;;  %v9545_v53 = vmul.f32 -1.442695, %v20917_v15 }
 0x616   : > { %v8505_v31 = vrot.slane %v8504_v41, 2  ;;  %v20932_v35 = vadd.f32 %v20846_v36, %v19279_v61  ;;  %v5220_v3 = vor.u32 1.1754944e-38, %v5219_v42  ;;  %v5224_v60 = vmul.f32 %v10916_v19, %v20894_v30 }
 0x617   : > { %v5212_v48 = vadd.f32 %v10912_v1, %v5211_v26  ;;  %v8409_v29 = vadd.f32 %v8408_v40, %v7927_v8  ;;  %vm5228_vm12 = vweird.f32 %v20894_v30  ;;  %10919 = vrcp.f32 %v20922_v32  ;;  %v1669_v58 = vpop.f32.mrf.mxu1 }
 0x618   : > { %v8506_v4 = vadd.f32 %v8505_v31, %v8504_v41  ;;  %v20942_v43 = vadd.f32 %v20876_v24, %v19273_v14  ;;  %v5225_v7 = vsub.f32 1.0, %v5224_v60  ;;  %v5232_v54 = vand.u32 2147483647, %v20894_v30 }
 0x619   : > { %v5216_v50 = vsel %vm5215_vm0, %v10912_v1, %v5212_v48  ;;  %v5234_v33 = vand.u32 2147483648, %v20894_v30  ;;  %10921 = vpow2.f32 %v9545_v53  ;;  %v9546_v62 = vmul.f32 -1.442695, %v20932_v35 }
 0x61a   : > { %v8507_v36 = vrot.slane %v8506_v4, 1  ;;  %v10918_v59 = vpop.eup %10917  ;;  %v5221_v23 = vsel %vm20925_vm8, %v5220_v3, %v5216_v50  ;;  %v5226_v24 = vmul.f32 %v10916_v19, %v5225_v7  ;;  %vm5229_vm14 = vweird.f32 %v10916_v19 }
 0x61b   : > { %v7936_v20 = vmul.f32 %v5221_v23, %v20778_v37  ;;  %v20950_v44 = vadd.f32 1.0, %v10918_v59  ;;  %10923 = vpow2.f32 %v9546_v62  ;;  %v9555_v34 = vmul.f32 -1.442695, %v20942_v43  ;;  %vm5230_vm4 = vmor %vm5228_vm12, %vm5229_vm14 }
 0x61c   : > { %v8508_v49 = vadd.f32 %v8507_v36, %v8506_v4  ;;  %v20954_v16 = vadd.f32 %v1663_v5, %v19279_v61  ;;  %v5227_v40 = vadd.f32 %v10916_v19, %v5226_v24  ;;  %v20959_v11 = vadd.f32 %v1553_v2, %v19273_v14  ;;  %v21008_v50 = vpop.f32.mrf.mxu0 }
 0x61d   : > { %v20956_v45 = vadd.f32 %v8378_v25, %v7936_v20  ;;  %v10920_v57 = vpop.eup %10919  ;;  %v5235_v37 = vor.u32 1.1754944e-38, %v5234_v33  ;;  %10925 = vrcp.f32 %v20950_v44  ;;  %vm5233_vm6 = vcmp.eq.f32.partialorder %v5232_v54, 8.507059e+37 }
 0x61e   : > { %v8528_v27 = vmul.f32 0.00390625, %v8508_v49  ;;  %v5231_v18 = vsel %vm5230_vm4, %v10916_v19, %v5227_v40  ;;  %v5359_v56 = vmul.f32 %v10920_v57, %v20922_v32  ;;  %10927 = vpow2.f32 %v9555_v34 }
 0x61f   : > { %v10922_v1 = vpop.eup %10921  ;;  %v5236_v52 = vsel %vm5233_vm6, %v5235_v37, %v5231_v18  ;;  %v5367_v55 = vand.u32 2147483647, %v20922_v32  ;;  %v5369_v5 = vand.u32 2147483648, %v20922_v32  ;;  %v9556_v10 = vmul.f32 -1.442695, %v20954_v16 }
 0x620   : > { %8848 = vmatmul.f32.vlgmr.msrb.gmra.mxu3 %v8528_v27  ;;  %v7937_v30 = vmul.f32 %v5236_v52, %v20789_v63  ;;  %v5360_v51 = vsub.f32 1.0, %v5359_v56  ;;  %v20969_v6 = vadd.f32 1.0, %v10922_v1  ;;  %v9565_v21 = vmul.f32 -1.442695, %v20959_v11 }
 0x621   : > { %v10924_v22 = vpop.eup %10923  ;;  %vm5364_vm13 = vweird.f32 %v10920_v57  ;;  %v5382_v17 = vand.u32 2147483647, %v20950_v44  ;;  %v5384_v42 = vand.u32 2147483648, %v20950_v44  ;;  %10929 = vpow2.f32 %v9556_v10 }
 0x622   : > { %v20974_v9 = vadd.f32 %v8409_v29, %v7937_v30  ;;  %v5361_v41 = vmul.f32 %v10920_v57, %v5360_v51  ;;  %10931 = vrcp.f32 %v20969_v6  ;;  %v20978_v25 = vadd.f32 %v1666_v47, %v19279_v61 }
 0x623   : > { %v10926_v63 = vpop.eup %10925  ;;  %vm5363_vm9 = vweird.f32 %v20922_v32  ;;  %vm20981_vm3 = vcmp.eq.f32.partialorder %v5367_v55, 8.507059e+37  ;;  %v20985_v12 = vadd.f32 1.0, %v10924_v22  ;;  %10933 = vpow2.f32 %v9565_v21 }
 0x624   : > { %v10928_v2 = vpop.eup %10927  ;;  %v5362_v31 = vadd.f32 %v10920_v57, %v5361_v41  ;;  %v5370_v28 = vor.u32 1.1754944e-38, %v5369_v5  ;;  %v5374_v26 = vmul.f32 %v10926_v63, %v20950_v44  ;;  %v20989_v19 = vadd.f32 %v1556_v46, %v19273_v14  ;;  %vm5365_vm5 = vmor %vm5363_vm9, %vm5364_vm13 }
 0x625   : > { %vm5378_vm2 = vweird.f32 %v20950_v44  ;;  %vm20993_vm7 = vcmp.eq.f32.partialorder %v5382_v17, 8.507059e+37  ;;  %v5517_v8 = vand.u32 2147483647, %v20969_v6  ;;  %10935 = vrcp.f32 %v20985_v12  ;;  %v21033_v44 = vpop.f32.mrf.mxu1 }
 0x626   : > { %v5366_v13 = vsel %vm5365_vm5, %v10920_v57, %v5362_v31  ;;  %v5375_v53 = vsub.f32 1.0, %v5374_v26  ;;  %v5385_v4 = vor.u32 1.1754944e-38, %v5384_v42  ;;  %v9566_v48 = vmul.f32 -1.442695, %v20978_v25 }
 0x627   : > { %v10930_v3 = vpop.eup %10929  ;;  %v5371_v60 = vsel %vm20981_vm3, %v5370_v28, %v5366_v13  ;;  %vm5513_vm10 = vweird.f32 %v20969_v6  ;;  %v21003_v29 = vadd.f32 1.0, %v10928_v2  ;;  %v21006_v36 = vadd.f32 %v1669_v58, %v19279_v61  ;;  %v21053_v58 = vpop.f32.mrf.mxu0 }
 0x628   : > { %v10932_v7 = vpop.eup %10931  ;;  %v7946_v54 = vmul.f32 %v5371_v60, %v20844_v0  ;;  %v5376_v59 = vmul.f32 %v10926_v63, %v5375_v53  ;;  %vm5379_vm1 = vweird.f32 %v10926_v63  ;;  %v9575_v23 = vmul.f32 -1.442695, %v20989_v19 }
 0x629   : > { %v10934_v33 = vpop.eup %10933  ;;  %v5509_v62 = vmul.f32 %v10932_v7, %v20969_v6  ;;  %vm21013_vm11 = vcmp.eq.f32.partialorder %v5517_v8, 8.507059e+37  ;;  %v5519_v49 = vand.u32 2147483648, %v20969_v6  ;;  %10937 = vrcp.f32 %v21003_v29  ;;  %vm5380_vm15 = vmor %vm5378_vm2, %vm5379_vm1 }
 0x62a   : > { %v8380_v20 = vadd.f32 %v20956_v45, %v7946_v54  ;;  %v5377_v24 = vadd.f32 %v10926_v63, %v5376_v59  ;;  %v5532_v0 = vand.u32 2147483647, %v20985_v12  ;;  %10939 = vpow2.f32 %v9566_v48 }
 0x62b   : > { %v10936_v34 = vpop.eup %10935  ;;  %v5510_v27 = vsub.f32 1.0, %v5509_v62  ;;  %v5534_v40 = vand.u32 2147483648, %v20985_v12  ;;  %v21024_v57 = vadd.f32 1.0, %v10930_v3  ;;  %v21026_v37 = vadd.f32 1.0, %v10934_v33 }
 0x62c   : > { %v5381_v46 = vsel %vm5380_vm15, %v10926_v63, %v5377_v24  ;;  %vm5514_vm8 = vweird.f32 %v10932_v7  ;;  %v5524_v18 = vmul.f32 %v10936_v34, %v20985_v12  ;;  %10941 = vpow2.f32 %v9575_v23 }
 0x62d   : > { %v5386_v45 = vsel %vm20993_vm7, %v5385_v4, %v5381_v46  ;;  %v5511_v56 = vmul.f32 %v10932_v7, %v5510_v27  ;;  %v5667_v1 = vand.u32 2147483647, %v21003_v29  ;;  %10943 = vrcp.f32 %v21024_v57  ;;  %vm5515_vm14 = vmor %vm5513_vm10, %vm5514_vm8  ;;  %v21077_v47 = vpop.f32.mrf.mxu1 }
 0x62e   : > { %v7947_v52 = vmul.f32 %v5386_v45, %v20903_v38  ;;  %v5520_v55 = vor.u32 1.1754944e-38, %v5519_v49  ;;  %v5525_v5 = vsub.f32 1.0, %v5524_v18  ;;  %v5669_v10 = vand.u32 2147483648, %v21003_v29 }
 0x62f   : > { %v10938_v30 = vpop.eup %10937  ;;  %v5512_v51 = vadd.f32 %v10932_v7, %v5511_v56  ;;  %vm5528_vm0 = vweird.f32 %v20985_v12  ;;  %vm21038_vm12 = vcmp.eq.f32.partialorder %v5532_v0, 8.507059e+37  ;;  %10945 = vrcp.f32 %v21026_v37 }
 0x630   : > { %v10940_v22 = vpop.eup %10939  ;;  %v8411_v17 = vadd.f32 %v20974_v9, %v7947_v52  ;;  %v5526_v38 = vmul.f32 %v10936_v34, %v5525_v5  ;;  %vm5529_vm4 = vweird.f32 %v10936_v34  ;;  %v5659_v42 = vmul.f32 %v10938_v30, %v21003_v29 }
 0x631   : > { %v5516_v41 = vsel %vm5515_vm14, %v10932_v7, %v5512_v51  ;;  %v5535_v63 = vor.u32 1.1754944e-38, %v5534_v40  ;;  %vm5663_vm6 = vweird.f32 %v21003_v29  ;;  %vm21049_vm13 = vcmp.eq.f32.partialorder %v5667_v1, 8.507059e+37  ;;  %vm5530_vm9 = vmor %vm5528_vm0, %vm5529_vm4 }
 0x632   : > { %v10942_v2 = vpop.eup %10941  ;;  %v5521_v9 = vsel %vm21013_vm11, %v5520_v55, %v5516_v41  ;;  %v5527_v6 = vadd.f32 %v10936_v34, %v5526_v38  ;;  %v5660_v31 = vsub.f32 1.0, %v5659_v42  ;;  %v5670_v28 = vor.u32 1.1754944e-38, %v5669_v10 }
 0x633   : > { %v10944_v26 = vpop.eup %10943  ;;  %v7956_v32 = vmul.f32 %v5521_v9, %v20917_v15  ;;  %vm5678_vm3 = vweird.f32 %v21024_v57  ;;  %v5682_v8 = vand.u32 2147483647, %v21024_v57  ;;  %v21062_v13 = vadd.f32 1.0, %v10940_v22 }
 0x634   : > { %v5531_v53 = vsel %vm5530_vm9, %v10936_v34, %v5527_v6  ;;  %v5661_v4 = vmul.f32 %v10938_v30, %v5660_v31  ;;  %vm5664_vm5 = vweird.f32 %v10938_v30  ;;  %v5674_v48 = vmul.f32 %v10944_v26, %v21024_v57 }
 0x635   : > { %v10946_v3 = vpop.eup %10945  ;;  %v8381_v60 = vadd.f32 %v8380_v20, %v7956_v32  ;;  %v5536_v7 = vsel %vm21038_vm12, %v5535_v63, %v5531_v53  ;;  %10947 = vrcp.f32 %v21062_v13  ;;  %v21068_v15 = vadd.f32 1.0, %v10942_v2  ;;  %vm5665_vm2 = vmor %vm5663_vm6, %vm5664_vm5  ;;  %v1678_v31 = vpop.f32.mrf.mxu1 }
 0x636   : > { %v7957_v12 = vmul.f32 %v5536_v7, %v20932_v35  ;;  %v5662_v54 = vadd.f32 %v10938_v30, %v5661_v4  ;;  %v5675_v59 = vsub.f32 1.0, %v5674_v48  ;;  %v5809_v23 = vmul.f32 %v10946_v3, %v21026_v37 }
 0x637   : > { %vm5679_vm7 = vweird.f32 %v10944_v26  ;;  %v5684_v33 = vand.u32 2147483648, %v21024_v57  ;;  %vm5813_vm10 = vweird.f32 %v21026_v37  ;;  %v5817_v62 = vand.u32 2147483647, %v21026_v37 }
 0x638   : > { %v8412_v49 = vadd.f32 %v8411_v17, %v7957_v12  ;;  %v5666_v20 = vsel %vm5665_vm2, %v10938_v30, %v5662_v54  ;;  %v5676_v24 = vmul.f32 %v10944_v26, %v5675_v59  ;;  %v5810_v35 = vsub.f32 1.0, %v5809_v23  ;;  %vm5680_vm15 = vmor %vm5678_vm3, %vm5679_vm7 }
 0x639   : > { %v5671_v0 = vsel %vm21049_vm13, %v5670_v28, %v5666_v20  ;;  %vm21081_vm1 = vcmp.eq.f32.partialorder %v5682_v8, 8.507059e+37  ;;  %v5819_v29 = vand.u32 2147483648, %v21026_v37  ;;  %10949 = vrcp.f32 %v21068_v15 }
 0x63a   : > { %v7966_v27 = vmul.f32 %v5671_v0, %v20942_v43  ;;  %v5677_v40 = vadd.f32 %v10944_v26, %v5676_v24  ;;  %v5811_v46 = vmul.f32 %v10946_v3, %v5810_v35  ;;  %vm5814_vm11 = vweird.f32 %v10946_v3  ;;  %v1565_v43 = vpop.f32.mrf.mxu0 }
 0x63b   : > { %v10948_v18 = vpop.eup %10947  ;;  %v5685_v45 = vor.u32 1.1754944e-38, %v5684_v33  ;;  %vm21091_vm8 = vcmp.eq.f32.partialorder %v5817_v62, 8.507059e+37  ;;  %v9576_v1 = vmul.f32 -1.442695, %v21006_v36  ;;  %v21098_v52 = vadd.f32 %v21008_v50, %v19273_v14  ;;  %vm5815_vm0 = vmor %vm5813_vm10, %vm5814_vm11 }
 0x63c   : > { %v8382_v55 = vadd.f32 %v8381_v60, %v7966_v27  ;;  %v5681_v5 = vsel %vm5680_vm15, %v10944_v26, %v5677_v40  ;;  %v5812_v10 = vadd.f32 %v10946_v3, %v5811_v46  ;;  %v5824_v30 = vmul.f32 %v10948_v18, %v21062_v13 }
 0x63d   : > { %v5686_v57 = vsel %vm21081_vm1, %v5685_v45, %v5681_v5  ;;  %v5820_v51 = vor.u32 1.1754944e-38, %v5819_v29  ;;  %v5832_v21 = vand.u32 2147483647, %v21062_v13  ;;  %v5834_v22 = vand.u32 2147483648, %v21062_v13  ;;  %v21144_v34 = vpop.f32.mrf.mxu1 }
 0x63e   : > { %v7967_v50 = vmul.f32 %v5686_v57, %v20954_v16  ;;  %v5816_v17 = vsel %vm5815_vm0, %v10946_v3, %v5812_v10  ;;  %v5825_v38 = vsub.f32 1.0, %v5824_v30  ;;  %10951 = vpow2.f32 %v9576_v1 }
 0x63f   : > { %v10950_v42 = vpop.eup %10949  ;;  %v5821_v41 = vsel %vm21091_vm8, %v5820_v51, %v5816_v17  ;;  %vm5829_vm12 = vweird.f32 %v10948_v18  ;;  %v9585_v63 = vmul.f32 -1.442695, %v21098_v52  ;;  %v21113_v37 = vadd.f32 %v21033_v44, %v19279_v61 }
 0x640   : > { %v8413_v39 = vadd.f32 %v8412_v49, %v7967_v50  ;;  %v7976_v2 = vmul.f32 %v5821_v41, %v20959_v11  ;;  %v5826_v9 = vmul.f32 %v10948_v18, %v5825_v38  ;;  %v5959_v16 = vmul.f32 %v10950_v42, %v21068_v15 }
 0x641   : > { %vm5828_vm14 = vweird.f32 %v21062_v13  ;;  %10953 = vpow2.f32 %v9585_v63  ;;  %v9586_v6 = vmul.f32 -1.442695, %v21113_v37  ;;  %v5835_v32 = vor.u32 1.1754944e-38, %v5834_v22 }
 0x642   : > { %v8383_v28 = vadd.f32 %v8382_v55, %v7976_v2  ;;  %v5827_v26 = vadd.f32 %v10948_v18, %v5826_v9  ;;  %v5960_v8 = vsub.f32 1.0, %v5959_v16  ;;  %vm5830_vm4 = vmor %vm5828_vm14, %vm5829_vm12  ;;  %v5967_v44 = vand.u32 2147483647, %v21068_v15  ;;  %v21126_v7 = vpop.f32.mrf.mxu0 }
 0x643   : > { %v5969_v53 = vand.u32 2147483648, %v21068_v15  ;;  %10955 = vpow2.f32 %v9586_v6  ;;  %v21124_v11 = vadd.f32 %v21053_v58, %v19273_v14  ;;  %vm5833_vm6 = vcmp.eq.f32.partialorder %v5832_v21, 8.507059e+37 }
 0x644   : > { %v10952_v13 = vpop.eup %10951  ;;  %v5831_v4 = vsel %vm5830_vm4, %v10948_v18, %v5827_v26  ;;  %v5961_v48 = vmul.f32 %v10950_v42, %v5960_v8  ;;  %vm5964_vm13 = vweird.f32 %v10950_v42  ;;  %vm5963_vm9 = vweird.f32 %v21068_v15 }
 0x645   : > { %v5836_v3 = vsel %vm5833_vm6, %v5835_v32, %v5831_v4  ;;  %v2867_v60 = vadd.f32 1.0, %v10952_v13  ;;  %v21132_v59 = vadd.f32 %v21077_v47, %v19279_v61  ;;  %vm5965_vm3 = vmor %vm5963_vm9, %vm5964_vm13  ;;  %vm5968_vm5 = vcmp.eq.f32.partialorder %v5967_v44, 8.507059e+37 }
 0x646   : > { %v7977_v12 = vmul.f32 %v5836_v3, %v20978_v25  ;;  %v5962_v54 = vadd.f32 %v10950_v42, %v5961_v48  ;;  %v5970_v23 = vor.u32 1.1754944e-38, %v5969_v53  ;;  %v9595_v33 = vmul.f32 -1.442695, %v21124_v11 }
 0x647   : > { %v10954_v58 = vpop.eup %10953  ;;  %10957 = vrcp.f32 %v2867_v60  ;;  %v21138_v25 = vadd.f32 %v1565_v43, %v19273_v14  ;;  %v9596_v47 = vmul.f32 -1.442695, %v21132_v59  ;;  %v21150_v40 = vadd.f32 %v1678_v31, %v19279_v61 }
 0x648   : > { %v21135_v62 = vadd.f32 %v8413_v39, %v7977_v12  ;;  %v5966_v49 = vsel %vm5965_vm3, %v10950_v42, %v5962_v54  ;;  %v2876_v20 = vadd.f32 1.0, %v10954_v58  ;;  %v5984_v43 = vand.u32 2147483648, %v2867_v60  ;;  %v1684_v39 = vpop.f32.mrf.mxu1 }
 0x649   : > { %v10956_v24 = vpop.eup %10955  ;;  %v5971_v15 = vsel %vm5968_vm5, %v5970_v23, %v5966_v49  ;;  %v9605_v27 = vmul.f32 -1.442695, %v21138_v25  ;;  %v9606_v55 = vmul.f32 -1.442695, %v21150_v40  ;;  %vm5978_vm7 = vweird.f32 %v2867_v60 }
 0x64a   : > { %v7986_v35 = vmul.f32 %v5971_v15, %v20989_v19  ;;  %10959 = vrcp.f32 %v2876_v20  ;;  %v21142_v0 = vadd.f32 1.0, %v10956_v24  ;;  %v5982_v19 = vand.u32 2147483647, %v2867_v60  ;;  %v21153_v45 = vpop.f32.mrf.mxu0 }
 0x64b   : > { %10961 = vpow2.f32 %v9595_v33  ;;  %v6119_v57 = vand.u32 2147483648, %v2876_v20  ;;  %v5985_v38 = vor.u32 1.1754944e-38, %v5984_v43  ;;  %vm6113_vm11 = vweird.f32 %v2876_v20 }
 0x64c   : > { %v21146_v29 = vadd.f32 %v8383_v28, %v7986_v35  ;;  %10963 = vrcp.f32 %v21142_v0  ;;  %vm21156_vm10 = vcmp.eq.f32.partialorder %v5982_v19, 8.507059e+37  ;;  %v6117_v63 = vand.u32 2147483647, %v2876_v20 }
 0x64d   : > { %v10958_v46 = vpop.eup %10957  ;;  %10965 = vpow2.f32 %v9596_v47  ;;  %v6120_v16 = vor.u32 1.1754944e-38, %v6119_v57  ;;  %v6134_v32 = vand.u32 2147483648, %v21142_v0  ;;  %v6132_v13 = vand.u32 2147483647, %v21142_v0 }
 0x64e   : > { %v5974_v18 = vmul.f32 %v10958_v46, %v2867_v60  ;;  %10967 = vpow2.f32 %v9605_v27  ;;  %vm5979_vm2 = vweird.f32 %v10958_v46  ;;  %vm6118_vm12 = vcmp.eq.f32.partialorder %v6117_v63, 8.507059e+37 }
 0x64f   : > { %10969 = vpow2.f32 %v9606_v55  ;;  %vm5980_vm1 = vmor %vm5978_vm7, %vm5979_vm2  ;;  %vm6128_vm14 = vweird.f32 %v21142_v0  ;;  %v6135_v23 = vor.u32 1.1754944e-38, %v6134_v32  ;;  %v21179_v33 = vadd.f32 %v21126_v7, %v19273_v14 }
 0x650   : > { %v10960_v56 = vpop.eup %10959  ;;  %v5975_v1 = vsub.f32 1.0, %v5974_v18  ;;  %vm6133_vm6 = vcmp.eq.f32.partialorder %v6132_v13, 8.507059e+37  ;;  %v1687_v7 = vpop.f32.mrf.mxu1 }
 0x651   : > { %v6109_v5 = vmul.f32 %v10960_v56, %v2876_v20  ;;  %v10962_v10 = vpop.eup %10961  ;;  %vm6114_vm15 = vweird.f32 %v10960_v56  ;;  %v21183_v20 = vadd.f32 %v21144_v34, %v19279_v61  ;;  %v9615_v35 = vmul.f32 -1.442695, %v21179_v33 }
 0x652   : > { %v5976_v30 = vmul.f32 %v10958_v46, %v5975_v1  ;;  %v10964_v51 = vpop.eup %10963  ;;  %v21161_v31 = vadd.f32 1.0, %v10962_v10  ;;  %vm6115_vm8 = vmor %vm6113_vm11, %vm6114_vm15  ;;  %v1574_v3 = vpop.f32.mrf.mxu0  ;;  %v21213_v1 = vadd.f32 %v1684_v39, %v19279_v61 }
 0x653   : > { %v6110_v22 = vsub.f32 1.0, %v6109_v5  ;;  %v10966_v50 = vpop.eup %10965  ;;  %v6124_v42 = vmul.f32 %v10964_v51, %v21142_v0  ;;  %vm6129_vm0 = vweird.f32 %v10964_v51  ;;  %v9616_v34 = vmul.f32 -1.442695, %v21183_v20 }
 0x654   : > { %v5977_v17 = vadd.f32 %v10958_v46, %v5976_v30  ;;  %v10968_v2 = vpop.eup %10967  ;;  %v21166_v8 = vadd.f32 1.0, %v10966_v50  ;;  %10971 = vrcp.f32 %v21161_v31  ;;  %vm6130_vm4 = vmor %vm6128_vm14, %vm6129_vm0  ;;  %v21218_v30 = vadd.f32 %v1574_v3, %v19273_v14 }
 0x655   : > { %v6111_v41 = vmul.f32 %v10960_v56, %v6110_v22  ;;  %v6125_v6 = vsub.f32 1.0, %v6124_v42  ;;  %v21171_v48 = vadd.f32 1.0, %v10968_v2  ;;  %v10970_v60 = vpop.eup %10969  ;;  %v6267_v22 = vand.u32 2147483647, %v21161_v31 }
 0x656   : > { %v5981_v9 = vsel %vm5980_vm1, %v10958_v46, %v5977_v17  ;;  %10973 = vrcp.f32 %v21166_v8  ;;  %v21190_v15 = vadd.f32 1.0, %v10970_v60  ;;  %v9635_v39 = vmul.f32 -1.442695, %v21218_v30 }
 0x657   : > { %v5986_v28 = vsel %vm21156_vm10, %v5985_v38, %v5981_v9  ;;  %v6112_v26 = vadd.f32 %v10960_v56, %v6111_v41  ;;  %v6126_v53 = vmul.f32 %v10964_v51, %v6125_v6  ;;  %10975 = vrcp.f32 %v21171_v48 }
 0x658   : > { %v7987_v44 = vmul.f32 %v5986_v28, %v21006_v36  ;;  %10977 = vpow2.f32 %v9615_v35  ;;  %v1690_v21 = vpop.f32.mrf.mxu1  ;;  %vm6263_vm13 = vweird.f32 %v21161_v31  ;;  %v6269_v2 = vand.u32 2147483648, %v21161_v31 }
 0x659   : > { %v6116_v4 = vsel %vm6115_vm8, %v10960_v56, %v6112_v26  ;;  %v6127_v58 = vadd.f32 %v10964_v51, %v6126_v53  ;;  %10979 = vpow2.f32 %v9616_v34  ;;  %v21236_v9 = vadd.f32 %v1687_v7, %v19279_v61 }
 0x65a   : > { %v8415_v12 = vadd.f32 %v21135_v62, %v7987_v44  ;;  %v6121_v54 = vsel %vm6118_vm12, %v6120_v16, %v6116_v4  ;;  %v21193_v47 = vpop.eup %10971  ;;  %10981 = vrcp.f32 %v21190_v15  ;;  %v1577_v18 = vpop.f32.mrf.mxu0  ;;  %vm21238_vm9 = vcmp.eq.f32.partialorder %v6267_v22, 8.507059e+37 }
 0x65b   : > { %v7996_v36 = vmul.f32 %v6121_v54, %v21098_v52  ;;  %v6131_v49 = vsel %vm6130_vm4, %v10964_v51, %v6127_v58  ;;  %v6259_v46 = vmul.f32 %v21193_v47, %v21161_v31  ;;  %v9626_v51 = vmul.f32 -1.442695, %v21213_v1 }
 0x65c   : > { %v6136_v24 = vsel %vm6133_vm6, %v6135_v23, %v6131_v49  ;;  %v21198_v27 = vpop.eup %10973  ;;  %v6282_v28 = vand.u32 2147483647, %v21166_v8  ;;  %vm6264_vm3 = vweird.f32 %v21193_v47  ;;  %v21249_v53 = vadd.f32 %v1577_v18, %v19273_v14 }
 0x65d   : > { %v21186_v62 = vadd.f32 %v21146_v29, %v7996_v36  ;;  %v7997_v52 = vmul.f32 %v6136_v24, %v21113_v37  ;;  %v21202_v29 = vadd.f32 %v21153_v45, %v19273_v14  ;;  %v21204_v37 = vpop.eup %10975  ;;  %v6274_v19 = vmul.f32 %v21198_v27, %v21166_v8  ;;  %vm21259_vm2 = vmor %vm6263_vm13, %vm6264_vm3 }
 0x65e   : > { %v6409_v45 = vmul.f32 %v21204_v37, %v21171_v48  ;;  %v10978_v43 = vpop.eup %10977  ;;  %v6260_v55 = vsub.f32 1.0, %v6259_v46  ;;  %vm6279_vm5 = vweird.f32 %v21198_v27  ;;  %v6284_v3 = vand.u32 2147483648, %v21166_v8 }
 0x65f   : > { %v21195_v0 = vadd.f32 %v8415_v12, %v7997_v52  ;;  %v9625_v56 = vmul.f32 -1.442695, %v21202_v29  ;;  %v10980_v5 = vpop.eup %10979  ;;  %v6275_v10 = vsub.f32 1.0, %v6274_v19  ;;  %v21224_v17 = vadd.f32 1.0, %v10978_v43 }
 0x660   : > { %v21220_v57 = vpop.eup %10981  ;;  %v6410_v50 = vsub.f32 1.0, %v6409_v45  ;;  %v6261_v38 = vmul.f32 %v21193_v47, %v6260_v55  ;;  %v21227_v42 = vadd.f32 1.0, %v10980_v5  ;;  %v6417_v60 = vand.u32 2147483647, %v21171_v48  ;;  %v1693_v35 = vpop.f32.mrf.mxu1 }
 0x661   : > { %10983 = vpow2.f32 %v9625_v56  ;;  %v6276_v41 = vmul.f32 %v21198_v27, %v6275_v10  ;;  %v6424_v63 = vmul.f32 %v21220_v57, %v21190_v15  ;;  %v6419_v12 = vand.u32 2147483648, %v21171_v48 }
 0x662   : > { %10985 = vpow2.f32 %v9626_v51  ;;  %v1580_v16 = vpop.f32.mrf.mxu0  ;;  %v6411_v26 = vmul.f32 %v21204_v37, %v6410_v50  ;;  %v6262_v44 = vadd.f32 %v21193_v47, %v6261_v38  ;;  %v9636_v54 = vmul.f32 -1.442695, %v21236_v9 }
 0x663   : > { %10987 = vrcp.f32 %v21224_v17  ;;  %v6277_v13 = vadd.f32 %v21198_v27, %v6276_v41  ;;  %v6425_v4 = vsub.f32 1.0, %v6424_v63  ;;  %vm6278_vm7 = vweird.f32 %v21166_v8 }
 0x664   : > { %10989 = vrcp.f32 %v21227_v42  ;;  %v6412_v36 = vadd.f32 %v21204_v37, %v6411_v26  ;;  %vm6414_vm10 = vweird.f32 %v21204_v37  ;;  %v6266_v24 = vsel %vm21259_vm2, %v21193_v47, %v6262_v44  ;;  %vm21273_vm1 = vmor %vm6278_vm7, %vm6279_vm5 }
 0x665   : > { %10991 = vpow2.f32 %v9635_v39  ;;  %v6270_v52 = vor.u32 1.1754944e-38, %v6269_v2  ;;  %vm6413_vm11 = vweird.f32 %v21171_v48  ;;  %v9645_v8 = vmul.f32 -1.442695, %v21249_v53 }
 0x666   : > { %v6281_v34 = vsel %vm21273_vm1, %v21198_v27, %v6277_v13  ;;  %vm6283_vm15 = vcmp.eq.f32.partialorder %v6282_v28, 8.507059e+37  ;;  %v6426_v47 = vmul.f32 %v21220_v57, %v6425_v4  ;;  %v21286_v46 = vadd.f32 %v1690_v21, %v19279_v61  ;;  %vm21292_vm8 = vmor %vm6413_vm11, %vm6414_vm10 }
 0x667   : > { %v10984_v32 = vpop.eup %10983  ;;  %v6285_v19 = vor.u32 1.1754944e-38, %v6284_v3  ;;  %vm21296_vm0 = vcmp.eq.f32.partialorder %v6417_v60, 8.507059e+37  ;;  %v6420_v27 = vor.u32 1.1754944e-38, %v6419_v12  ;;  %10993 = vpow2.f32 %v9636_v54 }
 0x668   : > { %v21266_v23 = vadd.f32 1.0, %v10984_v32  ;;  %v10986_v49 = vpop.eup %10985  ;;  %v6271_v43 = vsel %vm21238_vm9, %v6270_v52, %v6266_v24  ;;  %v6416_v55 = vsel %vm21292_vm8, %v21204_v37, %v6412_v36  ;;  %v21307_v5 = vadd.f32 %v1580_v16, %v19273_v14  ;;  %v21342_v60 = vpop.f32.mrf.mxu1 }
 0x669   : > { %v21279_v7 = vpop.eup %10987  ;;  %v6286_v10 = vsel %vm6283_vm15, %v6285_v19, %v6281_v34  ;;  %v21311_v21 = vadd.f32 1.0, %v10986_v49  ;;  %v6427_v50 = vadd.f32 %v21220_v57, %v6426_v47  ;;  %vm6429_vm12 = vweird.f32 %v21220_v57 }
 0x66a   : > { %v21288_v18 = vpop.eup %10989  ;;  %10995 = vrcp.f32 %v21266_v23  ;;  %v6559_v51 = vmul.f32 %v21279_v7, %v21224_v17  ;;  %v21313_v22 = vpop.f32.mrf.mxu0  ;;  %v9646_v38 = vmul.f32 -1.442695, %v21286_v46  ;;  %v6421_v41 = vsel %vm21296_vm0, %v6420_v27, %v6416_v55 }
 0x66b   : > { %v10992_v45 = vpop.eup %10991  ;;  %10997 = vpow2.f32 %v9645_v8  ;;  %v6574_v37 = vmul.f32 %v21288_v18, %v21227_v42  ;;  %v6432_v63 = vand.u32 2147483647, %v21190_v15  ;;  %v6434_v39 = vand.u32 2147483648, %v21190_v15 }
 0x66c   : > { %v21324_v2 = vadd.f32 1.0, %v10992_v45  ;;  %v8006_v16 = vmul.f32 %v6271_v43, %v21124_v11  ;;  %v8007_v6 = vmul.f32 %v6286_v10, %v21132_v59  ;;  %vm6428_vm14 = vweird.f32 %v21190_v15 }
 0x66d   : > { %v9655_v28 = vmul.f32 -1.442695, %v21307_v5  ;;  %v10994_v26 = vpop.eup %10993  ;;  %vm21330_vm4 = vmor %vm6428_vm14, %vm6429_vm12  ;;  %v6560_v44 = vsub.f32 1.0, %v6559_v51  ;;  %10999 = vrcp.f32 %v21311_v21  ;;  %v8016_v4 = vmul.f32 %v6421_v41, %v21138_v25 }
 0x66e   : > { %v6431_v11 = vsel %vm21330_vm4, %v21220_v57, %v6427_v50  ;;  %v6575_v59 = vsub.f32 1.0, %v6574_v37  ;;  %11001 = vpow2.f32 %v9646_v38  ;;  %vm6433_vm6 = vcmp.eq.f32.partialorder %v6432_v63, 8.507059e+37 }
 0x66f   : > { %v6435_v3 = vor.u32 1.1754944e-38, %v6434_v39  ;;  %11003 = vrcp.f32 %v21324_v2  ;;  %v8386_v12 = vadd.f32 %v21186_v62, %v8006_v16  ;;  %v8417_v54 = vadd.f32 %v21195_v0, %v8007_v6 }
 0x670   : > { %v21335_v13 = vpop.eup %10995  ;;  %v6567_v58 = vand.u32 2147483647, %v21224_v17  ;;  %11005 = vpow2.f32 %v9655_v28  ;;  %v6561_v36 = vmul.f32 %v21279_v7, %v6560_v44  ;;  %v21350_v49 = vadd.f32 1.0, %v10994_v26 }
 0x671   : > { %v10998_v15 = vpop.eup %10997  ;;  %v6436_v25 = vsel %vm6433_vm6, %v6435_v3, %v6431_v11  ;;  %v6709_v57 = vmul.f32 %v21335_v13, %v21266_v23  ;;  %v21352_v24 = vadd.f32 %v8386_v12, %v8016_v4  ;;  %v6576_v52 = vmul.f32 %v21288_v18, %v6575_v59  ;;  %v1699_v11 = vpop.f32.mrf.mxu1 }
 0x672   : > { %v21355_v31 = vadd.f32 1.0, %v10998_v15  ;;  %v21358_v62 = vadd.f32 %v1693_v35, %v19279_v61  ;;  %vm6563_vm13 = vweird.f32 %v21224_v17  ;;  %v6569_v8 = vand.u32 2147483648, %v21224_v17  ;;  %v1586_v19 = vpop.f32.mrf.mxu0 }
 0x673   : > { %v21360_v0 = vpop.eup %10999  ;;  %v6582_v34 = vand.u32 2147483647, %v21227_v42  ;;  %v6584_v47 = vand.u32 2147483648, %v21227_v42  ;;  %v8017_v56 = vmul.f32 %v6436_v25, %v21150_v40  ;;  %vm21367_vm9 = vcmp.eq.f32.partialorder %v6567_v58, 8.507059e+37 }
 0x674   : > { %v11002_v48 = vpop.eup %11001  ;;  %vm6578_vm3 = vweird.f32 %v21227_v42  ;;  %v6719_v35 = vand.u32 2147483648, %v21266_v23  ;;  %v6562_v43 = vadd.f32 %v21279_v7, %v6561_v36  ;;  %vm6564_vm5 = vweird.f32 %v21279_v7 }
 0x675   : > { %v21373_v45 = vpop.eup %11003  ;;  %v6710_v55 = vsub.f32 1.0, %v6709_v57  ;;  %11007 = vrcp.f32 %v21350_v49  ;;  %v6577_v40 = vadd.f32 %v21288_v18, %v6576_v52  ;;  %vm6579_vm2 = vweird.f32 %v21288_v18  ;;  %vm21390_vm10 = vmor %vm6563_vm13, %vm6564_vm5 }
 0x676   : > { %v11006_v10 = vpop.eup %11005  ;;  %v6724_v51 = vmul.f32 %v21360_v0, %v21311_v21  ;;  %11009 = vrcp.f32 %v21355_v31  ;;  %v6570_v50 = vor.u32 1.1754944e-38, %v6569_v8  ;;  %vm21383_vm7 = vcmp.eq.f32.partialorder %v6582_v34, 8.507059e+37  ;;  %vm21408_vm1 = vmor %vm6578_vm3, %vm6579_vm2 }
 0x677   : > { %v6585_v38 = vor.u32 1.1754944e-38, %v6584_v47  ;;  %v6717_v41 = vand.u32 2147483647, %v21266_v23  ;;  %v6859_v39 = vmul.f32 %v21373_v45, %v21324_v2  ;;  %v21396_v16 = vadd.f32 1.0, %v11002_v48 }
 0x678   : > { %v9656_v6 = vmul.f32 -1.442695, %v21358_v62  ;;  %v21401_v28 = vadd.f32 %v21313_v22, %v19273_v14  ;;  %v8418_v26 = vadd.f32 %v8417_v54, %v8017_v56  ;;  %v6566_v17 = vsel %vm21390_vm10, %v21279_v7, %v6562_v43 }
 0x679   : > { %v6711_v44 = vmul.f32 %v21335_v13, %v6710_v55  ;;  %v21413_v4 = vadd.f32 1.0, %v11006_v10  ;;  %v6581_v22 = vsel %vm21408_vm1, %v21288_v18, %v6577_v40  ;;  %vm6713_vm11 = vweird.f32 %v21266_v23  ;;  %v1702_v32 = vpop.f32.mrf.mxu1 }
 0x67a   : > { %v6720_v59 = vor.u32 1.1754944e-38, %v6719_v35  ;;  %v6725_v15 = vsub.f32 1.0, %v6724_v51  ;;  %vm6714_vm15 = vweird.f32 %v21335_v13  ;;  %vm21422_vm8 = vcmp.eq.f32.partialorder %v6717_v41, 8.507059e+37  ;;  %v1589_v34 = vpop.f32.mrf.mxu0 }
 0x67b   : > { %v21419_v7 = vpop.eup %11007  ;;  %v6732_v3 = vand.u32 2147483647, %v21311_v21  ;;  %v6734_v12 = vand.u32 2147483648, %v21311_v21  ;;  %v6869_v54 = vand.u32 2147483648, %v21324_v2  ;;  %v6571_v18 = vsel %vm21367_vm9, %v6570_v50, %v6566_v17  ;;  %vm21456_vm14 = vmor %vm6713_vm11, %vm6714_vm15 }
 0x67c   : > { %v21429_v58 = vpop.eup %11009  ;;  %v6860_v25 = vsub.f32 1.0, %v6859_v39  ;;  %11011 = vrcp.f32 %v21396_v16  ;;  %v9665_v36 = vmul.f32 -1.442695, %v21401_v28  ;;  %v6586_v57 = vsel %vm21383_vm7, %v6585_v38, %v6581_v22 }
 0x67d   : > { %v6712_v52 = vadd.f32 %v21335_v13, %v6711_v44  ;;  %11013 = vrcp.f32 %v21413_v4  ;;  %v21440_v8 = vadd.f32 %v1586_v19, %v19273_v14  ;;  %v6726_v47 = vmul.f32 %v21360_v0, %v6725_v15 }
 0x67e   : > { %vm6728_vm0 = vweird.f32 %v21311_v21  ;;  %v6874_v48 = vmul.f32 %v21419_v7, %v21350_v49  ;;  %11015 = vpow2.f32 %v9665_v36  ;;  %v8026_v56 = vmul.f32 %v6571_v18, %v21179_v33 }
 0x67f   : > { %vm6863_vm12 = vweird.f32 %v21324_v2  ;;  %v6867_v27 = vand.u32 2147483647, %v21324_v2  ;;  %v7009_v35 = vmul.f32 %v21429_v58, %v21355_v31  ;;  %v8027_v19 = vmul.f32 %v6586_v57, %v21183_v20 }
 0x680   : > { %vm21460_vm4 = vcmp.eq.f32.partialorder %v6732_v3, 8.507059e+37  ;;  %v6735_v33 = vor.u32 1.1754944e-38, %v6734_v12  ;;  %v6861_v10 = vmul.f32 %v21373_v45, %v6860_v25  ;;  %v21465_v40 = vor.u32 1.1754944e-38, %v6869_v54 }
 0x681   : > { %v6716_v20 = vsel %vm21456_vm14, %v21335_v13, %v6712_v52  ;;  %vm6729_vm6 = vweird.f32 %v21360_v0  ;;  %v21473_v23 = vadd.f32 %v21342_v60, %v19279_v61  ;;  %v9675_v51 = vmul.f32 -1.442695, %v21440_v8 }
 0x682   : > { %v21476_v50 = vpop.eup %11011  ;;  %v6727_v37 = vadd.f32 %v21360_v0, %v6726_v47  ;;  %vm6864_vm13 = vweird.f32 %v21373_v45  ;;  %v6875_v38 = vsub.f32 1.0, %v6874_v48  ;;  %v21481_v41 = vadd.f32 %v1589_v34, %v19273_v14  ;;  %vm21498_vm3 = vmor %vm6728_vm0, %vm6729_vm6  ;;  %v1592_v57 = vpop.f32.mrf.mxu0 }
 0x683   : > { %v21483_v63 = vpop.eup %11013  ;;  %v8388_v13 = vadd.f32 %v21352_v24, %v8026_v56  ;;  %v6882_v39 = vand.u32 2147483647, %v21350_v49  ;;  %v6884_v60 = vand.u32 2147483648, %v21350_v49  ;;  %v7010_v17 = vsub.f32 1.0, %v7009_v35  ;;  %vm21531_vm2 = vmor %vm6863_vm12, %vm6864_vm13 }
 0x684   : > { %v11016_v44 = vpop.eup %11015  ;;  %v21488_v22 = vadd.f32 %v8418_v26, %v8027_v19  ;;  %v6721_v15 = vsel %vm21422_vm8, %v6720_v59, %v6716_v20  ;;  %v6862_v3 = vadd.f32 %v21373_v45, %v6861_v10  ;;  %vm6878_vm9 = vweird.f32 %v21350_v49 }
 0x685   : > { %11017 = vpow2.f32 %v9656_v6  ;;  %vm21502_vm5 = vcmp.eq.f32.partialorder %v6867_v27, 8.507059e+37  ;;  %v21506_v26 = vadd.f32 1.0, %v11016_v44  ;;  %v9666_v59 = vmul.f32 -1.442695, %v21473_v23 }
 0x686   : > { %11019 = vpow2.f32 %v9675_v51  ;;  %v21510_v42 = vadd.f32 %v1699_v11, %v19279_v61  ;;  %v6731_v21 = vsel %vm21498_vm3, %v21360_v0, %v6727_v37  ;;  %v6876_v6 = vmul.f32 %v21419_v7, %v6875_v38 }
 0x687   : > { %v9685_v54 = vmul.f32 -1.442695, %v21481_v41  ;;  %v21518_v18 = vadd.f32 %v1702_v32, %v19279_v61  ;;  %v7011_v25 = vmul.f32 %v21429_v58, %v7010_v17  ;;  %v7024_v36 = vmul.f32 %v21476_v50, %v21396_v16 }
 0x688   : > { %v7159_v11 = vmul.f32 %v21483_v63, %v21413_v4  ;;  %11021 = vrcp.f32 %v21506_v26  ;;  %v8036_v0 = vmul.f32 %v6721_v15, %v21202_v29  ;;  %vm6879_vm7 = vweird.f32 %v21419_v7 }
 0x689   : > { %vm21536_vm10 = vcmp.eq.f32.partialorder %v6882_v39, 8.507059e+37  ;;  %v6885_v47 = vor.u32 1.1754944e-38, %v6884_v60  ;;  %v6736_v48 = vsel %vm21460_vm4, %v6735_v33, %v6731_v21  ;;  %v6866_v29 = vsel %vm21531_vm2, %v21373_v45, %v6862_v3  ;;  %vm21565_vm15 = vmor %vm6878_vm9, %vm6879_vm7 }
 0x68a   : > { %11023 = vpow2.f32 %v9666_v59  ;;  %v9676_v2 = vmul.f32 -1.442695, %v21510_v42  ;;  %v6877_v27 = vadd.f32 %v21419_v7, %v6876_v6  ;;  %v9686_v35 = vmul.f32 -1.442695, %v21518_v18  ;;  %v8674_v59 = vld [vmem:[#allocation3 + $0x478] sm:$0xff] }
 0x68b   : > { %v11018_v56 = vpop.eup %11017  ;;  %11025 = vpow2.f32 %v9685_v54  ;;  %v21549_v19 = vadd.f32 %v1592_v57, %v19273_v14  ;;  %v7012_v55 = vadd.f32 %v21429_v58, %v7011_v25  ;;  %vm7014_vm1 = vweird.f32 %v21429_v58  ;;  %8852 = vmatpush.msrb.mxu2 %v8674_v59  ;;  %v8690_v6 = vld [vmem:[#allocation3 + $0x4f8] sm:$0xff]  ;;  %v8673_v57 = vld [vmem:[#allocation3 + $0x470] sm:$0xff] }
 0x68c   : > { %v11020_v43 = vpop.eup %11019  ;;  %v7025_v33 = vsub.f32 1.0, %v7024_v36  ;;  %v7160_v10 = vsub.f32 1.0, %v7159_v11  ;;  %vm7013_vm11 = vweird.f32 %v21355_v31  ;;  %v7017_v45 = vand.u32 2147483647, %v21355_v31  ;;  %8872 = vmatpush.msra.mxu3 %v8690_v6  ;;  %v8669_v59 = vld [vmem:[#allocation3 + $0x450] sm:$0xff] }
 0x68d   : > { %v7019_v20 = vand.u32 2147483648, %v21355_v31  ;;  %v21556_v51 = vadd.f32 1.0, %v11020_v43  ;;  %v8389_v38 = vadd.f32 %v8388_v13, %v8036_v0  ;;  %v8037_v14 = vmul.f32 %v6736_v48, %v21213_v1  ;;  %vm21579_vm8 = vmor %vm7013_vm11, %vm7014_vm1  ;;  %v8689_v0 = vld [vmem:[#allocation3 + $0x4f0] sm:$0xff]  ;;  %8853 = vmatpush.msrb.mxu2 %v8673_v57  ;;  %v8672_v43 = vld [vmem:[#allocation3 + $0x468] sm:$0xff] }
 0x68e   : > { %v21558_v37 = vpop.eup %11021  ;;  %v21569_v60 = vadd.f32 1.0, %v11018_v56  ;;  %11027 = vpow2.f32 %v9676_v2  ;;  %v6871_v31 = vsel %vm21502_vm5, %v21465_v40, %v6866_v29  ;;  %v6881_v13 = vsel %vm21565_vm15, %v21419_v7, %v6877_v27  ;;  %8873 = vmatpush.msra.mxu3 %v8689_v0 }
 0x68f   : > { %11029 = vpow2.f32 %v9686_v35  ;;  %v9695_v49 = vmul.f32 -1.442695, %v21549_v19  ;;  %v7016_v32 = vsel %vm21579_vm8, %v21429_v58, %v7012_v55  ;;  %v7026_v40 = vmul.f32 %v21476_v50, %v7025_v33  ;;  %v8688_v55 = vld [vmem:[#allocation3 + $0x4e8] sm:$0xff]  ;;  %8854 = vmatpush.msrb.mxu2 %v8672_v43  ;;  %v8667_v43 = vld [vmem:[#allocation3 + $0x440] sm:$0xff] }
 0x690   : > { %v11024_v17 = vpop.eup %11023  ;;  %v7161_v44 = vmul.f32 %v21483_v63, %v7160_v10  ;;  %11031 = vrcp.f32 %v21556_v51  ;;  %vm7018_vm0 = vcmp.eq.f32.partialorder %v7017_v45, 8.507059e+37  ;;  %v7020_v15 = vor.u32 1.1754944e-38, %v7019_v20  ;;  %8874 = vmatpush.msra.mxu3 %v8688_v55 }
 0x691   : > { %v11026_v7 = vpop.eup %11025  ;;  %vm7028_vm12 = vweird.f32 %v21396_v16  ;;  %v7309_v3 = vmul.f32 %v21558_v37, %v21506_v26  ;;  %v8046_v24 = vmul.f32 %v6871_v31, %v21218_v30  ;;  %v6886_v12 = vsel %vm21536_vm10, %v6885_v47, %v6881_v13 }
 0x692   : > { %v7034_v58 = vand.u32 2147483648, %v21396_v16  ;;  %11033 = vrcp.f32 %v21569_v60  ;;  %v7021_v21 = vsel %vm7018_vm0, %v7020_v15, %v7016_v32  ;;  %vm7029_vm14 = vweird.f32 %v21476_v50  ;;  %v8686_v32 = vld [vmem:[#allocation3 + $0x4d8] sm:$0xff] }
 0x693   : > { %vm7164_vm4 = vweird.f32 %v21483_v63  ;;  %11035 = vpow2.f32 %v9695_v49  ;;  %v7027_v25 = vadd.f32 %v21476_v50, %v7026_v40  ;;  %v7162_v30 = vadd.f32 %v21483_v63, %v7161_v44  ;;  %vm21617_vm13 = vmor %vm7028_vm12, %vm7029_vm14 }
 0x694   : > { %v11028_v54 = vpop.eup %11027  ;;  %v21602_v36 = vadd.f32 1.0, %v11024_v17  ;;  %v21604_v11 = vadd.f32 1.0, %v11026_v7  ;;  %v7032_v34 = vand.u32 2147483647, %v21396_v16  ;;  %vm7163_vm6 = vweird.f32 %v21413_v4 }
 0x695   : > { %v11030_v52 = vpop.eup %11029  ;;  %v7169_v47 = vand.u32 2147483648, %v21413_v4  ;;  %v7310_v48 = vsub.f32 1.0, %v7309_v3  ;;  %v8047_v2 = vmul.f32 %v6886_v12, %v21236_v9  ;;  %v8056_v56 = vmul.f32 %v7021_v21, %v21249_v53  ;;  %vm21628_vm9 = vmor %vm7163_vm6, %vm7164_vm4  ;;  %v8685_v21 = vld [vmem:[#allocation3 + $0x4d0] sm:$0xff] }
 0x696   : > { %v21609_v29 = vpop.eup %11031  ;;  %v7167_v35 = vand.u32 2147483647, %v21413_v4  ;;  %11037 = vrcp.f32 %v21604_v11  ;;  %v8420_v33 = vadd.f32 %v21488_v22, %v8037_v14  ;;  %v8390_v9 = vadd.f32 %v8389_v38, %v8046_v24  ;;  %v8671_v38 = vld [vmem:[#allocation3 + $0x460] sm:$0xff] }
 0x697   : > { %v7459_v16 = vmul.f32 %v21609_v29, %v21556_v51  ;;  %v21634_v10 = vadd.f32 1.0, %v11028_v54  ;;  %v7031_v22 = vsel %vm21617_vm13, %v21476_v50, %v7027_v25  ;;  %v7035_v20 = vor.u32 1.1754944e-38, %v7034_v58  ;;  %v8687_v14 = vld [vmem:[#allocation3 + $0x4e0] sm:$0xff]  ;;  %8855 = vmatpush.msrb.mxu2 %v8671_v38  ;;  %v1705_v58 = vpop.f32.mrf.mxu1 }
 0x698   : > { %v21636_v45 = vpop.eup %11033  ;;  %v7166_v4 = vsel %vm21628_vm9, %v21483_v63, %v7162_v30  ;;  %11039 = vrcp.f32 %v21602_v36  ;;  %v7170_v31 = vor.u32 1.1754944e-38, %v7169_v47  ;;  %v7311_v13 = vmul.f32 %v21558_v37, %v7310_v48  ;;  %8875 = vmatpush.msra.mxu3 %v8687_v14  ;;  %v8670_v63 = vld [vmem:[#allocation3 + $0x458] sm:$0xff] }
 0x699   : > { %v11036_v39 = vpop.eup %11035  ;;  %v7460_v1 = vsub.f32 1.0, %v7459_v16  ;;  %v21646_v49 = vadd.f32 1.0, %v11030_v52  ;;  %v21648_v17 = vadd.f32 %v8420_v33, %v8047_v2  ;;  %v21650_v50 = vadd.f32 %v8390_v9, %v8056_v56  ;;  %8856 = vmatpush.msrb.mxu2 %v8670_v63  ;;  %v8668_v52 = vld [vmem:[#allocation3 + $0x448] sm:$0xff] }
 0x69a   : > { %vm7033_vm3 = vcmp.eq.f32.partialorder %v7032_v34, 8.507059e+37  ;;  %vm7168_vm5 = vcmp.eq.f32.partialorder %v7167_v35, 8.507059e+37  ;;  %11041 = vrcp.f32 %v21634_v10  ;;  %v7174_v3 = vmul.f32 %v21636_v45, %v21569_v60  ;;  %8876 = vmatpush.msra.mxu3 %v8686_v32  ;;  %v8684_v34 = vld [vmem:[#allocation3 + $0x4c8] sm:$0xff] }
 0x69b   : > { %v21652_v40 = vsel %vm7033_vm3, %v7035_v20, %v7031_v22  ;;  %v7171_v44 = vsel %vm7168_vm5, %v7170_v31, %v7166_v4  ;;  %v7461_v7 = vmul.f32 %v21609_v29, %v7460_v1  ;;  %v7182_v24 = vand.u32 2147483647, %v21569_v60  ;;  %8857 = vmatpush.msrb.mxu2 %v8669_v59  ;;  %v8666_v22 = vld [vmem:[#allocation3 + $0x438] sm:$0xff] }
 0x69c   : > { %v21656_v15 = vpop.eup %11037  ;;  %vm7313_vm2 = vweird.f32 %v21506_v26  ;;  %v21662_v12 = vadd.f32 1.0, %v11036_v39  ;;  %v7312_v6 = vadd.f32 %v21558_v37, %v7311_v13  ;;  %vm7314_vm7 = vweird.f32 %v21558_v37  ;;  %8877 = vmatpush.msra.mxu3 %v8685_v21  ;;  %v8682_v20 = vld [vmem:[#allocation3 + $0x4b8] sm:$0xff] }
 0x69d   : > { %v7609_v54 = vmul.f32 %v21656_v15, %v21604_v11  ;;  %11043 = vrcp.f32 %v21646_v49  ;;  %v21672_v30 = vmul.f32 %v7171_v44, %v21307_v5  ;;  %v7317_v57 = vand.u32 2147483647, %v21506_v26  ;;  %8858 = vmatpush.msrb.mxu2 %v8668_v52  ;;  %vm21686_vm1 = vmor %vm7313_vm2, %vm7314_vm7 }
 0x69e   : > { %v21669_v25 = vpop.eup %11039  ;;  %v7319_v0 = vand.u32 2147483648, %v21506_v26  ;;  %11045 = vrcp.f32 %v21662_v12  ;;  %v7462_v47 = vadd.f32 %v21609_v29, %v7461_v7  ;;  %vm7464_vm10 = vweird.f32 %v21609_v29  ;;  %8878 = vmatpush.msra.mxu3 %v8684_v34  ;;  %v8665_v7 = vld [vmem:[#allocation3 + $0x430] sm:$0xff] }
 0x69f   : > { %v7610_v48 = vsub.f32 1.0, %v7609_v54  ;;  %v21680_v2 = vadd.f32 %v1705_v58, %v19279_v61  ;;  %v7175_v5 = vsub.f32 1.0, %v7174_v3  ;;  %vm7463_vm11 = vweird.f32 %v21556_v51  ;;  %v8683_v61 = vld [vmem:[#allocation3 + $0x4c0] sm:$0xff]  ;;  %8859 = vmatpush.msrb.mxu2 %v8667_v43  ;;  %v8681_v3 = vld [vmem:[#allocation3 + $0x4b0] sm:$0xff] }
 0x6a0   : > { %v7467_v27 = vand.u32 2147483647, %v21556_v51  ;;  %v7469_v35 = vand.u32 2147483648, %v21556_v51  ;;  %v21693_v55 = vpop.eup %11041  ;;  %v7316_v33 = vsel %vm21686_vm1, %v21558_v37, %v7312_v6  ;;  %v7324_v26 = vmul.f32 %v21669_v25, %v21602_v36  ;;  %vm21708_vm0 = vmor %vm7463_vm11, %vm7464_vm10  ;;  %8879 = vmatpush.msra.mxu3 %v8683_v61 }
 0x6a1   : > { %v7611_v9 = vmul.f32 %v21656_v15, %v7610_v48  ;;  %vm7614_vm15 = vweird.f32 %v21656_v15  ;;  %vm21702_vm8 = vcmp.eq.f32.partialorder %v7317_v57, 8.507059e+37  ;;  %v7320_v51 = vor.u32 1.1754944e-38, %v7319_v0  ;;  %8860 = vmatpush.msrb.mxu2 %v8666_v22  ;;  %v8664_v57 = vld [vmem:[#allocation3 + $0x428] sm:$0xff] }
 0x6a2   : > { %vm7613_vm12 = vweird.f32 %v21604_v11  ;;  %v7619_v37 = vand.u32 2147483648, %v21604_v11  ;;  %v7466_v38 = vsel %vm21708_vm0, %v21609_v29, %v7462_v47  ;;  %v7617_v39 = vand.u32 2147483647, %v21604_v11  ;;  %8880 = vmatpush.msra.mxu3 %v8682_v20  ;;  %v8680_v0 = vld [vmem:[#allocation3 + $0x4a8] sm:$0xff] }
 0x6a3   : > { %v21714_v4 = vpop.eup %11043  ;;  %v7612_v14 = vadd.f32 %v21656_v15, %v7611_v9  ;;  %v9696_v31 = vmul.f32 -1.442695, %v21680_v2  ;;  %v7176_v1 = vmul.f32 %v21636_v45, %v7175_v5  ;;  %v7321_v63 = vsel %vm21702_vm8, %v7320_v51, %v7316_v33  ;;  %vm21733_vm14 = vmor %vm7613_vm12, %vm7614_vm15  ;;  %8861 = vmatpush.msrb.mxu2 %v8665_v7  ;;  %v8678_v9 = vld [vmem:[#allocation3 + $0x498] sm:$0xff]  ;;  %v8676_v29 = vld [vmem:[#allocation3 + $0x488] sm:$0xff] }
 0x6a4   : > { %v21722_v13 = vpop.eup %11045  ;;  %v7470_v32 = vor.u32 1.1754944e-38, %v7469_v35  ;;  %v7474_v44 = vmul.f32 %v21693_v55, %v21634_v10  ;;  %vm7178_vm4 = vweird.f32 %v21569_v60  ;;  %v7325_v58 = vsub.f32 1.0, %v7324_v26  ;;  %8881 = vmatpush.msra.mxu3 %v8681_v3  ;;  %v8679_v35 = vld [vmem:[#allocation3 + $0x4a0] sm:$0xff] }
 0x6a5   : > { %vm7468_vm6 = vcmp.eq.f32.partialorder %v7467_v27, 8.507059e+37  ;;  %v7616_v59 = vsel %vm21733_vm14, %v21656_v15, %v7612_v14  ;;  %v7759_v21 = vmul.f32 %v21722_v13, %v21662_v12  ;;  %v7620_v6 = vor.u32 1.1754944e-38, %v7619_v37  ;;  %8862 = vmatpush.msrb.mxu2 %v8664_v57  ;;  %v8663_v27 = vld [vmem:[#allocation3 + $0x420] sm:$0xff]  ;;  %v8661_v14 = vld [vmem:[#allocation3 + $0x410] sm:$0xff] }
 0x6a6   : > { %v7471_v11 = vsel %vm7468_vm6, %v7470_v32, %v7466_v38  ;;  %v7624_v54 = vmul.f32 %v21714_v4, %v21646_v49  ;;  %11047 = vpow2.f32 %v9696_v31  ;;  %v7184_v52 = vand.u32 2147483648, %v21569_v60  ;;  %8882 = vmatpush.msra.mxu3 %v8680_v0 }
 0x6a7   : > { %v8076_v34 = vmul.f32 %v7321_v63, %v21401_v28  ;;  %vm7618_vm13 = vcmp.eq.f32.partialorder %v7617_v39, 8.507059e+37  ;;  %v7760_v47 = vsub.f32 1.0, %v7759_v21  ;;  %v8392_v15 = vadd.f32 %v21650_v50, %v21672_v30  ;;  %8863 = vmatpush.msrb.mxu2 %v8663_v27  ;;  %v8677_v39 = vld [vmem:[#allocation3 + $0x490] sm:$0xff]  ;;  %v8659_v21 = vld [vmem:[#allocation3 + $0x400] sm:$0xff] }
 0x6a8   : > { %v7475_v48 = vsub.f32 1.0, %v7474_v44  ;;  %v7621_v5 = vsel %vm7618_vm13, %v7620_v6, %v7616_v59  ;;  %v7769_v56 = vand.u32 2147483648, %v21662_v12  ;;  %vm21752_vm9 = vcmp.eq.f32.partialorder %v7182_v24, 8.507059e+37  ;;  %8883 = vmatpush.msra.mxu3 %v8679_v35  ;;  %v8662_v24 = vld [vmem:[#allocation3 + $0x418] sm:$0xff] }
 0x6a9   : > { %v8086_v28 = vmul.f32 %v7471_v11, %v21440_v8  ;;  %v7761_v61 = vmul.f32 %v21722_v13, %v7760_v47  ;;  %vm7764_vm3 = vweird.f32 %v21722_v13  ;;  %v7767_v50 = vand.u32 2147483647, %v21662_v12  ;;  %8864 = vmatpush.msrb.mxu2 %v8662_v24  ;;  %v8675_v11 = vld [vmem:[#allocation3 + $0x480] sm:$0xff] }
 0x6aa   : > { %v7177_v30 = vadd.f32 %v21636_v45, %v7176_v1  ;;  %vm7179_vm5 = vweird.f32 %v21636_v45  ;;  %v7326_v33 = vmul.f32 %v21669_v25, %v7325_v58  ;;  %v7625_v26 = vsub.f32 1.0, %v7624_v54  ;;  %8884 = vmatpush.msra.mxu3 %v8678_v9 }
 0x6ab   : > { %v8393_v53 = vadd.f32 %v8392_v15, %v8076_v34  ;;  %v8096_v8 = vmul.f32 %v7621_v5, %v21481_v41  ;;  %v7762_v51 = vadd.f32 %v21722_v13, %v7761_v61  ;;  %vm7763_vm2 = vweird.f32 %v21662_v12  ;;  %8865 = vmatpush.msrb.mxu2 %v8661_v14  ;;  %vm21777_vm1 = vmor %vm7178_vm4, %vm7179_vm5 }
 0x6ac   : > { %v11048_v16 = vpop.eup %11047  ;;  %v7185_v37 = vor.u32 1.1754944e-38, %v7184_v52  ;;  %v7334_v22 = vand.u32 2147483648, %v21602_v36  ;;  %v7476_v20 = vmul.f32 %v21693_v55, %v7475_v48  ;;  %vm7765_vm7 = vmor %vm7763_vm2, %vm7764_vm3  ;;  %v7770_v38 = vor.u32 1.1754944e-38, %v7769_v56  ;;  %8885 = vmatpush.msra.mxu3 %v8677_v39  ;;  %v8912_v52 = vld [vmem:[%s21943_s6 + $0x78] sm:$0xff] }
 0x6ad   : > { %v8394_v31 = vadd.f32 %v8393_v53, %v8086_v28  ;;  %v7766_v41 = vsel %vm7765_vm7, %v21722_v13, %v7762_v51  ;;  %vm7768_vm10 = vcmp.eq.f32.partialorder %v7767_v50, 8.507059e+37  ;;  %v21771_v1 = vadd.f32 1.0, %v11048_v16  ;;  %v8660_v13 = vld [vmem:[#allocation3 + $0x408] sm:$0xff] }
 0x6ae   : > { %v7327_v63 = vadd.f32 %v21669_v25, %v7326_v33  ;;  %vm7329_vm11 = vweird.f32 %v21669_v25  ;;  %v7626_v32 = vmul.f32 %v21714_v4, %v7625_v26  ;;  %v7771_v44 = vsel %vm7768_vm10, %v7770_v38, %v7766_v41  ;;  %8866 = vmatpush.msrb.mxu2 %v8660_v13  ;;  %8886 = vmatpush.msra.mxu3 %v8676_v29  ;;  %v8904_v29 = vld [vmem:[%s21943_s6 + $0x38] sm:$0xff] }
 0x6af   : > { %v7181_v7 = vsel %vm21777_vm1, %v21636_v45, %v7177_v30  ;;  %v8395_v3 = vadd.f32 %v8394_v31, %v8096_v8  ;;  %v8106_v60 = vmul.f32 %v7771_v44, %v21549_v19  ;;  %11049 = vrcp.f32 %v21771_v1 }
 0x6b0   : > { %vm7328_vm15 = vweird.f32 %v21602_v36  ;;  %v7332_v58 = vand.u32 2147483647, %v21602_v36  ;;  %v7477_v59 = vadd.f32 %v21693_v55, %v7476_v20  ;;  %vm7479_vm8 = vweird.f32 %v21693_v55  ;;  %8867 = vmatpush.msrb.mxu2 %v8659_v21  ;;  %8887 = vmatpush.msra.mxu3 %v8675_v11 }
 0x6b1   : > { %vm21795_vm0 = vmor %vm7328_vm15, %vm7329_vm11  ;;  %vm7478_vm12 = vweird.f32 %v21634_v10  ;;  %v7482_v19 = vand.u32 2147483647, %v21634_v10  ;;  %v7484_v6 = vand.u32 2147483648, %v21634_v10  ;;  %v8396_v36 = vadd.f32 %v8395_v3, %v8106_v60  ;;  %v8911_v10 = vld [vmem:[%s21943_s6 + $0x70] sm:$0xff] }
 0x6b2   : > { %v7186_v54 = vsel %vm21752_vm9, %v7185_v37, %v7181_v7  ;;  %v7331_v57 = vsel %vm21795_vm0, %v21669_v25, %v7327_v63  ;;  %v7627_v0 = vadd.f32 %v21714_v4, %v7626_v32  ;;  %vm7629_vm14 = vweird.f32 %v21714_v4  ;;  %vm21819_vm4 = vmor %vm7478_vm12, %vm7479_vm8  ;;  %8914 = vmatpush.msra.mxu2 %v8912_v52  ;;  %v8903_v3 = vld [vmem:[%s21943_s6 + $0x30] sm:$0xff] }
 0x6b3   : > { %v8057_v34 = vmul.f32 %v21652_v40, %v21286_v46  ;;  %v7335_v47 = vor.u32 1.1754944e-38, %v7334_v22  ;;  %v7634_v15 = vand.u32 2147483648, %v21646_v49  ;;  %v8509_v48 = vrot.slane %v8396_v36, 4  ;;  %v8910_v40 = vld [vmem:[%s21943_s6 + $0x68] sm:$0xff]  ;;  %v8899_v52 = vld [vmem:[%s21943_s6 + $0x10] sm:$0xff] }
 0x6b4   : > { %vm7333_vm6 = vcmp.eq.f32.partialorder %v7332_v58, 8.507059e+37  ;;  %v7481_v5 = vsel %vm21819_vm4, %v21693_v55, %v7477_v59  ;;  %vm7628_vm13 = vweird.f32 %v21646_v49  ;;  %v7632_v46 = vand.u32 2147483647, %v21646_v49  ;;  %8915 = vmatpush.msra.mxu2 %v8911_v10  ;;  %v8902_v58 = vld [vmem:[%s21943_s6 + $0x28] sm:$0xff]  ;;  %v8691_v10 = vld [vmem:[%s21941_s4] sm:$0x1] }
 0x6b5   : > { %v11050_v56 = vpop.eup %11049  ;;  %v8067_v27 = vmul.f32 %v7186_v54, %v21358_v62  ;;  %v7336_v35 = vsel %vm7333_vm6, %v7335_v47, %v7331_v57  ;;  %v7485_v43 = vor.u32 1.1754944e-38, %v7484_v6  ;;  %vm21835_vm9 = vmor %vm7628_vm13, %vm7629_vm14  ;;  %v8510_v55 = vadd.f32 %v8509_v48, %v8396_v36  ;;  %v8909_v62 = vld [vmem:[%s21943_s6 + $0x60] sm:$0xff]  ;;  %v8709_v6 = vpop.f32.mrf.mxu2 }
 0x6b6   : > { %vm7483_vm3 = vcmp.eq.f32.partialorder %v7482_v19, 8.507059e+37  ;;  %v7631_v49 = vsel %vm21835_vm9, %v21714_v4, %v7627_v0  ;;  %v7774_v61 = vmul.f32 %v11050_v56, %v21771_v1  ;;  %v8422_v50 = vadd.f32 %v21648_v17, %v8057_v34  ;;  %8916 = vmatpush.msra.mxu2 %v8910_v40  ;;  %v8908_v4 = vld [vmem:[%s21943_s6 + $0x58] sm:$0xff]  ;;  %v8729_v36 = vpop.f32.mrf.mxu3  ;;  %v8901_v54 = vld [vmem:[%s21943_s6 + $0x20] sm:$0xff]  ;;  %v8898_v34 = vld [vmem:[%s21943_s6 + $0x8] sm:$0xff] }
 0x6b7   : > { %v7486_v30 = vsel %vm7483_vm3, %v7485_v43, %v7481_v5  ;;  %v7635_v33 = vor.u32 1.1754944e-38, %v7634_v15  ;;  %v8511_v26 = vrot.slane %v8510_v55, 2  ;;  %v8077_v24 = vmul.f32 %v7336_v35, %v21473_v23  ;;  %v8907_v23 = vld [vmem:[%s21943_s6 + $0x50] sm:$0xff]  ;;  %v8900_v0 = vld [vmem:[%s21943_s6 + $0x18] sm:$0xff]  ;;  %v8897_v47 = vld [vmem:[%s21943_s6] sm:$0xff] }
 0x6b8   : > { %vm7633_vm5 = vcmp.eq.f32.partialorder %v7632_v46, 8.507059e+37  ;;  %v7775_v9 = vsub.f32 1.0, %v7774_v61  ;;  %v8423_v53 = vadd.f32 %v8422_v50, %v8067_v27  ;;  %v7784_v16 = vand.u32 2147483648, %v21771_v1  ;;  %8917 = vmatpush.msra.mxu2 %v8909_v62 }
 0x6b9   : > { %v7636_v8 = vsel %vm7633_vm5, %v7635_v33, %v7631_v49  ;;  %v8512_v51 = vadd.f32 %v8511_v26, %v8510_v55  ;;  %v8087_v17 = vmul.f32 %v7486_v30, %v21510_v42  ;;  %vm7779_vm2 = vweird.f32 %v11050_v56  ;;  %v8906_v42 = vld [vmem:[%s21943_s6 + $0x48] sm:$0xff]  ;;  %v8895_v26 = vld [vmem:[%s361_s20] sm:$0x1]  ;;  %s11202_s20 = scalar_lea.hbm %s11201_s19, 1 }
 0x6ba   : > { %v7776_v37 = vmul.f32 %v11050_v56, %v7775_v9  ;;  %v7782_v22 = vand.u32 2147483647, %v21771_v1  ;;  %8918 = vmatpush.msra.mxu2 %v8908_v4  ;;  %v8424_v38 = vadd.f32 %v8423_v53, %v8077_v24  ;;  %v8097_v14 = vmul.f32 %v7636_v8, %v21518_v18  ;;  %v8905_v18 = vld [vmem:[%s21943_s6 + $0x40] sm:$0xff]  ;;  %p11203_p1 = scmp.ne.s32.totalorder %s11201_s19, %s11202_s20  ;;  %p11208_p6 = scmp.lt.s32.totalorder %s11206_s24, %s11202_s20 }
 0x6bb   : > { %v8513_v20 = vrot.slane %v8512_v51, 1  ;;  %vm7778_vm7 = vweird.f32 %v21771_v1  ;;  %v7785_v41 = vor.u32 1.1754944e-38, %v7784_v16  ;;  %v8710_v15 = vadd.f32 %v8709_v6, %v8691_v10  ;;  %v8913_v4 = vld [vmem:[%s21944_s7] sm:$0x1] }
 0x6bc   : > { %v7777_v39 = vadd.f32 %v11050_v56, %v7776_v37  ;;  %vm7780_vm10 = vmor %vm7778_vm7, %vm7779_vm2  ;;  %8919 = vmatpush.msra.mxu2 %v8907_v23  ;;  %v8425_v12 = vadd.f32 %v8424_v38, %v8087_v17  ;;  %vm7783_vm1 = vcmp.eq.f32.partialorder %v7782_v22, 8.507059e+37  ;;  %p11204_p2 = pnand %p11203_p1, %p11358_p4  ;;  %p11209_p7 = por %p11208_p6, %p11207_p5 }
 0x6bd   : > { %v8514_v31 = vadd.f32 %v8513_v20, %v8512_v51  ;;  %v8749_v57 = vpop.f32.mrf.mxu2  ;;  %v8730_v5 = vadd.f32 %v8729_v36, %v8710_v15 }
 0x6be   : > { %v7781_v63 = vsel %vm7780_vm10, %v11050_v56, %v7777_v39  ;;  %8920 = vmatpush.msra.mxu2 %v8906_v42  ;;  %v8426_v13 = vadd.f32 %v8425_v12, %v8097_v14  ;;  %v8769_v25 = vpop.f32.mrf.mxu3  ;;  %p11205_p3 = pneg %p11204_p2 }
 0x6bf   : > { %v8529_v32 = vmul.f32 0.00390625, %v8514_v31  ;;  %v7786_v44 = vsel %vm7783_vm1, %v7785_v41, %v7781_v63  ;;  %v8750_v46 = vadd.f32 %v8749_v57, %v8730_v5 }
 0x6c0   : > { %v8107_v1 = vmul.f32 %v7786_v44, %v21680_v2  ;;  %8921 = vmatpush.msra.mxu2 %v8905_v18  ;;  %p11210_p9 = pnand %p11209_p7, %p11205_p3 }
 0x6c1   : > { %8868 = vmatmul.f32.vlgmr.msrb.gmra.mxu2 %v8529_v32  ;;  %v8770_v56 = vadd.f32 %v8769_v25, %v8750_v46 }
 0x6c2   : > { %v8427_v7 = vadd.f32 %v8426_v13, %v8107_v1  ;;  %8922 = vmatpush.msra.mxu2 %v8904_v29 }
 0x6c4   : > { %v8515_v60 = vrot.slane %v8427_v7, 4  ;;  %8923 = vmatpush.msra.mxu2 %v8903_v3 }
 0x6c5   : > { %v8789_v48 = vpop.f32.mrf.mxu2 }
 0x6c6   : > { %v8516_v59 = vadd.f32 %v8515_v60, %v8427_v7  ;;  %8924 = vmatpush.msra.mxu2 %v8902_v58  ;;  %v8809_v40 = vpop.f32.mrf.mxu3  ;;  %v8790_v35 = vadd.f32 %v8789_v48, %v8770_v56 }
 0x6c8   : > { %v8517_v2 = vrot.slane %v8516_v59, 2  ;;  %8925 = vmatpush.msra.mxu2 %v8901_v54  ;;  %v8810_v43 = vadd.f32 %v8809_v40, %v8790_v35 }
 0x6ca   : > { %v8518_v21 = vadd.f32 %v8517_v2, %v8516_v59  ;;  %8926 = vmatpush.msra.mxu2 %v8900_v0 }
 0x6cc   : > { %v8519_v11 = vrot.slane %v8518_v21, 1  ;;  %8927 = vmatpush.msra.mxu2 %v8899_v52 }
 0x6cd   : > { %v8829_v27 = vpop.f32.mrf.mxu2 }
 0x6ce   : > { %v8520_v45 = vadd.f32 %v8519_v11, %v8518_v21  ;;  %8928 = vmatpush.msra.mxu2 %v8898_v34  ;;  %v8849_v28 = vpop.f32.mrf.mxu3  ;;  %v8830_v55 = vadd.f32 %v8829_v27, %v8810_v43 }
 0x6d0   : > { %v8530_v19 = vmul.f32 0.00390625, %v8520_v45  ;;  %8929 = vmatpush.msra.mxu2 %v8897_v47  ;;  %v8850_v61 = vadd.f32 %v8849_v28, %v8830_v55 }
 0x6d2   : > { %8888 = vmatmul.f32.vlgmr.msra.gmra.mxu3 %v8530_v19 }
 0x744   : > { %v8869_v49 = vpop.f32.mrf.mxu2 }
 0x745   : > { %v8870_v62 = vadd.f32 %v8869_v49, %v8850_v61 }
 0x755   : > { %v8889_v50 = vpop.f32.mrf.mxu3 }
 0x756   : > { %v8890_v30 = vadd.f32 %v8889_v50, %v8870_v62 }
 0x758   : > { %vm8892_vm11 = vcmp.ge.f32.partialorder %v8890_v30, 0.0  ;;  %v8893_v33 = vmul.f32 0.01, %v8890_v30 }
 0x75a   : > { %v8894_v24 = vsel %vm8892_vm11, %v8890_v30, %v8893_v33 }
 0x75b   : > { %v8896_v9 = vmul.f32 %v8895_v26, %v8894_v24 }
 0x75d   : > { %8930 = vmatmul.f32.vlgmr.msra.gmra.mxu2 %v8896_v9 }
 0x7e0   : > { %v8931_v53 = vpop.f32.mrf.mxu2 }
 0x7e1   : > { %v8932_v8 = vadd.f32 %v8931_v53, %v8913_v4 }
 0x7e3   : > { %8934 = vst [vmem:[%s348_s14] sm:$0x1] %v8932_v8 }
 0x7e4   : > { %11213 = shalt.err (!%p11210_p9)
}
 0x7e5   : > { %9707 = dma.vmem_to_hbm [thread:$0]  (%p11358_p4), %s8947_s26, 16, %s8949_s22, %s8936_s16  }
 0x7e6 PF: > { %p9719_p10 = scmp.ge.s32.totalorder %s11268_s10, 2  ;;  %s8960_s21 = sand.u32 1, %s11248_s27  }
 0x7e7   : > { %s8961_s25 = scalar_lea.sflag [#allocation5], %s8960_s21 }
 0x7e8   : > { %p9714_p11 = pnand %p9719_p10, %p11365_p8 }
 0x7ea   : > { %p9715_p12 = pneg %p9714_p11 }
 0x7ec   : > { %11243 = dma.done.wait (%p9715_p12), %s8961_s25, 16  }
 0x7ed   : > { %11245 = vsyncadd (%p9715_p12), %s8961_s25, 4294967280  ;;  %s22_s10 = sadd.s32 1, %s11268_s10   ;;  %s22924_s27 = smov %s11252_s28 }
 0x7ee   : > { %p19_p13 = scmp.ge.s32.totalorder %s22_s10, 4   ;;  %s22925_s28 = smov %s11256_s29 }
 0x7ef   : > { %s22926_s29 = smov %s11371_s18  ;;  %s22927_s30 = smov %s11264_s9 }
 0x7f0   : > { %s22928_s9 = smov %s22930_s13  ;;  %21 = sbr.rel (!%p19_p13) target bundleno = 5 (0x5), region = 106 }
 0x7f5   :  { %8966 = vsyncpa [#allocation4], 1 }
 0x7f6   :  { %8968 = vsyncpa [#allocation4 + $0x1], 1 }
 0x7f7   :  { %8969 = vsyncpa [#allocation5], 1 }
 0x7f8   :  { %8971 = vsyncpa [#allocation5 + $0x1], 1 }

</bundles_post_ra>
